<compile_context>
chip_gen: v5e
topology: v5e:2x2
jax: 0.10.0
libtpu: 0.0.40
codegen_flags: <defaults>
</compile_context>

<pallas_src>
import functools

import jax
import jax.numpy as jnp
import numpy as np
from jax import lax
from jax.experimental import pallas as pl
from jax.experimental.pallas import tpu as pltpu


# ----------------------------------------------------------------------------
# Pallas kernel: two fused passes of GroupNorm -> BiLSTM(over K) -> Linear -> +residual
# ----------------------------------------------------------------------------
def band_seq_kernel(x_ref, gnp_ref, p_ref, bg_ref, wih_ref, whh_ref, wl_ref,
                    out_ref, buf_sc, ginf_sc, ginb_sc, h_sc, *, num_groups):
    K, B, N = x_ref.shape          # bands, (batch*time) tile rows, fc_dim
    H4 = wih_ref.shape[-1]         # 4 * hidden (per direction)
    H = H4 // 4
    eps = 1e-5
    inv_cnt = 1.0 / float((N // num_groups) * K)

    gnp = gnp_ref[...]                                   # (3, N): gamma, beta, blin (f32)
    gamma = gnp[0:1].reshape(1, 1, N)
    beta = gnp[1:2].reshape(1, 1, N)
    blin = gnp[2:3].reshape(1, 1, N)
    P = p_ref[...]                                       # (N, N) 1s within a GroupNorm group
    bg = bg_ref[...]                                     # (2, 4H) f32 gate biases [fwd; bwd]
    bgf = bg[0:1]                                        # (1, 4H)
    bgb = bg[1:2]
    wih_f = wih_ref[0]                                   # (N, 4H) bf16, gates [i|f|o|g]
    wih_b = wih_ref[1]
    whh_f = whh_ref[0]                                   # (H, 4H) bf16
    whh_b = whh_ref[1]
    wl = wl_ref[...]                                     # (2H, N) bf16  [Wl_fwd; Wl_bwd]

    unroll = True if K <= 8 else 4

    def band_pass(src_ref, dst_ref):
        # ---- GroupNorm over (K, channels-in-group) per (b, t) row; stats in f32 ----
        x = src_ref[...]                                 # (K, B, N) f32
        s1 = jnp.sum(x, axis=0)                          # (B, N)
        mean_c = jnp.dot(s1, P, preferred_element_type=jnp.float32) * inv_cnt
        d = x - mean_c[None]
        s2 = jnp.sum(d * d, axis=0)                      # (B, N)
        var_c = jnp.dot(s2, P, preferred_element_type=jnp.float32) * inv_cnt
        rstd_c = lax.rsqrt(var_c + eps)
        xn = (d * rstd_c[None] * gamma + beta).astype(jnp.bfloat16)       # (K, B, N) bf16
        xn2 = xn.reshape(K * B, N)

        # ---- hoisted input projection, one matmul per direction, bf16 scratch ----
        ginf = jnp.dot(xn2, wih_f, preferred_element_type=jnp.float32) + bgf   # (K*B, 4H)
        ginf_sc[...] = ginf.reshape(K, B, H4).astype(jnp.bfloat16)
        ginb = jnp.dot(xn2, wih_b, preferred_element_type=jnp.float32) + bgb
        ginb_sc[...] = ginb.reshape(K, B, H4).astype(jnp.bfloat16)

        # ---- bidirectional recurrence over K; directions kept separate ----
        def step(s, carry):
            hf, cf, hb, cb = carry                        # h: (B,H) bf16, c: (B,H) f32
            sr = K - 1 - s
            zf = ginf_sc[s] + jnp.dot(hf, whh_f, preferred_element_type=jnp.float32)
            zb = ginb_sc[sr] + jnp.dot(hb, whh_b, preferred_element_type=jnp.float32)
            # gate order [i | f | o | g]: one wide sigmoid + one tanh per direction
            sf = jax.nn.sigmoid(zf[:, :3 * H]); gf = jnp.tanh(zf[:, 3 * H:])
            sb = jax.nn.sigmoid(zb[:, :3 * H]); gb = jnp.tanh(zb[:, 3 * H:])
            cf = sf[:, H:2 * H] * cf + sf[:, :H] * gf
            cb = sb[:, H:2 * H] * cb + sb[:, :H] * gb
            hf = (sf[:, 2 * H:] * jnp.tanh(cf)).astype(jnp.bfloat16)
            hb = (sb[:, 2 * H:] * jnp.tanh(cb)).astype(jnp.bfloat16)
            h_sc[s, :, :H] = hf                           # forward hidden for band s
            h_sc[sr, :, H:] = hb                          # backward hidden for band sr
            return hf, cf, hb, cb

        hz = jnp.zeros((B, H), jnp.bfloat16)
        cz = jnp.zeros((B, H), jnp.float32)
        lax.fori_loop(0, K, step, (hz, cz, hz, cz), unroll=unroll)

        # ---- merged output projection (contraction depth 2H) + bias + residual ----
        proj = jnp.dot(h_sc[...].reshape(K * B, 2 * H), wl,
                       preferred_element_type=jnp.float32)                # (K*B, N)
        dst_ref[...] = src_ref[...] + blin + proj.reshape(K, B, N)

    band_pass(x_ref, buf_sc)      # z_hat = blstm_band(z) + z      (kept in VMEM)
    band_pass(buf_sc, out_ref)    # q     = blstm_band(z_hat) + z_hat


# ----------------------------------------------------------------------------
# Wrapper: device-aware tile sizing, parameter packing, pallas_call construction
# ----------------------------------------------------------------------------
def _tpu_vmem_capacity():
    try:
        cap = int(pltpu.get_tpu_info().vmem_capacity_bytes)
        if cap > 0:
            return cap
    except Exception:
        pass
    return 64 * 1024 * 1024           # conservative fallback (v7x per-TC)


def choose_tile(BT, K, N, H, vmem_cap):
    """Largest multiple-of-8 row tile dividing BT that fits the VMEM budget,
    preferring >=2 (ideally an even number of) grid blocks for megacore."""
    # weights, double-buffered by the pipeline (f32: gnp, P, biases; bf16: wih, whh, wl)
    w_bytes = 2 * (4 * (3 * N + N * N + 8 * H)
                   + 2 * (8 * N * H + 8 * H * H + 2 * H * N))
    budget = int(vmem_cap * 0.45) - w_bytes
    # per-(b,t)-row bytes: in/out double buffers + z_hat buffer + x/d/xn/proj temporaries
    # + bf16 gate/hidden scratch + the live f32 gate-matmul result.
    per_row = 34 * K * N + 36 * K * H
    max_rows = max(8, budget // max(per_row, 1))
    cap = int(min(BT, max_rows, 2048 if vmem_cap > 96 * 2 ** 20 else 1024))
    cands = [t for t in range(8, cap + 1, 8) if BT % t == 0]
    if not cands:
        return BT                      # tiny / unaligned BT: single block
    multi = [t for t in cands if BT // t >= 2]
    if multi:
        even = [t for t in multi if (BT // t) % 2 == 0]
        return max(even) if even else max(multi)
    return max(cands)


@functools.lru_cache(maxsize=None)
def make_band_seq_call(K, BT, N, H, G, tb, vmem_limit):
    kernel = functools.partial(band_seq_kernel, num_groups=G)

    def row_map(i):
        return (0, i, 0)

    def c2(i):
        return (0, 0)

    def c3(i):
        return (0, 0, 0)

    in_specs = [
        pl.BlockSpec((K, tb, N), row_map),            # x tile
        pl.BlockSpec((3, N), c2),                     # gamma / beta / linear bias (f32)
        pl.BlockSpec((N, N), c2),                     # GroupNorm group-mask matrix (f32)
        pl.BlockSpec((2, 4 * H), c2),                 # gate biases [fwd; bwd] (f32)
        pl.BlockSpec((2, N, 4 * H), c3),              # input->gates weights [fwd; bwd] (bf16)
        pl.BlockSpec((2, H, 4 * H), c3),              # hidden->gates weights [fwd; bwd] (bf16)
        pl.BlockSpec((2 * H, N), c2),                 # output projection [Wlf; Wlb] (bf16)
    ]
    return pl.pallas_call(
        kernel,
        out_shape=jax.ShapeDtypeStruct((K, BT, N), jnp.float32),
        grid_spec=pltpu.PrefetchScalarGridSpec(
            num_scalar_prefetch=0,
            grid=(BT // tb,),
            in_specs=in_specs,
            out_specs=pl.BlockSpec((K, tb, N), row_map),
            scratch_shapes=[
                pltpu.VMEM((K, tb, N), jnp.float32),        # z_hat tile (pass-1 output)
                pltpu.VMEM((K, tb, 4 * H), jnp.bfloat16),   # hoisted forward gate inputs
                pltpu.VMEM((K, tb, 4 * H), jnp.bfloat16),   # hoisted backward gate inputs
                pltpu.VMEM((K, tb, 2 * H), jnp.bfloat16),   # [fwd | bwd] hidden states
            ]),
        compiler_params=pltpu.CompilerParams(
            dimension_semantics=("parallel",),
            vmem_limit_bytes=vmem_limit),
    )


def group_mask(N, G):
    cpg = N // G
    c = np.arange(N)
    return jnp.asarray((c[:, None] // cpg == c[None, :] // cpg).astype(np.float32))


def pack_params(p):
    """Pack the 12 per-gate / per-direction parameter arrays into 5 kernel operands."""
    H = p['whh_f'].shape[-1]

    def gates4(w):                 # (4, A, H) in [i,f,g,o] -> (A, 4H) in [i,f,o,g]
        w = jnp.stack([w[0], w[1], w[3], w[2]], axis=0)
        return jnp.transpose(w, (1, 0, 2)).reshape(w.shape[1], 4 * H)

    gnp = jnp.concatenate([p['gamma'], p['beta'], p['blin']], axis=0).astype(jnp.float32)
    bg = jnp.concatenate([gates4(p['bf']), gates4(p['bb'])], axis=0).astype(jnp.float32)
    wih = jnp.stack([gates4(p['wih_f']), gates4(p['wih_b'])], axis=0).astype(jnp.bfloat16)
    whh = jnp.stack([gates4(p['whh_f']), gates4(p['whh_b'])], axis=0).astype(jnp.bfloat16)
    wl = jnp.concatenate([p['wlf'], p['wlb']], axis=0).astype(jnp.bfloat16)
    return gnp, bg, wih, whh, wl


def band_seq_forward(z, params, num_groups):
    """z: (b, n, k, t) as in the PyTorch module.  Returns q: (b, n, k, t)."""
    b, n, k, t = z.shape
    H = params['whh_f'].shape[-1]
    BT = b * t
    vmem_cap = _tpu_vmem_capacity()
    tb = choose_tile(BT, k, n, H, vmem_cap)
    vmem_limit = int(min(vmem_cap * 0.75, 100 * 1024 * 1024))
    call = make_band_seq_call(k, BT, n, H, num_groups, tb, vmem_limit)
    gnp, bg, wih, whh, wl = pack_params(params)
    pmat = group_mask(n, num_groups)
    # 'b n k t -> (b t) k n' expressed as layout (K, B*T, N), row index = b*T + t
    x = jnp.transpose(z, (2, 0, 3, 1)).reshape(k, BT, n)
    q = call(x, gnp, pmat, bg, wih, whh, wl)
    # back to 'b n k t'
    return jnp.transpose(q.reshape(k, b, t, n), (1, 3, 0, 2))


# ----------------------------------------------------------------------------
# Pure-JAX f32 reference (same math) for correctness checking
# ----------------------------------------------------------------------------
def ref_band_block(x, p, G):
    K, B, N = x.shape
    H = p['whh_f'].shape[-1]
    xg = x.reshape(K, B, G, N // G)
    mean = jnp.mean(xg, axis=(0, 3))
    var = jnp.mean((xg - mean[None, :, :, None]) ** 2, axis=(0, 3))
    xn = (xg - mean[None, :, :, None]) * jax.lax.rsqrt(var[None, :, :, None] + 1e-5)
    xn = xn.reshape(K, B, N) * p['gamma'] + p['beta']

    def run(wih, whh, bias, reverse):
        def step(carry, xt):
            h, c = carry
            zi = xt @ wih[0] + h @ whh[0] + bias[0]
            zf = xt @ wih[1] + h @ whh[1] + bias[1]
            zg = xt @ wih[2] + h @ whh[2] + bias[2]
            zo = xt @ wih[3] + h @ whh[3] + bias[3]
            i, f = jax.nn.sigmoid(zi), jax.nn.sigmoid(zf)
            g, o = jnp.tanh(zg), jax.nn.sigmoid(zo)
            c = f * c + i * g
            h = o * jnp.tanh(c)
            return (h, c), h

        xs = xn[::-1] if reverse else xn
        h0 = jnp.zeros((B, H), jnp.float32)
        _, hs = jax.lax.scan(step, (h0, h0), xs)
        return hs[::-1] if reverse else hs

    hf = run(p['wih_f'], p['whh_f'], p['bf'], False)
    hb = run(p['wih_b'], p['whh_b'], p['bb'], True)
    y = (jnp.einsum('kbh,hn->kbn', hf, p['wlf'])
         + jnp.einsum('kbh,hn->kbn', hb, p['wlb']) + p['blin'])
    return y + x


def ref_forward(z, p, G):
    b, n, k, t = z.shape
    x = jnp.transpose(z, (2, 0, 3, 1)).reshape(k, b * t, n)
    z_hat = ref_band_block(x, p, G)
    q = ref_band_block(z_hat, p, G)
    return jnp.transpose(q.reshape(k, b, t, n), (1, 3, 0, 2))


# ----------------------------------------------------------------------------
if __name__ == "__main__":
    # small shapes consistent with the module
    BATCH = 2
    FC_DIM = 32                 # fc_dim (channels n)
    GROUP = 4                   # GroupNorm groups (FC_DIM % GROUP == 0)
    NUM_SUBBANDS = [3, 3, 2]    # sum = K = 8 bands
    K = sum(NUM_SUBBANDS)
    T = 4                       # time frames
    HIDDEN = 2 * FC_DIM         # LSTM hidden size per direction (hidden_dim)

    key = jax.random.PRNGKey(0)
    ks = jax.random.split(key, 12)
    s = 0.1
    params = dict(
        gamma=1.0 + s * jax.random.normal(ks[0], (1, FC_DIM), jnp.float32),
        beta=s * jax.random.normal(ks[1], (1, FC_DIM), jnp.float32),
        # per-gate (i, f, g, o) weights, stored pre-transposed for x @ W
        wih_f=s * jax.random.normal(ks[2], (4, FC_DIM, HIDDEN), jnp.float32),
        whh_f=s * jax.random.normal(ks[3], (4, HIDDEN, HIDDEN), jnp.float32),
        bf=s * jax.random.normal(ks[4], (4, 1, HIDDEN), jnp.float32),
        wih_b=s * jax.random.normal(ks[5], (4, FC_DIM, HIDDEN), jnp.float32),
        whh_b=s * jax.random.normal(ks[6], (4, HIDDEN, HIDDEN), jnp.float32),
        bb=s * jax.random.normal(ks[7], (4, 1, HIDDEN), jnp.float32),
        # output Linear (2*HIDDEN -> FC_DIM), split into forward/backward halves
        wlf=s * jax.random.normal(ks[8], (HIDDEN, FC_DIM), jnp.float32),
        wlb=s * jax.random.normal(ks[9], (HIDDEN, FC_DIM), jnp.float32),
        blin=s * jax.random.normal(ks[10], (1, FC_DIM), jnp.float32),
    )

    z = jax.random.normal(ks[11], (BATCH, FC_DIM, K, T), jnp.float32)

    fwd = jax.jit(lambda zz, pp: band_seq_forward(zz, pp, GROUP))
    out = jax.block_until_ready(fwd(z, params))

    ref = jax.block_until_ready(ref_forward(z, params, GROUP))
    # Tolerance covers bf16 MXU operands in the kernel vs. the pure-f32 reference.
    np.testing.assert_allclose(np.asarray(out), np.asarray(ref), rtol=3e-2, atol=3e-2)

    print("KERNEL_OK")
</pallas_src>

<mosaic_0001>
module attributes {stable_mosaic.version = 11 : i64} {
  func.func @band_seq_kernel(%arg0: i32, %arg1: memref<8x8x32xf32, #tpu.memory_space<vmem>>, %arg2: memref<3x32xf32, #tpu.memory_space<vmem>>, %arg3: memref<32x32xf32, #tpu.memory_space<vmem>>, %arg4: memref<2x256xf32, #tpu.memory_space<vmem>>, %arg5: memref<2x32x256xbf16, #tpu.memory_space<vmem>>, %arg6: memref<2x64x256xbf16, #tpu.memory_space<vmem>>, %arg7: memref<128x32xbf16, #tpu.memory_space<vmem>>, %arg8: memref<8x8x32xf32, #tpu.memory_space<vmem>>, %arg9: memref<8x8x32xf32, #tpu.memory_space<vmem>>, %arg10: memref<8x8x256xbf16, #tpu.memory_space<vmem>>, %arg11: memref<8x8x256xbf16, #tpu.memory_space<vmem>>, %arg12: memref<8x8x128xbf16, #tpu.memory_space<vmem>>) attributes {dimension_semantics = [#tpu.dimension_semantics<parallel>], iteration_bounds = array<i64: 1>, scalar_prefetch = 0 : i64, scratch_operands = 4 : i64, tpu.core_type = #tpu.core_type<tc>, window_params = [{transform_indices = @transform_0, window_bounds = array<i64: 8, 8, 32>}, {pipeline_mode = #tpu.pipeline_mode<synchronous>, transform_indices = @transform_1, window_bounds = array<i64: 3, 32>}, {pipeline_mode = #tpu.pipeline_mode<synchronous>, transform_indices = @transform_2, window_bounds = array<i64: 32, 32>}, {pipeline_mode = #tpu.pipeline_mode<synchronous>, transform_indices = @transform_3, window_bounds = array<i64: 2, 256>}, {pipeline_mode = #tpu.pipeline_mode<synchronous>, transform_indices = @transform_4, window_bounds = array<i64: 2, 32, 256>}, {pipeline_mode = #tpu.pipeline_mode<synchronous>, transform_indices = @transform_5, window_bounds = array<i64: 2, 64, 256>}, {pipeline_mode = #tpu.pipeline_mode<synchronous>, transform_indices = @transform_6, window_bounds = array<i64: 128, 32>}, {transform_indices = @transform_7, window_bounds = array<i64: 8, 8, 32>}]} {
    %c0 = arith.constant 0 : index
    %c0_0 = arith.constant 0 : index
    %0 = vector.load %arg2[%c0, %c0_0] : memref<3x32xf32, #tpu.memory_space<vmem>>, vector<3x32xf32>
    %1 = vector.extract_strided_slice %0 {offsets = [0, 0], sizes = [1, 32], strides = [1, 1]} : vector<3x32xf32> to vector<1x32xf32>
    %2 = vector.shape_cast %1 : vector<1x32xf32> to vector<1x1x32xf32>
    %3 = vector.extract_strided_slice %0 {offsets = [1, 0], sizes = [1, 32], strides = [1, 1]} : vector<3x32xf32> to vector<1x32xf32>
    %4 = vector.shape_cast %3 : vector<1x32xf32> to vector<1x1x32xf32>
    %5 = vector.extract_strided_slice %0 {offsets = [2, 0], sizes = [1, 32], strides = [1, 1]} : vector<3x32xf32> to vector<1x32xf32>
    %6 = vector.shape_cast %5 : vector<1x32xf32> to vector<1x1x32xf32>
    %c0_1 = arith.constant 0 : index
    %c0_2 = arith.constant 0 : index
    %7 = vector.load %arg3[%c0_1, %c0_2] : memref<32x32xf32, #tpu.memory_space<vmem>>, vector<32x32xf32>
    %c0_3 = arith.constant 0 : index
    %c0_4 = arith.constant 0 : index
    %8 = vector.load %arg4[%c0_3, %c0_4] : memref<2x256xf32, #tpu.memory_space<vmem>>, vector<2x256xf32>
    %9 = vector.extract_strided_slice %8 {offsets = [0, 0], sizes = [1, 256], strides = [1, 1]} : vector<2x256xf32> to vector<1x256xf32>
    %10 = vector.extract_strided_slice %8 {offsets = [1, 0], sizes = [1, 256], strides = [1, 1]} : vector<2x256xf32> to vector<1x256xf32>
    %c0_5 = arith.constant 0 : index
    %c0_6 = arith.constant 0 : index
    %c0_7 = arith.constant 0 : index
    %11 = vector.load %arg5[%c0_5, %c0_6, %c0_7] : memref<2x32x256xbf16, #tpu.memory_space<vmem>>, vector<1x32x256xbf16>
    %12 = vector.shape_cast %11 : vector<1x32x256xbf16> to vector<32x256xbf16>
    %c1 = arith.constant 1 : index
    %c0_8 = arith.constant 0 : index
    %c0_9 = arith.constant 0 : index
    %13 = vector.load %arg5[%c1, %c0_8, %c0_9] : memref<2x32x256xbf16, #tpu.memory_space<vmem>>, vector<1x32x256xbf16>
    %14 = vector.shape_cast %13 : vector<1x32x256xbf16> to vector<32x256xbf16>
    %c0_10 = arith.constant 0 : index
    %c0_11 = arith.constant 0 : index
    %c0_12 = arith.constant 0 : index
    %15 = vector.load %arg6[%c0_10, %c0_11, %c0_12] : memref<2x64x256xbf16, #tpu.memory_space<vmem>>, vector<1x64x256xbf16>
    %16 = vector.shape_cast %15 : vector<1x64x256xbf16> to vector<64x256xbf16>
    %c1_13 = arith.constant 1 : index
    %c0_14 = arith.constant 0 : index
    %c0_15 = arith.constant 0 : index
    %17 = vector.load %arg6[%c1_13, %c0_14, %c0_15] : memref<2x64x256xbf16, #tpu.memory_space<vmem>>, vector<1x64x256xbf16>
    %18 = vector.shape_cast %17 : vector<1x64x256xbf16> to vector<64x256xbf16>
    %c0_16 = arith.constant 0 : index
    %c0_17 = arith.constant 0 : index
    %19 = vector.load %arg7[%c0_16, %c0_17] : memref<128x32xbf16, #tpu.memory_space<vmem>>, vector<128x32xbf16>
    %c0_18 = arith.constant 0 : index
    %c0_19 = arith.constant 0 : index
    %c0_20 = arith.constant 0 : index
    %20 = vector.load %arg1[%c0_18, %c0_19, %c0_20] : memref<8x8x32xf32, #tpu.memory_space<vmem>>, vector<8x8x32xf32>
    %cst = arith.constant dense<0.000000e+00> : vector<8x32xf32>
    %21 = vector.multi_reduction <add>, %20, %cst [0] : vector<8x8x32xf32> to vector<8x32xf32>
    %cst_21 = arith.constant dense<0.000000e+00> : vector<8x32xf32>
    %22 = tpu.matmul %21, %7, %cst_21 {dimension_numbers = #tpu.dot_dimension_numbers<[1], [0], [0], [1], [0, 0, 1, 1], [], []>} : vector<8x32xf32>, vector<32x32xf32>, vector<8x32xf32> -> vector<8x32xf32>
    %cst_22 = arith.constant 1.562500e-02 : f32
    %23 = vector.broadcast %cst_22 : f32 to vector<8x32xf32>
    %24 = arith.mulf %22, %23 : vector<8x32xf32>
    %25 = vector.shape_cast %24 : vector<8x32xf32> to vector<1x8x32xf32>
    %26 = vector.broadcast %25 : vector<1x8x32xf32> to vector<8x8x32xf32>
    %27 = arith.subf %20, %26 : vector<8x8x32xf32>
    %28 = arith.mulf %27, %27 : vector<8x8x32xf32>
    %cst_23 = arith.constant dense<0.000000e+00> : vector<8x32xf32>
    %29 = vector.multi_reduction <add>, %28, %cst_23 [0] : vector<8x8x32xf32> to vector<8x32xf32>
    %cst_24 = arith.constant dense<0.000000e+00> : vector<8x32xf32>
    %30 = tpu.matmul %29, %7, %cst_24 {dimension_numbers = #tpu.dot_dimension_numbers<[1], [0], [0], [1], [0, 0, 1, 1], [], []>} : vector<8x32xf32>, vector<32x32xf32>, vector<8x32xf32> -> vector<8x32xf32>
    %cst_25 = arith.constant 1.562500e-02 : f32
    %31 = vector.broadcast %cst_25 : f32 to vector<8x32xf32>
    %32 = arith.mulf %30, %31 : vector<8x32xf32>
    %cst_26 = arith.constant 9.99999974E-6 : f32
    %33 = vector.broadcast %cst_26 : f32 to vector<8x32xf32>
    %34 = arith.addf %32, %33 : vector<8x32xf32>
    %35 = math.rsqrt %34 : vector<8x32xf32>
    %36 = vector.shape_cast %35 : vector<8x32xf32> to vector<1x8x32xf32>
    %37 = vector.broadcast %36 : vector<1x8x32xf32> to vector<8x8x32xf32>
    %38 = arith.mulf %27, %37 : vector<8x8x32xf32>
    %39 = vector.broadcast %2 : vector<1x1x32xf32> to vector<8x8x32xf32>
    %40 = arith.mulf %38, %39 : vector<8x8x32xf32>
    %41 = vector.broadcast %4 : vector<1x1x32xf32> to vector<8x8x32xf32>
    %42 = arith.addf %40, %41 : vector<8x8x32xf32>
    %43 = arith.truncf %42 : vector<8x8x32xf32> to vector<8x8x32xbf16>
    %44 = vector.shape_cast %43 : vector<8x8x32xbf16> to vector<64x32xbf16>
    %cst_27 = arith.constant dense<0.000000e+00> : vector<64x256xf32>
    %45 = tpu.matmul %44, %12, %cst_27 {dimension_numbers = #tpu.dot_dimension_numbers<[1], [0], [0], [1], [0, 0, 1, 1], [], []>} : vector<64x32xbf16>, vector<32x256xbf16>, vector<64x256xf32> -> vector<64x256xf32>
    %46 = vector.broadcast %9 : vector<1x256xf32> to vector<64x256xf32>
    %47 = arith.addf %45, %46 : vector<64x256xf32>
    %48 = vector.shape_cast %47 : vector<64x256xf32> to vector<8x8x256xf32>
    %49 = arith.truncf %48 : vector<8x8x256xf32> to vector<8x8x256xbf16>
    %c0_28 = arith.constant 0 : index
    %c0_29 = arith.constant 0 : index
    %c0_30 = arith.constant 0 : index
    %50 = vector.load %arg10[%c0_28, %c0_29, %c0_30] : memref<8x8x256xbf16, #tpu.memory_space<vmem>>, vector<8x8x256xbf16>
    tpu.vector_store %arg10[%c0_28, %c0_29, %c0_30], %49 {strides = array<i32>} : memref<8x8x256xbf16, #tpu.memory_space<vmem>>, vector<8x8x256xbf16>,
    %cst_31 = arith.constant dense<0.000000e+00> : vector<64x256xf32>
    %51 = tpu.matmul %44, %14, %cst_31 {dimension_numbers = #tpu.dot_dimension_numbers<[1], [0], [0], [1], [0, 0, 1, 1], [], []>} : vector<64x32xbf16>, vector<32x256xbf16>, vector<64x256xf32> -> vector<64x256xf32>
    %52 = vector.broadcast %10 : vector<1x256xf32> to vector<64x256xf32>
    %53 = arith.addf %51, %52 : vector<64x256xf32>
    %54 = vector.shape_cast %53 : vector<64x256xf32> to vector<8x8x256xf32>
    %55 = arith.truncf %54 : vector<8x8x256xf32> to vector<8x8x256xbf16>
    %c0_32 = arith.constant 0 : index
    %c0_33 = arith.constant 0 : index
    %c0_34 = arith.constant 0 : index
    %56 = vector.load %arg11[%c0_32, %c0_33, %c0_34] : memref<8x8x256xbf16, #tpu.memory_space<vmem>>, vector<8x8x256xbf16>
    tpu.vector_store %arg11[%c0_32, %c0_33, %c0_34], %55 {strides = array<i32>} : memref<8x8x256xbf16, #tpu.memory_space<vmem>>, vector<8x8x256xbf16>,
    %cst_35 = arith.constant 0.000000e+00 : bf16
    %57 = vector.broadcast %cst_35 : bf16 to vector<8x64xbf16>
    %cst_36 = arith.constant 0.000000e+00 : f32
    %58 = vector.broadcast %cst_36 : f32 to vector<8x64xf32>
    %c0_i32 = arith.constant 0 : i32
    %c7_i32 = arith.constant 7 : i32
    %59 = arith.subi %c7_i32, %c0_i32 : i32
    %60 = arith.index_cast %c0_i32 : i32 to index
    %c0_37 = arith.constant 0 : index
    %c0_38 = arith.constant 0 : index
    %61 = vector.load %arg10[%60, %c0_37, %c0_38] : memref<8x8x256xbf16, #tpu.memory_space<vmem>>, vector<1x8x256xbf16>
    %62 = vector.shape_cast %61 : vector<1x8x256xbf16> to vector<8x256xbf16>
    %cst_39 = arith.constant dense<0.000000e+00> : vector<8x256xf32>
    %63 = tpu.matmul %57, %16, %cst_39 {dimension_numbers = #tpu.dot_dimension_numbers<[1], [0], [0], [1], [0, 0, 1, 1], [], []>} : vector<8x64xbf16>, vector<64x256xbf16>, vector<8x256xf32> -> vector<8x256xf32>
    %64 = arith.extf %62 : vector<8x256xbf16> to vector<8x256xf32>
    %65 = arith.addf %64, %63 : vector<8x256xf32>
    %66 = arith.index_cast %59 : i32 to index
    %c0_40 = arith.constant 0 : index
    %c0_41 = arith.constant 0 : index
    %67 = vector.load %arg11[%66, %c0_40, %c0_41] : memref<8x8x256xbf16, #tpu.memory_space<vmem>>, vector<1x8x256xbf16>
    %68 = vector.shape_cast %67 : vector<1x8x256xbf16> to vector<8x256xbf16>
    %cst_42 = arith.constant dense<0.000000e+00> : vector<8x256xf32>
    %69 = tpu.matmul %57, %18, %cst_42 {dimension_numbers = #tpu.dot_dimension_numbers<[1], [0], [0], [1], [0, 0, 1, 1], [], []>} : vector<8x64xbf16>, vector<64x256xbf16>, vector<8x256xf32> -> vector<8x256xf32>
    %70 = arith.extf %68 : vector<8x256xbf16> to vector<8x256xf32>
    %71 = arith.addf %70, %69 : vector<8x256xf32>
    %72 = vector.extract_strided_slice %65 {offsets = [0, 0], sizes = [8, 192], strides = [1, 1]} : vector<8x256xf32> to vector<8x192xf32>
    %73 = arith.negf %72 : vector<8x192xf32>
    %74 = math.exp %73 : vector<8x192xf32>
    %cst_43 = arith.constant 1.000000e+00 : f32
    %75 = vector.broadcast %cst_43 : f32 to vector<8x192xf32>
    %76 = arith.addf %75, %74 : vector<8x192xf32>
    %77 = arith.divf %75, %76 : vector<8x192xf32>
    %78 = vector.extract_strided_slice %65 {offsets = [0, 192], sizes = [8, 64], strides = [1, 1]} : vector<8x256xf32> to vector<8x64xf32>
    %79 = math.tanh %78 : vector<8x64xf32>
    %80 = vector.extract_strided_slice %71 {offsets = [0, 0], sizes = [8, 192], strides = [1, 1]} : vector<8x256xf32> to vector<8x192xf32>
    %81 = arith.negf %80 : vector<8x192xf32>
    %82 = math.exp %81 : vector<8x192xf32>
    %cst_44 = arith.constant 1.000000e+00 : f32
    %83 = vector.broadcast %cst_44 : f32 to vector<8x192xf32>
    %84 = arith.addf %83, %82 : vector<8x192xf32>
    %85 = arith.divf %83, %84 : vector<8x192xf32>
    %86 = vector.extract_strided_slice %71 {offsets = [0, 192], sizes = [8, 64], strides = [1, 1]} : vector<8x256xf32> to vector<8x64xf32>
    %87 = math.tanh %86 : vector<8x64xf32>
    %88 = vector.extract_strided_slice %77 {offsets = [0, 64], sizes = [8, 64], strides = [1, 1]} : vector<8x192xf32> to vector<8x64xf32>
    %89 = arith.mulf %88, %58 : vector<8x64xf32>
    %90 = vector.extract_strided_slice %77 {offsets = [0, 0], sizes = [8, 64], strides = [1, 1]} : vector<8x192xf32> to vector<8x64xf32>
    %91 = arith.mulf %90, %79 : vector<8x64xf32>
    %92 = arith.addf %89, %91 : vector<8x64xf32>
    %93 = vector.extract_strided_slice %85 {offsets = [0, 64], sizes = [8, 64], strides = [1, 1]} : vector<8x192xf32> to vector<8x64xf32>
    %94 = arith.mulf %93, %58 : vector<8x64xf32>
    %95 = vector.extract_strided_slice %85 {offsets = [0, 0], sizes = [8, 64], strides = [1, 1]} : vector<8x192xf32> to vector<8x64xf32>
    %96 = arith.mulf %95, %87 : vector<8x64xf32>
    %97 = arith.addf %94, %96 : vector<8x64xf32>
    %98 = vector.extract_strided_slice %77 {offsets = [0, 128], sizes = [8, 64], strides = [1, 1]} : vector<8x192xf32> to vector<8x64xf32>
    %99 = math.tanh %92 : vector<8x64xf32>
    %100 = arith.mulf %98, %99 : vector<8x64xf32>
    %101 = arith.truncf %100 : vector<8x64xf32> to vector<8x64xbf16>
    %102 = vector.extract_strided_slice %85 {offsets = [0, 128], sizes = [8, 64], strides = [1, 1]} : vector<8x192xf32> to vector<8x64xf32>
    %103 = math.tanh %97 : vector<8x64xf32>
    %104 = arith.mulf %102, %103 : vector<8x64xf32>
    %105 = arith.truncf %104 : vector<8x64xf32> to vector<8x64xbf16>
    %106 = arith.index_cast %c0_i32 : i32 to index
    %c0_45 = arith.constant 0 : index
    %c0_46 = arith.constant 0 : index
    %107 = vector.load %arg12[%106, %c0_45, %c0_46] : memref<8x8x128xbf16, #tpu.memory_space<vmem>>, vector<1x8x64xbf16>
    %108 = vector.shape_cast %107 : vector<1x8x64xbf16> to vector<8x64xbf16>
    %109 = vector.shape_cast %101 : vector<8x64xbf16> to vector<1x8x64xbf16>
    tpu.vector_store %arg12[%106, %c0_45, %c0_46], %109 {strides = array<i32>} : memref<8x8x128xbf16, #tpu.memory_space<vmem>>, vector<1x8x64xbf16>,
    %110 = arith.index_cast %59 : i32 to index
    %c0_47 = arith.constant 0 : index
    %c64 = arith.constant 64 : index
    %111 = vector.load %arg12[%110, %c0_47, %c64] : memref<8x8x128xbf16, #tpu.memory_space<vmem>>, vector<1x8x64xbf16>
    %112 = vector.shape_cast %111 : vector<1x8x64xbf16> to vector<8x64xbf16>
    %113 = vector.shape_cast %105 : vector<8x64xbf16> to vector<1x8x64xbf16>
    tpu.vector_store %arg12[%110, %c0_47, %c64], %113 {strides = array<i32>} : memref<8x8x128xbf16, #tpu.memory_space<vmem>>, vector<1x8x64xbf16>,
    %c1_i32 = arith.constant 1 : i32
    %c7_i32_48 = arith.constant 7 : i32
    %114 = arith.subi %c7_i32_48, %c1_i32 : i32
    %115 = arith.index_cast %c1_i32 : i32 to index
    %c0_49 = arith.constant 0 : index
    %c0_50 = arith.constant 0 : index
    %116 = vector.load %arg10[%115, %c0_49, %c0_50] : memref<8x8x256xbf16, #tpu.memory_space<vmem>>, vector<1x8x256xbf16>
    %117 = vector.shape_cast %116 : vector<1x8x256xbf16> to vector<8x256xbf16>
    %cst_51 = arith.constant dense<0.000000e+00> : vector<8x256xf32>
    %118 = tpu.matmul %101, %16, %cst_51 {dimension_numbers = #tpu.dot_dimension_numbers<[1], [0], [0], [1], [0, 0, 1, 1], [], []>} : vector<8x64xbf16>, vector<64x256xbf16>, vector<8x256xf32> -> vector<8x256xf32>
    %119 = arith.extf %117 : vector<8x256xbf16> to vector<8x256xf32>
    %120 = arith.addf %119, %118 : vector<8x256xf32>
    %121 = arith.index_cast %114 : i32 to index
    %c0_52 = arith.constant 0 : index
    %c0_53 = arith.constant 0 : index
    %122 = vector.load %arg11[%121, %c0_52, %c0_53] : memref<8x8x256xbf16, #tpu.memory_space<vmem>>, vector<1x8x256xbf16>
    %123 = vector.shape_cast %122 : vector<1x8x256xbf16> to vector<8x256xbf16>
    %cst_54 = arith.constant dense<0.000000e+00> : vector<8x256xf32>
    %124 = tpu.matmul %105, %18, %cst_54 {dimension_numbers = #tpu.dot_dimension_numbers<[1], [0], [0], [1], [0, 0, 1, 1], [], []>} : vector<8x64xbf16>, vector<64x256xbf16>, vector<8x256xf32> -> vector<8x256xf32>
    %125 = arith.extf %123 : vector<8x256xbf16> to vector<8x256xf32>
    %126 = arith.addf %125, %124 : vector<8x256xf32>
    %127 = vector.extract_strided_slice %120 {offsets = [0, 0], sizes = [8, 192], strides = [1, 1]} : vector<8x256xf32> to vector<8x192xf32>
    %128 = arith.negf %127 : vector<8x192xf32>
    %129 = math.exp %128 : vector<8x192xf32>
    %cst_55 = arith.constant 1.000000e+00 : f32
    %130 = vector.broadcast %cst_55 : f32 to vector<8x192xf32>
    %131 = arith.addf %130, %129 : vector<8x192xf32>
    %132 = arith.divf %130, %131 : vector<8x192xf32>
    %133 = vector.extract_strided_slice %120 {offsets = [0, 192], sizes = [8, 64], strides = [1, 1]} : vector<8x256xf32> to vector<8x64xf32>
    %134 = math.tanh %133 : vector<8x64xf32>
    %135 = vector.extract_strided_slice %126 {offsets = [0, 0], sizes = [8, 192], strides = [1, 1]} : vector<8x256xf32> to vector<8x192xf32>
    %136 = arith.negf %135 : vector<8x192xf32>
    %137 = math.exp %136 : vector<8x192xf32>
    %cst_56 = arith.constant 1.000000e+00 : f32
    %138 = vector.broadcast %cst_56 : f32 to vector<8x192xf32>
    %139 = arith.addf %138, %137 : vector<8x192xf32>
    %140 = arith.divf %138, %139 : vector<8x192xf32>
    %141 = vector.extract_strided_slice %126 {offsets = [0, 192], sizes = [8, 64], strides = [1, 1]} : vector<8x256xf32> to vector<8x64xf32>
    %142 = math.tanh %141 : vector<8x64xf32>
    %143 = vector.extract_strided_slice %132 {offsets = [0, 64], sizes = [8, 64], strides = [1, 1]} : vector<8x192xf32> to vector<8x64xf32>
    %144 = arith.mulf %143, %92 : vector<8x64xf32>
    %145 = vector.extract_strided_slice %132 {offsets = [0, 0], sizes = [8, 64], strides = [1, 1]} : vector<8x192xf32> to vector<8x64xf32>
    %146 = arith.mulf %145, %134 : vector<8x64xf32>
    %147 = arith.addf %144, %146 : vector<8x64xf32>
    %148 = vector.extract_strided_slice %140 {offsets = [0, 64], sizes = [8, 64], strides = [1, 1]} : vector<8x192xf32> to vector<8x64xf32>
    %149 = arith.mulf %148, %97 : vector<8x64xf32>
    %150 = vector.extract_strided_slice %140 {offsets = [0, 0], sizes = [8, 64], strides = [1, 1]} : vector<8x192xf32> to vector<8x64xf32>
    %151 = arith.mulf %150, %142 : vector<8x64xf32>
    %152 = arith.addf %149, %151 : vector<8x64xf32>
    %153 = vector.extract_strided_slice %132 {offsets = [0, 128], sizes = [8, 64], strides = [1, 1]} : vector<8x192xf32> to vector<8x64xf32>
    %154 = math.tanh %147 : vector<8x64xf32>
    %155 = arith.mulf %153, %154 : vector<8x64xf32>
    %156 = arith.truncf %155 : vector<8x64xf32> to vector<8x64xbf16>
    %157 = vector.extract_strided_slice %140 {offsets = [0, 128], sizes = [8, 64], strides = [1, 1]} : vector<8x192xf32> to vector<8x64xf32>
    %158 = math.tanh %152 : vector<8x64xf32>
    %159 = arith.mulf %157, %158 : vector<8x64xf32>
    %160 = arith.truncf %159 : vector<8x64xf32> to vector<8x64xbf16>
    %161 = arith.index_cast %c1_i32 : i32 to index
    %c0_57 = arith.constant 0 : index
    %c0_58 = arith.constant 0 : index
    %162 = vector.load %arg12[%161, %c0_57, %c0_58] : memref<8x8x128xbf16, #tpu.memory_space<vmem>>, vector<1x8x64xbf16>
    %163 = vector.shape_cast %162 : vector<1x8x64xbf16> to vector<8x64xbf16>
    %164 = vector.shape_cast %156 : vector<8x64xbf16> to vector<1x8x64xbf16>
    tpu.vector_store %arg12[%161, %c0_57, %c0_58], %164 {strides = array<i32>} : memref<8x8x128xbf16, #tpu.memory_space<vmem>>, vector<1x8x64xbf16>,
    %165 = arith.index_cast %114 : i32 to index
    %c0_59 = arith.constant 0 : index
    %c64_60 = arith.constant 64 : index
    %166 = vector.load %arg12[%165, %c0_59, %c64_60] : memref<8x8x128xbf16, #tpu.memory_space<vmem>>, vector<1x8x64xbf16>
    %167 = vector.shape_cast %166 : vector<1x8x64xbf16> to vector<8x64xbf16>
    %168 = vector.shape_cast %160 : vector<8x64xbf16> to vector<1x8x64xbf16>
    tpu.vector_store %arg12[%165, %c0_59, %c64_60], %168 {strides = array<i32>} : memref<8x8x128xbf16, #tpu.memory_space<vmem>>, vector<1x8x64xbf16>,
    %c2_i32 = arith.constant 2 : i32
    %c7_i32_61 = arith.constant 7 : i32
    %169 = arith.subi %c7_i32_61, %c2_i32 : i32
    %170 = arith.index_cast %c2_i32 : i32 to index
    %c0_62 = arith.constant 0 : index
    %c0_63 = arith.constant 0 : index
    %171 = vector.load %arg10[%170, %c0_62, %c0_63] : memref<8x8x256xbf16, #tpu.memory_space<vmem>>, vector<1x8x256xbf16>
    %172 = vector.shape_cast %171 : vector<1x8x256xbf16> to vector<8x256xbf16>
    %cst_64 = arith.constant dense<0.000000e+00> : vector<8x256xf32>
    %173 = tpu.matmul %156, %16, %cst_64 {dimension_numbers = #tpu.dot_dimension_numbers<[1], [0], [0], [1], [0, 0, 1, 1], [], []>} : vector<8x64xbf16>, vector<64x256xbf16>, vector<8x256xf32> -> vector<8x256xf32>
    %174 = arith.extf %172 : vector<8x256xbf16> to vector<8x256xf32>
    %175 = arith.addf %174, %173 : vector<8x256xf32>
    %176 = arith.index_cast %169 : i32 to index
    %c0_65 = arith.constant 0 : index
    %c0_66 = arith.constant 0 : index
    %177 = vector.load %arg11[%176, %c0_65, %c0_66] : memref<8x8x256xbf16, #tpu.memory_space<vmem>>, vector<1x8x256xbf16>
    %178 = vector.shape_cast %177 : vector<1x8x256xbf16> to vector<8x256xbf16>
    %cst_67 = arith.constant dense<0.000000e+00> : vector<8x256xf32>
    %179 = tpu.matmul %160, %18, %cst_67 {dimension_numbers = #tpu.dot_dimension_numbers<[1], [0], [0], [1], [0, 0, 1, 1], [], []>} : vector<8x64xbf16>, vector<64x256xbf16>, vector<8x256xf32> -> vector<8x256xf32>
    %180 = arith.extf %178 : vector<8x256xbf16> to vector<8x256xf32>
    %181 = arith.addf %180, %179 : vector<8x256xf32>
    %182 = vector.extract_strided_slice %175 {offsets = [0, 0], sizes = [8, 192], strides = [1, 1]} : vector<8x256xf32> to vector<8x192xf32>
    %183 = arith.negf %182 : vector<8x192xf32>
    %184 = math.exp %183 : vector<8x192xf32>
    %cst_68 = arith.constant 1.000000e+00 : f32
    %185 = vector.broadcast %cst_68 : f32 to vector<8x192xf32>
    %186 = arith.addf %185, %184 : vector<8x192xf32>
    %187 = arith.divf %185, %186 : vector<8x192xf32>
    %188 = vector.extract_strided_slice %175 {offsets = [0, 192], sizes = [8, 64], strides = [1, 1]} : vector<8x256xf32> to vector<8x64xf32>
    %189 = math.tanh %188 : vector<8x64xf32>
    %190 = vector.extract_strided_slice %181 {offsets = [0, 0], sizes = [8, 192], strides = [1, 1]} : vector<8x256xf32> to vector<8x192xf32>
    %191 = arith.negf %190 : vector<8x192xf32>
    %192 = math.exp %191 : vector<8x192xf32>
    %cst_69 = arith.constant 1.000000e+00 : f32
    %193 = vector.broadcast %cst_69 : f32 to vector<8x192xf32>
    %194 = arith.addf %193, %192 : vector<8x192xf32>
    %195 = arith.divf %193, %194 : vector<8x192xf32>
    %196 = vector.extract_strided_slice %181 {offsets = [0, 192], sizes = [8, 64], strides = [1, 1]} : vector<8x256xf32> to vector<8x64xf32>
    %197 = math.tanh %196 : vector<8x64xf32>
    %198 = vector.extract_strided_slice %187 {offsets = [0, 64], sizes = [8, 64], strides = [1, 1]} : vector<8x192xf32> to vector<8x64xf32>
    %199 = arith.mulf %198, %147 : vector<8x64xf32>
    %200 = vector.extract_strided_slice %187 {offsets = [0, 0], sizes = [8, 64], strides = [1, 1]} : vector<8x192xf32> to vector<8x64xf32>
    %201 = arith.mulf %200, %189 : vector<8x64xf32>
    %202 = arith.addf %199, %201 : vector<8x64xf32>
    %203 = vector.extract_strided_slice %195 {offsets = [0, 64], sizes = [8, 64], strides = [1, 1]} : vector<8x192xf32> to vector<8x64xf32>
    %204 = arith.mulf %203, %152 : vector<8x64xf32>
    %205 = vector.extract_strided_slice %195 {offsets = [0, 0], sizes = [8, 64], strides = [1, 1]} : vector<8x192xf32> to vector<8x64xf32>
    %206 = arith.mulf %205, %197 : vector<8x64xf32>
    %207 = arith.addf %204, %206 : vector<8x64xf32>
    %208 = vector.extract_strided_slice %187 {offsets = [0, 128], sizes = [8, 64], strides = [1, 1]} : vector<8x192xf32> to vector<8x64xf32>
    %209 = math.tanh %202 : vector<8x64xf32>
    %210 = arith.mulf %208, %209 : vector<8x64xf32>
    %211 = arith.truncf %210 : vector<8x64xf32> to vector<8x64xbf16>
    %212 = vector.extract_strided_slice %195 {offsets = [0, 128], sizes = [8, 64], strides = [1, 1]} : vector<8x192xf32> to vector<8x64xf32>
    %213 = math.tanh %207 : vector<8x64xf32>
    %214 = arith.mulf %212, %213 : vector<8x64xf32>
    %215 = arith.truncf %214 : vector<8x64xf32> to vector<8x64xbf16>
    %216 = arith.index_cast %c2_i32 : i32 to index
    %c0_70 = arith.constant 0 : index
    %c0_71 = arith.constant 0 : index
    %217 = vector.load %arg12[%216, %c0_70, %c0_71] : memref<8x8x128xbf16, #tpu.memory_space<vmem>>, vector<1x8x64xbf16>
    %218 = vector.shape_cast %217 : vector<1x8x64xbf16> to vector<8x64xbf16>
    %219 = vector.shape_cast %211 : vector<8x64xbf16> to vector<1x8x64xbf16>
    tpu.vector_store %arg12[%216, %c0_70, %c0_71], %219 {strides = array<i32>} : memref<8x8x128xbf16, #tpu.memory_space<vmem>>, vector<1x8x64xbf16>,
    %220 = arith.index_cast %169 : i32 to index
    %c0_72 = arith.constant 0 : index
    %c64_73 = arith.constant 64 : index
    %221 = vector.load %arg12[%220, %c0_72, %c64_73] : memref<8x8x128xbf16, #tpu.memory_space<vmem>>, vector<1x8x64xbf16>
    %222 = vector.shape_cast %221 : vector<1x8x64xbf16> to vector<8x64xbf16>
    %223 = vector.shape_cast %215 : vector<8x64xbf16> to vector<1x8x64xbf16>
    tpu.vector_store %arg12[%220, %c0_72, %c64_73], %223 {strides = array<i32>} : memref<8x8x128xbf16, #tpu.memory_space<vmem>>, vector<1x8x64xbf16>,
    %c3_i32 = arith.constant 3 : i32
    %c7_i32_74 = arith.constant 7 : i32
    %224 = arith.subi %c7_i32_74, %c3_i32 : i32
    %225 = arith.index_cast %c3_i32 : i32 to index
    %c0_75 = arith.constant 0 : index
    %c0_76 = arith.constant 0 : index
    %226 = vector.load %arg10[%225, %c0_75, %c0_76] : memref<8x8x256xbf16, #tpu.memory_space<vmem>>, vector<1x8x256xbf16>
    %227 = vector.shape_cast %226 : vector<1x8x256xbf16> to vector<8x256xbf16>
    %cst_77 = arith.constant dense<0.000000e+00> : vector<8x256xf32>
    %228 = tpu.matmul %211, %16, %cst_77 {dimension_numbers = #tpu.dot_dimension_numbers<[1], [0], [0], [1], [0, 0, 1, 1], [], []>} : vector<8x64xbf16>, vector<64x256xbf16>, vector<8x256xf32> -> vector<8x256xf32>
    %229 = arith.extf %227 : vector<8x256xbf16> to vector<8x256xf32>
    %230 = arith.addf %229, %228 : vector<8x256xf32>
    %231 = arith.index_cast %224 : i32 to index
    %c0_78 = arith.constant 0 : index
    %c0_79 = arith.constant 0 : index
    %232 = vector.load %arg11[%231, %c0_78, %c0_79] : memref<8x8x256xbf16, #tpu.memory_space<vmem>>, vector<1x8x256xbf16>
    %233 = vector.shape_cast %232 : vector<1x8x256xbf16> to vector<8x256xbf16>
    %cst_80 = arith.constant dense<0.000000e+00> : vector<8x256xf32>
    %234 = tpu.matmul %215, %18, %cst_80 {dimension_numbers = #tpu.dot_dimension_numbers<[1], [0], [0], [1], [0, 0, 1, 1], [], []>} : vector<8x64xbf16>, vector<64x256xbf16>, vector<8x256xf32> -> vector<8x256xf32>
    %235 = arith.extf %233 : vector<8x256xbf16> to vector<8x256xf32>
    %236 = arith.addf %235, %234 : vector<8x256xf32>
    %237 = vector.extract_strided_slice %230 {offsets = [0, 0], sizes = [8, 192], strides = [1, 1]} : vector<8x256xf32> to vector<8x192xf32>
    %238 = arith.negf %237 : vector<8x192xf32>
    %239 = math.exp %238 : vector<8x192xf32>
    %cst_81 = arith.constant 1.000000e+00 : f32
    %240 = vector.broadcast %cst_81 : f32 to vector<8x192xf32>
    %241 = arith.addf %240, %239 : vector<8x192xf32>
    %242 = arith.divf %240, %241 : vector<8x192xf32>
    %243 = vector.extract_strided_slice %230 {offsets = [0, 192], sizes = [8, 64], strides = [1, 1]} : vector<8x256xf32> to vector<8x64xf32>
    %244 = math.tanh %243 : vector<8x64xf32>
    %245 = vector.extract_strided_slice %236 {offsets = [0, 0], sizes = [8, 192], strides = [1, 1]} : vector<8x256xf32> to vector<8x192xf32>
    %246 = arith.negf %245 : vector<8x192xf32>
    %247 = math.exp %246 : vector<8x192xf32>
    %cst_82 = arith.constant 1.000000e+00 : f32
    %248 = vector.broadcast %cst_82 : f32 to vector<8x192xf32>
    %249 = arith.addf %248, %247 : vector<8x192xf32>
    %250 = arith.divf %248, %249 : vector<8x192xf32>
    %251 = vector.extract_strided_slice %236 {offsets = [0, 192], sizes = [8, 64], strides = [1, 1]} : vector<8x256xf32> to vector<8x64xf32>
    %252 = math.tanh %251 : vector<8x64xf32>
    %253 = vector.extract_strided_slice %242 {offsets = [0, 64], sizes = [8, 64], strides = [1, 1]} : vector<8x192xf32> to vector<8x64xf32>
    %254 = arith.mulf %253, %202 : vector<8x64xf32>
    %255 = vector.extract_strided_slice %242 {offsets = [0, 0], sizes = [8, 64], strides = [1, 1]} : vector<8x192xf32> to vector<8x64xf32>
    %256 = arith.mulf %255, %244 : vector<8x64xf32>
    %257 = arith.addf %254, %256 : vector<8x64xf32>
    %258 = vector.extract_strided_slice %250 {offsets = [0, 64], sizes = [8, 64], strides = [1, 1]} : vector<8x192xf32> to vector<8x64xf32>
    %259 = arith.mulf %258, %207 : vector<8x64xf32>
    %260 = vector.extract_strided_slice %250 {offsets = [0, 0], sizes = [8, 64], strides = [1, 1]} : vector<8x192xf32> to vector<8x64xf32>
    %261 = arith.mulf %260, %252 : vector<8x64xf32>
    %262 = arith.addf %259, %261 : vector<8x64xf32>
    %263 = vector.extract_strided_slice %242 {offsets = [0, 128], sizes = [8, 64], strides = [1, 1]} : vector<8x192xf32> to vector<8x64xf32>
    %264 = math.tanh %257 : vector<8x64xf32>
    %265 = arith.mulf %263, %264 : vector<8x64xf32>
    %266 = arith.truncf %265 : vector<8x64xf32> to vector<8x64xbf16>
    %267 = vector.extract_strided_slice %250 {offsets = [0, 128], sizes = [8, 64], strides = [1, 1]} : vector<8x192xf32> to vector<8x64xf32>
    %268 = math.tanh %262 : vector<8x64xf32>
    %269 = arith.mulf %267, %268 : vector<8x64xf32>
    %270 = arith.truncf %269 : vector<8x64xf32> to vector<8x64xbf16>
    %271 = arith.index_cast %c3_i32 : i32 to index
    %c0_83 = arith.constant 0 : index
    %c0_84 = arith.constant 0 : index
    %272 = vector.load %arg12[%271, %c0_83, %c0_84] : memref<8x8x128xbf16, #tpu.memory_space<vmem>>, vector<1x8x64xbf16>
    %273 = vector.shape_cast %272 : vector<1x8x64xbf16> to vector<8x64xbf16>
    %274 = vector.shape_cast %266 : vector<8x64xbf16> to vector<1x8x64xbf16>
    tpu.vector_store %arg12[%271, %c0_83, %c0_84], %274 {strides = array<i32>} : memref<8x8x128xbf16, #tpu.memory_space<vmem>>, vector<1x8x64xbf16>,
    %275 = arith.index_cast %224 : i32 to index
    %c0_85 = arith.constant 0 : index
    %c64_86 = arith.constant 64 : index
    %276 = vector.load %arg12[%275, %c0_85, %c64_86] : memref<8x8x128xbf16, #tpu.memory_space<vmem>>, vector<1x8x64xbf16>
    %277 = vector.shape_cast %276 : vector<1x8x64xbf16> to vector<8x64xbf16>
    %278 = vector.shape_cast %270 : vector<8x64xbf16> to vector<1x8x64xbf16>
    tpu.vector_store %arg12[%275, %c0_85, %c64_86], %278 {strides = array<i32>} : memref<8x8x128xbf16, #tpu.memory_space<vmem>>, vector<1x8x64xbf16>,
    %c4_i32 = arith.constant 4 : i32
    %c7_i32_87 = arith.constant 7 : i32
    %279 = arith.subi %c7_i32_87, %c4_i32 : i32
    %280 = arith.index_cast %c4_i32 : i32 to index
    %c0_88 = arith.constant 0 : index
    %c0_89 = arith.constant 0 : index
    %281 = vector.load %arg10[%280, %c0_88, %c0_89] : memref<8x8x256xbf16, #tpu.memory_space<vmem>>, vector<1x8x256xbf16>
    %282 = vector.shape_cast %281 : vector<1x8x256xbf16> to vector<8x256xbf16>
    %cst_90 = arith.constant dense<0.000000e+00> : vector<8x256xf32>
    %283 = tpu.matmul %266, %16, %cst_90 {dimension_numbers = #tpu.dot_dimension_numbers<[1], [0], [0], [1], [0, 0, 1, 1], [], []>} : vector<8x64xbf16>, vector<64x256xbf16>, vector<8x256xf32> -> vector<8x256xf32>
    %284 = arith.extf %282 : vector<8x256xbf16> to vector<8x256xf32>
    %285 = arith.addf %284, %283 : vector<8x256xf32>
    %286 = arith.index_cast %279 : i32 to index
    %c0_91 = arith.constant 0 : index
    %c0_92 = arith.constant 0 : index
    %287 = vector.load %arg11[%286, %c0_91, %c0_92] : memref<8x8x256xbf16, #tpu.memory_space<vmem>>, vector<1x8x256xbf16>
    %288 = vector.shape_cast %287 : vector<1x8x256xbf16> to vector<8x256xbf16>
    %cst_93 = arith.constant dense<0.000000e+00> : vector<8x256xf32>
    %289 = tpu.matmul %270, %18, %cst_93 {dimension_numbers = #tpu.dot_dimension_numbers<[1], [0], [0], [1], [0, 0, 1, 1], [], []>} : vector<8x64xbf16>, vector<64x256xbf16>, vector<8x256xf32> -> vector<8x256xf32>
    %290 = arith.extf %288 : vector<8x256xbf16> to vector<8x256xf32>
    %291 = arith.addf %290, %289 : vector<8x256xf32>
    %292 = vector.extract_strided_slice %285 {offsets = [0, 0], sizes = [8, 192], strides = [1, 1]} : vector<8x256xf32> to vector<8x192xf32>
    %293 = arith.negf %292 : vector<8x192xf32>
    %294 = math.exp %293 : vector<8x192xf32>
    %cst_94 = arith.constant 1.000000e+00 : f32
    %295 = vector.broadcast %cst_94 : f32 to vector<8x192xf32>
    %296 = arith.addf %295, %294 : vector<8x192xf32>
    %297 = arith.divf %295, %296 : vector<8x192xf32>
    %298 = vector.extract_strided_slice %285 {offsets = [0, 192], sizes = [8, 64], strides = [1, 1]} : vector<8x256xf32> to vector<8x64xf32>
    %299 = math.tanh %298 : vector<8x64xf32>
    %300 = vector.extract_strided_slice %291 {offsets = [0, 0], sizes = [8, 192], strides = [1, 1]} : vector<8x256xf32> to vector<8x192xf32>
    %301 = arith.negf %300 : vector<8x192xf32>
    %302 = math.exp %301 : vector<8x192xf32>
    %cst_95 = arith.constant 1.000000e+00 : f32
    %303 = vector.broadcast %cst_95 : f32 to vector<8x192xf32>
    %304 = arith.addf %303, %302 : vector<8x192xf32>
    %305 = arith.divf %303, %304 : vector<8x192xf32>
    %306 = vector.extract_strided_slice %291 {offsets = [0, 192], sizes = [8, 64], strides = [1, 1]} : vector<8x256xf32> to vector<8x64xf32>
    %307 = math.tanh %306 : vector<8x64xf32>
    %308 = vector.extract_strided_slice %297 {offsets = [0, 64], sizes = [8, 64], strides = [1, 1]} : vector<8x192xf32> to vector<8x64xf32>
    %309 = arith.mulf %308, %257 : vector<8x64xf32>
    %310 = vector.extract_strided_slice %297 {offsets = [0, 0], sizes = [8, 64], strides = [1, 1]} : vector<8x192xf32> to vector<8x64xf32>
    %311 = arith.mulf %310, %299 : vector<8x64xf32>
    %312 = arith.addf %309, %311 : vector<8x64xf32>
    %313 = vector.extract_strided_slice %305 {offsets = [0, 64], sizes = [8, 64], strides = [1, 1]} : vector<8x192xf32> to vector<8x64xf32>
    %314 = arith.mulf %313, %262 : vector<8x64xf32>
    %315 = vector.extract_strided_slice %305 {offsets = [0, 0], sizes = [8, 64], strides = [1, 1]} : vector<8x192xf32> to vector<8x64xf32>
    %316 = arith.mulf %315, %307 : vector<8x64xf32>
    %317 = arith.addf %314, %316 : vector<8x64xf32>
    %318 = vector.extract_strided_slice %297 {offsets = [0, 128], sizes = [8, 64], strides = [1, 1]} : vector<8x192xf32> to vector<8x64xf32>
    %319 = math.tanh %312 : vector<8x64xf32>
    %320 = arith.mulf %318, %319 : vector<8x64xf32>
    %321 = arith.truncf %320 : vector<8x64xf32> to vector<8x64xbf16>
    %322 = vector.extract_strided_slice %305 {offsets = [0, 128], sizes = [8, 64], strides = [1, 1]} : vector<8x192xf32> to vector<8x64xf32>
    %323 = math.tanh %317 : vector<8x64xf32>
    %324 = arith.mulf %322, %323 : vector<8x64xf32>
    %325 = arith.truncf %324 : vector<8x64xf32> to vector<8x64xbf16>
    %326 = arith.index_cast %c4_i32 : i32 to index
    %c0_96 = arith.constant 0 : index
    %c0_97 = arith.constant 0 : index
    %327 = vector.load %arg12[%326, %c0_96, %c0_97] : memref<8x8x128xbf16, #tpu.memory_space<vmem>>, vector<1x8x64xbf16>
    %328 = vector.shape_cast %327 : vector<1x8x64xbf16> to vector<8x64xbf16>
    %329 = vector.shape_cast %321 : vector<8x64xbf16> to vector<1x8x64xbf16>
    tpu.vector_store %arg12[%326, %c0_96, %c0_97], %329 {strides = array<i32>} : memref<8x8x128xbf16, #tpu.memory_space<vmem>>, vector<1x8x64xbf16>,
    %330 = arith.index_cast %279 : i32 to index
    %c0_98 = arith.constant 0 : index
    %c64_99 = arith.constant 64 : index
    %331 = vector.load %arg12[%330, %c0_98, %c64_99] : memref<8x8x128xbf16, #tpu.memory_space<vmem>>, vector<1x8x64xbf16>
    %332 = vector.shape_cast %331 : vector<1x8x64xbf16> to vector<8x64xbf16>
    %333 = vector.shape_cast %325 : vector<8x64xbf16> to vector<1x8x64xbf16>
    tpu.vector_store %arg12[%330, %c0_98, %c64_99], %333 {strides = array<i32>} : memref<8x8x128xbf16, #tpu.memory_space<vmem>>, vector<1x8x64xbf16>,
    %c5_i32 = arith.constant 5 : i32
    %c7_i32_100 = arith.constant 7 : i32
    %334 = arith.subi %c7_i32_100, %c5_i32 : i32
    %335 = arith.index_cast %c5_i32 : i32 to index
    %c0_101 = arith.constant 0 : index
    %c0_102 = arith.constant 0 : index
    %336 = vector.load %arg10[%335, %c0_101, %c0_102] : memref<8x8x256xbf16, #tpu.memory_space<vmem>>, vector<1x8x256xbf16>
    %337 = vector.shape_cast %336 : vector<1x8x256xbf16> to vector<8x256xbf16>
    %cst_103 = arith.constant dense<0.000000e+00> : vector<8x256xf32>
    %338 = tpu.matmul %321, %16, %cst_103 {dimension_numbers = #tpu.dot_dimension_numbers<[1], [0], [0], [1], [0, 0, 1, 1], [], []>} : vector<8x64xbf16>, vector<64x256xbf16>, vector<8x256xf32> -> vector<8x256xf32>
    %339 = arith.extf %337 : vector<8x256xbf16> to vector<8x256xf32>
    %340 = arith.addf %339, %338 : vector<8x256xf32>
    %341 = arith.index_cast %334 : i32 to index
    %c0_104 = arith.constant 0 : index
    %c0_105 = arith.constant 0 : index
    %342 = vector.load %arg11[%341, %c0_104, %c0_105] : memref<8x8x256xbf16, #tpu.memory_space<vmem>>, vector<1x8x256xbf16>
    %343 = vector.shape_cast %342 : vector<1x8x256xbf16> to vector<8x256xbf16>
    %cst_106 = arith.constant dense<0.000000e+00> : vector<8x256xf32>
    %344 = tpu.matmul %325, %18, %cst_106 {dimension_numbers = #tpu.dot_dimension_numbers<[1], [0], [0], [1], [0, 0, 1, 1], [], []>} : vector<8x64xbf16>, vector<64x256xbf16>, vector<8x256xf32> -> vector<8x256xf32>
    %345 = arith.extf %343 : vector<8x256xbf16> to vector<8x256xf32>
    %346 = arith.addf %345, %344 : vector<8x256xf32>
    %347 = vector.extract_strided_slice %340 {offsets = [0, 0], sizes = [8, 192], strides = [1, 1]} : vector<8x256xf32> to vector<8x192xf32>
    %348 = arith.negf %347 : vector<8x192xf32>
    %349 = math.exp %348 : vector<8x192xf32>
    %cst_107 = arith.constant 1.000000e+00 : f32
    %350 = vector.broadcast %cst_107 : f32 to vector<8x192xf32>
    %351 = arith.addf %350, %349 : vector<8x192xf32>
    %352 = arith.divf %350, %351 : vector<8x192xf32>
    %353 = vector.extract_strided_slice %340 {offsets = [0, 192], sizes = [8, 64], strides = [1, 1]} : vector<8x256xf32> to vector<8x64xf32>
    %354 = math.tanh %353 : vector<8x64xf32>
    %355 = vector.extract_strided_slice %346 {offsets = [0, 0], sizes = [8, 192], strides = [1, 1]} : vector<8x256xf32> to vector<8x192xf32>
    %356 = arith.negf %355 : vector<8x192xf32>
    %357 = math.exp %356 : vector<8x192xf32>
    %cst_108 = arith.constant 1.000000e+00 : f32
    %358 = vector.broadcast %cst_108 : f32 to vector<8x192xf32>
    %359 = arith.addf %358, %357 : vector<8x192xf32>
    %360 = arith.divf %358, %359 : vector<8x192xf32>
    %361 = vector.extract_strided_slice %346 {offsets = [0, 192], sizes = [8, 64], strides = [1, 1]} : vector<8x256xf32> to vector<8x64xf32>
    %362 = math.tanh %361 : vector<8x64xf32>
    %363 = vector.extract_strided_slice %352 {offsets = [0, 64], sizes = [8, 64], strides = [1, 1]} : vector<8x192xf32> to vector<8x64xf32>
    %364 = arith.mulf %363, %312 : vector<8x64xf32>
    %365 = vector.extract_strided_slice %352 {offsets = [0, 0], sizes = [8, 64], strides = [1, 1]} : vector<8x192xf32> to vector<8x64xf32>
    %366 = arith.mulf %365, %354 : vector<8x64xf32>
    %367 = arith.addf %364, %366 : vector<8x64xf32>
    %368 = vector.extract_strided_slice %360 {offsets = [0, 64], sizes = [8, 64], strides = [1, 1]} : vector<8x192xf32> to vector<8x64xf32>
    %369 = arith.mulf %368, %317 : vector<8x64xf32>
    %370 = vector.extract_strided_slice %360 {offsets = [0, 0], sizes = [8, 64], strides = [1, 1]} : vector<8x192xf32> to vector<8x64xf32>
    %371 = arith.mulf %370, %362 : vector<8x64xf32>
    %372 = arith.addf %369, %371 : vector<8x64xf32>
    %373 = vector.extract_strided_slice %352 {offsets = [0, 128], sizes = [8, 64], strides = [1, 1]} : vector<8x192xf32> to vector<8x64xf32>
    %374 = math.tanh %367 : vector<8x64xf32>
    %375 = arith.mulf %373, %374 : vector<8x64xf32>
    %376 = arith.truncf %375 : vector<8x64xf32> to vector<8x64xbf16>
    %377 = vector.extract_strided_slice %360 {offsets = [0, 128], sizes = [8, 64], strides = [1, 1]} : vector<8x192xf32> to vector<8x64xf32>
    %378 = math.tanh %372 : vector<8x64xf32>
    %379 = arith.mulf %377, %378 : vector<8x64xf32>
    %380 = arith.truncf %379 : vector<8x64xf32> to vector<8x64xbf16>
    %381 = arith.index_cast %c5_i32 : i32 to index
    %c0_109 = arith.constant 0 : index
    %c0_110 = arith.constant 0 : index
    %382 = vector.load %arg12[%381, %c0_109, %c0_110] : memref<8x8x128xbf16, #tpu.memory_space<vmem>>, vector<1x8x64xbf16>
    %383 = vector.shape_cast %382 : vector<1x8x64xbf16> to vector<8x64xbf16>
    %384 = vector.shape_cast %376 : vector<8x64xbf16> to vector<1x8x64xbf16>
    tpu.vector_store %arg12[%381, %c0_109, %c0_110], %384 {strides = array<i32>} : memref<8x8x128xbf16, #tpu.memory_space<vmem>>, vector<1x8x64xbf16>,
    %385 = arith.index_cast %334 : i32 to index
    %c0_111 = arith.constant 0 : index
    %c64_112 = arith.constant 64 : index
    %386 = vector.load %arg12[%385, %c0_111, %c64_112] : memref<8x8x128xbf16, #tpu.memory_space<vmem>>, vector<1x8x64xbf16>
    %387 = vector.shape_cast %386 : vector<1x8x64xbf16> to vector<8x64xbf16>
    %388 = vector.shape_cast %380 : vector<8x64xbf16> to vector<1x8x64xbf16>
    tpu.vector_store %arg12[%385, %c0_111, %c64_112], %388 {strides = array<i32>} : memref<8x8x128xbf16, #tpu.memory_space<vmem>>, vector<1x8x64xbf16>,
    %c6_i32 = arith.constant 6 : i32
    %c7_i32_113 = arith.constant 7 : i32
    %389 = arith.subi %c7_i32_113, %c6_i32 : i32
    %390 = arith.index_cast %c6_i32 : i32 to index
    %c0_114 = arith.constant 0 : index
    %c0_115 = arith.constant 0 : index
    %391 = vector.load %arg10[%390, %c0_114, %c0_115] : memref<8x8x256xbf16, #tpu.memory_space<vmem>>, vector<1x8x256xbf16>
    %392 = vector.shape_cast %391 : vector<1x8x256xbf16> to vector<8x256xbf16>
    %cst_116 = arith.constant dense<0.000000e+00> : vector<8x256xf32>
    %393 = tpu.matmul %376, %16, %cst_116 {dimension_numbers = #tpu.dot_dimension_numbers<[1], [0], [0], [1], [0, 0, 1, 1], [], []>} : vector<8x64xbf16>, vector<64x256xbf16>, vector<8x256xf32> -> vector<8x256xf32>
    %394 = arith.extf %392 : vector<8x256xbf16> to vector<8x256xf32>
    %395 = arith.addf %394, %393 : vector<8x256xf32>
    %396 = arith.index_cast %389 : i32 to index
    %c0_117 = arith.constant 0 : index
    %c0_118 = arith.constant 0 : index
    %397 = vector.load %arg11[%396, %c0_117, %c0_118] : memref<8x8x256xbf16, #tpu.memory_space<vmem>>, vector<1x8x256xbf16>
    %398 = vector.shape_cast %397 : vector<1x8x256xbf16> to vector<8x256xbf16>
    %cst_119 = arith.constant dense<0.000000e+00> : vector<8x256xf32>
    %399 = tpu.matmul %380, %18, %cst_119 {dimension_numbers = #tpu.dot_dimension_numbers<[1], [0], [0], [1], [0, 0, 1, 1], [], []>} : vector<8x64xbf16>, vector<64x256xbf16>, vector<8x256xf32> -> vector<8x256xf32>
    %400 = arith.extf %398 : vector<8x256xbf16> to vector<8x256xf32>
    %401 = arith.addf %400, %399 : vector<8x256xf32>
    %402 = vector.extract_strided_slice %395 {offsets = [0, 0], sizes = [8, 192], strides = [1, 1]} : vector<8x256xf32> to vector<8x192xf32>
    %403 = arith.negf %402 : vector<8x192xf32>
    %404 = math.exp %403 : vector<8x192xf32>
    %cst_120 = arith.constant 1.000000e+00 : f32
    %405 = vector.broadcast %cst_120 : f32 to vector<8x192xf32>
    %406 = arith.addf %405, %404 : vector<8x192xf32>
    %407 = arith.divf %405, %406 : vector<8x192xf32>
    %408 = vector.extract_strided_slice %395 {offsets = [0, 192], sizes = [8, 64], strides = [1, 1]} : vector<8x256xf32> to vector<8x64xf32>
    %409 = math.tanh %408 : vector<8x64xf32>
    %410 = vector.extract_strided_slice %401 {offsets = [0, 0], sizes = [8, 192], strides = [1, 1]} : vector<8x256xf32> to vector<8x192xf32>
    %411 = arith.negf %410 : vector<8x192xf32>
    %412 = math.exp %411 : vector<8x192xf32>
    %cst_121 = arith.constant 1.000000e+00 : f32
    %413 = vector.broadcast %cst_121 : f32 to vector<8x192xf32>
    %414 = arith.addf %413, %412 : vector<8x192xf32>
    %415 = arith.divf %413, %414 : vector<8x192xf32>
    %416 = vector.extract_strided_slice %401 {offsets = [0, 192], sizes = [8, 64], strides = [1, 1]} : vector<8x256xf32> to vector<8x64xf32>
    %417 = math.tanh %416 : vector<8x64xf32>
    %418 = vector.extract_strided_slice %407 {offsets = [0, 64], sizes = [8, 64], strides = [1, 1]} : vector<8x192xf32> to vector<8x64xf32>
    %419 = arith.mulf %418, %367 : vector<8x64xf32>
    %420 = vector.extract_strided_slice %407 {offsets = [0, 0], sizes = [8, 64], strides = [1, 1]} : vector<8x192xf32> to vector<8x64xf32>
    %421 = arith.mulf %420, %409 : vector<8x64xf32>
    %422 = arith.addf %419, %421 : vector<8x64xf32>
    %423 = vector.extract_strided_slice %415 {offsets = [0, 64], sizes = [8, 64], strides = [1, 1]} : vector<8x192xf32> to vector<8x64xf32>
    %424 = arith.mulf %423, %372 : vector<8x64xf32>
    %425 = vector.extract_strided_slice %415 {offsets = [0, 0], sizes = [8, 64], strides = [1, 1]} : vector<8x192xf32> to vector<8x64xf32>
    %426 = arith.mulf %425, %417 : vector<8x64xf32>
    %427 = arith.addf %424, %426 : vector<8x64xf32>
    %428 = vector.extract_strided_slice %407 {offsets = [0, 128], sizes = [8, 64], strides = [1, 1]} : vector<8x192xf32> to vector<8x64xf32>
    %429 = math.tanh %422 : vector<8x64xf32>
    %430 = arith.mulf %428, %429 : vector<8x64xf32>
    %431 = arith.truncf %430 : vector<8x64xf32> to vector<8x64xbf16>
    %432 = vector.extract_strided_slice %415 {offsets = [0, 128], sizes = [8, 64], strides = [1, 1]} : vector<8x192xf32> to vector<8x64xf32>
    %433 = math.tanh %427 : vector<8x64xf32>
    %434 = arith.mulf %432, %433 : vector<8x64xf32>
    %435 = arith.truncf %434 : vector<8x64xf32> to vector<8x64xbf16>
    %436 = arith.index_cast %c6_i32 : i32 to index
    %c0_122 = arith.constant 0 : index
    %c0_123 = arith.constant 0 : index
    %437 = vector.load %arg12[%436, %c0_122, %c0_123] : memref<8x8x128xbf16, #tpu.memory_space<vmem>>, vector<1x8x64xbf16>
    %438 = vector.shape_cast %437 : vector<1x8x64xbf16> to vector<8x64xbf16>
    %439 = vector.shape_cast %431 : vector<8x64xbf16> to vector<1x8x64xbf16>
    tpu.vector_store %arg12[%436, %c0_122, %c0_123], %439 {strides = array<i32>} : memref<8x8x128xbf16, #tpu.memory_space<vmem>>, vector<1x8x64xbf16>,
    %440 = arith.index_cast %389 : i32 to index
    %c0_124 = arith.constant 0 : index
    %c64_125 = arith.constant 64 : index
    %441 = vector.load %arg12[%440, %c0_124, %c64_125] : memref<8x8x128xbf16, #tpu.memory_space<vmem>>, vector<1x8x64xbf16>
    %442 = vector.shape_cast %441 : vector<1x8x64xbf16> to vector<8x64xbf16>
    %443 = vector.shape_cast %435 : vector<8x64xbf16> to vector<1x8x64xbf16>
    tpu.vector_store %arg12[%440, %c0_124, %c64_125], %443 {strides = array<i32>} : memref<8x8x128xbf16, #tpu.memory_space<vmem>>, vector<1x8x64xbf16>,
    %c7_i32_126 = arith.constant 7 : i32
    %c7_i32_127 = arith.constant 7 : i32
    %444 = arith.subi %c7_i32_127, %c7_i32_126 : i32
    %445 = arith.index_cast %c7_i32_126 : i32 to index
    %c0_128 = arith.constant 0 : index
    %c0_129 = arith.constant 0 : index
    %446 = vector.load %arg10[%445, %c0_128, %c0_129] : memref<8x8x256xbf16, #tpu.memory_space<vmem>>, vector<1x8x256xbf16>
    %447 = vector.shape_cast %446 : vector<1x8x256xbf16> to vector<8x256xbf16>
    %cst_130 = arith.constant dense<0.000000e+00> : vector<8x256xf32>
    %448 = tpu.matmul %431, %16, %cst_130 {dimension_numbers = #tpu.dot_dimension_numbers<[1], [0], [0], [1], [0, 0, 1, 1], [], []>} : vector<8x64xbf16>, vector<64x256xbf16>, vector<8x256xf32> -> vector<8x256xf32>
    %449 = arith.extf %447 : vector<8x256xbf16> to vector<8x256xf32>
    %450 = arith.addf %449, %448 : vector<8x256xf32>
    %451 = arith.index_cast %444 : i32 to index
    %c0_131 = arith.constant 0 : index
    %c0_132 = arith.constant 0 : index
    %452 = vector.load %arg11[%451, %c0_131, %c0_132] : memref<8x8x256xbf16, #tpu.memory_space<vmem>>, vector<1x8x256xbf16>
    %453 = vector.shape_cast %452 : vector<1x8x256xbf16> to vector<8x256xbf16>
    %cst_133 = arith.constant dense<0.000000e+00> : vector<8x256xf32>
    %454 = tpu.matmul %435, %18, %cst_133 {dimension_numbers = #tpu.dot_dimension_numbers<[1], [0], [0], [1], [0, 0, 1, 1], [], []>} : vector<8x64xbf16>, vector<64x256xbf16>, vector<8x256xf32> -> vector<8x256xf32>
    %455 = arith.extf %453 : vector<8x256xbf16> to vector<8x256xf32>
    %456 = arith.addf %455, %454 : vector<8x256xf32>
    %457 = vector.extract_strided_slice %450 {offsets = [0, 0], sizes = [8, 192], strides = [1, 1]} : vector<8x256xf32> to vector<8x192xf32>
    %458 = arith.negf %457 : vector<8x192xf32>
    %459 = math.exp %458 : vector<8x192xf32>
    %cst_134 = arith.constant 1.000000e+00 : f32
    %460 = vector.broadcast %cst_134 : f32 to vector<8x192xf32>
    %461 = arith.addf %460, %459 : vector<8x192xf32>
    %462 = arith.divf %460, %461 : vector<8x192xf32>
    %463 = vector.extract_strided_slice %450 {offsets = [0, 192], sizes = [8, 64], strides = [1, 1]} : vector<8x256xf32> to vector<8x64xf32>
    %464 = math.tanh %463 : vector<8x64xf32>
    %465 = vector.extract_strided_slice %456 {offsets = [0, 0], sizes = [8, 192], strides = [1, 1]} : vector<8x256xf32> to vector<8x192xf32>
    %466 = arith.negf %465 : vector<8x192xf32>
    %467 = math.exp %466 : vector<8x192xf32>
    %cst_135 = arith.constant 1.000000e+00 : f32
    %468 = vector.broadcast %cst_135 : f32 to vector<8x192xf32>
    %469 = arith.addf %468, %467 : vector<8x192xf32>
    %470 = arith.divf %468, %469 : vector<8x192xf32>
    %471 = vector.extract_strided_slice %456 {offsets = [0, 192], sizes = [8, 64], strides = [1, 1]} : vector<8x256xf32> to vector<8x64xf32>
    %472 = math.tanh %471 : vector<8x64xf32>
    %473 = vector.extract_strided_slice %462 {offsets = [0, 64], sizes = [8, 64], strides = [1, 1]} : vector<8x192xf32> to vector<8x64xf32>
    %474 = arith.mulf %473, %422 : vector<8x64xf32>
    %475 = vector.extract_strided_slice %462 {offsets = [0, 0], sizes = [8, 64], strides = [1, 1]} : vector<8x192xf32> to vector<8x64xf32>
    %476 = arith.mulf %475, %464 : vector<8x64xf32>
    %477 = arith.addf %474, %476 : vector<8x64xf32>
    %478 = vector.extract_strided_slice %470 {offsets = [0, 64], sizes = [8, 64], strides = [1, 1]} : vector<8x192xf32> to vector<8x64xf32>
    %479 = arith.mulf %478, %427 : vector<8x64xf32>
    %480 = vector.extract_strided_slice %470 {offsets = [0, 0], sizes = [8, 64], strides = [1, 1]} : vector<8x192xf32> to vector<8x64xf32>
    %481 = arith.mulf %480, %472 : vector<8x64xf32>
    %482 = arith.addf %479, %481 : vector<8x64xf32>
    %483 = vector.extract_strided_slice %462 {offsets = [0, 128], sizes = [8, 64], strides = [1, 1]} : vector<8x192xf32> to vector<8x64xf32>
    %484 = math.tanh %477 : vector<8x64xf32>
    %485 = arith.mulf %483, %484 : vector<8x64xf32>
    %486 = arith.truncf %485 : vector<8x64xf32> to vector<8x64xbf16>
    %487 = vector.extract_strided_slice %470 {offsets = [0, 128], sizes = [8, 64], strides = [1, 1]} : vector<8x192xf32> to vector<8x64xf32>
    %488 = math.tanh %482 : vector<8x64xf32>
    %489 = arith.mulf %487, %488 : vector<8x64xf32>
    %490 = arith.truncf %489 : vector<8x64xf32> to vector<8x64xbf16>
    %491 = arith.index_cast %c7_i32_126 : i32 to index
    %c0_136 = arith.constant 0 : index
    %c0_137 = arith.constant 0 : index
    %492 = vector.load %arg12[%491, %c0_136, %c0_137] : memref<8x8x128xbf16, #tpu.memory_space<vmem>>, vector<1x8x64xbf16>
    %493 = vector.shape_cast %492 : vector<1x8x64xbf16> to vector<8x64xbf16>
    %494 = vector.shape_cast %486 : vector<8x64xbf16> to vector<1x8x64xbf16>
    tpu.vector_store %arg12[%491, %c0_136, %c0_137], %494 {strides = array<i32>} : memref<8x8x128xbf16, #tpu.memory_space<vmem>>, vector<1x8x64xbf16>,
    %495 = arith.index_cast %444 : i32 to index
    %c0_138 = arith.constant 0 : index
    %c64_139 = arith.constant 64 : index
    %496 = vector.load %arg12[%495, %c0_138, %c64_139] : memref<8x8x128xbf16, #tpu.memory_space<vmem>>, vector<1x8x64xbf16>
    %497 = vector.shape_cast %496 : vector<1x8x64xbf16> to vector<8x64xbf16>
    %498 = vector.shape_cast %490 : vector<8x64xbf16> to vector<1x8x64xbf16>
    tpu.vector_store %arg12[%495, %c0_138, %c64_139], %498 {strides = array<i32>} : memref<8x8x128xbf16, #tpu.memory_space<vmem>>, vector<1x8x64xbf16>,
    %c8_i32 = arith.constant 8 : i32
    %c0_140 = arith.constant 0 : index
    %c0_141 = arith.constant 0 : index
    %c0_142 = arith.constant 0 : index
    %499 = vector.load %arg12[%c0_140, %c0_141, %c0_142] : memref<8x8x128xbf16, #tpu.memory_space<vmem>>, vector<8x8x128xbf16>
    %500 = vector.shape_cast %499 : vector<8x8x128xbf16> to vector<64x128xbf16>
    %cst_143 = arith.constant dense<0.000000e+00> : vector<64x32xf32>
    %501 = tpu.matmul %500, %19, %cst_143 {dimension_numbers = #tpu.dot_dimension_numbers<[1], [0], [0], [1], [0, 0, 1, 1], [], []>} : vector<64x128xbf16>, vector<128x32xbf16>, vector<64x32xf32> -> vector<64x32xf32>
    %c0_144 = arith.constant 0 : index
    %c0_145 = arith.constant 0 : index
    %c0_146 = arith.constant 0 : index
    %502 = vector.load %arg1[%c0_144, %c0_145, %c0_146] : memref<8x8x32xf32, #tpu.memory_space<vmem>>, vector<8x8x32xf32>
    %503 = vector.broadcast %6 : vector<1x1x32xf32> to vector<8x8x32xf32>
    %504 = arith.addf %502, %503 : vector<8x8x32xf32>
    %505 = vector.shape_cast %501 : vector<64x32xf32> to vector<8x8x32xf32>
    %506 = arith.addf %504, %505 : vector<8x8x32xf32>
    %c0_147 = arith.constant 0 : index
    %c0_148 = arith.constant 0 : index
    %c0_149 = arith.constant 0 : index
    %507 = vector.load %arg9[%c0_147, %c0_148, %c0_149] : memref<8x8x32xf32, #tpu.memory_space<vmem>>, vector<8x8x32xf32>
    tpu.vector_store %arg9[%c0_147, %c0_148, %c0_149], %506 {strides = array<i32>} : memref<8x8x32xf32, #tpu.memory_space<vmem>>, vector<8x8x32xf32>,
    %c0_150 = arith.constant 0 : index
    %c0_151 = arith.constant 0 : index
    %c0_152 = arith.constant 0 : index
    %508 = vector.load %arg9[%c0_150, %c0_151, %c0_152] : memref<8x8x32xf32, #tpu.memory_space<vmem>>, vector<8x8x32xf32>
    %cst_153 = arith.constant dense<0.000000e+00> : vector<8x32xf32>
    %509 = vector.multi_reduction <add>, %508, %cst_153 [0] : vector<8x8x32xf32> to vector<8x32xf32>
    %cst_154 = arith.constant dense<0.000000e+00> : vector<8x32xf32>
    %510 = tpu.matmul %509, %7, %cst_154 {dimension_numbers = #tpu.dot_dimension_numbers<[1], [0], [0], [1], [0, 0, 1, 1], [], []>} : vector<8x32xf32>, vector<32x32xf32>, vector<8x32xf32> -> vector<8x32xf32>
    %cst_155 = arith.constant 1.562500e-02 : f32
    %511 = vector.broadcast %cst_155 : f32 to vector<8x32xf32>
    %512 = arith.mulf %510, %511 : vector<8x32xf32>
    %513 = vector.shape_cast %512 : vector<8x32xf32> to vector<1x8x32xf32>
    %514 = vector.broadcast %513 : vector<1x8x32xf32> to vector<8x8x32xf32>
    %515 = arith.subf %508, %514 : vector<8x8x32xf32>
    %516 = arith.mulf %515, %515 : vector<8x8x32xf32>
    %cst_156 = arith.constant dense<0.000000e+00> : vector<8x32xf32>
    %517 = vector.multi_reduction <add>, %516, %cst_156 [0] : vector<8x8x32xf32> to vector<8x32xf32>
    %cst_157 = arith.constant dense<0.000000e+00> : vector<8x32xf32>
    %518 = tpu.matmul %517, %7, %cst_157 {dimension_numbers = #tpu.dot_dimension_numbers<[1], [0], [0], [1], [0, 0, 1, 1], [], []>} : vector<8x32xf32>, vector<32x32xf32>, vector<8x32xf32> -> vector<8x32xf32>
    %cst_158 = arith.constant 1.562500e-02 : f32
    %519 = vector.broadcast %cst_158 : f32 to vector<8x32xf32>
    %520 = arith.mulf %518, %519 : vector<8x32xf32>
    %cst_159 = arith.constant 9.99999974E-6 : f32
    %521 = vector.broadcast %cst_159 : f32 to vector<8x32xf32>
    %522 = arith.addf %520, %521 : vector<8x32xf32>
    %523 = math.rsqrt %522 : vector<8x32xf32>
    %524 = vector.shape_cast %523 : vector<8x32xf32> to vector<1x8x32xf32>
    %525 = vector.broadcast %524 : vector<1x8x32xf32> to vector<8x8x32xf32>
    %526 = arith.mulf %515, %525 : vector<8x8x32xf32>
    %527 = vector.broadcast %2 : vector<1x1x32xf32> to vector<8x8x32xf32>
    %528 = arith.mulf %526, %527 : vector<8x8x32xf32>
    %529 = vector.broadcast %4 : vector<1x1x32xf32> to vector<8x8x32xf32>
    %530 = arith.addf %528, %529 : vector<8x8x32xf32>
    %531 = arith.truncf %530 : vector<8x8x32xf32> to vector<8x8x32xbf16>
    %532 = vector.shape_cast %531 : vector<8x8x32xbf16> to vector<64x32xbf16>
    %cst_160 = arith.constant dense<0.000000e+00> : vector<64x256xf32>
    %533 = tpu.matmul %532, %12, %cst_160 {dimension_numbers = #tpu.dot_dimension_numbers<[1], [0], [0], [1], [0, 0, 1, 1], [], []>} : vector<64x32xbf16>, vector<32x256xbf16>, vector<64x256xf32> -> vector<64x256xf32>
    %534 = vector.broadcast %9 : vector<1x256xf32> to vector<64x256xf32>
    %535 = arith.addf %533, %534 : vector<64x256xf32>
    %536 = vector.shape_cast %535 : vector<64x256xf32> to vector<8x8x256xf32>
    %537 = arith.truncf %536 : vector<8x8x256xf32> to vector<8x8x256xbf16>
    %c0_161 = arith.constant 0 : index
    %c0_162 = arith.constant 0 : index
    %c0_163 = arith.constant 0 : index
    %538 = vector.load %arg10[%c0_161, %c0_162, %c0_163] : memref<8x8x256xbf16, #tpu.memory_space<vmem>>, vector<8x8x256xbf16>
    tpu.vector_store %arg10[%c0_161, %c0_162, %c0_163], %537 {strides = array<i32>} : memref<8x8x256xbf16, #tpu.memory_space<vmem>>, vector<8x8x256xbf16>,
    %cst_164 = arith.constant dense<0.000000e+00> : vector<64x256xf32>
    %539 = tpu.matmul %532, %14, %cst_164 {dimension_numbers = #tpu.dot_dimension_numbers<[1], [0], [0], [1], [0, 0, 1, 1], [], []>} : vector<64x32xbf16>, vector<32x256xbf16>, vector<64x256xf32> -> vector<64x256xf32>
    %540 = vector.broadcast %10 : vector<1x256xf32> to vector<64x256xf32>
    %541 = arith.addf %539, %540 : vector<64x256xf32>
    %542 = vector.shape_cast %541 : vector<64x256xf32> to vector<8x8x256xf32>
    %543 = arith.truncf %542 : vector<8x8x256xf32> to vector<8x8x256xbf16>
    %c0_165 = arith.constant 0 : index
    %c0_166 = arith.constant 0 : index
    %c0_167 = arith.constant 0 : index
    %544 = vector.load %arg11[%c0_165, %c0_166, %c0_167] : memref<8x8x256xbf16, #tpu.memory_space<vmem>>, vector<8x8x256xbf16>
    tpu.vector_store %arg11[%c0_165, %c0_166, %c0_167], %543 {strides = array<i32>} : memref<8x8x256xbf16, #tpu.memory_space<vmem>>, vector<8x8x256xbf16>,
    %cst_168 = arith.constant 0.000000e+00 : bf16
    %545 = vector.broadcast %cst_168 : bf16 to vector<8x64xbf16>
    %cst_169 = arith.constant 0.000000e+00 : f32
    %546 = vector.broadcast %cst_169 : f32 to vector<8x64xf32>
    %c0_i32_170 = arith.constant 0 : i32
    %c7_i32_171 = arith.constant 7 : i32
    %547 = arith.subi %c7_i32_171, %c0_i32_170 : i32
    %548 = arith.index_cast %c0_i32_170 : i32 to index
    %c0_172 = arith.constant 0 : index
    %c0_173 = arith.constant 0 : index
    %549 = vector.load %arg10[%548, %c0_172, %c0_173] : memref<8x8x256xbf16, #tpu.memory_space<vmem>>, vector<1x8x256xbf16>
    %550 = vector.shape_cast %549 : vector<1x8x256xbf16> to vector<8x256xbf16>
    %cst_174 = arith.constant dense<0.000000e+00> : vector<8x256xf32>
    %551 = tpu.matmul %545, %16, %cst_174 {dimension_numbers = #tpu.dot_dimension_numbers<[1], [0], [0], [1], [0, 0, 1, 1], [], []>} : vector<8x64xbf16>, vector<64x256xbf16>, vector<8x256xf32> -> vector<8x256xf32>
    %552 = arith.extf %550 : vector<8x256xbf16> to vector<8x256xf32>
    %553 = arith.addf %552, %551 : vector<8x256xf32>
    %554 = arith.index_cast %547 : i32 to index
    %c0_175 = arith.constant 0 : index
    %c0_176 = arith.constant 0 : index
    %555 = vector.load %arg11[%554, %c0_175, %c0_176] : memref<8x8x256xbf16, #tpu.memory_space<vmem>>, vector<1x8x256xbf16>
    %556 = vector.shape_cast %555 : vector<1x8x256xbf16> to vector<8x256xbf16>
    %cst_177 = arith.constant dense<0.000000e+00> : vector<8x256xf32>
    %557 = tpu.matmul %545, %18, %cst_177 {dimension_numbers = #tpu.dot_dimension_numbers<[1], [0], [0], [1], [0, 0, 1, 1], [], []>} : vector<8x64xbf16>, vector<64x256xbf16>, vector<8x256xf32> -> vector<8x256xf32>
    %558 = arith.extf %556 : vector<8x256xbf16> to vector<8x256xf32>
    %559 = arith.addf %558, %557 : vector<8x256xf32>
    %560 = vector.extract_strided_slice %553 {offsets = [0, 0], sizes = [8, 192], strides = [1, 1]} : vector<8x256xf32> to vector<8x192xf32>
    %561 = arith.negf %560 : vector<8x192xf32>
    %562 = math.exp %561 : vector<8x192xf32>
    %cst_178 = arith.constant 1.000000e+00 : f32
    %563 = vector.broadcast %cst_178 : f32 to vector<8x192xf32>
    %564 = arith.addf %563, %562 : vector<8x192xf32>
    %565 = arith.divf %563, %564 : vector<8x192xf32>
    %566 = vector.extract_strided_slice %553 {offsets = [0, 192], sizes = [8, 64], strides = [1, 1]} : vector<8x256xf32> to vector<8x64xf32>
    %567 = math.tanh %566 : vector<8x64xf32>
    %568 = vector.extract_strided_slice %559 {offsets = [0, 0], sizes = [8, 192], strides = [1, 1]} : vector<8x256xf32> to vector<8x192xf32>
    %569 = arith.negf %568 : vector<8x192xf32>
    %570 = math.exp %569 : vector<8x192xf32>
    %cst_179 = arith.constant 1.000000e+00 : f32
    %571 = vector.broadcast %cst_179 : f32 to vector<8x192xf32>
    %572 = arith.addf %571, %570 : vector<8x192xf32>
    %573 = arith.divf %571, %572 : vector<8x192xf32>
    %574 = vector.extract_strided_slice %559 {offsets = [0, 192], sizes = [8, 64], strides = [1, 1]} : vector<8x256xf32> to vector<8x64xf32>
    %575 = math.tanh %574 : vector<8x64xf32>
    %576 = vector.extract_strided_slice %565 {offsets = [0, 64], sizes = [8, 64], strides = [1, 1]} : vector<8x192xf32> to vector<8x64xf32>
    %577 = arith.mulf %576, %546 : vector<8x64xf32>
    %578 = vector.extract_strided_slice %565 {offsets = [0, 0], sizes = [8, 64], strides = [1, 1]} : vector<8x192xf32> to vector<8x64xf32>
    %579 = arith.mulf %578, %567 : vector<8x64xf32>
    %580 = arith.addf %577, %579 : vector<8x64xf32>
    %581 = vector.extract_strided_slice %573 {offsets = [0, 64], sizes = [8, 64], strides = [1, 1]} : vector<8x192xf32> to vector<8x64xf32>
    %582 = arith.mulf %581, %546 : vector<8x64xf32>
    %583 = vector.extract_strided_slice %573 {offsets = [0, 0], sizes = [8, 64], strides = [1, 1]} : vector<8x192xf32> to vector<8x64xf32>
    %584 = arith.mulf %583, %575 : vector<8x64xf32>
    %585 = arith.addf %582, %584 : vector<8x64xf32>
    %586 = vector.extract_strided_slice %565 {offsets = [0, 128], sizes = [8, 64], strides = [1, 1]} : vector<8x192xf32> to vector<8x64xf32>
    %587 = math.tanh %580 : vector<8x64xf32>
    %588 = arith.mulf %586, %587 : vector<8x64xf32>
    %589 = arith.truncf %588 : vector<8x64xf32> to vector<8x64xbf16>
    %590 = vector.extract_strided_slice %573 {offsets = [0, 128], sizes = [8, 64], strides = [1, 1]} : vector<8x192xf32> to vector<8x64xf32>
    %591 = math.tanh %585 : vector<8x64xf32>
    %592 = arith.mulf %590, %591 : vector<8x64xf32>
    %593 = arith.truncf %592 : vector<8x64xf32> to vector<8x64xbf16>
    %594 = arith.index_cast %c0_i32_170 : i32 to index
    %c0_180 = arith.constant 0 : index
    %c0_181 = arith.constant 0 : index
    %595 = vector.load %arg12[%594, %c0_180, %c0_181] : memref<8x8x128xbf16, #tpu.memory_space<vmem>>, vector<1x8x64xbf16>
    %596 = vector.shape_cast %595 : vector<1x8x64xbf16> to vector<8x64xbf16>
    %597 = vector.shape_cast %589 : vector<8x64xbf16> to vector<1x8x64xbf16>
    tpu.vector_store %arg12[%594, %c0_180, %c0_181], %597 {strides = array<i32>} : memref<8x8x128xbf16, #tpu.memory_space<vmem>>, vector<1x8x64xbf16>,
    %598 = arith.index_cast %547 : i32 to index
    %c0_182 = arith.constant 0 : index
    %c64_183 = arith.constant 64 : index
    %599 = vector.load %arg12[%598, %c0_182, %c64_183] : memref<8x8x128xbf16, #tpu.memory_space<vmem>>, vector<1x8x64xbf16>
    %600 = vector.shape_cast %599 : vector<1x8x64xbf16> to vector<8x64xbf16>
    %601 = vector.shape_cast %593 : vector<8x64xbf16> to vector<1x8x64xbf16>
    tpu.vector_store %arg12[%598, %c0_182, %c64_183], %601 {strides = array<i32>} : memref<8x8x128xbf16, #tpu.memory_space<vmem>>, vector<1x8x64xbf16>,
    %c1_i32_184 = arith.constant 1 : i32
    %c7_i32_185 = arith.constant 7 : i32
    %602 = arith.subi %c7_i32_185, %c1_i32_184 : i32
    %603 = arith.index_cast %c1_i32_184 : i32 to index
    %c0_186 = arith.constant 0 : index
    %c0_187 = arith.constant 0 : index
    %604 = vector.load %arg10[%603, %c0_186, %c0_187] : memref<8x8x256xbf16, #tpu.memory_space<vmem>>, vector<1x8x256xbf16>
    %605 = vector.shape_cast %604 : vector<1x8x256xbf16> to vector<8x256xbf16>
    %cst_188 = arith.constant dense<0.000000e+00> : vector<8x256xf32>
    %606 = tpu.matmul %589, %16, %cst_188 {dimension_numbers = #tpu.dot_dimension_numbers<[1], [0], [0], [1], [0, 0, 1, 1], [], []>} : vector<8x64xbf16>, vector<64x256xbf16>, vector<8x256xf32> -> vector<8x256xf32>
    %607 = arith.extf %605 : vector<8x256xbf16> to vector<8x256xf32>
    %608 = arith.addf %607, %606 : vector<8x256xf32>
    %609 = arith.index_cast %602 : i32 to index
    %c0_189 = arith.constant 0 : index
    %c0_190 = arith.constant 0 : index
    %610 = vector.load %arg11[%609, %c0_189, %c0_190] : memref<8x8x256xbf16, #tpu.memory_space<vmem>>, vector<1x8x256xbf16>
    %611 = vector.shape_cast %610 : vector<1x8x256xbf16> to vector<8x256xbf16>
    %cst_191 = arith.constant dense<0.000000e+00> : vector<8x256xf32>
    %612 = tpu.matmul %593, %18, %cst_191 {dimension_numbers = #tpu.dot_dimension_numbers<[1], [0], [0], [1], [0, 0, 1, 1], [], []>} : vector<8x64xbf16>, vector<64x256xbf16>, vector<8x256xf32> -> vector<8x256xf32>
    %613 = arith.extf %611 : vector<8x256xbf16> to vector<8x256xf32>
    %614 = arith.addf %613, %612 : vector<8x256xf32>
    %615 = vector.extract_strided_slice %608 {offsets = [0, 0], sizes = [8, 192], strides = [1, 1]} : vector<8x256xf32> to vector<8x192xf32>
    %616 = arith.negf %615 : vector<8x192xf32>
    %617 = math.exp %616 : vector<8x192xf32>
    %cst_192 = arith.constant 1.000000e+00 : f32
    %618 = vector.broadcast %cst_192 : f32 to vector<8x192xf32>
    %619 = arith.addf %618, %617 : vector<8x192xf32>
    %620 = arith.divf %618, %619 : vector<8x192xf32>
    %621 = vector.extract_strided_slice %608 {offsets = [0, 192], sizes = [8, 64], strides = [1, 1]} : vector<8x256xf32> to vector<8x64xf32>
    %622 = math.tanh %621 : vector<8x64xf32>
    %623 = vector.extract_strided_slice %614 {offsets = [0, 0], sizes = [8, 192], strides = [1, 1]} : vector<8x256xf32> to vector<8x192xf32>
    %624 = arith.negf %623 : vector<8x192xf32>
    %625 = math.exp %624 : vector<8x192xf32>
    %cst_193 = arith.constant 1.000000e+00 : f32
    %626 = vector.broadcast %cst_193 : f32 to vector<8x192xf32>
    %627 = arith.addf %626, %625 : vector<8x192xf32>
    %628 = arith.divf %626, %627 : vector<8x192xf32>
    %629 = vector.extract_strided_slice %614 {offsets = [0, 192], sizes = [8, 64], strides = [1, 1]} : vector<8x256xf32> to vector<8x64xf32>
    %630 = math.tanh %629 : vector<8x64xf32>
    %631 = vector.extract_strided_slice %620 {offsets = [0, 64], sizes = [8, 64], strides = [1, 1]} : vector<8x192xf32> to vector<8x64xf32>
    %632 = arith.mulf %631, %580 : vector<8x64xf32>
    %633 = vector.extract_strided_slice %620 {offsets = [0, 0], sizes = [8, 64], strides = [1, 1]} : vector<8x192xf32> to vector<8x64xf32>
    %634 = arith.mulf %633, %622 : vector<8x64xf32>
    %635 = arith.addf %632, %634 : vector<8x64xf32>
    %636 = vector.extract_strided_slice %628 {offsets = [0, 64], sizes = [8, 64], strides = [1, 1]} : vector<8x192xf32> to vector<8x64xf32>
    %637 = arith.mulf %636, %585 : vector<8x64xf32>
    %638 = vector.extract_strided_slice %628 {offsets = [0, 0], sizes = [8, 64], strides = [1, 1]} : vector<8x192xf32> to vector<8x64xf32>
    %639 = arith.mulf %638, %630 : vector<8x64xf32>
    %640 = arith.addf %637, %639 : vector<8x64xf32>
    %641 = vector.extract_strided_slice %620 {offsets = [0, 128], sizes = [8, 64], strides = [1, 1]} : vector<8x192xf32> to vector<8x64xf32>
    %642 = math.tanh %635 : vector<8x64xf32>
    %643 = arith.mulf %641, %642 : vector<8x64xf32>
    %644 = arith.truncf %643 : vector<8x64xf32> to vector<8x64xbf16>
    %645 = vector.extract_strided_slice %628 {offsets = [0, 128], sizes = [8, 64], strides = [1, 1]} : vector<8x192xf32> to vector<8x64xf32>
    %646 = math.tanh %640 : vector<8x64xf32>
    %647 = arith.mulf %645, %646 : vector<8x64xf32>
    %648 = arith.truncf %647 : vector<8x64xf32> to vector<8x64xbf16>
    %649 = arith.index_cast %c1_i32_184 : i32 to index
    %c0_194 = arith.constant 0 : index
    %c0_195 = arith.constant 0 : index
    %650 = vector.load %arg12[%649, %c0_194, %c0_195] : memref<8x8x128xbf16, #tpu.memory_space<vmem>>, vector<1x8x64xbf16>
    %651 = vector.shape_cast %650 : vector<1x8x64xbf16> to vector<8x64xbf16>
    %652 = vector.shape_cast %644 : vector<8x64xbf16> to vector<1x8x64xbf16>
    tpu.vector_store %arg12[%649, %c0_194, %c0_195], %652 {strides = array<i32>} : memref<8x8x128xbf16, #tpu.memory_space<vmem>>, vector<1x8x64xbf16>,
    %653 = arith.index_cast %602 : i32 to index
    %c0_196 = arith.constant 0 : index
    %c64_197 = arith.constant 64 : index
    %654 = vector.load %arg12[%653, %c0_196, %c64_197] : memref<8x8x128xbf16, #tpu.memory_space<vmem>>, vector<1x8x64xbf16>
    %655 = vector.shape_cast %654 : vector<1x8x64xbf16> to vector<8x64xbf16>
    %656 = vector.shape_cast %648 : vector<8x64xbf16> to vector<1x8x64xbf16>
    tpu.vector_store %arg12[%653, %c0_196, %c64_197], %656 {strides = array<i32>} : memref<8x8x128xbf16, #tpu.memory_space<vmem>>, vector<1x8x64xbf16>,
    %c2_i32_198 = arith.constant 2 : i32
    %c7_i32_199 = arith.constant 7 : i32
    %657 = arith.subi %c7_i32_199, %c2_i32_198 : i32
    %658 = arith.index_cast %c2_i32_198 : i32 to index
    %c0_200 = arith.constant 0 : index
    %c0_201 = arith.constant 0 : index
    %659 = vector.load %arg10[%658, %c0_200, %c0_201] : memref<8x8x256xbf16, #tpu.memory_space<vmem>>, vector<1x8x256xbf16>
    %660 = vector.shape_cast %659 : vector<1x8x256xbf16> to vector<8x256xbf16>
    %cst_202 = arith.constant dense<0.000000e+00> : vector<8x256xf32>
    %661 = tpu.matmul %644, %16, %cst_202 {dimension_numbers = #tpu.dot_dimension_numbers<[1], [0], [0], [1], [0, 0, 1, 1], [], []>} : vector<8x64xbf16>, vector<64x256xbf16>, vector<8x256xf32> -> vector<8x256xf32>
    %662 = arith.extf %660 : vector<8x256xbf16> to vector<8x256xf32>
    %663 = arith.addf %662, %661 : vector<8x256xf32>
    %664 = arith.index_cast %657 : i32 to index
    %c0_203 = arith.constant 0 : index
    %c0_204 = arith.constant 0 : index
    %665 = vector.load %arg11[%664, %c0_203, %c0_204] : memref<8x8x256xbf16, #tpu.memory_space<vmem>>, vector<1x8x256xbf16>
    %666 = vector.shape_cast %665 : vector<1x8x256xbf16> to vector<8x256xbf16>
    %cst_205 = arith.constant dense<0.000000e+00> : vector<8x256xf32>
    %667 = tpu.matmul %648, %18, %cst_205 {dimension_numbers = #tpu.dot_dimension_numbers<[1], [0], [0], [1], [0, 0, 1, 1], [], []>} : vector<8x64xbf16>, vector<64x256xbf16>, vector<8x256xf32> -> vector<8x256xf32>
    %668 = arith.extf %666 : vector<8x256xbf16> to vector<8x256xf32>
    %669 = arith.addf %668, %667 : vector<8x256xf32>
    %670 = vector.extract_strided_slice %663 {offsets = [0, 0], sizes = [8, 192], strides = [1, 1]} : vector<8x256xf32> to vector<8x192xf32>
    %671 = arith.negf %670 : vector<8x192xf32>
    %672 = math.exp %671 : vector<8x192xf32>
    %cst_206 = arith.constant 1.000000e+00 : f32
    %673 = vector.broadcast %cst_206 : f32 to vector<8x192xf32>
    %674 = arith.addf %673, %672 : vector<8x192xf32>
    %675 = arith.divf %673, %674 : vector<8x192xf32>
    %676 = vector.extract_strided_slice %663 {offsets = [0, 192], sizes = [8, 64], strides = [1, 1]} : vector<8x256xf32> to vector<8x64xf32>
    %677 = math.tanh %676 : vector<8x64xf32>
    %678 = vector.extract_strided_slice %669 {offsets = [0, 0], sizes = [8, 192], strides = [1, 1]} : vector<8x256xf32> to vector<8x192xf32>
    %679 = arith.negf %678 : vector<8x192xf32>
    %680 = math.exp %679 : vector<8x192xf32>
    %cst_207 = arith.constant 1.000000e+00 : f32
    %681 = vector.broadcast %cst_207 : f32 to vector<8x192xf32>
    %682 = arith.addf %681, %680 : vector<8x192xf32>
    %683 = arith.divf %681, %682 : vector<8x192xf32>
    %684 = vector.extract_strided_slice %669 {offsets = [0, 192], sizes = [8, 64], strides = [1, 1]} : vector<8x256xf32> to vector<8x64xf32>
    %685 = math.tanh %684 : vector<8x64xf32>
    %686 = vector.extract_strided_slice %675 {offsets = [0, 64], sizes = [8, 64], strides = [1, 1]} : vector<8x192xf32> to vector<8x64xf32>
    %687 = arith.mulf %686, %635 : vector<8x64xf32>
    %688 = vector.extract_strided_slice %675 {offsets = [0, 0], sizes = [8, 64], strides = [1, 1]} : vector<8x192xf32> to vector<8x64xf32>
    %689 = arith.mulf %688, %677 : vector<8x64xf32>
    %690 = arith.addf %687, %689 : vector<8x64xf32>
    %691 = vector.extract_strided_slice %683 {offsets = [0, 64], sizes = [8, 64], strides = [1, 1]} : vector<8x192xf32> to vector<8x64xf32>
    %692 = arith.mulf %691, %640 : vector<8x64xf32>
    %693 = vector.extract_strided_slice %683 {offsets = [0, 0], sizes = [8, 64], strides = [1, 1]} : vector<8x192xf32> to vector<8x64xf32>
    %694 = arith.mulf %693, %685 : vector<8x64xf32>
    %695 = arith.addf %692, %694 : vector<8x64xf32>
    %696 = vector.extract_strided_slice %675 {offsets = [0, 128], sizes = [8, 64], strides = [1, 1]} : vector<8x192xf32> to vector<8x64xf32>
    %697 = math.tanh %690 : vector<8x64xf32>
    %698 = arith.mulf %696, %697 : vector<8x64xf32>
    %699 = arith.truncf %698 : vector<8x64xf32> to vector<8x64xbf16>
    %700 = vector.extract_strided_slice %683 {offsets = [0, 128], sizes = [8, 64], strides = [1, 1]} : vector<8x192xf32> to vector<8x64xf32>
    %701 = math.tanh %695 : vector<8x64xf32>
    %702 = arith.mulf %700, %701 : vector<8x64xf32>
    %703 = arith.truncf %702 : vector<8x64xf32> to vector<8x64xbf16>
    %704 = arith.index_cast %c2_i32_198 : i32 to index
    %c0_208 = arith.constant 0 : index
    %c0_209 = arith.constant 0 : index
    %705 = vector.load %arg12[%704, %c0_208, %c0_209] : memref<8x8x128xbf16, #tpu.memory_space<vmem>>, vector<1x8x64xbf16>
    %706 = vector.shape_cast %705 : vector<1x8x64xbf16> to vector<8x64xbf16>
    %707 = vector.shape_cast %699 : vector<8x64xbf16> to vector<1x8x64xbf16>
    tpu.vector_store %arg12[%704, %c0_208, %c0_209], %707 {strides = array<i32>} : memref<8x8x128xbf16, #tpu.memory_space<vmem>>, vector<1x8x64xbf16>,
    %708 = arith.index_cast %657 : i32 to index
    %c0_210 = arith.constant 0 : index
    %c64_211 = arith.constant 64 : index
    %709 = vector.load %arg12[%708, %c0_210, %c64_211] : memref<8x8x128xbf16, #tpu.memory_space<vmem>>, vector<1x8x64xbf16>
    %710 = vector.shape_cast %709 : vector<1x8x64xbf16> to vector<8x64xbf16>
    %711 = vector.shape_cast %703 : vector<8x64xbf16> to vector<1x8x64xbf16>
    tpu.vector_store %arg12[%708, %c0_210, %c64_211], %711 {strides = array<i32>} : memref<8x8x128xbf16, #tpu.memory_space<vmem>>, vector<1x8x64xbf16>,
    %c3_i32_212 = arith.constant 3 : i32
    %c7_i32_213 = arith.constant 7 : i32
    %712 = arith.subi %c7_i32_213, %c3_i32_212 : i32
    %713 = arith.index_cast %c3_i32_212 : i32 to index
    %c0_214 = arith.constant 0 : index
    %c0_215 = arith.constant 0 : index
    %714 = vector.load %arg10[%713, %c0_214, %c0_215] : memref<8x8x256xbf16, #tpu.memory_space<vmem>>, vector<1x8x256xbf16>
    %715 = vector.shape_cast %714 : vector<1x8x256xbf16> to vector<8x256xbf16>
    %cst_216 = arith.constant dense<0.000000e+00> : vector<8x256xf32>
    %716 = tpu.matmul %699, %16, %cst_216 {dimension_numbers = #tpu.dot_dimension_numbers<[1], [0], [0], [1], [0, 0, 1, 1], [], []>} : vector<8x64xbf16>, vector<64x256xbf16>, vector<8x256xf32> -> vector<8x256xf32>
    %717 = arith.extf %715 : vector<8x256xbf16> to vector<8x256xf32>
    %718 = arith.addf %717, %716 : vector<8x256xf32>
    %719 = arith.index_cast %712 : i32 to index
    %c0_217 = arith.constant 0 : index
    %c0_218 = arith.constant 0 : index
    %720 = vector.load %arg11[%719, %c0_217, %c0_218] : memref<8x8x256xbf16, #tpu.memory_space<vmem>>, vector<1x8x256xbf16>
    %721 = vector.shape_cast %720 : vector<1x8x256xbf16> to vector<8x256xbf16>
    %cst_219 = arith.constant dense<0.000000e+00> : vector<8x256xf32>
    %722 = tpu.matmul %703, %18, %cst_219 {dimension_numbers = #tpu.dot_dimension_numbers<[1], [0], [0], [1], [0, 0, 1, 1], [], []>} : vector<8x64xbf16>, vector<64x256xbf16>, vector<8x256xf32> -> vector<8x256xf32>
    %723 = arith.extf %721 : vector<8x256xbf16> to vector<8x256xf32>
    %724 = arith.addf %723, %722 : vector<8x256xf32>
    %725 = vector.extract_strided_slice %718 {offsets = [0, 0], sizes = [8, 192], strides = [1, 1]} : vector<8x256xf32> to vector<8x192xf32>
    %726 = arith.negf %725 : vector<8x192xf32>
    %727 = math.exp %726 : vector<8x192xf32>
    %cst_220 = arith.constant 1.000000e+00 : f32
    %728 = vector.broadcast %cst_220 : f32 to vector<8x192xf32>
    %729 = arith.addf %728, %727 : vector<8x192xf32>
    %730 = arith.divf %728, %729 : vector<8x192xf32>
    %731 = vector.extract_strided_slice %718 {offsets = [0, 192], sizes = [8, 64], strides = [1, 1]} : vector<8x256xf32> to vector<8x64xf32>
    %732 = math.tanh %731 : vector<8x64xf32>
    %733 = vector.extract_strided_slice %724 {offsets = [0, 0], sizes = [8, 192], strides = [1, 1]} : vector<8x256xf32> to vector<8x192xf32>
    %734 = arith.negf %733 : vector<8x192xf32>
    %735 = math.exp %734 : vector<8x192xf32>
    %cst_221 = arith.constant 1.000000e+00 : f32
    %736 = vector.broadcast %cst_221 : f32 to vector<8x192xf32>
    %737 = arith.addf %736, %735 : vector<8x192xf32>
    %738 = arith.divf %736, %737 : vector<8x192xf32>
    %739 = vector.extract_strided_slice %724 {offsets = [0, 192], sizes = [8, 64], strides = [1, 1]} : vector<8x256xf32> to vector<8x64xf32>
    %740 = math.tanh %739 : vector<8x64xf32>
    %741 = vector.extract_strided_slice %730 {offsets = [0, 64], sizes = [8, 64], strides = [1, 1]} : vector<8x192xf32> to vector<8x64xf32>
    %742 = arith.mulf %741, %690 : vector<8x64xf32>
    %743 = vector.extract_strided_slice %730 {offsets = [0, 0], sizes = [8, 64], strides = [1, 1]} : vector<8x192xf32> to vector<8x64xf32>
    %744 = arith.mulf %743, %732 : vector<8x64xf32>
    %745 = arith.addf %742, %744 : vector<8x64xf32>
    %746 = vector.extract_strided_slice %738 {offsets = [0, 64], sizes = [8, 64], strides = [1, 1]} : vector<8x192xf32> to vector<8x64xf32>
    %747 = arith.mulf %746, %695 : vector<8x64xf32>
    %748 = vector.extract_strided_slice %738 {offsets = [0, 0], sizes = [8, 64], strides = [1, 1]} : vector<8x192xf32> to vector<8x64xf32>
    %749 = arith.mulf %748, %740 : vector<8x64xf32>
    %750 = arith.addf %747, %749 : vector<8x64xf32>
    %751 = vector.extract_strided_slice %730 {offsets = [0, 128], sizes = [8, 64], strides = [1, 1]} : vector<8x192xf32> to vector<8x64xf32>
    %752 = math.tanh %745 : vector<8x64xf32>
    %753 = arith.mulf %751, %752 : vector<8x64xf32>
    %754 = arith.truncf %753 : vector<8x64xf32> to vector<8x64xbf16>
    %755 = vector.extract_strided_slice %738 {offsets = [0, 128], sizes = [8, 64], strides = [1, 1]} : vector<8x192xf32> to vector<8x64xf32>
    %756 = math.tanh %750 : vector<8x64xf32>
    %757 = arith.mulf %755, %756 : vector<8x64xf32>
    %758 = arith.truncf %757 : vector<8x64xf32> to vector<8x64xbf16>
    %759 = arith.index_cast %c3_i32_212 : i32 to index
    %c0_222 = arith.constant 0 : index
    %c0_223 = arith.constant 0 : index
    %760 = vector.load %arg12[%759, %c0_222, %c0_223] : memref<8x8x128xbf16, #tpu.memory_space<vmem>>, vector<1x8x64xbf16>
    %761 = vector.shape_cast %760 : vector<1x8x64xbf16> to vector<8x64xbf16>
    %762 = vector.shape_cast %754 : vector<8x64xbf16> to vector<1x8x64xbf16>
    tpu.vector_store %arg12[%759, %c0_222, %c0_223], %762 {strides = array<i32>} : memref<8x8x128xbf16, #tpu.memory_space<vmem>>, vector<1x8x64xbf16>,
    %763 = arith.index_cast %712 : i32 to index
    %c0_224 = arith.constant 0 : index
    %c64_225 = arith.constant 64 : index
    %764 = vector.load %arg12[%763, %c0_224, %c64_225] : memref<8x8x128xbf16, #tpu.memory_space<vmem>>, vector<1x8x64xbf16>
    %765 = vector.shape_cast %764 : vector<1x8x64xbf16> to vector<8x64xbf16>
    %766 = vector.shape_cast %758 : vector<8x64xbf16> to vector<1x8x64xbf16>
    tpu.vector_store %arg12[%763, %c0_224, %c64_225], %766 {strides = array<i32>} : memref<8x8x128xbf16, #tpu.memory_space<vmem>>, vector<1x8x64xbf16>,
    %c4_i32_226 = arith.constant 4 : i32
    %c7_i32_227 = arith.constant 7 : i32
    %767 = arith.subi %c7_i32_227, %c4_i32_226 : i32
    %768 = arith.index_cast %c4_i32_226 : i32 to index
    %c0_228 = arith.constant 0 : index
    %c0_229 = arith.constant 0 : index
    %769 = vector.load %arg10[%768, %c0_228, %c0_229] : memref<8x8x256xbf16, #tpu.memory_space<vmem>>, vector<1x8x256xbf16>
    %770 = vector.shape_cast %769 : vector<1x8x256xbf16> to vector<8x256xbf16>
    %cst_230 = arith.constant dense<0.000000e+00> : vector<8x256xf32>
    %771 = tpu.matmul %754, %16, %cst_230 {dimension_numbers = #tpu.dot_dimension_numbers<[1], [0], [0], [1], [0, 0, 1, 1], [], []>} : vector<8x64xbf16>, vector<64x256xbf16>, vector<8x256xf32> -> vector<8x256xf32>
    %772 = arith.extf %770 : vector<8x256xbf16> to vector<8x256xf32>
    %773 = arith.addf %772, %771 : vector<8x256xf32>
    %774 = arith.index_cast %767 : i32 to index
    %c0_231 = arith.constant 0 : index
    %c0_232 = arith.constant 0 : index
    %775 = vector.load %arg11[%774, %c0_231, %c0_232] : memref<8x8x256xbf16, #tpu.memory_space<vmem>>, vector<1x8x256xbf16>
    %776 = vector.shape_cast %775 : vector<1x8x256xbf16> to vector<8x256xbf16>
    %cst_233 = arith.constant dense<0.000000e+00> : vector<8x256xf32>
    %777 = tpu.matmul %758, %18, %cst_233 {dimension_numbers = #tpu.dot_dimension_numbers<[1], [0], [0], [1], [0, 0, 1, 1], [], []>} : vector<8x64xbf16>, vector<64x256xbf16>, vector<8x256xf32> -> vector<8x256xf32>
    %778 = arith.extf %776 : vector<8x256xbf16> to vector<8x256xf32>
    %779 = arith.addf %778, %777 : vector<8x256xf32>
    %780 = vector.extract_strided_slice %773 {offsets = [0, 0], sizes = [8, 192], strides = [1, 1]} : vector<8x256xf32> to vector<8x192xf32>
    %781 = arith.negf %780 : vector<8x192xf32>
    %782 = math.exp %781 : vector<8x192xf32>
    %cst_234 = arith.constant 1.000000e+00 : f32
    %783 = vector.broadcast %cst_234 : f32 to vector<8x192xf32>
    %784 = arith.addf %783, %782 : vector<8x192xf32>
    %785 = arith.divf %783, %784 : vector<8x192xf32>
    %786 = vector.extract_strided_slice %773 {offsets = [0, 192], sizes = [8, 64], strides = [1, 1]} : vector<8x256xf32> to vector<8x64xf32>
    %787 = math.tanh %786 : vector<8x64xf32>
    %788 = vector.extract_strided_slice %779 {offsets = [0, 0], sizes = [8, 192], strides = [1, 1]} : vector<8x256xf32> to vector<8x192xf32>
    %789 = arith.negf %788 : vector<8x192xf32>
    %790 = math.exp %789 : vector<8x192xf32>
    %cst_235 = arith.constant 1.000000e+00 : f32
    %791 = vector.broadcast %cst_235 : f32 to vector<8x192xf32>
    %792 = arith.addf %791, %790 : vector<8x192xf32>
    %793 = arith.divf %791, %792 : vector<8x192xf32>
    %794 = vector.extract_strided_slice %779 {offsets = [0, 192], sizes = [8, 64], strides = [1, 1]} : vector<8x256xf32> to vector<8x64xf32>
    %795 = math.tanh %794 : vector<8x64xf32>
    %796 = vector.extract_strided_slice %785 {offsets = [0, 64], sizes = [8, 64], strides = [1, 1]} : vector<8x192xf32> to vector<8x64xf32>
    %797 = arith.mulf %796, %745 : vector<8x64xf32>
    %798 = vector.extract_strided_slice %785 {offsets = [0, 0], sizes = [8, 64], strides = [1, 1]} : vector<8x192xf32> to vector<8x64xf32>
    %799 = arith.mulf %798, %787 : vector<8x64xf32>
    %800 = arith.addf %797, %799 : vector<8x64xf32>
    %801 = vector.extract_strided_slice %793 {offsets = [0, 64], sizes = [8, 64], strides = [1, 1]} : vector<8x192xf32> to vector<8x64xf32>
    %802 = arith.mulf %801, %750 : vector<8x64xf32>
    %803 = vector.extract_strided_slice %793 {offsets = [0, 0], sizes = [8, 64], strides = [1, 1]} : vector<8x192xf32> to vector<8x64xf32>
    %804 = arith.mulf %803, %795 : vector<8x64xf32>
    %805 = arith.addf %802, %804 : vector<8x64xf32>
    %806 = vector.extract_strided_slice %785 {offsets = [0, 128], sizes = [8, 64], strides = [1, 1]} : vector<8x192xf32> to vector<8x64xf32>
    %807 = math.tanh %800 : vector<8x64xf32>
    %808 = arith.mulf %806, %807 : vector<8x64xf32>
    %809 = arith.truncf %808 : vector<8x64xf32> to vector<8x64xbf16>
    %810 = vector.extract_strided_slice %793 {offsets = [0, 128], sizes = [8, 64], strides = [1, 1]} : vector<8x192xf32> to vector<8x64xf32>
    %811 = math.tanh %805 : vector<8x64xf32>
    %812 = arith.mulf %810, %811 : vector<8x64xf32>
    %813 = arith.truncf %812 : vector<8x64xf32> to vector<8x64xbf16>
    %814 = arith.index_cast %c4_i32_226 : i32 to index
    %c0_236 = arith.constant 0 : index
    %c0_237 = arith.constant 0 : index
    %815 = vector.load %arg12[%814, %c0_236, %c0_237] : memref<8x8x128xbf16, #tpu.memory_space<vmem>>, vector<1x8x64xbf16>
    %816 = vector.shape_cast %815 : vector<1x8x64xbf16> to vector<8x64xbf16>
    %817 = vector.shape_cast %809 : vector<8x64xbf16> to vector<1x8x64xbf16>
    tpu.vector_store %arg12[%814, %c0_236, %c0_237], %817 {strides = array<i32>} : memref<8x8x128xbf16, #tpu.memory_space<vmem>>, vector<1x8x64xbf16>,
    %818 = arith.index_cast %767 : i32 to index
    %c0_238 = arith.constant 0 : index
    %c64_239 = arith.constant 64 : index
    %819 = vector.load %arg12[%818, %c0_238, %c64_239] : memref<8x8x128xbf16, #tpu.memory_space<vmem>>, vector<1x8x64xbf16>
    %820 = vector.shape_cast %819 : vector<1x8x64xbf16> to vector<8x64xbf16>
    %821 = vector.shape_cast %813 : vector<8x64xbf16> to vector<1x8x64xbf16>
    tpu.vector_store %arg12[%818, %c0_238, %c64_239], %821 {strides = array<i32>} : memref<8x8x128xbf16, #tpu.memory_space<vmem>>, vector<1x8x64xbf16>,
    %c5_i32_240 = arith.constant 5 : i32
    %c7_i32_241 = arith.constant 7 : i32
    %822 = arith.subi %c7_i32_241, %c5_i32_240 : i32
    %823 = arith.index_cast %c5_i32_240 : i32 to index
    %c0_242 = arith.constant 0 : index
    %c0_243 = arith.constant 0 : index
    %824 = vector.load %arg10[%823, %c0_242, %c0_243] : memref<8x8x256xbf16, #tpu.memory_space<vmem>>, vector<1x8x256xbf16>
    %825 = vector.shape_cast %824 : vector<1x8x256xbf16> to vector<8x256xbf16>
    %cst_244 = arith.constant dense<0.000000e+00> : vector<8x256xf32>
    %826 = tpu.matmul %809, %16, %cst_244 {dimension_numbers = #tpu.dot_dimension_numbers<[1], [0], [0], [1], [0, 0, 1, 1], [], []>} : vector<8x64xbf16>, vector<64x256xbf16>, vector<8x256xf32> -> vector<8x256xf32>
    %827 = arith.extf %825 : vector<8x256xbf16> to vector<8x256xf32>
    %828 = arith.addf %827, %826 : vector<8x256xf32>
    %829 = arith.index_cast %822 : i32 to index
    %c0_245 = arith.constant 0 : index
    %c0_246 = arith.constant 0 : index
    %830 = vector.load %arg11[%829, %c0_245, %c0_246] : memref<8x8x256xbf16, #tpu.memory_space<vmem>>, vector<1x8x256xbf16>
    %831 = vector.shape_cast %830 : vector<1x8x256xbf16> to vector<8x256xbf16>
    %cst_247 = arith.constant dense<0.000000e+00> : vector<8x256xf32>
    %832 = tpu.matmul %813, %18, %cst_247 {dimension_numbers = #tpu.dot_dimension_numbers<[1], [0], [0], [1], [0, 0, 1, 1], [], []>} : vector<8x64xbf16>, vector<64x256xbf16>, vector<8x256xf32> -> vector<8x256xf32>
    %833 = arith.extf %831 : vector<8x256xbf16> to vector<8x256xf32>
    %834 = arith.addf %833, %832 : vector<8x256xf32>
    %835 = vector.extract_strided_slice %828 {offsets = [0, 0], sizes = [8, 192], strides = [1, 1]} : vector<8x256xf32> to vector<8x192xf32>
    %836 = arith.negf %835 : vector<8x192xf32>
    %837 = math.exp %836 : vector<8x192xf32>
    %cst_248 = arith.constant 1.000000e+00 : f32
    %838 = vector.broadcast %cst_248 : f32 to vector<8x192xf32>
    %839 = arith.addf %838, %837 : vector<8x192xf32>
    %840 = arith.divf %838, %839 : vector<8x192xf32>
    %841 = vector.extract_strided_slice %828 {offsets = [0, 192], sizes = [8, 64], strides = [1, 1]} : vector<8x256xf32> to vector<8x64xf32>
    %842 = math.tanh %841 : vector<8x64xf32>
    %843 = vector.extract_strided_slice %834 {offsets = [0, 0], sizes = [8, 192], strides = [1, 1]} : vector<8x256xf32> to vector<8x192xf32>
    %844 = arith.negf %843 : vector<8x192xf32>
    %845 = math.exp %844 : vector<8x192xf32>
    %cst_249 = arith.constant 1.000000e+00 : f32
    %846 = vector.broadcast %cst_249 : f32 to vector<8x192xf32>
    %847 = arith.addf %846, %845 : vector<8x192xf32>
    %848 = arith.divf %846, %847 : vector<8x192xf32>
    %849 = vector.extract_strided_slice %834 {offsets = [0, 192], sizes = [8, 64], strides = [1, 1]} : vector<8x256xf32> to vector<8x64xf32>
    %850 = math.tanh %849 : vector<8x64xf32>
    %851 = vector.extract_strided_slice %840 {offsets = [0, 64], sizes = [8, 64], strides = [1, 1]} : vector<8x192xf32> to vector<8x64xf32>
    %852 = arith.mulf %851, %800 : vector<8x64xf32>
    %853 = vector.extract_strided_slice %840 {offsets = [0, 0], sizes = [8, 64], strides = [1, 1]} : vector<8x192xf32> to vector<8x64xf32>
    %854 = arith.mulf %853, %842 : vector<8x64xf32>
    %855 = arith.addf %852, %854 : vector<8x64xf32>
    %856 = vector.extract_strided_slice %848 {offsets = [0, 64], sizes = [8, 64], strides = [1, 1]} : vector<8x192xf32> to vector<8x64xf32>
    %857 = arith.mulf %856, %805 : vector<8x64xf32>
    %858 = vector.extract_strided_slice %848 {offsets = [0, 0], sizes = [8, 64], strides = [1, 1]} : vector<8x192xf32> to vector<8x64xf32>
    %859 = arith.mulf %858, %850 : vector<8x64xf32>
    %860 = arith.addf %857, %859 : vector<8x64xf32>
    %861 = vector.extract_strided_slice %840 {offsets = [0, 128], sizes = [8, 64], strides = [1, 1]} : vector<8x192xf32> to vector<8x64xf32>
    %862 = math.tanh %855 : vector<8x64xf32>
    %863 = arith.mulf %861, %862 : vector<8x64xf32>
    %864 = arith.truncf %863 : vector<8x64xf32> to vector<8x64xbf16>
    %865 = vector.extract_strided_slice %848 {offsets = [0, 128], sizes = [8, 64], strides = [1, 1]} : vector<8x192xf32> to vector<8x64xf32>
    %866 = math.tanh %860 : vector<8x64xf32>
    %867 = arith.mulf %865, %866 : vector<8x64xf32>
    %868 = arith.truncf %867 : vector<8x64xf32> to vector<8x64xbf16>
    %869 = arith.index_cast %c5_i32_240 : i32 to index
    %c0_250 = arith.constant 0 : index
    %c0_251 = arith.constant 0 : index
    %870 = vector.load %arg12[%869, %c0_250, %c0_251] : memref<8x8x128xbf16, #tpu.memory_space<vmem>>, vector<1x8x64xbf16>
    %871 = vector.shape_cast %870 : vector<1x8x64xbf16> to vector<8x64xbf16>
    %872 = vector.shape_cast %864 : vector<8x64xbf16> to vector<1x8x64xbf16>
    tpu.vector_store %arg12[%869, %c0_250, %c0_251], %872 {strides = array<i32>} : memref<8x8x128xbf16, #tpu.memory_space<vmem>>, vector<1x8x64xbf16>,
    %873 = arith.index_cast %822 : i32 to index
    %c0_252 = arith.constant 0 : index
    %c64_253 = arith.constant 64 : index
    %874 = vector.load %arg12[%873, %c0_252, %c64_253] : memref<8x8x128xbf16, #tpu.memory_space<vmem>>, vector<1x8x64xbf16>
    %875 = vector.shape_cast %874 : vector<1x8x64xbf16> to vector<8x64xbf16>
    %876 = vector.shape_cast %868 : vector<8x64xbf16> to vector<1x8x64xbf16>
    tpu.vector_store %arg12[%873, %c0_252, %c64_253], %876 {strides = array<i32>} : memref<8x8x128xbf16, #tpu.memory_space<vmem>>, vector<1x8x64xbf16>,
    %c6_i32_254 = arith.constant 6 : i32
    %c7_i32_255 = arith.constant 7 : i32
    %877 = arith.subi %c7_i32_255, %c6_i32_254 : i32
    %878 = arith.index_cast %c6_i32_254 : i32 to index
    %c0_256 = arith.constant 0 : index
    %c0_257 = arith.constant 0 : index
    %879 = vector.load %arg10[%878, %c0_256, %c0_257] : memref<8x8x256xbf16, #tpu.memory_space<vmem>>, vector<1x8x256xbf16>
    %880 = vector.shape_cast %879 : vector<1x8x256xbf16> to vector<8x256xbf16>
    %cst_258 = arith.constant dense<0.000000e+00> : vector<8x256xf32>
    %881 = tpu.matmul %864, %16, %cst_258 {dimension_numbers = #tpu.dot_dimension_numbers<[1], [0], [0], [1], [0, 0, 1, 1], [], []>} : vector<8x64xbf16>, vector<64x256xbf16>, vector<8x256xf32> -> vector<8x256xf32>
    %882 = arith.extf %880 : vector<8x256xbf16> to vector<8x256xf32>
    %883 = arith.addf %882, %881 : vector<8x256xf32>
    %884 = arith.index_cast %877 : i32 to index
    %c0_259 = arith.constant 0 : index
    %c0_260 = arith.constant 0 : index
    %885 = vector.load %arg11[%884, %c0_259, %c0_260] : memref<8x8x256xbf16, #tpu.memory_space<vmem>>, vector<1x8x256xbf16>
    %886 = vector.shape_cast %885 : vector<1x8x256xbf16> to vector<8x256xbf16>
    %cst_261 = arith.constant dense<0.000000e+00> : vector<8x256xf32>
    %887 = tpu.matmul %868, %18, %cst_261 {dimension_numbers = #tpu.dot_dimension_numbers<[1], [0], [0], [1], [0, 0, 1, 1], [], []>} : vector<8x64xbf16>, vector<64x256xbf16>, vector<8x256xf32> -> vector<8x256xf32>
    %888 = arith.extf %886 : vector<8x256xbf16> to vector<8x256xf32>
    %889 = arith.addf %888, %887 : vector<8x256xf32>
    %890 = vector.extract_strided_slice %883 {offsets = [0, 0], sizes = [8, 192], strides = [1, 1]} : vector<8x256xf32> to vector<8x192xf32>
    %891 = arith.negf %890 : vector<8x192xf32>
    %892 = math.exp %891 : vector<8x192xf32>
    %cst_262 = arith.constant 1.000000e+00 : f32
    %893 = vector.broadcast %cst_262 : f32 to vector<8x192xf32>
    %894 = arith.addf %893, %892 : vector<8x192xf32>
    %895 = arith.divf %893, %894 : vector<8x192xf32>
    %896 = vector.extract_strided_slice %883 {offsets = [0, 192], sizes = [8, 64], strides = [1, 1]} : vector<8x256xf32> to vector<8x64xf32>
    %897 = math.tanh %896 : vector<8x64xf32>
    %898 = vector.extract_strided_slice %889 {offsets = [0, 0], sizes = [8, 192], strides = [1, 1]} : vector<8x256xf32> to vector<8x192xf32>
    %899 = arith.negf %898 : vector<8x192xf32>
    %900 = math.exp %899 : vector<8x192xf32>
    %cst_263 = arith.constant 1.000000e+00 : f32
    %901 = vector.broadcast %cst_263 : f32 to vector<8x192xf32>
    %902 = arith.addf %901, %900 : vector<8x192xf32>
    %903 = arith.divf %901, %902 : vector<8x192xf32>
    %904 = vector.extract_strided_slice %889 {offsets = [0, 192], sizes = [8, 64], strides = [1, 1]} : vector<8x256xf32> to vector<8x64xf32>
    %905 = math.tanh %904 : vector<8x64xf32>
    %906 = vector.extract_strided_slice %895 {offsets = [0, 64], sizes = [8, 64], strides = [1, 1]} : vector<8x192xf32> to vector<8x64xf32>
    %907 = arith.mulf %906, %855 : vector<8x64xf32>
    %908 = vector.extract_strided_slice %895 {offsets = [0, 0], sizes = [8, 64], strides = [1, 1]} : vector<8x192xf32> to vector<8x64xf32>
    %909 = arith.mulf %908, %897 : vector<8x64xf32>
    %910 = arith.addf %907, %909 : vector<8x64xf32>
    %911 = vector.extract_strided_slice %903 {offsets = [0, 64], sizes = [8, 64], strides = [1, 1]} : vector<8x192xf32> to vector<8x64xf32>
    %912 = arith.mulf %911, %860 : vector<8x64xf32>
    %913 = vector.extract_strided_slice %903 {offsets = [0, 0], sizes = [8, 64], strides = [1, 1]} : vector<8x192xf32> to vector<8x64xf32>
    %914 = arith.mulf %913, %905 : vector<8x64xf32>
    %915 = arith.addf %912, %914 : vector<8x64xf32>
    %916 = vector.extract_strided_slice %895 {offsets = [0, 128], sizes = [8, 64], strides = [1, 1]} : vector<8x192xf32> to vector<8x64xf32>
    %917 = math.tanh %910 : vector<8x64xf32>
    %918 = arith.mulf %916, %917 : vector<8x64xf32>
    %919 = arith.truncf %918 : vector<8x64xf32> to vector<8x64xbf16>
    %920 = vector.extract_strided_slice %903 {offsets = [0, 128], sizes = [8, 64], strides = [1, 1]} : vector<8x192xf32> to vector<8x64xf32>
    %921 = math.tanh %915 : vector<8x64xf32>
    %922 = arith.mulf %920, %921 : vector<8x64xf32>
    %923 = arith.truncf %922 : vector<8x64xf32> to vector<8x64xbf16>
    %924 = arith.index_cast %c6_i32_254 : i32 to index
    %c0_264 = arith.constant 0 : index
    %c0_265 = arith.constant 0 : index
    %925 = vector.load %arg12[%924, %c0_264, %c0_265] : memref<8x8x128xbf16, #tpu.memory_space<vmem>>, vector<1x8x64xbf16>
    %926 = vector.shape_cast %925 : vector<1x8x64xbf16> to vector<8x64xbf16>
    %927 = vector.shape_cast %919 : vector<8x64xbf16> to vector<1x8x64xbf16>
    tpu.vector_store %arg12[%924, %c0_264, %c0_265], %927 {strides = array<i32>} : memref<8x8x128xbf16, #tpu.memory_space<vmem>>, vector<1x8x64xbf16>,
    %928 = arith.index_cast %877 : i32 to index
    %c0_266 = arith.constant 0 : index
    %c64_267 = arith.constant 64 : index
    %929 = vector.load %arg12[%928, %c0_266, %c64_267] : memref<8x8x128xbf16, #tpu.memory_space<vmem>>, vector<1x8x64xbf16>
    %930 = vector.shape_cast %929 : vector<1x8x64xbf16> to vector<8x64xbf16>
    %931 = vector.shape_cast %923 : vector<8x64xbf16> to vector<1x8x64xbf16>
    tpu.vector_store %arg12[%928, %c0_266, %c64_267], %931 {strides = array<i32>} : memref<8x8x128xbf16, #tpu.memory_space<vmem>>, vector<1x8x64xbf16>,
    %c7_i32_268 = arith.constant 7 : i32
    %c7_i32_269 = arith.constant 7 : i32
    %932 = arith.subi %c7_i32_269, %c7_i32_268 : i32
    %933 = arith.index_cast %c7_i32_268 : i32 to index
    %c0_270 = arith.constant 0 : index
    %c0_271 = arith.constant 0 : index
    %934 = vector.load %arg10[%933, %c0_270, %c0_271] : memref<8x8x256xbf16, #tpu.memory_space<vmem>>, vector<1x8x256xbf16>
    %935 = vector.shape_cast %934 : vector<1x8x256xbf16> to vector<8x256xbf16>
    %cst_272 = arith.constant dense<0.000000e+00> : vector<8x256xf32>
    %936 = tpu.matmul %919, %16, %cst_272 {dimension_numbers = #tpu.dot_dimension_numbers<[1], [0], [0], [1], [0, 0, 1, 1], [], []>} : vector<8x64xbf16>, vector<64x256xbf16>, vector<8x256xf32> -> vector<8x256xf32>
    %937 = arith.extf %935 : vector<8x256xbf16> to vector<8x256xf32>
    %938 = arith.addf %937, %936 : vector<8x256xf32>
    %939 = arith.index_cast %932 : i32 to index
    %c0_273 = arith.constant 0 : index
    %c0_274 = arith.constant 0 : index
    %940 = vector.load %arg11[%939, %c0_273, %c0_274] : memref<8x8x256xbf16, #tpu.memory_space<vmem>>, vector<1x8x256xbf16>
    %941 = vector.shape_cast %940 : vector<1x8x256xbf16> to vector<8x256xbf16>
    %cst_275 = arith.constant dense<0.000000e+00> : vector<8x256xf32>
    %942 = tpu.matmul %923, %18, %cst_275 {dimension_numbers = #tpu.dot_dimension_numbers<[1], [0], [0], [1], [0, 0, 1, 1], [], []>} : vector<8x64xbf16>, vector<64x256xbf16>, vector<8x256xf32> -> vector<8x256xf32>
    %943 = arith.extf %941 : vector<8x256xbf16> to vector<8x256xf32>
    %944 = arith.addf %943, %942 : vector<8x256xf32>
    %945 = vector.extract_strided_slice %938 {offsets = [0, 0], sizes = [8, 192], strides = [1, 1]} : vector<8x256xf32> to vector<8x192xf32>
    %946 = arith.negf %945 : vector<8x192xf32>
    %947 = math.exp %946 : vector<8x192xf32>
    %cst_276 = arith.constant 1.000000e+00 : f32
    %948 = vector.broadcast %cst_276 : f32 to vector<8x192xf32>
    %949 = arith.addf %948, %947 : vector<8x192xf32>
    %950 = arith.divf %948, %949 : vector<8x192xf32>
    %951 = vector.extract_strided_slice %938 {offsets = [0, 192], sizes = [8, 64], strides = [1, 1]} : vector<8x256xf32> to vector<8x64xf32>
    %952 = math.tanh %951 : vector<8x64xf32>
    %953 = vector.extract_strided_slice %944 {offsets = [0, 0], sizes = [8, 192], strides = [1, 1]} : vector<8x256xf32> to vector<8x192xf32>
    %954 = arith.negf %953 : vector<8x192xf32>
    %955 = math.exp %954 : vector<8x192xf32>
    %cst_277 = arith.constant 1.000000e+00 : f32
    %956 = vector.broadcast %cst_277 : f32 to vector<8x192xf32>
    %957 = arith.addf %956, %955 : vector<8x192xf32>
    %958 = arith.divf %956, %957 : vector<8x192xf32>
    %959 = vector.extract_strided_slice %944 {offsets = [0, 192], sizes = [8, 64], strides = [1, 1]} : vector<8x256xf32> to vector<8x64xf32>
    %960 = math.tanh %959 : vector<8x64xf32>
    %961 = vector.extract_strided_slice %950 {offsets = [0, 64], sizes = [8, 64], strides = [1, 1]} : vector<8x192xf32> to vector<8x64xf32>
    %962 = arith.mulf %961, %910 : vector<8x64xf32>
    %963 = vector.extract_strided_slice %950 {offsets = [0, 0], sizes = [8, 64], strides = [1, 1]} : vector<8x192xf32> to vector<8x64xf32>
    %964 = arith.mulf %963, %952 : vector<8x64xf32>
    %965 = arith.addf %962, %964 : vector<8x64xf32>
    %966 = vector.extract_strided_slice %958 {offsets = [0, 64], sizes = [8, 64], strides = [1, 1]} : vector<8x192xf32> to vector<8x64xf32>
    %967 = arith.mulf %966, %915 : vector<8x64xf32>
    %968 = vector.extract_strided_slice %958 {offsets = [0, 0], sizes = [8, 64], strides = [1, 1]} : vector<8x192xf32> to vector<8x64xf32>
    %969 = arith.mulf %968, %960 : vector<8x64xf32>
    %970 = arith.addf %967, %969 : vector<8x64xf32>
    %971 = vector.extract_strided_slice %950 {offsets = [0, 128], sizes = [8, 64], strides = [1, 1]} : vector<8x192xf32> to vector<8x64xf32>
    %972 = math.tanh %965 : vector<8x64xf32>
    %973 = arith.mulf %971, %972 : vector<8x64xf32>
    %974 = arith.truncf %973 : vector<8x64xf32> to vector<8x64xbf16>
    %975 = vector.extract_strided_slice %958 {offsets = [0, 128], sizes = [8, 64], strides = [1, 1]} : vector<8x192xf32> to vector<8x64xf32>
    %976 = math.tanh %970 : vector<8x64xf32>
    %977 = arith.mulf %975, %976 : vector<8x64xf32>
    %978 = arith.truncf %977 : vector<8x64xf32> to vector<8x64xbf16>
    %979 = arith.index_cast %c7_i32_268 : i32 to index
    %c0_278 = arith.constant 0 : index
    %c0_279 = arith.constant 0 : index
    %980 = vector.load %arg12[%979, %c0_278, %c0_279] : memref<8x8x128xbf16, #tpu.memory_space<vmem>>, vector<1x8x64xbf16>
    %981 = vector.shape_cast %980 : vector<1x8x64xbf16> to vector<8x64xbf16>
    %982 = vector.shape_cast %974 : vector<8x64xbf16> to vector<1x8x64xbf16>
    tpu.vector_store %arg12[%979, %c0_278, %c0_279], %982 {strides = array<i32>} : memref<8x8x128xbf16, #tpu.memory_space<vmem>>, vector<1x8x64xbf16>,
    %983 = arith.index_cast %932 : i32 to index
    %c0_280 = arith.constant 0 : index
    %c64_281 = arith.constant 64 : index
    %984 = vector.load %arg12[%983, %c0_280, %c64_281] : memref<8x8x128xbf16, #tpu.memory_space<vmem>>, vector<1x8x64xbf16>
    %985 = vector.shape_cast %984 : vector<1x8x64xbf16> to vector<8x64xbf16>
    %986 = vector.shape_cast %978 : vector<8x64xbf16> to vector<1x8x64xbf16>
    tpu.vector_store %arg12[%983, %c0_280, %c64_281], %986 {strides = array<i32>} : memref<8x8x128xbf16, #tpu.memory_space<vmem>>, vector<1x8x64xbf16>,
    %c8_i32_282 = arith.constant 8 : i32
    %c0_283 = arith.constant 0 : index
    %c0_284 = arith.constant 0 : index
    %c0_285 = arith.constant 0 : index
    %987 = vector.load %arg12[%c0_283, %c0_284, %c0_285] : memref<8x8x128xbf16, #tpu.memory_space<vmem>>, vector<8x8x128xbf16>
    %988 = vector.shape_cast %987 : vector<8x8x128xbf16> to vector<64x128xbf16>
    %cst_286 = arith.constant dense<0.000000e+00> : vector<64x32xf32>
    %989 = tpu.matmul %988, %19, %cst_286 {dimension_numbers = #tpu.dot_dimension_numbers<[1], [0], [0], [1], [0, 0, 1, 1], [], []>} : vector<64x128xbf16>, vector<128x32xbf16>, vector<64x32xf32> -> vector<64x32xf32>
    %c0_287 = arith.constant 0 : index
    %c0_288 = arith.constant 0 : index
    %c0_289 = arith.constant 0 : index
    %990 = vector.load %arg9[%c0_287, %c0_288, %c0_289] : memref<8x8x32xf32, #tpu.memory_space<vmem>>, vector<8x8x32xf32>
    %991 = vector.broadcast %6 : vector<1x1x32xf32> to vector<8x8x32xf32>
    %992 = arith.addf %990, %991 : vector<8x8x32xf32>
    %993 = vector.shape_cast %989 : vector<64x32xf32> to vector<8x8x32xf32>
    %994 = arith.addf %992, %993 : vector<8x8x32xf32>
    %c0_290 = arith.constant 0 : index
    %c0_291 = arith.constant 0 : index
    %c0_292 = arith.constant 0 : index
    %995 = vector.load %arg8[%c0_290, %c0_291, %c0_292] : memref<8x8x32xf32, #tpu.memory_space<vmem>>, vector<8x8x32xf32>
    tpu.vector_store %arg8[%c0_290, %c0_291, %c0_292], %994 {strides = array<i32>} : memref<8x8x32xf32, #tpu.memory_space<vmem>>, vector<8x8x32xf32>,
    return
  }
  func.func @transform_0(%arg0: i32) -> (i32, i32, i32) {
    %c0_i32 = arith.constant 0 : i32
    %c0_i32_0 = arith.constant 0 : i32
    %c0_i32_1 = arith.constant 0 : i32
    return %c0_i32, %arg0, %c0_i32_0 : i32, i32, i32
  }
  func.func @transform_1(%arg0: i32) -> (i32, i32) {
    %c0_i32 = arith.constant 0 : i32
    %c0_i32_0 = arith.constant 0 : i32
    %c0_i32_1 = arith.constant 0 : i32
    return %c0_i32, %c0_i32_0 : i32, i32
  }
  func.func @transform_2(%arg0: i32) -> (i32, i32) {
    %c0_i32 = arith.constant 0 : i32
    %c0_i32_0 = arith.constant 0 : i32
    %c0_i32_1 = arith.constant 0 : i32
    return %c0_i32, %c0_i32_0 : i32, i32
  }
  func.func @transform_3(%arg0: i32) -> (i32, i32) {
    %c0_i32 = arith.constant 0 : i32
    %c0_i32_0 = arith.constant 0 : i32
    %c0_i32_1 = arith.constant 0 : i32
    return %c0_i32, %c0_i32_0 : i32, i32
  }
  func.func @transform_4(%arg0: i32) -> (i32, i32, i32) {
    %c0_i32 = arith.constant 0 : i32
    %c0_i32_0 = arith.constant 0 : i32
    %c0_i32_1 = arith.constant 0 : i32
    %c0_i32_2 = arith.constant 0 : i32
    return %c0_i32, %c0_i32_0, %c0_i32_1 : i32, i32, i32
  }
  func.func @transform_5(%arg0: i32) -> (i32, i32, i32) {
    %c0_i32 = arith.constant 0 : i32
    %c0_i32_0 = arith.constant 0 : i32
    %c0_i32_1 = arith.constant 0 : i32
    %c0_i32_2 = arith.constant 0 : i32
    return %c0_i32, %c0_i32_0, %c0_i32_1 : i32, i32, i32
  }
  func.func @transform_6(%arg0: i32) -> (i32, i32) {
    %c0_i32 = arith.constant 0 : i32
    %c0_i32_0 = arith.constant 0 : i32
    %c0_i32_1 = arith.constant 0 : i32
    return %c0_i32, %c0_i32_0 : i32, i32
  }
  func.func @transform_7(%arg0: i32) -> (i32, i32, i32) {
    %c0_i32 = arith.constant 0 : i32
    %c0_i32_0 = arith.constant 0 : i32
    %c0_i32_1 = arith.constant 0 : i32
    return %c0_i32, %arg0, %c0_i32_0 : i32, i32, i32
  }
}

</mosaic_0001>

<bundles_post_ra>
// kernel: _lambda_.1
= control target key start
LH: loop header
LB: loop body
LE: loop exit
PB: predicated region body
PF: predicated region fallthrough
CT: control target
= control target key end

     0   :  { %vm83_vm0 = vcmask 261120   ;;  %s6466_s2 = inlined_call_operand.vmem [shape: f32[32,32], index: 2, kind: input, shape index: {}]   ;;  %s6467_s0 = inlined_call_operand.vmem [shape: f32[8,8,32], index: 0, kind: input, shape index: {}]   ;;  %s6468_s4 = inlined_call_operand.vmem [shape: bf16[2,32,256], index: 4, kind: input, shape index: {}]   ;;  %s6469_s1 = inlined_call_operand.vmem [shape: f32[3,32], index: 1, kind: input, shape index: {}]   ;;  %s6470_s5 = inlined_call_operand.vmem [shape: bf16[2,64,256], index: 5, kind: input, shape index: {}]   ;;  %s6471_s3 = inlined_call_operand.vmem [shape: f32[2,256], index: 3, kind: input, shape index: {}]   ;;  %s6472_s6 = inlined_call_operand.vmem [shape: bf16[128,32], index: 6, kind: input, shape index: {}]   ;;  %s6473_s7 = inlined_call_operand.vmem [shape: f32[8,8,32], index: 7, kind: output, shape index: {}]  }
   0x1   :  { %v31_v0 = vld [vmem:[%s6466_s2 + $0x18] sm:$0xff]  ;;  %v30_v1 = vld [vmem:[%s6466_s2 + $0x10] sm:$0xff]  ;;  %v75_v2 = vld [vmem:[%s6467_s0] sm:$0xff] }
   0x2   :  { %114 = vmatpush.msra.mxu0 %v31_v0  ;;  %v76_v3 = vld [vmem:[%s6467_s0 + $0x8] sm:$0xff]  ;;  %169 = vmatpush.msra.mxu2 %v31_v0  ;;  %v77_v5 = vld [vmem:[%s6467_s0 + $0x10] sm:$0xff]  ;;  %v78_v6 = vld [vmem:[%s6467_s0 + $0x18] sm:$0xff]  ;;  %v84_v7 = vsel %vm83_vm0, %v75_v2, 0.0 }
   0x3   :  { %v29_v4 = vld [vmem:[%s6466_s2 + $0x8] sm:$0xff]  ;;  %v85_v8 = vsel %vm83_vm0, %v76_v3, 0.0  ;;  %v79_v9 = vld [vmem:[%s6467_s0 + $0x20] sm:$0xff]  ;;  %v87_v11 = vsel %vm83_vm0, %v77_v5, 0.0  ;;  %v89_v13 = vsel %vm83_vm0, %v78_v6, 0.0  ;;  %v81_v17 = vld [vmem:[%s6467_s0 + $0x30] sm:$0xff] }
   0x4   :  { %115 = vmatpush.msra.mxu0 %v30_v1  ;;  %v86_v10 = vadd.f32 %v85_v8, %v84_v7  ;;  %170 = vmatpush.msra.mxu2 %v30_v1  ;;  %v28_v12 = vld [vmem:[%s6466_s2] sm:$0xff]  ;;  %v80_v14 = vld [vmem:[%s6467_s0 + $0x28] sm:$0xff]  ;;  %v91_v16 = vsel %vm83_vm0, %v79_v9, 0.0  ;;  %v82_v20 = vld [vmem:[%s6467_s0 + $0x38] sm:$0xff]  ;;  %v95_v22 = vsel %vm83_vm0, %v81_v17, 0.0 }
   0x5   :  { %v93_v19 = vsel %vm83_vm0, %v80_v14, 0.0  ;;  %v97_v24 = vsel %vm83_vm0, %v82_v20, 0.0  ;;  %v4095_v60 = vld [vmem:[%s6468_s4 + $0x10] sm:$0xf]  ;;  %v4402_v61 = vld [vmem:[%s6468_s4 + $0x14] sm:$0xf0] }
   0x6   :  { %116 = vmatpush.msra.mxu0 %v29_v4  ;;  %v88_v15 = vadd.f32 %v87_v11, %v86_v10  ;;  %171 = vmatpush.msra.mxu2 %v29_v4  ;;  %v4401_v62 = vld [vmem:[%s6468_s4 + $0x14] sm:$0xf]  ;;  %v4983_v63 = vor.u32 %v4402_v61, %v4095_v60  ;;  %v4097_v0 = vld [vmem:[%s6468_s4 + $0x18] sm:$0xf0]  ;;  %v4399_v7 = vld [vmem:[%s6468_s4 + $0x4] sm:$0xf] }
   0x7   :  { %v4405_v1 = vld [vmem:[%s6468_s4 + $0x34] sm:$0xf]  ;;  %v4403_v10 = vld [vmem:[%s6468_s4 + $0x24] sm:$0xf]  ;;  %v4113_v11 = vld [vmem:[%s6468_s4 + $0x28] sm:$0xf0] }
   0x8   :  { %117 = vmatpush.msra.mxu0 %v28_v12  ;;  %v90_v18 = vadd.f32 %v89_v13, %v88_v15  ;;  %172 = vmatpush.msra.mxu2 %v28_v12  ;;  %v5024_v13 = vor.u32 %v4403_v10, %v4113_v11 }
   0xa   :  { %v92_v21 = vadd.f32 %v91_v16, %v90_v18  ;;  %288 = vmatpush.bf16.msrb.mxu2 %v4983_v63  ;;  %6491 = vst [vmem:[#allocation9_spill] sm:$0xff] %v5024_v13  ;;  %v4406_v18 = vld [vmem:[%s6468_s4 + $0x34] sm:$0xf0] }
   0xc   :  { %v94_v23 = vadd.f32 %v93_v19, %v92_v21  ;;  %v4111_v19 = vld [vmem:[%s6468_s4 + $0x20] sm:$0xf]  ;;  %v4404_v21 = vld [vmem:[%s6468_s4 + $0x24] sm:$0xf0] }
   0xe   :  { %v96_v25 = vadd.f32 %v95_v22, %v94_v23  ;;  %v5047_v22 = vor.u32 %v4404_v21, %v4111_v19  ;;  %v4143_v21 = vld [vmem:[%s6470_s5 + $0x10] sm:$0xf] }
  0x10   :  { %v98_v26 = vadd.f32 %v97_v24, %v96_v25  ;;  %6493 = vst [vmem:[#allocation11_spill] sm:$0xff] %v5047_v22 }
  0x12   :  { %4083 = vmatmul.msk.f32.vlgmr.msra.gmra.mxu0 %vm83_vm0, %v98_v26 }
  0x8f   :  { %v119_v27 = vpop.f32.mrf.mxu0 }
  0x90   :  { %v122_v28 = vmul.f32 0.015625, %v119_v27 }
  0x92   :  { %v4933_v29 = vsub.f32 %v75_v2, %v122_v28  ;;  %v4935_v30 = vsub.f32 %v76_v3, %v122_v28  ;;  %v4937_v31 = vsub.f32 %v77_v5, %v122_v28  ;;  %v4939_v32 = vsub.f32 %v78_v6, %v122_v28  ;;  %v4121_v2 = vld [vmem:[%s6468_s4 + $0x38] sm:$0xf0]  ;;  %v4087_v5 = vld [vmem:[%s6468_s4] sm:$0xf]  ;;  %v4400_v6 = vld [vmem:[%s6468_s4 + $0x4] sm:$0xf0] }
  0x93   :  { %v4941_v33 = vsub.f32 %v79_v9, %v122_v28  ;;  %v4949_v37 = vsub.f32 %v80_v14, %v122_v28  ;;  %v4955_v42 = vsub.f32 %v81_v17, %v122_v28  ;;  %v4960_v46 = vsub.f32 %v82_v20, %v122_v28  ;;  %v4089_v9 = vld [vmem:[%s6468_s4 + $0x8] sm:$0xf0]  ;;  %v4119_v17 = vld [vmem:[%s6468_s4 + $0x30] sm:$0xf]  ;;  %v27_v28 = vld [vmem:[%s6469_s1] sm:$0x7] }
  0x94   :  { %v131_v34 = vmul.f32 %v4933_v29, %v4933_v29  ;;  %v132_v35 = vmul.f32 %v4935_v30, %v4935_v30  ;;  %v133_v36 = vmul.f32 %v4937_v31, %v4937_v31  ;;  %v134_v38 = vmul.f32 %v4939_v32, %v4939_v32 }
  0x95   :  { %v135_v43 = vmul.f32 %v4941_v33, %v4941_v33  ;;  %v136_v47 = vmul.f32 %v4949_v37, %v4949_v37  ;;  %v137_v50 = vmul.f32 %v4955_v42, %v4955_v42  ;;  %v138_v53 = vmul.f32 %v4960_v46, %v4960_v46 }
  0x96   :  { %v139_v39 = vsel %vm83_vm0, %v131_v34, 0.0  ;;  %v140_v40 = vsel %vm83_vm0, %v132_v35, 0.0  ;;  %v142_v44 = vsel %vm83_vm0, %v133_v36, 0.0  ;;  %v144_v48 = vsel %vm83_vm0, %v134_v38, 0.0 }
  0x97   :  { %v141_v41 = vadd.f32 %v140_v40, %v139_v39  ;;  %v146_v51 = vsel %vm83_vm0, %v135_v43, 0.0  ;;  %v148_v54 = vsel %vm83_vm0, %v136_v47, 0.0  ;;  %v150_v56 = vsel %vm83_vm0, %v137_v50, 0.0 }
  0x98   :  { %v152_v58 = vsel %vm83_vm0, %v138_v53, 0.0  ;;  %v4994_v3 = vor.u32 %v4401_v62, %v4097_v0  ;;  %v4996_v4 = vor.u32 %v4405_v1, %v4121_v2  ;;  %v5008_v8 = vor.u32 %v4400_v6, %v4087_v5 }
  0x99   :  { %v143_v45 = vadd.f32 %v142_v44, %v141_v41  ;;  %v5021_v12 = vor.u32 %v4399_v7, %v4089_v9  ;;  %v5041_v20 = vor.u32 %v4406_v18, %v4119_v17  ;;  %v5053_v35 = vperm.slane %v27_v28, 0 }
  0x9a   :  { %6488 = vst [vmem:[#allocation6_spill] sm:$0xff] %v4994_v3  ;;  %317 = vmatpush.bf16.msrb.mxu0 %v4994_v3  ;;  %4439 = vmatpush.bf16.msra.mxu3 %v4994_v3  ;;  %v5055_v38 = vperm.slane %v27_v28, 1  ;;  %v4408_v28 = vld [vmem:[%s6470_s5 + $0x4] sm:$0xf0] }
  0x9b   :  { %v145_v49 = vadd.f32 %v144_v48, %v143_v45  ;;  %6489 = vst [vmem:[#allocation7_spill] sm:$0xff] %v4996_v4  ;;  %417 = vmatpush.bf16.msra.mxu1 %v4996_v4  ;;  %289 = vmatpush.bf16.msrb.mxu2 %v5008_v8 }
  0x9c   :  { %6490 = vst [vmem:[#allocation8_spill] sm:$0xff] %v5021_v12 }
  0x9d   :  { %v147_v52 = vadd.f32 %v146_v51, %v145_v49  ;;  %6492 = vst [vmem:[#allocation10_spill] sm:$0xff] %v5041_v20 }
  0x9e   :  { %318 = vmatpush.bf16.msrb.mxu0 %v5021_v12  ;;  %4440 = vmatpush.bf16.msra.mxu3 %v5021_v12  ;;  %6494 = vst [vmem:[#allocation12_spill] sm:$0xff] %v5053_v35 }
  0x9f   :  { %v149_v55 = vadd.f32 %v148_v54, %v147_v52  ;;  %418 = vmatpush.bf16.msra.mxu1 %v5024_v13  ;;  %6495 = vst [vmem:[#allocation13_spill] sm:$0xff] %v5055_v38 }
  0xa1   :  { %v151_v57 = vadd.f32 %v150_v56, %v149_v55 }
  0xa2   :  { %4441 = vmatpush.bf16.msrb.mxu3 %v4996_v4  ;;  %388 = vmatpush.bf16.msra.mxu0 %v5041_v20 }
  0xa3   :  { %v153_v59 = vadd.f32 %v152_v58, %v151_v57 }
  0xa5   :  { %4084 = vmatmul.msk.f32.vlgmr.msra.gmra.mxu2 %vm83_vm0, %v153_v59 }
  0xa6   :  { %4442 = vmatpush.bf16.msrb.mxu3 %v5024_v13  ;;  %389 = vmatpush.bf16.msra.mxu0 %v5047_v22 }
 0x128   :  { %v174_v14 = vpop.f32.mrf.mxu2 }
 0x129   :  { %v177_v15 = vmul.f32 0.015625, %v174_v14  ;;  %v4159_v14 = vld [vmem:[%s6470_s5 + $0x30] sm:$0xf] }
 0x12b   :  { %v178_v16 = vadd.f32 1e-05, %v177_v15  ;;  %v4151_v15 = vld [vmem:[%s6470_s5 + $0x20] sm:$0xf] }
 0x12d   :  { %4445 = vrsqrt.f32 %v178_v16  ;;  %vm185_vm2 = vweird.f32 %v178_v16 }
 0x133   :  { %v4446_v23 = vpop.eup %4445 }
 0x134   :  { %v180_v24 = vmul.f32 %v4446_v23, %v178_v16  ;;  %vm186_vm1 = vweird.f32 %v4446_v23  ;;  %v4412_v16 = vld [vmem:[%s6470_s5 + $0x24] sm:$0xf0] }
 0x135   :  { %vm187_vm3 = vmor %vm185_vm2, %vm186_vm1  ;;  %v5106_v19 = vor.u32 %v4412_v16, %v4151_v15  ;;  %vm497_vm2 = vcmask 523264  }
 0x136   :  { %v181_v25 = vmul.f32 %v4446_v23, %v180_v24 }
 0x138   :  { %v182_v26 = vmul.f32 0.5, %v181_v25 }
 0x13a   :  { %v183_v27 = vsub.f32 1.5, %v182_v26 }
 0x13c   :  { %v184_v34 = vmul.f32 %v4446_v23, %v183_v27  ;;  %v4135_v27 = vld [vmem:[%s6470_s5] sm:$0xf] }
 0x13e   :  { %v188_v36 = vsel %vm187_vm3, %v4446_v23, %v184_v34  ;;  %v4410_v23 = vld [vmem:[%s6470_s5 + $0x14] sm:$0xf0] }
 0x13f   :  { %v189_v39 = vmul.f32 %v188_v36, %v4933_v29  ;;  %v190_v40 = vmul.f32 %v188_v36, %v4935_v30  ;;  %v191_v41 = vmul.f32 %v188_v36, %v4937_v31  ;;  %v192_v43 = vmul.f32 %v188_v36, %v4939_v32 }
 0x140   :  { %v193_v53 = vmul.f32 %v188_v36, %v4941_v33  ;;  %v194_v54 = vmul.f32 %v188_v36, %v4949_v37  ;;  %v195_v6 = vmul.f32 %v188_v36, %v4955_v42  ;;  %v196_v7 = vmul.f32 %v188_v36, %v4960_v46  ;;  %v4414_v42 = vld [vmem:[%s6470_s5 + $0x34] sm:$0xf0] }
 0x141   :  { %v198_v44 = vmul.f32 %v5053_v35, %v189_v39  ;;  %v199_v45 = vmul.f32 %v5053_v35, %v190_v40  ;;  %v200_v47 = vmul.f32 %v5053_v35, %v191_v41  ;;  %v201_v48 = vmul.f32 %v5053_v35, %v192_v43  ;;  %v4421_v41 = vld [vmem:[%s6470_s5 + $0x74] sm:$0xf]  ;;  %v4193_v43 = vld [vmem:[%s6470_s5 + $0x78] sm:$0xf0] }
 0x142   :  { %v202_v61 = vmul.f32 %v5053_v35, %v193_v53  ;;  %v203_v62 = vmul.f32 %v5053_v35, %v194_v54  ;;  %v204_v10 = vmul.f32 %v5053_v35, %v195_v6  ;;  %v205_v11 = vmul.f32 %v5053_v35, %v196_v7  ;;  %v4137_v6 = vld [vmem:[%s6470_s5 + $0x8] sm:$0xf0] }
 0x143   :  { %v207_v49 = vadd.f32 %v5055_v38, %v198_v44  ;;  %v208_v50 = vadd.f32 %v5055_v38, %v199_v45  ;;  %v209_v29 = vadd.f32 %v5055_v38, %v200_v47  ;;  %v210_v30 = vadd.f32 %v5055_v38, %v201_v48  ;;  %v4413_v45 = vld [vmem:[%s6470_s5 + $0x34] sm:$0xf]  ;;  %v4161_v47 = vld [vmem:[%s6470_s5 + $0x38] sm:$0xf0]  ;;  %v4419_v48 = vld [vmem:[%s6470_s5 + $0x64] sm:$0xf] }
 0x144   :  { %v211_v33 = vadd.f32 %v5055_v38, %v202_v61  ;;  %v212_v37 = vadd.f32 %v5055_v38, %v203_v62  ;;  %v5095_v46 = vor.u32 %v4414_v42, %v4159_v14  ;;  %v213_v17 = vadd.f32 %v5055_v38, %v204_v10  ;;  %v4415_v62 = vld [vmem:[%s6470_s5 + $0x44] sm:$0xf]  ;;  %v4167_v14 = vld [vmem:[%s6470_s5 + $0x40] sm:$0xf]  ;;  %v4416_v42 = vld [vmem:[%s6470_s5 + $0x44] sm:$0xf0] }
 0x145   :  { %v215_v51 = vpack.c.bf16 %v207_v49, %v207_v49  ;;  %v216_v31 = vpack.c.bf16 %v208_v50, %v208_v50  ;;  %v217_v52 = vpack.c.bf16 %v209_v29, %v209_v29  ;;  %v218_v32 = vpack.c.bf16 %v210_v30, %v210_v30  ;;  %v4185_v50 = vld [vmem:[%s6470_s5 + $0x68] sm:$0xf0]  ;;  %v4411_v29 = vld [vmem:[%s6470_s5 + $0x24] sm:$0xf] }
 0x146   :  { %v219_v0 = vpack.c.bf16 %v211_v33, %v211_v33  ;;  %v220_v1 = vpack.c.bf16 %v212_v37, %v212_v37  ;;  %v214_v18 = vadd.f32 %v5055_v38, %v205_v11  ;;  %505 = vmatpush.bf16.msra.mxu2 %v5095_v46  ;;  %v221_v24 = vpack.c.bf16 %v213_v17, %v213_v17  ;;  %v4153_v30 = vld [vmem:[%s6470_s5 + $0x28] sm:$0xf0]  ;;  %v4175_v37 = vld [vmem:[%s6470_s5 + $0x50] sm:$0xf] }
 0x147   :  { %v238_v55 = vunpack.c.l.b16 %v215_v51  ;;  %v239_v56 = vunpack.c.l.b16 %v216_v31  ;;  %v240_v57 = vunpack.c.l.b16 %v217_v52  ;;  %v241_v58 = vunpack.c.l.b16 %v218_v32  ;;  %v4191_v31 = vld [vmem:[%s6470_s5 + $0x70] sm:$0xf]  ;;  %v4422_v52 = vld [vmem:[%s6470_s5 + $0x74] sm:$0xf0]  ;;  %v4417_v32 = vld [vmem:[%s6470_s5 + $0x54] sm:$0xf] }
 0x148   :  { %v242_v2 = vunpack.c.l.b16 %v219_v0  ;;  %v243_v5 = vunpack.c.l.b16 %v220_v1  ;;  %v222_v25 = vpack.c.bf16 %v214_v18, %v214_v18  ;;  %v5115_v26 = vor.u32 %v4410_v23, %v4143_v21  ;;  %v4169_v33 = vld [vmem:[%s6470_s5 + $0x48] sm:$0xf0]  ;;  %v4418_v0 = vld [vmem:[%s6470_s5 + $0x54] sm:$0xf0] }
 0x149   :  { %v246_v59 = vpack.c.b16 %v239_v56, %v238_v55  ;;  %v247_v60 = vpack.c.b16 %v241_v58, %v240_v57  ;;  %v244_v34 = vunpack.c.l.b16 %v221_v24  ;;  %v5124_v39 = vor.u32 %v4408_v28, %v4135_v27  ;;  %v4177_v55 = vld [vmem:[%s6470_s5 + $0x58] sm:$0xf0]  ;;  %v4409_v56 = vld [vmem:[%s6470_s5 + $0x14] sm:$0xf] }
 0x14a   :  { %v5081_v9 = vpack.c.b16 %v243_v5, %v242_v2  ;;  %506 = vmatpush.bf16.msra.mxu2 %v5106_v19  ;;  %v245_v36 = vunpack.c.l.b16 %v222_v25  ;;  %v5141_v44 = vor.u32 %v4421_v41, %v4193_v43  ;;  %v5161_v49 = vor.u32 %v4413_v45, %v4161_v47  ;;  %v4145_v58 = vld [vmem:[%s6470_s5 + $0x18] sm:$0xf0]  ;;  %v4407_v5 = vld [vmem:[%s6470_s5 + $0x4] sm:$0xf] }
 0x14b   :  { %4101 = vmatmul.msk.bf16.vlgmr.msrb.gmra.mxu2 %vm83_vm0, %v246_v59  ;;  %4105 = vmatmul.msk.bf16.vlgmr.msrb.gmra.mxu0 %vm83_vm0, %v246_v59  ;;  %v5172_v51 = vor.u32 %v4419_v48, %v4185_v50  ;;  %v5184_v53 = vor.u32 %v4411_v29, %v4153_v30  ;;  %v5186_v54 = vor.u32 %v4422_v52, %v4191_v31  ;;  %v4846_v11 = vmov 0  }
 0x14c   :  { %4106 = vmatmul.msk.bf16.vlgmr.msra.gmra.mxu3 %vm83_vm0, %v247_v60  ;;  %4129 = vmatmul.msk.bf16.vlgmr.msra.gmra.mxu1 %vm83_vm0, %v246_v59  ;;  %v5126_v40 = vpack.c.b16 %v245_v36, %v244_v34  ;;  %v5195_v57 = vor.u32 %v4417_v32, %v4177_v55  ;;  %v5222_v1 = vor.u32 %v4409_v56, %v4145_v58 }
 0x14d   :  { %590 = vmatpush.bf16.msrb.mxu1 %v5141_v44  ;;  %518 = vmatpush.bf16.msra.mxu3 %v5161_v49  ;;  %v5225_v2 = vor.u32 %v4415_v62, %v4169_v33  ;;  %v5234_v7 = vor.u32 %v4418_v0, %v4175_v37  ;;  %v5237_v10 = vor.u32 %v4407_v5, %v4137_v6 }
 0x14e   :  { %507 = vmatpush.bf16.msra.mxu2 %v5115_v26  ;;  %577 = vmatpush.bf16.msrb.mxu0 %v5186_v54  ;;  %v5253_v15 = vor.u32 %v4416_v42, %v4167_v14 }
 0x151   :  { %591 = vmatpush.bf16.msrb.mxu1 %v5172_v51  ;;  %519 = vmatpush.bf16.msra.mxu3 %v5184_v53 }
 0x152   :  { %508 = vmatpush.bf16.msra.mxu2 %v5124_v39 }
 0x155   :  { %592 = vmatpush.bf16.msrb.mxu1 %v5195_v57  ;;  %520 = vmatpush.bf16.msra.mxu3 %v5222_v1 }
 0x156   :  { %735 = vmatpush.bf16.msrb.mxu2 %v5095_v46 }
 0x159   :  { %593 = vmatpush.bf16.msrb.mxu1 %v5225_v2  ;;  %521 = vmatpush.bf16.msra.mxu3 %v5237_v10 }
 0x15a   :  { %736 = vmatpush.bf16.msrb.mxu2 %v5106_v19 }
 0x15b   :  { %4102 = vmatmul.msk.bf16.gmra.mxu2 %vm83_vm0, %v247_v60  ;;  %4125 = vmatmul.msk.bf16.vlgmr.msra.gmra.mxu0 %vm83_vm0, %v246_v59  ;;  %v4183_v59 = vld [vmem:[%s6470_s5 + $0x60] sm:$0xf] }
 0x15c   :  { %4107 = vmatmul.msk.bf16.gmra.mxu3 %vm83_vm0, %v5081_v9  ;;  %594 = vmatmul.bf16.vlgmr.msrb.gmra.mxu1 %v4846_v11 }
 0x15d   :  { %783 = vmatpush.bf16.msra.mxu1 %v5141_v44 }
 0x15e   :  { %737 = vmatpush.bf16.msrb.mxu2 %v5115_v26 }
 0x161   :  { %784 = vmatpush.bf16.msra.mxu1 %v5172_v51 }
 0x162   :  { %738 = vmatpush.bf16.msrb.mxu2 %v5124_v39 }
 0x165   :  { %785 = vmatpush.bf16.msra.mxu1 %v5195_v57 }
 0x169   :  { %786 = vmatpush.bf16.msra.mxu1 %v5225_v2 }
 0x16b   :  { %4103 = vmatmul.msk.bf16.gmra.mxu2 %vm83_vm0, %v5081_v9  ;;  %4126 = vmatmul.msk.bf16.gmra.mxu0 %vm83_vm0, %v247_v60 }
 0x16c   :  { %4108 = vmatmul.msk.bf16.gmra.mxu3 %vm83_vm0, %v5126_v40 }
 0x16d   :  { %975 = vmatpush.bf16.msrb.mxu1 %v5141_v44 }
 0x171   :  { %976 = vmatpush.bf16.msrb.mxu1 %v5172_v51 }
 0x175   :  { %977 = vmatpush.bf16.msrb.mxu1 %v5195_v57 }
 0x179   :  { %978 = vmatpush.bf16.msrb.mxu1 %v5225_v2 }
 0x17b   :  { %4104 = vmatmul.msk.bf16.gmra.mxu2 %vm83_vm0, %v5126_v40  ;;  %4127 = vmatmul.msk.bf16.gmra.mxu0 %vm83_vm0, %v5081_v9 }
 0x17c   :  { %4130 = vmatmul.msk.bf16.vlgmr.msrb.gmra.mxu3 %vm83_vm0, %v247_v60  ;;  %v4420_v60 = vld [vmem:[%s6470_s5 + $0x64] sm:$0xf0] }
 0x17d   :  { %v5207_v61 = vor.u32 %v4420_v60, %v4183_v59  ;;  %748 = vmatpush.bf16.msrb.mxu3 %v5161_v49 }
 0x17f   :  { %578 = vmatpush.bf16.msrb.mxu0 %v5207_v61 }
 0x181   :  { %749 = vmatpush.bf16.msrb.mxu3 %v5184_v53 }
 0x183   :  { %579 = vmatpush.bf16.msrb.mxu0 %v5234_v7 }
 0x185   :  { %750 = vmatpush.bf16.msrb.mxu3 %v5222_v1 }
 0x187   :  { %580 = vmatpush.bf16.msrb.mxu0 %v5253_v15 }
 0x189   :  { %751 = vmatpush.bf16.msrb.mxu3 %v5237_v10 }
 0x18b   :  { %4128 = vmatmul.msk.bf16.gmra.mxu0 %vm83_vm0, %v5126_v40  ;;  %509 = vmatmul.bf16.vlgmr.msra.gmra.mxu2 %v4846_v11 }
 0x18c   :  { %4131 = vmatmul.msk.bf16.gmra.mxu3 %vm83_vm0, %v5081_v9  ;;  %927 = vmatpush.bf16.msra.mxu2 %v5095_v46  ;;  %v32_v9 = vld [vmem:[%s6471_s3] sm:$0xf]  ;;  %s4847_s3 = smov 64  }
 0x18d   :  { %770 = vmatpush.bf16.msra.mxu0 %v5186_v54  ;;  %v225_v16 = vperm.slane %v32_v9, 2  ;;  %v224_v17 = vperm.slane %v32_v9, 0 }
 0x18f   :  { %v5288_v21 = vperm.slane %v225_v16, 0  ;;  %v5290_v23 = vperm.slane %v224_v17, 0  ;;  %v357_v16 = vperm.slane %v32_v9, 3  ;;  %v356_v17 = vperm.slane %v32_v9, 1 }
 0x190   :  { %928 = vmatpush.bf16.msra.mxu2 %v5106_v19 }
 0x191   :  { %771 = vmatpush.bf16.msra.mxu0 %v5207_v61 }
 0x194   :  { %929 = vmatpush.bf16.msra.mxu2 %v5115_v26 }
 0x195   :  { %772 = vmatpush.bf16.msra.mxu0 %v5234_v7 }
 0x198   :  { %930 = vmatpush.bf16.msra.mxu2 %v5124_v39 }
 0x199   :  { %773 = vmatpush.bf16.msra.mxu0 %v5253_v15 }
 0x19b   :  { %581 = vmatmul.bf16.vlgmr.msrb.gmra.mxu0 %v4846_v11 }
 0x19c   :  { %4132 = vmatmul.msk.bf16.gmra.mxu3 %vm83_vm0, %v5126_v40 }
 0x19d   :  { %962 = vmatpush.bf16.msrb.mxu0 %v5186_v54 }
 0x1a1   :  { %963 = vmatpush.bf16.msrb.mxu0 %v5207_v61 }
 0x1a5   :  { %964 = vmatpush.bf16.msrb.mxu0 %v5234_v7 }
 0x1a9   :  { %965 = vmatpush.bf16.msrb.mxu0 %v5253_v15 }
 0x1ac   :  { %522 = vmatmul.bf16.vlgmr.msra.gmra.mxu3 %v4846_v11 }
 0x1ad   :  { %940 = vmatpush.bf16.msra.mxu3 %v5161_v49 }
 0x1b1   :  { %941 = vmatpush.bf16.msra.mxu3 %v5184_v53 }
 0x1b5   :  { %942 = vmatpush.bf16.msra.mxu3 %v5222_v1 }
 0x1b9   :  { %943 = vmatpush.bf16.msra.mxu3 %v5237_v10 }
 0x1c8   :  { %v320_v18 = vpop.f32.mrf.mxu0 }
 0x1c9   :  { %v321_v25 = vadd.f32 %v320_v18, %v5288_v21  ;;  %v5322_v33 = vpop.f32.mrf.mxu1  ;;  %v5336_v18 = vperm.slane %v357_v16, 1 }
 0x1ca   :  { %6497 = vst [vmem:[#allocation15_spill] sm:$0xff] %v5322_v33 }
 0x1ce   :  { %v291_v24 = vpop.f32.mrf.mxu2 }
 0x1cf   :  { %v292_v27 = vadd.f32 %v291_v24, %v5290_v23  ;;  %v325_v28 = vpop.f32.mrf.mxu3  ;;  %v5338_v24 = vperm.slane %v356_v17, 1 }
 0x1d0   :  { %v5294_v34 = vpop.f32.mrf.mxu0  ;;  %v326_v47 = vadd.f32 %v325_v28, %v5288_v21 }
 0x1d1   :  { %v5296_v36 = vpack.c.bf16 %v321_v25, %v292_v27  ;;  %v5332_v11 = vpop.f32.mrf.mxu1 }
 0x1d6   :  { %v5298_v40 = vpop.f32.mrf.mxu2 }
 0x1d7   :  { %v5300_v41 = vpop.f32.mrf.mxu3 }
 0x1d8   :  { %v5302_v43 = vpop.f32.mrf.mxu0 }
 0x1d9   :  { %6496 = vst [vmem:[#allocation14_spill] sm:$0xff] %v5302_v43  ;;  %v5342_v28 = vpop.f32.mrf.mxu1 }
 0x1da   :  { %6500 = vst [vmem:[#allocation18_spill] sm:$0xff] %v5342_v28 }
 0x1de   :  { %v296_v45 = vpop.f32.mrf.mxu2 }
 0x1df   :  { %v297_v48 = vadd.f32 %v296_v45, %v5290_v23  ;;  %v330_v50 = vpop.f32.mrf.mxu3 }
 0x1e0   :  { %v5306_v29 = vpop.f32.mrf.mxu0  ;;  %v331_v56 = vadd.f32 %v330_v50, %v5288_v21 }
 0x1e1   :  { %v5308_v30 = vpack.c.bf16 %v326_v47, %v297_v48 }
 0x1e6   :  { %v5310_v31 = vpop.f32.mrf.mxu2 }
 0x1e7   :  { %v5312_v52 = vpop.f32.mrf.mxu3 }
 0x1e8   :  { %v5314_v32 = vpop.f32.mrf.mxu0 }
 0x1ee   :  { %v301_v55 = vpop.f32.mrf.mxu2 }
 0x1ef   :  { %v302_v58 = vadd.f32 %v301_v55, %v5290_v23  ;;  %v5318_v59 = vpop.f32.mrf.mxu3 }
 0x1f0   :  { %v398_v60 = vpop.f32.mrf.mxu0 }
 0x1f1   :  { %v5320_v62 = vpack.c.bf16 %v331_v56, %v302_v58  ;;  %v399_v45 = vadd.f32 %v398_v60, %v5338_v24  ;;  %v597_v56 = vpop.f32.mrf.mxu1 }
 0x1f6   :  { %v5324_v37 = vpop.f32.mrf.mxu2 }
 0x1f7   :  { %v5326_v0 = vpop.f32.mrf.mxu3 }
 0x1f8   :  { %6498 = vst [vmem:[#allocation16_spill] sm:$0xff] %v5326_v0  ;;  %v5328_v5 = vpop.f32.mrf.mxu0 }
 0x1fe   :  { %v5330_v6 = vpop.f32.mrf.mxu2 }
 0x1ff   :  { %v5334_v14 = vpop.f32.mrf.mxu3 }
 0x200   :  { %v403_v42 = vpop.f32.mrf.mxu0 }
 0x201   :  { %v404_v38 = vadd.f32 %v403_v42, %v5338_v24  ;;  %v528_v42 = vunpack.c.h.bf16 %v5296_v36 }
 0x206   :  { %v5340_v25 = vpop.f32.mrf.mxu2 }
 0x207   :  { %6499 = vst [vmem:[#allocation17_spill] sm:$0xff] %v5340_v25  ;;  %v427_v27 = vpop.f32.mrf.mxu3 }
 0x208   :  { %v428_v47 = vadd.f32 %v427_v27, %v5336_v18  ;;  %v5346_v48 = vpop.f32.mrf.mxu0 }
 0x20a   :  { %v5348_v50 = vpack.c.bf16 %v428_v47, %v399_v45 }
 0x20e   :  { %v5350_v55 = vpop.f32.mrf.mxu2 }
 0x20f   :  { %6501 = vst [vmem:[#allocation19_spill] sm:$0xff] %v5350_v55  ;;  %v5352_v9 = vpop.f32.mrf.mxu3 }
 0x210   :  { %v408_v58 = vpop.f32.mrf.mxu0 }
 0x211   :  { %v409_v43 = vadd.f32 %v408_v58, %v5338_v24 }
 0x216   :  { %v512_v16 = vpop.f32.mrf.mxu2 }
 0x217   :  { %v432_v17 = vpop.f32.mrf.mxu3 }
 0x218   :  { %v433_v35 = vadd.f32 %v432_v17, %v5336_v18  ;;  %v5356_v33 = vpop.f32.mrf.mxu0 }
 0x219   :  { %6502 = vst [vmem:[#allocation20_spill] sm:$0xff] %v5356_v33 }
 0x21a   :  { %v5358_v60 = vpack.c.bf16 %v433_v35, %v404_v38 }
 0x21f   :  { %v5360_v27 = vpop.f32.mrf.mxu3 }
 0x220   :  { %v584_v45 = vpop.f32.mrf.mxu0 }
 0x221   :  { %v527_v45 = vunpack.c.l.bf16 %v5296_v36 }
 0x227   :  { %v437_v47 = vpop.f32.mrf.mxu3 }
 0x228   :  { %v438_v0 = vadd.f32 %v437_v47, %v5336_v18 }
 0x22a   :  { %v447_v56 = vpack.c.bf16 %v438_v0, %v409_v43 }
 0x22c   :  { %v600_v25 = vunpack.c.h.bf16 %v447_v56 }
 0x22e   :  { %v5365_v16 = vadd.f32 %v600_v25, %v5342_v28  ;;  %v599_v25 = vunpack.c.l.bf16 %v447_v56  ;;  %v529_v28 = vadd.f32 %v527_v45, %v5350_v55 }
 0x22f   :  { %v5368_v17 = vpop.f32.mrf.mxu3 }
 0x230   :  { %6503 = vst [vmem:[#allocation21_spill] sm:$0xff] %v5368_v17  ;;  %4447 = vtanh.f32 %v5365_v16  ;;  %v5372_v35 = vadd.f32 %v528_v42, %v5368_v17  ;;  %v601_v58 = vadd.f32 %v599_v25, %v5356_v33  ;;  %v4197_v42 = vmul.f32 -1.442695, %v529_v28 }
 0x232   :  { %4449 = vtanh.f32 %v5372_v35  ;;  %v4199_v47 = vmul.f32 -1.442695, %v601_v58 }
 0x234   :  { %4451 = vpow2.f32 %v4199_v47 }
 0x235   :  { %4453 = vpow2.f32 %v4197_v42 }
 0x236   :  { %v4448_v38 = vpop.eup %4447 }
 0x237   :  { %694 = vrot.lane.b32.xlu0 %v4448_v38, %s4847_s3  ;;  %v525_v43 = vpop.f32.mrf.mxu3 }
 0x238   :  { %v4450_v0 = vpop.eup %4449 }
 0x239   :  { %683 = vrot.lane.b32.xlu1 %v4450_v0, %s4847_s3 }
 0x23a   :  { %v4452_v17 = vpop.eup %4451 }
 0x23b   :  { %v648_v13 = vadd.f32 1.0, %v4452_v17  ;;  %v4454_v22 = vpop.eup %4453 }
 0x23c   :  { %v609_v38 = vadd.f32 1.0, %v4454_v22 }
 0x23d   :  { %4455 = vrcp.f32 %v648_v13  ;;  %v661_v58 = vand.u32 2147483648, %v648_v13  ;;  %vm655_vm5 = vweird.f32 %v648_v13  ;;  %v659_v28 = vand.u32 2147483647, %v648_v13 }
 0x23e   :  { %4457 = vrcp.f32 %v609_v38  ;;  %v622_v22 = vand.u32 2147483648, %v609_v38  ;;  %vm616_vm9 = vweird.f32 %v609_v38 }
 0x23f   :  { %v662_v17 = vor.u32 1.1754944e-38, %v661_v58  ;;  %vm660_vm8 = vcmp.eq.f32.partialorder %v659_v28, 8.507059e+37  ;;  %v4200_v28 = vmul.f32 -1.442695, %v5365_v16 }
 0x243   :  { %v4456_v43 = vpop.eup %4455 }
 0x244   :  { %v651_v4 = vmul.f32 %v4456_v43, %v648_v13  ;;  %v4458_v0 = vpop.eup %4457  ;;  %vm656_vm4 = vweird.f32 %v4456_v43 }
 0x245   :  { %v612_v20 = vmul.f32 %v4458_v0, %v609_v38  ;;  %vm657_vm6 = vmor %vm655_vm5, %vm656_vm4  ;;  %vm617_vm7 = vweird.f32 %v4458_v0 }
 0x246   :  { %v652_v56 = vsub.f32 1.0, %v651_v4  ;;  %v620_v4 = vand.u32 2147483647, %v609_v38  ;;  %vm618_vm10 = vmor %vm616_vm9, %vm617_vm7 }
 0x247   :  { %v613_v33 = vsub.f32 1.0, %v612_v20 }
 0x248   :  { %v653_v25 = vmul.f32 %v4456_v43, %v652_v56  ;;  %v623_v56 = vor.u32 1.1754944e-38, %v622_v22  ;;  %vm621_vm11 = vcmp.eq.f32.partialorder %v620_v4, 8.507059e+37 }
 0x249   :  { %v614_v45 = vmul.f32 %v4458_v0, %v613_v33 }
 0x24a   :  { %v654_v36 = vadd.f32 %v4456_v43, %v653_v25 }
 0x24b   :  { %v615_v42 = vadd.f32 %v4458_v0, %v614_v45 }
 0x24c   :  { %v658_v47 = vsel %vm657_vm6, %v4456_v43, %v654_v36  ;;  %vm717_vm6 = vcmask 519168  }
 0x24d   :  { %v663_v12 = vsel %vm660_vm8, %v662_v17, %v658_v47  ;;  %v619_v20 = vsel %vm618_vm10, %v4458_v0, %v615_v42 }
 0x24e   :  { %v624_v13 = vsel %vm621_vm11, %v623_v56, %v619_v20  ;;  %v692_v43 = vmul.f32 0.0, %v663_v12 }
 0x24f   :  { %v681_v38 = vmul.f32 0.0, %v624_v13 }
 0x2a9   :  { %v695_v55 = vpop.permute.xlu0 %694 }
 0x2aa   :  { %v697_v3 = vmul.f32 %v695_v55, %v663_v12  ;;  %v4198_v12 = vmul.f32 -1.442695, %v5372_v35 }
 0x2ab   :  { %v684_v33 = vpop.permute.xlu1 %683 }
 0x2ac   :  { %699 = vrot.lane.b32.xlu0 %v697_v3, %s4847_s3  ;;  %v686_v25 = vmul.f32 %v684_v33, %v624_v13 }
 0x2ae   :  { %688 = vrot.lane.b32.xlu1 %v686_v25, %s4847_s3 }
 0x31e   :  { %v700_v36 = vpop.permute.xlu0 %699 }
 0x31f   :  { %v5382_v58 = vadd.f32 %v700_v36, %v692_v43 }
 0x320   :  { %v689_v45 = vpop.permute.xlu1 %688 }
 0x321   :  { %4459 = vtanh.f32 %v5382_v58  ;;  %v5385_v55 = vadd.f32 %v689_v45, %v681_v38 }
 0x323   :  { %4461 = vtanh.f32 %v5385_v55 }
 0x324   :  { %4463 = vpow2.f32 %v4200_v28 }
 0x325   :  { %4465 = vpow2.f32 %v4198_v12 }
 0x327   :  { %v4460_v0 = vpop.eup %4459 }
 0x328   :  { %712 = vrot.lane.b32.xlu2 %v4460_v0, %s4847_s3 }
 0x329   :  { %v4462_v3 = vpop.eup %4461 }
 0x32a   :  { %v4464_v47 = vpop.eup %4463 }
 0x32b   :  { %v649_v17 = vadd.f32 1.0, %v4464_v47  ;;  %v4466_v42 = vpop.eup %4465 }
 0x32c   :  { %v610_v22 = vadd.f32 1.0, %v4466_v42 }
 0x32d   :  { %4467 = vrcp.f32 %v649_v17  ;;  %v676_v16 = vand.u32 2147483648, %v649_v17  ;;  %vm670_vm13 = vweird.f32 %v649_v17  ;;  %v674_v45 = vand.u32 2147483647, %v649_v17 }
 0x32e   :  { %4469 = vrcp.f32 %v610_v22  ;;  %v637_v42 = vand.u32 2147483648, %v610_v22  ;;  %vm631_vm3 = vweird.f32 %v610_v22 }
 0x32f   :  { %v677_v0 = vor.u32 1.1754944e-38, %v676_v16  ;;  %vm675_vm15 = vcmp.eq.f32.partialorder %v674_v45, 8.507059e+37 }
 0x330   :  { %705 = vrot.lane.b32.xlu2 %v4462_v3, %s4847_s3 }
 0x333   :  { %v4468_v4 = vpop.eup %4467 }
 0x334   :  { %v666_v20 = vmul.f32 %v4468_v4, %v649_v17  ;;  %v4470_v33 = vpop.eup %4469  ;;  %vm671_vm12 = vweird.f32 %v4468_v4 }
 0x335   :  { %v627_v25 = vmul.f32 %v4470_v33, %v610_v22  ;;  %vm672_vm14 = vmor %vm670_vm13, %vm671_vm12  ;;  %vm632_vm1 = vweird.f32 %v4470_v33 }
 0x336   :  { %v667_v56 = vsub.f32 1.0, %v666_v20  ;;  %vm633_vm4 = vmor %vm631_vm3, %vm632_vm1 }
 0x337   :  { %v628_v36 = vsub.f32 1.0, %v627_v25 }
 0x338   :  { %v668_v13 = vmul.f32 %v4468_v4, %v667_v56  ;;  %v635_v56 = vand.u32 2147483647, %v610_v22 }
 0x339   :  { %v629_v38 = vmul.f32 %v4470_v33, %v628_v36  ;;  %v407_v36 = vadd.f32 %v5346_v48, %v5338_v24 }
 0x33a   :  { %v669_v43 = vadd.f32 %v4468_v4, %v668_v13  ;;  %vm636_vm5 = vcmp.eq.f32.partialorder %v635_v56, 8.507059e+37 }
 0x33b   :  { %v630_v47 = vadd.f32 %v4470_v33, %v629_v38 }
 0x33c   :  { %v673_v35 = vsel %vm672_vm14, %v4468_v4, %v669_v43  ;;  %v638_v4 = vor.u32 1.1754944e-38, %v637_v42 }
 0x33d   :  { %v678_v3 = vsel %vm675_vm15, %v677_v0, %v673_v35  ;;  %v634_v17 = vsel %vm633_vm4, %v4470_v33, %v630_v47  ;;  %v436_v33 = vadd.f32 %v5360_v27, %v5336_v18 }
 0x33e   :  { %v639_v13 = vsel %vm636_vm5, %v638_v4, %v634_v17 }
 0x33f   :  { %v446_v16 = vpack.c.bf16 %v436_v33, %v407_v36 }
 0x341   :  { %v793_v45 = vunpack.c.h.bf16 %v446_v16 }
 0x382   :  { %v713_v28 = vpop.permute.xlu2 %712 }
 0x383   :  { %v715_v12 = vmul.f32 %v713_v28, %v678_v3  ;;  %v294_v3 = vadd.f32 %v5298_v40, %v5290_v23  ;;  %v323_v28 = vadd.f32 %v5294_v34, %v5288_v21  ;;  %v792_v34 = vunpack.c.l.bf16 %v446_v16 }
 0x385   :  { %v5392_v20 = vpack.c.bf16 %v715_v12, %v715_v12  ;;  %v341_v42 = vpack.c.bf16 %v323_v28, %v294_v3 }
 0x387   :  { %4203 = vmatmul.msk.bf16.vlgmr.msra.gmra.mxu0 %vm497_vm2, %v5392_v20  ;;  %4204 = vmatmul.msk.bf16.vlgmr.msra.gmra.mxu1 %vm497_vm2, %v5392_v20  ;;  %v757_v48 = vunpack.c.l.bf16 %v341_v42  ;;  %v758_v56 = vunpack.c.h.bf16 %v341_v42 }
 0x388   :  { %1167 = vmatpush.bf16.msra.mxu1 %v5141_v44  ;;  %1154 = vmatpush.bf16.msra.mxu0 %v5186_v54 }
 0x38a   :  { %v706_v25 = vpop.permute.xlu2 %705 }
 0x38b   :  { %v708_v43 = vmul.f32 %v706_v25, %v639_v13 }
 0x38c   :  { %1168 = vmatpush.bf16.msra.mxu1 %v5172_v51  ;;  %1155 = vmatpush.bf16.msra.mxu0 %v5207_v61 }
 0x38d   :  { %v709_v22 = vpack.c.bf16 %v708_v43, %v708_v43 }
 0x38f   :  { %4201 = vmatmul.msk.bf16.vlgmr.msrb.gmra.mxu2 %vm497_vm2, %v709_v22  ;;  %4202 = vmatmul.msk.bf16.vlgmr.msrb.gmra.mxu3 %vm497_vm2, %v709_v22  ;;  %718 = vst.msk [vmem:[#allocation5] sm:$0xf] %vm717_vm6, %v709_v22 }
 0x390   :  { %1119 = vmatpush.bf16.msrb.mxu2 %v5095_v46  ;;  %1132 = vmatpush.bf16.msrb.mxu3 %v5161_v49 }
 0x391   :  { %1169 = vmatpush.bf16.msra.mxu1 %v5195_v57  ;;  %1156 = vmatpush.bf16.msra.mxu0 %v5234_v7 }
 0x394   :  { %1120 = vmatpush.bf16.msrb.mxu2 %v5106_v19  ;;  %1133 = vmatpush.bf16.msrb.mxu3 %v5184_v53 }
 0x395   :  { %1170 = vmatpush.bf16.msra.mxu1 %v5225_v2  ;;  %1157 = vmatpush.bf16.msra.mxu0 %v5253_v15 }
 0x398   :  { %1121 = vmatpush.bf16.msrb.mxu2 %v5115_v26  ;;  %1134 = vmatpush.bf16.msrb.mxu3 %v5222_v1 }
 0x39c   :  { %1122 = vmatpush.bf16.msrb.mxu2 %v5124_v39  ;;  %1135 = vmatpush.bf16.msrb.mxu3 %v5237_v10 }
 0x404   :  { %v775_v35 = vpop.f32.mrf.mxu0  ;;  %v788_v38 = vpop.f32.mrf.mxu1 }
 0x405   :  { %v5421_v0 = vadd.f32 %v793_v45, %v788_v38  ;;  %v794_v33 = vadd.f32 %v792_v34, %v775_v35 }
 0x407   :  { %4471 = vtanh.f32 %v5421_v0  ;;  %v4207_v36 = vmul.f32 -1.442695, %v794_v33 }
 0x40c   :  { %v777_v12 = vpop.f32.mrf.mxu0  ;;  %v790_v47 = vpop.f32.mrf.mxu1 }
 0x40d   :  { %v4472_v27 = vpop.eup %4471 }
 0x40e   :  { %887 = vrot.lane.b32.xlu0 %v4472_v27, %s4847_s3 }
 0x412   :  { %v740_v17 = vpop.f32.mrf.mxu2  ;;  %v753_v4 = vpop.f32.mrf.mxu3 }
 0x413   :  { %v759_v13 = vadd.f32 %v757_v48, %v740_v17  ;;  %v5429_v25 = vadd.f32 %v758_v56, %v753_v4 }
 0x415   :  { %4473 = vtanh.f32 %v5429_v25  ;;  %v4205_v45 = vmul.f32 -1.442695, %v759_v13 }
 0x416   :  { %4475 = vpow2.f32 %v4207_v36 }
 0x417   :  { %4477 = vpow2.f32 %v4205_v45 }
 0x41a   :  { %v742_v43 = vpop.f32.mrf.mxu2  ;;  %v755_v40 = vpop.f32.mrf.mxu3 }
 0x41b   :  { %v4474_v22 = vpop.eup %4473 }
 0x41c   :  { %876 = vrot.lane.b32.xlu2 %v4474_v22, %s4847_s3  ;;  %v4476_v38 = vpop.eup %4475 }
 0x41d   :  { %v841_v3 = vadd.f32 1.0, %v4476_v38  ;;  %v4478_v28 = vpop.eup %4477 }
 0x41e   :  { %v802_v12 = vadd.f32 1.0, %v4478_v28 }
 0x41f   :  { %4479 = vrcp.f32 %v841_v3  ;;  %v854_v16 = vand.u32 2147483648, %v841_v3  ;;  %vm848_vm8 = vweird.f32 %v841_v3  ;;  %v852_v35 = vand.u32 2147483647, %v841_v3 }
 0x420   :  { %4481 = vrcp.f32 %v802_v12  ;;  %v815_v38 = vand.u32 2147483648, %v802_v12  ;;  %vm809_vm12 = vweird.f32 %v802_v12  ;;  %v813_v28 = vand.u32 2147483647, %v802_v12 }
 0x421   :  { %v855_v22 = vor.u32 1.1754944e-38, %v854_v16  ;;  %vm853_vm10 = vcmp.eq.f32.partialorder %v852_v35, 8.507059e+37 }
 0x422   :  { %vm814_vm14 = vcmp.eq.f32.partialorder %v813_v28, 8.507059e+37 }
 0x425   :  { %v4480_v47 = vpop.eup %4479 }
 0x426   :  { %v844_v27 = vmul.f32 %v4480_v47, %v841_v3  ;;  %v4482_v48 = vpop.eup %4481  ;;  %vm849_vm7 = vweird.f32 %v4480_v47 }
 0x427   :  { %v805_v56 = vmul.f32 %v4482_v48, %v802_v12  ;;  %vm850_vm9 = vmor %vm848_vm8, %vm849_vm7  ;;  %vm810_vm11 = vweird.f32 %v4482_v48 }
 0x428   :  { %v845_v42 = vsub.f32 1.0, %v844_v27  ;;  %vm811_vm13 = vmor %vm809_vm12, %vm810_vm11 }
 0x429   :  { %v806_v4 = vsub.f32 1.0, %v805_v56  ;;  %v816_v56 = vor.u32 1.1754944e-38, %v815_v38 }
 0x42a   :  { %v846_v17 = vmul.f32 %v4480_v47, %v845_v42 }
 0x42b   :  { %v807_v13 = vmul.f32 %v4482_v48, %v806_v4 }
 0x42c   :  { %v847_v43 = vadd.f32 %v4480_v47, %v846_v17 }
 0x42d   :  { %v808_v36 = vadd.f32 %v4482_v48, %v807_v13 }
 0x42e   :  { %v851_v40 = vsel %vm850_vm9, %v4480_v47, %v847_v43 }
 0x42f   :  { %v856_v33 = vsel %vm853_vm10, %v855_v22, %v851_v40  ;;  %v812_v27 = vsel %vm811_vm13, %v4482_v48, %v808_v36 }
 0x430   :  { %v817_v3 = vsel %vm814_vm14, %v816_v56, %v812_v27  ;;  %v885_v47 = vmul.f32 %v856_v33, %v5382_v58  ;;  %v4206_v58 = vmul.f32 -1.442695, %v5429_v25 }
 0x431   :  { %v874_v12 = vmul.f32 %v817_v3, %v5385_v55 }
 0x476   :  { %v877_v42 = vpop.permute.xlu2 %876 }
 0x477   :  { %v879_v17 = vmul.f32 %v877_v42, %v817_v3 }
 0x480   :  { %v888_v34 = vpop.permute.xlu0 %887 }
 0x481   :  { %v890_v45 = vmul.f32 %v888_v34, %v856_v33  ;;  %v4208_v34 = vmul.f32 -1.442695, %v5421_v0 }
 0x483   :  { %892 = vrot.lane.b32.xlu1 %v890_v45, %s4847_s3 }
 0x48b   :  { %881 = vrot.lane.b32.xlu1 %v879_v17, %s4847_s3 }
 0x4f5   :  { %v893_v4 = vpop.permute.xlu1 %892 }
 0x4f6   :  { %v5436_v43 = vadd.f32 %v893_v4, %v885_v47 }
 0x4f8   :  { %4483 = vtanh.f32 %v5436_v43 }
 0x4fd   :  { %v882_v16 = vpop.permute.xlu1 %881 }
 0x4fe   :  { %v4484_v35 = vpop.eup %4483  ;;  %v5440_v13 = vadd.f32 %v882_v16, %v874_v12 }
 0x4ff   :  { %905 = vrot.lane.b32.xlu0 %v4484_v35, %s4847_s3 }
 0x500   :  { %4485 = vtanh.f32 %v5440_v13 }
 0x501   :  { %4487 = vpow2.f32 %v4206_v58 }
 0x506   :  { %v4486_v48 = vpop.eup %4485 }
 0x507   :  { %898 = vrot.lane.b32.xlu2 %v4486_v48, %s4847_s3  ;;  %v4488_v40 = vpop.eup %4487 }
 0x508   :  { %v803_v22 = vadd.f32 1.0, %v4488_v40 }
 0x50a   :  { %4489 = vrcp.f32 %v803_v22  ;;  %v830_v56 = vand.u32 2147483648, %v803_v22  ;;  %vm824_vm1 = vweird.f32 %v803_v22  ;;  %v828_v25 = vand.u32 2147483647, %v803_v22 }
 0x50b   :  { %4491 = vpow2.f32 %v4208_v34 }
 0x50c   :  { %v831_v47 = vor.u32 1.1754944e-38, %v830_v56  ;;  %vm829_vm4 = vcmp.eq.f32.partialorder %v828_v25, 8.507059e+37 }
 0x510   :  { %v4490_v55 = vpop.eup %4489 }
 0x511   :  { %v4492_v33 = vpop.eup %4491  ;;  %v820_v36 = vmul.f32 %v4490_v55, %v803_v22  ;;  %vm825_vm15 = vweird.f32 %v4490_v55 }
 0x512   :  { %v842_v45 = vadd.f32 1.0, %v4492_v33  ;;  %vm826_vm3 = vmor %vm824_vm1, %vm825_vm15 }
 0x513   :  { %v821_v38 = vsub.f32 1.0, %v820_v36 }
 0x514   :  { %4493 = vrcp.f32 %v842_v45  ;;  %v869_v40 = vand.u32 2147483648, %v842_v45  ;;  %vm863_vm7 = vweird.f32 %v842_v45  ;;  %v867_v22 = vand.u32 2147483647, %v842_v45 }
 0x515   :  { %v822_v28 = vmul.f32 %v4490_v55, %v821_v38 }
 0x516   :  { %vm868_vm9 = vcmp.eq.f32.partialorder %v867_v22, 8.507059e+37 }
 0x517   :  { %v823_v27 = vadd.f32 %v4490_v55, %v822_v28 }
 0x519   :  { %v827_v3 = vsel %vm826_vm3, %v4490_v55, %v823_v27  ;;  %v870_v55 = vor.u32 1.1754944e-38, %v869_v40  ;;  %v950_v27 = vunpack.c.h.bf16 %v5308_v30  ;;  %v984_v40 = vunpack.c.l.bf16 %v5358_v60 }
 0x51a   :  { %v4494_v42 = vpop.eup %4493  ;;  %v832_v0 = vsel %vm829_vm4, %v831_v47, %v827_v3 }
 0x51b   :  { %v859_v17 = vmul.f32 %v4494_v42, %v842_v45  ;;  %vm864_vm5 = vweird.f32 %v4494_v42  ;;  %v949_v45 = vunpack.c.l.bf16 %v5308_v30 }
 0x51c   :  { %vm865_vm8 = vmor %vm863_vm7, %vm864_vm5 }
 0x51d   :  { %v860_v16 = vsub.f32 1.0, %v859_v17 }
 0x51f   :  { %v861_v48 = vmul.f32 %v4494_v42, %v860_v16 }
 0x521   :  { %v862_v58 = vadd.f32 %v4494_v42, %v861_v48 }
 0x523   :  { %v866_v34 = vsel %vm865_vm8, %v4494_v42, %v862_v58 }
 0x524   :  { %v871_v33 = vsel %vm868_vm9, %v870_v55, %v866_v34 }
 0x561   :  { %v899_v4 = vpop.permute.xlu2 %898 }
 0x562   :  { %v901_v12 = vmul.f32 %v899_v4, %v832_v0  ;;  %v985_v4 = vunpack.c.h.bf16 %v5358_v60 }
 0x564   :  { %v902_v35 = vpack.c.bf16 %v901_v12, %v901_v12 }
 0x566   :  { %4209 = vmatmul.msk.bf16.vlgmr.msra.gmra.mxu2 %vm497_vm2, %v902_v35  ;;  %4210 = vmatmul.msk.bf16.vlgmr.msra.gmra.mxu3 %vm497_vm2, %v902_v35  ;;  %911 = vst.msk [vmem:[#allocation5 + $0x4] sm:$0xf] %vm717_vm6, %v902_v35 }
 0x567   :  { %1311 = vmatpush.bf16.msra.mxu2 %v5095_v46  ;;  %1324 = vmatpush.bf16.msra.mxu3 %v5161_v49 }
 0x56b   :  { %1312 = vmatpush.bf16.msra.mxu2 %v5106_v19  ;;  %1325 = vmatpush.bf16.msra.mxu3 %v5184_v53 }
 0x56f   :  { %1313 = vmatpush.bf16.msra.mxu2 %v5115_v26  ;;  %1326 = vmatpush.bf16.msra.mxu3 %v5222_v1 }
 0x571   :  { %v906_v36 = vpop.permute.xlu0 %905 }
 0x572   :  { %v908_v38 = vmul.f32 %v906_v36, %v871_v33 }
 0x573   :  { %1314 = vmatpush.bf16.msra.mxu2 %v5124_v39  ;;  %1327 = vmatpush.bf16.msra.mxu3 %v5237_v10 }
 0x574   :  { %v5458_v28 = vpack.c.bf16 %v908_v38, %v908_v38 }
 0x576   :  { %4211 = vmatmul.msk.bf16.vlgmr.msrb.gmra.mxu0 %vm497_vm2, %v5458_v28  ;;  %4212 = vmatmul.msk.bf16.vlgmr.msrb.gmra.mxu1 %vm497_vm2, %v5458_v28 }
 0x577   :  { %1359 = vmatpush.bf16.msrb.mxu1 %v5141_v44  ;;  %1346 = vmatpush.bf16.msrb.mxu0 %v5186_v54 }
 0x57b   :  { %1360 = vmatpush.bf16.msrb.mxu1 %v5172_v51  ;;  %1347 = vmatpush.bf16.msrb.mxu0 %v5207_v61 }
 0x57f   :  { %1361 = vmatpush.bf16.msrb.mxu1 %v5195_v57  ;;  %1348 = vmatpush.bf16.msrb.mxu0 %v5234_v7 }
 0x583   :  { %1362 = vmatpush.bf16.msrb.mxu1 %v5225_v2  ;;  %1349 = vmatpush.bf16.msrb.mxu0 %v5253_v15 }
 0x5e9   :  { %v932_v42 = vpop.f32.mrf.mxu2  ;;  %v945_v56 = vpop.f32.mrf.mxu3 }
 0x5ea   :  { %v951_v25 = vadd.f32 %v949_v45, %v932_v42  ;;  %v5474_v3 = vadd.f32 %v950_v27, %v945_v56 }
 0x5ec   :  { %4495 = vtanh.f32 %v5474_v3  ;;  %v4213_v55 = vmul.f32 -1.442695, %v951_v25 }
 0x5f1   :  { %v934_v17 = vpop.f32.mrf.mxu2  ;;  %v947_v47 = vpop.f32.mrf.mxu3 }
 0x5f2   :  { %v4496_v0 = vpop.eup %4495 }
 0x5f3   :  { %v967_v12 = vpop.f32.mrf.mxu0  ;;  %v980_v16 = vpop.f32.mrf.mxu1  ;;  %1068 = vrot.lane.b32.xlu2 %v4496_v0, %s4847_s3 }
 0x5f4   :  { %v5479_v35 = vadd.f32 %v985_v4, %v980_v16  ;;  %v986_v22 = vadd.f32 %v984_v40, %v967_v12 }
 0x5f6   :  { %4497 = vtanh.f32 %v5479_v35  ;;  %v4215_v34 = vmul.f32 -1.442695, %v986_v22 }
 0x5f8   :  { %4499 = vpow2.f32 %v4215_v34 }
 0x5f9   :  { %4501 = vpow2.f32 %v4213_v55 }
 0x5fb   :  { %v969_v30 = vpop.f32.mrf.mxu0  ;;  %v982_v48 = vpop.f32.mrf.mxu1 }
 0x5fc   :  { %v4498_v58 = vpop.eup %4497 }
 0x5fd   :  { %1079 = vrot.lane.b32.xlu0 %v4498_v58, %s4847_s3 }
 0x5fe   :  { %v4500_v33 = vpop.eup %4499 }
 0x5ff   :  { %v1033_v36 = vadd.f32 1.0, %v4500_v33  ;;  %v4502_v38 = vpop.eup %4501 }
 0x600   :  { %v994_v45 = vadd.f32 1.0, %v4502_v38 }
 0x601   :  { %4503 = vrcp.f32 %v1033_v36  ;;  %v1046_v60 = vand.u32 2147483648, %v1033_v36  ;;  %vm1040_vm11 = vweird.f32 %v1033_v36  ;;  %v1044_v12 = vand.u32 2147483647, %v1033_v36 }
 0x602   :  { %4505 = vrcp.f32 %v994_v45  ;;  %v1007_v55 = vand.u32 2147483648, %v994_v45  ;;  %vm1001_vm15 = vweird.f32 %v994_v45  ;;  %v1005_v33 = vand.u32 2147483647, %v994_v45 }
 0x603   :  { %v1047_v48 = vor.u32 1.1754944e-38, %v1046_v60  ;;  %vm1045_vm13 = vcmp.eq.f32.partialorder %v1044_v12, 8.507059e+37 }
 0x604   :  { %vm1006_vm3 = vcmp.eq.f32.partialorder %v1005_v33, 8.507059e+37 }
 0x607   :  { %v4504_v27 = vpop.eup %4503 }
 0x608   :  { %v1036_v42 = vmul.f32 %v4504_v27, %v1033_v36  ;;  %v4506_v17 = vpop.eup %4505  ;;  %vm1041_vm10 = vweird.f32 %v4504_v27 }
 0x609   :  { %v997_v47 = vmul.f32 %v4506_v17, %v994_v45  ;;  %vm1042_vm12 = vmor %vm1040_vm11, %vm1041_vm10  ;;  %vm1002_vm14 = vweird.f32 %v4506_v17 }
 0x60a   :  { %v1037_v56 = vsub.f32 1.0, %v1036_v42  ;;  %vm1003_vm1 = vmor %vm1001_vm15, %vm1002_vm14 }
 0x60b   :  { %v998_v4 = vsub.f32 1.0, %v997_v47 }
 0x60c   :  { %v1038_v0 = vmul.f32 %v4504_v27, %v1037_v56  ;;  %v1008_v56 = vor.u32 1.1754944e-38, %v1007_v55 }
 0x60d   :  { %v999_v25 = vmul.f32 %v4506_v17, %v998_v4 }
 0x60e   :  { %v1039_v16 = vadd.f32 %v4504_v27, %v1038_v0 }
 0x60f   :  { %v1000_v22 = vadd.f32 %v4506_v17, %v999_v25 }
 0x610   :  { %v1043_v30 = vsel %vm1042_vm12, %v4504_v27, %v1039_v16 }
 0x611   :  { %v1048_v40 = vsel %vm1045_vm13, %v1047_v48, %v1043_v30  ;;  %v1004_v38 = vsel %vm1003_vm1, %v4506_v17, %v1000_v22  ;;  %v4216_v48 = vmul.f32 -1.442695, %v5479_v35 }
 0x612   :  { %v1009_v36 = vsel %vm1006_vm3, %v1008_v56, %v1004_v38  ;;  %v1077_v27 = vmul.f32 %v1048_v40, %v5436_v43  ;;  %v4214_v43 = vmul.f32 -1.442695, %v5474_v3 }
 0x613   :  { %v1066_v45 = vmul.f32 %v1009_v36, %v5440_v13 }
 0x64d   :  { %v1069_v42 = vpop.permute.xlu2 %1068 }
 0x64e   :  { %v1071_v47 = vmul.f32 %v1069_v42, %v1009_v36 }
 0x66f   :  { %v1080_v58 = vpop.permute.xlu0 %1079 }
 0x670   :  { %v1082_v34 = vmul.f32 %v1080_v58, %v1048_v40 }
 0x672   :  { %1084 = vrot.lane.b32.xlu1 %v1082_v34, %s4847_s3 }
 0x67a   :  { %1073 = vrot.lane.b32.xlu1 %v1071_v47, %s4847_s3 }
 0x6e4   :  { %v1085_v0 = vpop.permute.xlu1 %1084 }
 0x6e5   :  { %v5487_v4 = vadd.f32 %v1085_v0, %v1077_v27 }
 0x6e7   :  { %4507 = vtanh.f32 %v5487_v4 }
 0x6ec   :  { %v1074_v16 = vpop.permute.xlu1 %1073 }
 0x6ed   :  { %v4508_v60 = vpop.eup %4507  ;;  %v5491_v12 = vadd.f32 %v1074_v16, %v1066_v45 }
 0x6ee   :  { %1097 = vrot.lane.b32.xlu0 %v4508_v60, %s4847_s3 }
 0x6ef   :  { %4509 = vtanh.f32 %v5491_v12 }
 0x6f0   :  { %4511 = vpow2.f32 %v4214_v43 }
 0x6f5   :  { %v4510_v17 = vpop.eup %4509 }
 0x6f6   :  { %1090 = vrot.lane.b32.xlu2 %v4510_v17, %s4847_s3  ;;  %v4512_v25 = vpop.eup %4511 }
 0x6f7   :  { %v995_v30 = vadd.f32 1.0, %v4512_v25 }
 0x6f9   :  { %4513 = vrcp.f32 %v995_v30  ;;  %v1022_v42 = vand.u32 2147483648, %v995_v30  ;;  %vm1016_vm5 = vweird.f32 %v995_v30  ;;  %v1020_v3 = vand.u32 2147483647, %v995_v30 }
 0x6fa   :  { %4515 = vpow2.f32 %v4216_v48 }
 0x6fb   :  { %v1023_v47 = vor.u32 1.1754944e-38, %v1022_v42  ;;  %vm1021_vm8 = vcmp.eq.f32.partialorder %v1020_v3, 8.507059e+37 }
 0x6ff   :  { %v4514_v13 = vpop.eup %4513 }
 0x700   :  { %v4516_v58 = vpop.eup %4515  ;;  %v1012_v40 = vmul.f32 %v4514_v13, %v995_v30  ;;  %vm1017_vm4 = vweird.f32 %v4514_v13 }
 0x701   :  { %v1034_v22 = vadd.f32 1.0, %v4516_v58  ;;  %vm1018_vm7 = vmor %vm1016_vm5, %vm1017_vm4 }
 0x702   :  { %v1013_v34 = vsub.f32 1.0, %v1012_v40 }
 0x703   :  { %4517 = vrcp.f32 %v1034_v22  ;;  %v1061_v43 = vand.u32 2147483648, %v1034_v22  ;;  %vm1055_vm10 = vweird.f32 %v1034_v22  ;;  %v1059_v25 = vand.u32 2147483647, %v1034_v22 }
 0x704   :  { %v1014_v55 = vmul.f32 %v4514_v13, %v1013_v34 }
 0x705   :  { %v1062_v48 = vor.u32 1.1754944e-38, %v1061_v43  ;;  %vm1060_vm12 = vcmp.eq.f32.partialorder %v1059_v25, 8.507059e+37 }
 0x706   :  { %v1015_v33 = vadd.f32 %v4514_v13, %v1014_v55  ;;  %v328_v55 = vadd.f32 %v5300_v41, %v5288_v21 }
 0x708   :  { %v1019_v56 = vsel %vm1018_vm7, %v4514_v13, %v1015_v33 }
 0x709   :  { %v4518_v38 = vpop.eup %4517  ;;  %v1024_v35 = vsel %vm1021_vm8, %v1023_v47, %v1019_v56 }
 0x70a   :  { %v1051_v36 = vmul.f32 %v4518_v38, %v1034_v22  ;;  %vm1056_vm9 = vweird.f32 %v4518_v38  ;;  %v299_v22 = vadd.f32 %v5310_v31, %v5290_v23 }
 0x70b   :  { %vm1057_vm11 = vmor %vm1055_vm10, %vm1056_vm9 }
 0x70c   :  { %v1052_v45 = vsub.f32 1.0, %v1051_v36  ;;  %v343_v33 = vpack.c.bf16 %v328_v55, %v299_v22  ;;  %v431_v36 = vadd.f32 %v5352_v9, %v5336_v18 }
 0x70e   :  { %v1053_v60 = vmul.f32 %v4518_v38, %v1052_v45  ;;  %v1142_v42 = vunpack.c.h.bf16 %v343_v33 }
 0x710   :  { %v1054_v17 = vadd.f32 %v4518_v38, %v1053_v60 }
 0x712   :  { %v1058_v30 = vsel %vm1057_vm11, %v4518_v38, %v1054_v17  ;;  %v1141_v38 = vunpack.c.l.bf16 %v343_v33 }
 0x713   :  { %v1063_v13 = vsel %vm1060_vm12, %v1062_v48, %v1058_v30 }
 0x750   :  { %v1091_v27 = vpop.permute.xlu2 %1090 }
 0x751   :  { %v1093_v0 = vmul.f32 %v1091_v27, %v1024_v35  ;;  %v402_v27 = vadd.f32 %v5328_v5, %v5338_v24 }
 0x753   :  { %v1094_v16 = vpack.c.bf16 %v1093_v0, %v1093_v0  ;;  %v444_v31 = vpack.c.bf16 %v431_v36, %v402_v27 }
 0x755   :  { %4217 = vmatmul.msk.bf16.vlgmr.msrb.gmra.mxu2 %vm497_vm2, %v1094_v16  ;;  %4218 = vmatmul.msk.bf16.vlgmr.msrb.gmra.mxu3 %vm497_vm2, %v1094_v16  ;;  %1103 = vst.msk [vmem:[#allocation5 + $0x8] sm:$0xf] %vm717_vm6, %v1094_v16  ;;  %v1177_v16 = vunpack.c.h.bf16 %v444_v31  ;;  %v1176_v5 = vunpack.c.l.bf16 %v444_v31 }
 0x756   :  { %1501 = vmatpush.bf16.msrb.mxu2 %v5095_v46  ;;  %1514 = vmatpush.bf16.msrb.mxu3 %v5161_v49 }
 0x75a   :  { %1502 = vmatpush.bf16.msrb.mxu2 %v5106_v19  ;;  %1515 = vmatpush.bf16.msrb.mxu3 %v5184_v53 }
 0x75e   :  { %1503 = vmatpush.bf16.msrb.mxu2 %v5115_v26  ;;  %1516 = vmatpush.bf16.msrb.mxu3 %v5222_v1 }
 0x760   :  { %v1098_v58 = vpop.permute.xlu0 %1097 }
 0x761   :  { %v1100_v40 = vmul.f32 %v1098_v58, %v1063_v13 }
 0x762   :  { %1504 = vmatpush.bf16.msrb.mxu2 %v5124_v39  ;;  %1517 = vmatpush.bf16.msrb.mxu3 %v5237_v10 }
 0x763   :  { %v5509_v34 = vpack.c.bf16 %v1100_v40, %v1100_v40 }
 0x765   :  { %4219 = vmatmul.msk.bf16.vlgmr.msra.gmra.mxu0 %vm497_vm2, %v5509_v34  ;;  %4220 = vmatmul.msk.bf16.vlgmr.msra.gmra.mxu1 %vm497_vm2, %v5509_v34 }
 0x766   :  { %1549 = vmatpush.bf16.msra.mxu1 %v5141_v44  ;;  %1536 = vmatpush.bf16.msra.mxu0 %v5186_v54 }
 0x76a   :  { %1550 = vmatpush.bf16.msra.mxu1 %v5172_v51  ;;  %1537 = vmatpush.bf16.msra.mxu0 %v5207_v61 }
 0x76e   :  { %1551 = vmatpush.bf16.msra.mxu1 %v5195_v57  ;;  %1538 = vmatpush.bf16.msra.mxu0 %v5234_v7 }
 0x772   :  { %1552 = vmatpush.bf16.msra.mxu1 %v5225_v2  ;;  %1539 = vmatpush.bf16.msra.mxu0 %v5253_v15 }
 0x7d8   :  { %v1124_v3 = vpop.f32.mrf.mxu2  ;;  %v1137_v56 = vpop.f32.mrf.mxu3 }
 0x7d9   :  { %v1143_v47 = vadd.f32 %v1141_v38, %v1124_v3  ;;  %v5529_v35 = vadd.f32 %v1142_v42, %v1137_v56 }
 0x7db   :  { %4519 = vtanh.f32 %v5529_v35  ;;  %v4221_v58 = vmul.f32 -1.442695, %v1143_v47 }
 0x7e0   :  { %v1126_v0 = vpop.f32.mrf.mxu2  ;;  %v1139_v45 = vpop.f32.mrf.mxu3 }
 0x7e1   :  { %v4520_v41 = vpop.eup %4519 }
 0x7e2   :  { %v1159_v60 = vpop.f32.mrf.mxu0  ;;  %v1172_v17 = vpop.f32.mrf.mxu1  ;;  %1260 = vrot.lane.b32.xlu2 %v4520_v41, %s4847_s3 }
 0x7e3   :  { %v5535_v43 = vadd.f32 %v1177_v16, %v1172_v17  ;;  %v1178_v48 = vadd.f32 %v1176_v5, %v1159_v60 }
 0x7e5   :  { %4521 = vtanh.f32 %v5535_v43  ;;  %v4223_v13 = vmul.f32 -1.442695, %v1178_v48 }
 0x7e7   :  { %4523 = vpow2.f32 %v4223_v13 }
 0x7e8   :  { %4525 = vpow2.f32 %v4221_v58 }
 0x7ea   :  { %v1161_v9 = vpop.f32.mrf.mxu0  ;;  %v1174_v25 = vpop.f32.mrf.mxu1 }
 0x7eb   :  { %v4522_v30 = vpop.eup %4521 }
 0x7ec   :  { %1271 = vrot.lane.b32.xlu0 %v4522_v30, %s4847_s3 }
 0x7ed   :  { %v4524_v40 = vpop.eup %4523 }
 0x7ee   :  { %v1225_v22 = vadd.f32 1.0, %v4524_v40  ;;  %v4526_v55 = vpop.eup %4525 }
 0x7ef   :  { %v1186_v33 = vadd.f32 1.0, %v4526_v55 }
 0x7f0   :  { %4527 = vrcp.f32 %v1225_v22  ;;  %v1238_v31 = vand.u32 2147483648, %v1225_v22  ;;  %vm1232_vm14 = vweird.f32 %v1225_v22  ;;  %v1236_v41 = vand.u32 2147483647, %v1225_v22 }
 0x7f1   :  { %4529 = vrcp.f32 %v1186_v33  ;;  %v1199_v5 = vand.u32 2147483648, %v1186_v33  ;;  %vm1193_vm4 = vweird.f32 %v1186_v33  ;;  %v1197_v48 = vand.u32 2147483647, %v1186_v33 }
 0x7f2   :  { %v1239_v60 = vor.u32 1.1754944e-38, %v1238_v31  ;;  %vm1237_vm1 = vcmp.eq.f32.partialorder %v1236_v41, 8.507059e+37  ;;  %v4224_v41 = vmul.f32 -1.442695, %v5535_v43 }
 0x7f3   :  { %v1200_v40 = vor.u32 1.1754944e-38, %v1199_v5  ;;  %vm1198_vm7 = vcmp.eq.f32.partialorder %v1197_v48, 8.507059e+37 }
 0x7f6   :  { %v4528_v38 = vpop.eup %4527 }
 0x7f7   :  { %v1228_v42 = vmul.f32 %v4528_v38, %v1225_v22  ;;  %v4530_v56 = vpop.eup %4529  ;;  %vm1233_vm13 = vweird.f32 %v4528_v38 }
 0x7f8   :  { %v1189_v36 = vmul.f32 %v4530_v56, %v1186_v33  ;;  %vm1234_vm15 = vmor %vm1232_vm14, %vm1233_vm13  ;;  %vm1194_vm3 = vweird.f32 %v4530_v56 }
 0x7f9   :  { %v1229_v3 = vsub.f32 1.0, %v1228_v42  ;;  %vm1195_vm5 = vmor %vm1193_vm4, %vm1194_vm3 }
 0x7fa   :  { %v1190_v0 = vsub.f32 1.0, %v1189_v36 }
 0x7fb   :  { %v1230_v27 = vmul.f32 %v4528_v38, %v1229_v3 }
 0x7fc   :  { %v1191_v47 = vmul.f32 %v4530_v56, %v1190_v0 }
 0x7fd   :  { %v1231_v45 = vadd.f32 %v4528_v38, %v1230_v27 }
 0x7fe   :  { %v1192_v25 = vadd.f32 %v4530_v56, %v1191_v47 }
 0x7ff   :  { %v1235_v16 = vsel %vm1234_vm15, %v4528_v38, %v1231_v45 }
 0x800   :  { %v1240_v9 = vsel %vm1237_vm1, %v1239_v60, %v1235_v16  ;;  %v1196_v13 = vsel %vm1195_vm5, %v4530_v56, %v1192_v25 }
 0x801   :  { %v1201_v22 = vsel %vm1198_vm7, %v1200_v40, %v1196_v13  ;;  %v1269_v38 = vmul.f32 %v1240_v9, %v5487_v4  ;;  %v4222_v4 = vmul.f32 -1.442695, %v5529_v35 }
 0x802   :  { %v1258_v33 = vmul.f32 %v1201_v22, %v5491_v12 }
 0x83c   :  { %v1261_v58 = vpop.permute.xlu2 %1260 }
 0x83d   :  { %v1263_v55 = vmul.f32 %v1261_v58, %v1201_v22 }
 0x85e   :  { %v1272_v17 = vpop.permute.xlu0 %1271 }
 0x85f   :  { %v1274_v30 = vmul.f32 %v1272_v17, %v1240_v9 }
 0x861   :  { %1276 = vrot.lane.b32.xlu1 %v1274_v30, %s4847_s3 }
 0x869   :  { %1265 = vrot.lane.b32.xlu1 %v1263_v55, %s4847_s3 }
 0x8d3   :  { %v1277_v42 = vpop.permute.xlu1 %1276 }
 0x8d4   :  { %v5542_v3 = vadd.f32 %v1277_v42, %v1269_v38 }
 0x8d6   :  { %4531 = vtanh.f32 %v5542_v3 }
 0x8db   :  { %v1266_v36 = vpop.permute.xlu1 %1265 }
 0x8dc   :  { %v4532_v27 = vpop.eup %4531  ;;  %v5546_v0 = vadd.f32 %v1266_v36, %v1258_v33 }
 0x8dd   :  { %1289 = vrot.lane.b32.xlu0 %v4532_v27, %s4847_s3 }
 0x8de   :  { %4533 = vtanh.f32 %v5546_v0 }
 0x8df   :  { %4535 = vpow2.f32 %v4222_v4 }
 0x8e4   :  { %v4534_v56 = vpop.eup %4533 }
 0x8e5   :  { %1282 = vrot.lane.b32.xlu2 %v4534_v56, %s4847_s3  ;;  %v4536_v45 = vpop.eup %4535 }
 0x8e6   :  { %v1187_v31 = vadd.f32 1.0, %v4536_v45 }
 0x8e8   :  { %4537 = vrcp.f32 %v1187_v31  ;;  %v1214_v5 = vand.u32 2147483648, %v1187_v31  ;;  %vm1208_vm9 = vweird.f32 %v1187_v31  ;;  %v1212_v35 = vand.u32 2147483647, %v1187_v31 }
 0x8e9   :  { %4539 = vpow2.f32 %v4224_v41 }
 0x8ea   :  { %v1215_v58 = vor.u32 1.1754944e-38, %v1214_v5  ;;  %vm1213_vm11 = vcmp.eq.f32.partialorder %v1212_v35, 8.507059e+37 }
 0x8ee   :  { %v4538_v12 = vpop.eup %4537 }
 0x8ef   :  { %v4540_v47 = vpop.eup %4539  ;;  %v1204_v16 = vmul.f32 %v4538_v12, %v1187_v31  ;;  %vm1209_vm8 = vweird.f32 %v4538_v12 }
 0x8f0   :  { %v1226_v60 = vadd.f32 1.0, %v4540_v47  ;;  %vm1210_vm10 = vmor %vm1208_vm9, %vm1209_vm8  ;;  %v1333_v47 = vunpack.c.l.bf16 %v5320_v62 }
 0x8f1   :  { %v1205_v17 = vsub.f32 1.0, %v1204_v16  ;;  %v1334_v16 = vunpack.c.h.bf16 %v5320_v62 }
 0x8f2   :  { %4541 = vrcp.f32 %v1226_v60  ;;  %v1253_v36 = vand.u32 2147483648, %v1226_v60  ;;  %vm1247_vm13 = vweird.f32 %v1226_v60  ;;  %v1251_v27 = vand.u32 2147483647, %v1226_v60 }
 0x8f3   :  { %v1206_v9 = vmul.f32 %v4538_v12, %v1205_v17 }
 0x8f4   :  { %v1254_v4 = vor.u32 1.1754944e-38, %v1253_v36  ;;  %vm1252_vm15 = vcmp.eq.f32.partialorder %v1251_v27, 8.507059e+37 }
 0x8f5   :  { %v1207_v25 = vadd.f32 %v4538_v12, %v1206_v9 }
 0x8f7   :  { %v1211_v48 = vsel %vm1210_vm10, %v4538_v12, %v1207_v25 }
 0x8f8   :  { %v4542_v30 = vpop.eup %4541  ;;  %v1216_v43 = vsel %vm1213_vm11, %v1215_v58, %v1211_v48  ;;  %v1369_v48 = vunpack.c.h.bf16 %v5348_v50 }
 0x8f9   :  { %v1243_v13 = vmul.f32 %v4542_v30, %v1226_v60  ;;  %vm1248_vm12 = vweird.f32 %v4542_v30 }
 0x8fa   :  { %vm1249_vm14 = vmor %vm1247_vm13, %vm1248_vm12 }
 0x8fb   :  { %v1244_v55 = vsub.f32 1.0, %v1243_v13 }
 0x8fd   :  { %v1245_v42 = vmul.f32 %v4542_v30, %v1244_v55  ;;  %v1368_v55 = vunpack.c.l.bf16 %v5348_v50 }
 0x8ff   :  { %v1246_v33 = vadd.f32 %v4542_v30, %v1245_v42 }
 0x901   :  { %v1250_v56 = vsel %vm1249_vm14, %v4542_v30, %v1246_v33 }
 0x902   :  { %v1255_v45 = vsel %vm1252_vm15, %v1254_v4, %v1250_v56 }
 0x93f   :  { %v1283_v40 = vpop.permute.xlu2 %1282 }
 0x940   :  { %v1285_v22 = vmul.f32 %v1283_v40, %v1216_v43 }
 0x942   :  { %v1286_v38 = vpack.c.bf16 %v1285_v22, %v1285_v22 }
 0x944   :  { %4225 = vmatmul.msk.bf16.vlgmr.msra.gmra.mxu2 %vm497_vm2, %v1286_v38  ;;  %4226 = vmatmul.msk.bf16.vlgmr.msra.gmra.mxu3 %vm497_vm2, %v1286_v38  ;;  %1295 = vst.msk [vmem:[#allocation5 + $0xc] sm:$0xf] %vm717_vm6, %v1286_v38 }
 0x945   :  { %1691 = vmatpush.bf16.msra.mxu2 %v5095_v46  ;;  %1704 = vmatpush.bf16.msra.mxu3 %v5161_v49 }
 0x949   :  { %1692 = vmatpush.bf16.msra.mxu2 %v5106_v19  ;;  %1705 = vmatpush.bf16.msra.mxu3 %v5184_v53 }
 0x94d   :  { %1693 = vmatpush.bf16.msra.mxu2 %v5115_v26  ;;  %1706 = vmatpush.bf16.msra.mxu3 %v5222_v1 }
 0x94f   :  { %v1290_v31 = vpop.permute.xlu0 %1289 }
 0x950   :  { %v1292_v41 = vmul.f32 %v1290_v31, %v1255_v45 }
 0x951   :  { %1694 = vmatpush.bf16.msra.mxu2 %v5124_v39  ;;  %1707 = vmatpush.bf16.msra.mxu3 %v5237_v10 }
 0x952   :  { %v5564_v12 = vpack.c.bf16 %v1292_v41, %v1292_v41 }
 0x954   :  { %4227 = vmatmul.msk.bf16.vlgmr.msrb.gmra.mxu0 %vm497_vm2, %v5564_v12  ;;  %4228 = vmatmul.msk.bf16.vlgmr.msrb.gmra.mxu1 %vm497_vm2, %v5564_v12 }
 0x955   :  { %1739 = vmatpush.bf16.msrb.mxu1 %v5141_v44  ;;  %1726 = vmatpush.bf16.msrb.mxu0 %v5186_v54 }
 0x959   :  { %1740 = vmatpush.bf16.msrb.mxu1 %v5172_v51  ;;  %1727 = vmatpush.bf16.msrb.mxu0 %v5207_v61 }
 0x95d   :  { %1741 = vmatpush.bf16.msrb.mxu1 %v5195_v57  ;;  %1728 = vmatpush.bf16.msrb.mxu0 %v5234_v7 }
 0x961   :  { %1742 = vmatpush.bf16.msrb.mxu1 %v5225_v2  ;;  %1729 = vmatpush.bf16.msrb.mxu0 %v5253_v15 }
 0x9c7   :  { %v1316_v60 = vpop.f32.mrf.mxu2  ;;  %v1329_v17 = vpop.f32.mrf.mxu3 }
 0x9c8   :  { %v1335_v9 = vadd.f32 %v1333_v47, %v1316_v60  ;;  %v5580_v25 = vadd.f32 %v1334_v16, %v1329_v17 }
 0x9ca   :  { %4543 = vtanh.f32 %v5580_v25  ;;  %v4229_v33 = vmul.f32 -1.442695, %v1335_v9 }
 0x9cf   :  { %v1318_v30 = vpop.f32.mrf.mxu2  ;;  %v1331_v5 = vpop.f32.mrf.mxu3 }
 0x9d0   :  { %v4544_v35 = vpop.eup %4543 }
 0x9d1   :  { %v1351_v13 = vpop.f32.mrf.mxu0  ;;  %v1364_v58 = vpop.f32.mrf.mxu1  ;;  %1452 = vrot.lane.b32.xlu2 %v4544_v35, %s4847_s3 }
 0x9d2   :  { %v5585_v43 = vadd.f32 %v1369_v48, %v1364_v58  ;;  %v1370_v38 = vadd.f32 %v1368_v55, %v1351_v13 }
 0x9d4   :  { %4545 = vtanh.f32 %v5585_v43  ;;  %v4231_v42 = vmul.f32 -1.442695, %v1370_v38 }
 0x9d6   :  { %4547 = vpow2.f32 %v4231_v42 }
 0x9d7   :  { %4549 = vpow2.f32 %v4229_v33 }
 0x9d9   :  { %v1353_v62 = vpop.f32.mrf.mxu0  ;;  %v1366_v40 = vpop.f32.mrf.mxu1 }
 0x9da   :  { %v4546_v22 = vpop.eup %4545 }
 0x9db   :  { %1463 = vrot.lane.b32.xlu0 %v4546_v22, %s4847_s3 }
 0x9dc   :  { %v4548_v36 = vpop.eup %4547 }
 0x9dd   :  { %v1417_v27 = vadd.f32 1.0, %v4548_v36  ;;  %v4550_v56 = vpop.eup %4549 }
 0x9de   :  { %v1378_v4 = vadd.f32 1.0, %v4550_v56 }
 0x9df   :  { %4551 = vrcp.f32 %v1417_v27  ;;  %v1430_v50 = vand.u32 2147483648, %v1417_v27  ;;  %vm1424_vm3 = vweird.f32 %v1417_v27  ;;  %v1428_v5 = vand.u32 2147483647, %v1417_v27 }
 0x9e0   :  { %4553 = vrcp.f32 %v1378_v4  ;;  %v1391_v22 = vand.u32 2147483648, %v1378_v4  ;;  %vm1385_vm8 = vweird.f32 %v1378_v4  ;;  %v1389_v55 = vand.u32 2147483647, %v1378_v4 }
 0x9e1   :  { %v1431_v48 = vor.u32 1.1754944e-38, %v1430_v50  ;;  %vm1429_vm5 = vcmp.eq.f32.partialorder %v1428_v5, 8.507059e+37  ;;  %v4232_v50 = vmul.f32 -1.442695, %v5585_v43 }
 0x9e2   :  { %v1392_v33 = vor.u32 1.1754944e-38, %v1391_v22  ;;  %vm1390_vm10 = vcmp.eq.f32.partialorder %v1389_v55, 8.507059e+37 }
 0x9e5   :  { %v4552_v45 = vpop.eup %4551 }
 0x9e6   :  { %v1420_v31 = vmul.f32 %v4552_v45, %v1417_v27  ;;  %v4554_v47 = vpop.eup %4553  ;;  %vm1425_vm1 = vweird.f32 %v4552_v45 }
 0x9e7   :  { %v1381_v16 = vmul.f32 %v4554_v47, %v1378_v4  ;;  %vm1426_vm4 = vmor %vm1424_vm3, %vm1425_vm1  ;;  %vm1386_vm7 = vweird.f32 %v4554_v47 }
 0x9e8   :  { %v1421_v41 = vsub.f32 1.0, %v1420_v31  ;;  %vm1387_vm9 = vmor %vm1385_vm8, %vm1386_vm7 }
 0x9e9   :  { %v1382_v17 = vsub.f32 1.0, %v1381_v16 }
 0x9ea   :  { %v1422_v60 = vmul.f32 %v4552_v45, %v1421_v41 }
 0x9eb   :  { %v1383_v9 = vmul.f32 %v4554_v47, %v1382_v17 }
 0x9ec   :  { %v1423_v30 = vadd.f32 %v4552_v45, %v1422_v60 }
 0x9ed   :  { %v1384_v62 = vadd.f32 %v4554_v47, %v1383_v9 }
 0x9ee   :  { %v1427_v35 = vsel %vm1426_vm4, %v4552_v45, %v1423_v30 }
 0x9ef   :  { %v1432_v58 = vsel %vm1429_vm5, %v1431_v48, %v1427_v35  ;;  %v1388_v38 = vsel %vm1387_vm9, %v4554_v47, %v1384_v62 }
 0x9f0   :  { %v1393_v36 = vsel %vm1390_vm10, %v1392_v33, %v1388_v38  ;;  %v1461_v56 = vmul.f32 %v1432_v58, %v5542_v3  ;;  %v4230_v3 = vmul.f32 -1.442695, %v5580_v25 }
 0x9f1   :  { %v1450_v4 = vmul.f32 %v1393_v36, %v5546_v0 }
 0xa2b   :  { %v1453_v42 = vpop.permute.xlu2 %1452 }
 0xa2c   :  { %v1455_v27 = vmul.f32 %v1453_v42, %v1393_v36 }
 0xa4d   :  { %v1464_v13 = vpop.permute.xlu0 %1463 }
 0xa4e   :  { %v1466_v40 = vmul.f32 %v1464_v13, %v1432_v58 }
 0xa50   :  { %1468 = vrot.lane.b32.xlu1 %v1466_v40, %s4847_s3 }
 0xa58   :  { %1457 = vrot.lane.b32.xlu1 %v1455_v27, %s4847_s3 }
 0xac2   :  { %v1469_v45 = vpop.permute.xlu1 %1468 }
 0xac3   :  { %v5593_v31 = vadd.f32 %v1469_v45, %v1461_v56 }
 0xac5   :  { %4555 = vtanh.f32 %v5593_v31 }
 0xaca   :  { %v1458_v41 = vpop.permute.xlu1 %1457 }
 0xacb   :  { %v4556_v16 = vpop.eup %4555  ;;  %v5597_v60 = vadd.f32 %v1458_v41, %v1450_v4 }
 0xacc   :  { %1481 = vrot.lane.b32.xlu0 %v4556_v16, %s4847_s3 }
 0xacd   :  { %4557 = vtanh.f32 %v5597_v60 }
 0xace   :  { %4559 = vpow2.f32 %v4230_v3 }
 0xad3   :  { %v4558_v47 = vpop.eup %4557 }
 0xad4   :  { %1474 = vrot.lane.b32.xlu2 %v4558_v47, %s4847_s3  ;;  %v4560_v17 = vpop.eup %4559 }
 0xad5   :  { %v1379_v30 = vadd.f32 1.0, %v4560_v17 }
 0xad7   :  { %4561 = vrcp.f32 %v1379_v30  ;;  %v1406_v40 = vand.u32 2147483648, %v1379_v30  ;;  %vm1400_vm12 = vweird.f32 %v1379_v30  ;;  %v1404_v25 = vand.u32 2147483647, %v1379_v30 }
 0xad8   :  { %4563 = vpow2.f32 %v4232_v50 }
 0xad9   :  { %v1407_v38 = vor.u32 1.1754944e-38, %v1406_v40  ;;  %vm1405_vm14 = vcmp.eq.f32.partialorder %v1404_v25, 8.507059e+37 }
 0xadd   :  { %v4562_v0 = vpop.eup %4561 }
 0xade   :  { %v4564_v5 = vpop.eup %4563  ;;  %v1396_v9 = vmul.f32 %v4562_v0, %v1379_v30  ;;  %vm1401_vm11 = vweird.f32 %v4562_v0 }
 0xadf   :  { %v1418_v35 = vadd.f32 1.0, %v4564_v5  ;;  %vm1402_vm13 = vmor %vm1400_vm12, %vm1401_vm11  ;;  %v333_v5 = vadd.f32 %v5312_v52, %v5288_v21 }
 0xae0   :  { %v1397_v48 = vsub.f32 1.0, %v1396_v9 }
 0xae1   :  { %4565 = vrcp.f32 %v1418_v35  ;;  %v1445_v4 = vand.u32 2147483648, %v1418_v35  ;;  %vm1439_vm1 = vweird.f32 %v1418_v35  ;;  %v1443_v41 = vand.u32 2147483647, %v1418_v35 }
 0xae2   :  { %v1398_v13 = vmul.f32 %v4562_v0, %v1397_v48 }
 0xae3   :  { %v1446_v47 = vor.u32 1.1754944e-38, %v1445_v4  ;;  %vm1444_vm4 = vcmp.eq.f32.partialorder %v1443_v41, 8.507059e+37 }
 0xae4   :  { %v1399_v58 = vadd.f32 %v4562_v0, %v1398_v13 }
 0xae6   :  { %v1403_v22 = vsel %vm1402_vm13, %v4562_v0, %v1399_v58  ;;  %v304_v0 = vadd.f32 %v5324_v37, %v5290_v23 }
 0xae7   :  { %v4566_v62 = vpop.eup %4565  ;;  %v1408_v43 = vsel %vm1405_vm14, %v1407_v38, %v1403_v22  ;;  %v397_v22 = vadd.f32 %v5314_v32, %v5338_v24 }
 0xae8   :  { %v1435_v55 = vmul.f32 %v4566_v62, %v1418_v35  ;;  %vm1440_vm15 = vweird.f32 %v4566_v62  ;;  %v345_v9 = vpack.c.bf16 %v333_v5, %v304_v0 }
 0xae9   :  { %vm1441_vm3 = vmor %vm1439_vm1, %vm1440_vm15 }
 0xaea   :  { %v1436_v36 = vsub.f32 1.0, %v1435_v55  ;;  %v1523_v35 = vunpack.c.l.bf16 %v345_v9  ;;  %v1524_v48 = vunpack.c.h.bf16 %v345_v9 }
 0xaec   :  { %v1437_v56 = vmul.f32 %v4566_v62, %v1436_v36 }
 0xaee   :  { %v1438_v45 = vadd.f32 %v4566_v62, %v1437_v56 }
 0xaf0   :  { %v1442_v16 = vsel %vm1441_vm3, %v4566_v62, %v1438_v45  ;;  %v426_v62 = vadd.f32 %v5334_v14, %v5336_v18 }
 0xaf1   :  { %v1447_v3 = vsel %vm1444_vm4, %v1446_v47, %v1442_v16 }
 0xaf2   :  { %v442_v37 = vpack.c.bf16 %v426_v62, %v397_v22 }
 0xaf4   :  { %v1558_v32 = vunpack.c.l.bf16 %v442_v37 }
 0xb2e   :  { %v1475_v42 = vpop.permute.xlu2 %1474 }
 0xb2f   :  { %v1477_v33 = vmul.f32 %v1475_v42, %v1408_v43  ;;  %v1559_v43 = vunpack.c.h.bf16 %v442_v37 }
 0xb31   :  { %v5604_v27 = vpack.c.bf16 %v1477_v33, %v1477_v33 }
 0xb33   :  { %4233 = vmatmul.msk.bf16.vlgmr.msrb.gmra.mxu2 %vm497_vm2, %v5604_v27  ;;  %4234 = vmatmul.msk.bf16.vlgmr.msrb.gmra.mxu3 %vm497_vm2, %v5604_v27 }
 0xb34   :  { %1881 = vmatpush.bf16.msrb.mxu2 %v5095_v46  ;;  %1894 = vmatpush.bf16.msrb.mxu3 %v5161_v49 }
 0xb38   :  { %1882 = vmatpush.bf16.msrb.mxu2 %v5106_v19  ;;  %1895 = vmatpush.bf16.msrb.mxu3 %v5184_v53 }
 0xb3c   :  { %1883 = vmatpush.bf16.msrb.mxu2 %v5115_v26  ;;  %1896 = vmatpush.bf16.msrb.mxu3 %v5222_v1 }
 0xb3e   :  { %v1482_v17 = vpop.permute.xlu0 %1481 }
 0xb3f   :  { %v1484_v30 = vmul.f32 %v1482_v17, %v1447_v3 }
 0xb40   :  { %1884 = vmatpush.bf16.msrb.mxu2 %v5124_v39  ;;  %1897 = vmatpush.bf16.msrb.mxu3 %v5237_v10 }
 0xb41   :  { %v5618_v50 = vpack.c.bf16 %v1484_v30, %v1484_v30 }
 0xb43   :  { %4235 = vmatmul.msk.bf16.vlgmr.msra.gmra.mxu0 %vm497_vm2, %v5618_v50  ;;  %4236 = vmatmul.msk.bf16.vlgmr.msra.gmra.mxu1 %vm497_vm2, %v5618_v50 }
 0xb44   :  { %1928 = vmatpush.bf16.msra.mxu1 %v5141_v44  ;;  %1915 = vmatpush.bf16.msra.mxu0 %v5186_v54 }
 0xb48   :  { %1929 = vmatpush.bf16.msra.mxu1 %v5172_v51  ;;  %1916 = vmatpush.bf16.msra.mxu0 %v5207_v61 }
 0xb4c   :  { %1930 = vmatpush.bf16.msra.mxu1 %v5195_v57  ;;  %1917 = vmatpush.bf16.msra.mxu0 %v5234_v7 }
 0xb50   :  { %1931 = vmatpush.bf16.msra.mxu1 %v5225_v2  ;;  %1918 = vmatpush.bf16.msra.mxu0 %v5253_v15 }
 0xbb6   :  { %v1506_v13 = vpop.f32.mrf.mxu2  ;;  %v1519_v58 = vpop.f32.mrf.mxu3 }
 0xbb7   :  { %v1525_v40 = vadd.f32 %v1523_v35, %v1506_v13  ;;  %v5638_v25 = vadd.f32 %v1524_v48, %v1519_v58 }
 0xbb9   :  { %4567 = vtanh.f32 %v5638_v25  ;;  %v4237_v16 = vmul.f32 -1.442695, %v1525_v40 }
 0xbbe   :  { %v1508_v55 = vpop.f32.mrf.mxu2  ;;  %v1521_v38 = vpop.f32.mrf.mxu3 }
 0xbbf   :  { %v4568_v52 = vpop.eup %4567 }
 0xbc0   :  { %v1541_v42 = vpop.f32.mrf.mxu0  ;;  %v1554_v33 = vpop.f32.mrf.mxu1  ;;  %1642 = vrot.lane.b32.xlu2 %v4568_v52, %s4847_s3 }
 0xbc1   :  { %v5644_v36 = vadd.f32 %v1559_v43, %v1554_v33  ;;  %v1560_v4 = vadd.f32 %v1558_v32, %v1541_v42 }
 0xbc3   :  { %4569 = vtanh.f32 %v5644_v36  ;;  %v4239_v41 = vmul.f32 -1.442695, %v1560_v4 }
 0xbc5   :  { %4571 = vpow2.f32 %v4239_v41 }
 0xbc6   :  { %4573 = vpow2.f32 %v4237_v16 }
 0xbc8   :  { %v1543_v14 = vpop.f32.mrf.mxu0  ;;  %v1556_v56 = vpop.f32.mrf.mxu1 }
 0xbc9   :  { %v4570_v45 = vpop.eup %4569 }
 0xbca   :  { %1653 = vrot.lane.b32.xlu0 %v4570_v45, %s4847_s3 }
 0xbcb   :  { %v4572_v47 = vpop.eup %4571 }
 0xbcc   :  { %v1607_v3 = vadd.f32 1.0, %v4572_v47  ;;  %v4574_v17 = vpop.eup %4573 }
 0xbcd   :  { %v1568_v30 = vadd.f32 1.0, %v4574_v17 }
 0xbce   :  { %4575 = vrcp.f32 %v1607_v3  ;;  %v1620_v22 = vand.u32 2147483648, %v1607_v3  ;;  %vm1614_vm7 = vweird.f32 %v1607_v3  ;;  %v1618_v37 = vand.u32 2147483647, %v1607_v3 }
 0xbcf   :  { %4577 = vrcp.f32 %v1568_v30  ;;  %v1581_v14 = vand.u32 2147483648, %v1568_v30  ;;  %vm1575_vm11 = vweird.f32 %v1568_v30  ;;  %v1579_v56 = vand.u32 2147483647, %v1568_v30 }
 0xbd0   :  { %v1621_v38 = vor.u32 1.1754944e-38, %v1620_v22  ;;  %vm1619_vm9 = vcmp.eq.f32.partialorder %v1618_v37, 8.507059e+37 }
 0xbd1   :  { %v1582_v4 = vor.u32 1.1754944e-38, %v1581_v14  ;;  %vm1580_vm13 = vcmp.eq.f32.partialorder %v1579_v56, 8.507059e+37 }
 0xbd4   :  { %v4576_v0 = vpop.eup %4575 }
 0xbd5   :  { %v1610_v5 = vmul.f32 %v4576_v0, %v1607_v3  ;;  %v4578_v35 = vpop.eup %4577  ;;  %vm1615_vm5 = vweird.f32 %v4576_v0 }
 0xbd6   :  { %v1571_v48 = vmul.f32 %v4578_v35, %v1568_v30  ;;  %vm1616_vm8 = vmor %vm1614_vm7, %vm1615_vm5  ;;  %vm1576_vm10 = vweird.f32 %v4578_v35 }
 0xbd7   :  { %v1611_v9 = vsub.f32 1.0, %v1610_v5  ;;  %vm1577_vm12 = vmor %vm1575_vm11, %vm1576_vm10 }
 0xbd8   :  { %v1572_v58 = vsub.f32 1.0, %v1571_v48 }
 0xbd9   :  { %v1612_v13 = vmul.f32 %v4576_v0, %v1611_v9 }
 0xbda   :  { %v1573_v40 = vmul.f32 %v4578_v35, %v1572_v58  ;;  %v4240_v58 = vmul.f32 -1.442695, %v5644_v36 }
 0xbdb   :  { %v1613_v62 = vadd.f32 %v4576_v0, %v1612_v13 }
 0xbdc   :  { %v1574_v42 = vadd.f32 %v4578_v35, %v1573_v40 }
 0xbdd   :  { %v1617_v55 = vsel %vm1616_vm8, %v4576_v0, %v1613_v62 }
 0xbde   :  { %v1622_v43 = vsel %vm1619_vm9, %v1621_v38, %v1617_v55  ;;  %v1578_v45 = vsel %vm1577_vm12, %v4578_v35, %v1574_v42 }
 0xbdf   :  { %v1583_v41 = vsel %vm1580_vm13, %v1582_v4, %v1578_v45  ;;  %v1651_v47 = vmul.f32 %v1622_v43, %v5593_v31  ;;  %v4238_v31 = vmul.f32 -1.442695, %v5638_v25 }
 0xbe0   :  { %v1640_v30 = vmul.f32 %v1583_v41, %v5597_v60 }
 0xc1a   :  { %v1643_v32 = vpop.permute.xlu2 %1642 }
 0xc1b   :  { %v1645_v16 = vmul.f32 %v1643_v32, %v1583_v41 }
 0xc3c   :  { %v1654_v52 = vpop.permute.xlu0 %1653 }
 0xc3d   :  { %v1656_v33 = vmul.f32 %v1654_v52, %v1622_v43 }
 0xc3f   :  { %1658 = vrot.lane.b32.xlu1 %v1656_v33, %s4847_s3 }
 0xc47   :  { %1647 = vrot.lane.b32.xlu1 %v1645_v16, %s4847_s3  ;;  %v4833_v16 = vld [vmem:[%s6466_s2 + $0x18] sm:$0xff] }
 0xcb1   :  { %v1659_v3 = vpop.permute.xlu1 %1658 }
 0xcb2   :  { %v5651_v17 = vadd.f32 %v1659_v3, %v1651_v47  ;;  %v4834_v47 = vld [vmem:[%s6466_s2 + $0x10] sm:$0xff] }
 0xcb4   :  { %4579 = vtanh.f32 %v5651_v17 }
 0xcb9   :  { %v1648_v0 = vpop.permute.xlu1 %1647 }
 0xcba   :  { %v4580_v5 = vpop.eup %4579  ;;  %v5655_v9 = vadd.f32 %v1648_v0, %v1640_v30  ;;  %v4835_v0 = vld [vmem:[%s6466_s2 + $0x8] sm:$0xff] }
 0xcbb   :  { %1671 = vrot.lane.b32.xlu0 %v4580_v5, %s4847_s3 }
 0xcbc   :  { %4581 = vtanh.f32 %v5655_v9 }
 0xcbd   :  { %4583 = vpow2.f32 %v4238_v31 }
 0xcc2   :  { %v4582_v35 = vpop.eup %4581 }
 0xcc3   :  { %1664 = vrot.lane.b32.xlu2 %v4582_v35, %s4847_s3  ;;  %v4584_v48 = vpop.eup %4583  ;;  %v4836_v35 = vld [vmem:[%s6466_s2] sm:$0xff] }
 0xcc4   :  { %v1569_v13 = vadd.f32 1.0, %v4584_v48 }
 0xcc6   :  { %4585 = vrcp.f32 %v1569_v13  ;;  %v1596_v43 = vand.u32 2147483648, %v1569_v13  ;;  %vm1590_vm15 = vweird.f32 %v1569_v13  ;;  %v1594_v25 = vand.u32 2147483647, %v1569_v13 }
 0xcc7   :  { %4587 = vpow2.f32 %v4240_v58 }
 0xcc8   :  { %v1597_v14 = vor.u32 1.1754944e-38, %v1596_v43  ;;  %vm1595_vm3 = vcmp.eq.f32.partialorder %v1594_v25, 8.507059e+37  ;;  %v394_v25 = vadd.f32 %v5306_v29, %v5338_v24 }
 0xccc   :  { %v4586_v60 = vpop.eup %4585 }
 0xccd   :  { %v4588_v62 = vpop.eup %4587  ;;  %v1586_v22 = vmul.f32 %v4586_v60, %v1569_v13  ;;  %vm1591_vm14 = vweird.f32 %v4586_v60 }
 0xcce   :  { %v1608_v37 = vadd.f32 1.0, %v4588_v62  ;;  %vm1592_vm1 = vmor %vm1590_vm15, %vm1591_vm14 }
 0xccf   :  { %v1587_v40 = vsub.f32 1.0, %v1586_v22  ;;  %v307_v22 = vadd.f32 %v5330_v6, %v5290_v23 }
 0xcd0   :  { %4589 = vrcp.f32 %v1608_v37  ;;  %v1635_v30 = vand.u32 2147483648, %v1608_v37  ;;  %vm1629_vm5 = vweird.f32 %v1608_v37  ;;  %v1633_v5 = vand.u32 2147483647, %v1608_v37 }
 0xcd1   :  { %v1588_v55 = vmul.f32 %v4586_v60, %v1587_v40 }
 0xcd2   :  { %v1636_v48 = vor.u32 1.1754944e-38, %v1635_v30  ;;  %vm1634_vm8 = vcmp.eq.f32.partialorder %v1633_v5, 8.507059e+37 }
 0xcd3   :  { %v1589_v38 = vadd.f32 %v4586_v60, %v1588_v55 }
 0xcd5   :  { %v1593_v42 = vsel %vm1592_vm1, %v4586_v60, %v1589_v38 }
 0xcd6   :  { %v4590_v52 = vpop.eup %4589  ;;  %v1598_v36 = vsel %vm1595_vm3, %v1597_v14, %v1593_v42 }
 0xcd7   :  { %v1625_v33 = vmul.f32 %v4590_v52, %v1608_v37  ;;  %vm1630_vm4 = vweird.f32 %v4590_v52  ;;  %v336_v37 = vadd.f32 %v5318_v59, %v5288_v21 }
 0xcd8   :  { %vm1631_vm7 = vmor %vm1629_vm5, %vm1630_vm4 }
 0xcd9   :  { %v1626_v32 = vsub.f32 1.0, %v1625_v33  ;;  %v346_v40 = vpack.c.bf16 %v336_v37, %v307_v22 }
 0xcdb   :  { %v1627_v41 = vmul.f32 %v4590_v52, %v1626_v32  ;;  %v1713_v55 = vunpack.c.l.bf16 %v346_v40  ;;  %v1714_v38 = vunpack.c.h.bf16 %v346_v40 }
 0xcdd   :  { %v1628_v3 = vadd.f32 %v4590_v52, %v1627_v41 }
 0xcdf   :  { %v1632_v31 = vsel %vm1631_vm7, %v4590_v52, %v1628_v3 }
 0xce0   :  { %v1637_v13 = vsel %vm1634_vm8, %v1636_v48, %v1632_v31 }
 0xd1d   :  { %v1665_v56 = vpop.permute.xlu2 %1664 }
 0xd1e   :  { %v1667_v45 = vmul.f32 %v1665_v56, %v1598_v36 }
 0xd20   :  { %v5662_v4 = vpack.c.bf16 %v1667_v45, %v1667_v45 }
 0xd22   :  { %4241 = vmatmul.msk.bf16.vlgmr.msra.gmra.mxu2 %vm497_vm2, %v5662_v4  ;;  %4242 = vmatmul.msk.bf16.vlgmr.msra.gmra.mxu3 %vm497_vm2, %v5662_v4 }
 0xd23   :  { %2241 = vmatpush.msra.mxu3 %v4833_v16 }
 0xd25   :  { %2242 = vmatpush.msra.mxu3 %v4834_v47 }
 0xd27   :  { %2243 = vmatpush.msra.mxu3 %v4835_v0 }
 0xd29   :  { %2244 = vmatpush.msra.mxu3 %v4836_v35 }
 0xd2d   :  { %v1672_v58 = vpop.permute.xlu0 %1671 }
 0xd2e   :  { %v1674_v60 = vmul.f32 %v1672_v58, %v1637_v13 }
 0xd30   :  { %v5680_v62 = vpack.c.bf16 %v1674_v60, %v1674_v60 }
 0xd32   :  { %4243 = vmatmul.msk.bf16.vlgmr.msrb.gmra.mxu0 %vm497_vm2, %v5680_v62  ;;  %4244 = vmatmul.msk.bf16.vlgmr.msrb.gmra.mxu1 %vm497_vm2, %v5680_v62 }
 0xd33   :  { %2296 = vmatpush.msrb.mxu0 %v4833_v16  ;;  %2386 = vmatpush.bf16.msrb.mxu1 %v4983_v63 }
 0xd35   :  { %2297 = vmatpush.msrb.mxu0 %v4834_v47 }
 0xd37   :  { %2298 = vmatpush.msrb.mxu0 %v4835_v0  ;;  %2387 = vmatpush.bf16.msrb.mxu1 %v5008_v8  ;;  %v423_v8 = vadd.f32 %v5332_v11, %v5336_v18 }
 0xd39   :  { %2299 = vmatpush.msrb.mxu0 %v4836_v35  ;;  %v441_v6 = vpack.c.bf16 %v423_v8, %v394_v25 }
 0xd3b   :  { %v1749_v36 = vunpack.c.h.bf16 %v441_v6  ;;  %v1748_v11 = vunpack.c.l.bf16 %v441_v6 }
 0xda5   :  { %v1696_v52 = vpop.f32.mrf.mxu2  ;;  %v1709_v43 = vpop.f32.mrf.mxu3 }
 0xda6   :  { %v1715_v63 = vadd.f32 %v1713_v55, %v1696_v52  ;;  %v5694_v42 = vadd.f32 %v1714_v38, %v1709_v43 }
 0xda8   :  { %4591 = vtanh.f32 %v5694_v42  ;;  %v4245_v30 = vmul.f32 -1.442695, %v1715_v63 }
 0xdad   :  { %v1698_v33 = vpop.f32.mrf.mxu2  ;;  %v1711_v14 = vpop.f32.mrf.mxu3 }
 0xdae   :  { %v4592_v59 = vpop.eup %4591 }
 0xdaf   :  { %v1731_v56 = vpop.f32.mrf.mxu0  ;;  %v1744_v45 = vpop.f32.mrf.mxu1  ;;  %1832 = vrot.lane.b32.xlu2 %v4592_v59, %s4847_s3 }
 0xdb0   :  { %v5700_v32 = vadd.f32 %v1749_v36, %v1744_v45  ;;  %v1750_v47 = vadd.f32 %v1748_v11, %v1731_v56 }
 0xdb2   :  { %4593 = vtanh.f32 %v5700_v32  ;;  %v4247_v3 = vmul.f32 -1.442695, %v1750_v47 }
 0xdb4   :  { %4595 = vpow2.f32 %v4247_v3 }
 0xdb5   :  { %4597 = vpow2.f32 %v4245_v30 }
 0xdb7   :  { %v1733_v29 = vpop.f32.mrf.mxu0  ;;  %v1746_v41 = vpop.f32.mrf.mxu1 }
 0xdb8   :  { %v4594_v16 = vpop.eup %4593 }
 0xdb9   :  { %1843 = vrot.lane.b32.xlu0 %v4594_v16, %s4847_s3 }
 0xdba   :  { %v4596_v0 = vpop.eup %4595 }
 0xdbb   :  { %v1797_v5 = vadd.f32 1.0, %v4596_v0  ;;  %v4598_v35 = vpop.eup %4597 }
 0xdbc   :  { %v1758_v31 = vadd.f32 1.0, %v4598_v35 }
 0xdbd   :  { %4599 = vrcp.f32 %v1797_v5  ;;  %v1810_v38 = vand.u32 2147483648, %v1797_v5  ;;  %vm1804_vm10 = vweird.f32 %v1797_v5  ;;  %v1808_v52 = vand.u32 2147483647, %v1797_v5 }
 0xdbe   :  { %4601 = vrcp.f32 %v1758_v31  ;;  %v1771_v59 = vand.u32 2147483648, %v1758_v31  ;;  %vm1765_vm14 = vweird.f32 %v1758_v31  ;;  %v1769_v36 = vand.u32 2147483647, %v1758_v31 }
 0xdbf   :  { %v1811_v63 = vor.u32 1.1754944e-38, %v1810_v38  ;;  %vm1809_vm12 = vcmp.eq.f32.partialorder %v1808_v52, 8.507059e+37 }
 0xdc0   :  { %v1772_v29 = vor.u32 1.1754944e-38, %v1771_v59  ;;  %vm1770_vm1 = vcmp.eq.f32.partialorder %v1769_v36, 8.507059e+37 }
 0xdc3   :  { %v4600_v48 = vpop.eup %4599 }
 0xdc4   :  { %v1800_v13 = vmul.f32 %v4600_v48, %v1797_v5  ;;  %v4602_v60 = vpop.eup %4601  ;;  %vm1805_vm9 = vweird.f32 %v4600_v48 }
 0xdc5   :  { %v1761_v22 = vmul.f32 %v4602_v60, %v1758_v31  ;;  %vm1806_vm11 = vmor %vm1804_vm10, %vm1805_vm9  ;;  %vm1766_vm13 = vweird.f32 %v4602_v60 }
 0xdc6   :  { %v1801_v58 = vsub.f32 1.0, %v1800_v13  ;;  %vm1767_vm15 = vmor %vm1765_vm14, %vm1766_vm13 }
 0xdc7   :  { %v1762_v40 = vsub.f32 1.0, %v1761_v22 }
 0xdc8   :  { %v1802_v37 = vmul.f32 %v4600_v48, %v1801_v58  ;;  %v4248_v58 = vmul.f32 -1.442695, %v5700_v32 }
 0xdc9   :  { %v1763_v43 = vmul.f32 %v4602_v60, %v1762_v40 }
 0xdca   :  { %v1803_v55 = vadd.f32 %v4600_v48, %v1802_v37 }
 0xdcb   :  { %v1764_v33 = vadd.f32 %v4602_v60, %v1763_v43 }
 0xdcc   :  { %v1807_v25 = vsel %vm1806_vm11, %v4600_v48, %v1803_v55 }
 0xdcd   :  { %v1812_v6 = vsel %vm1809_vm12, %v1811_v63, %v1807_v25  ;;  %v1768_v56 = vsel %vm1767_vm15, %v4602_v60, %v1764_v33  ;;  %vm724_vm12 = vcmask 1043968  }
 0xdce   :  { %v1773_v41 = vsel %vm1770_vm1, %v1772_v29, %v1768_v56  ;;  %v1841_v11 = vmul.f32 %v1812_v6, %v5651_v17  ;;  %v4246_v17 = vmul.f32 -1.442695, %v5694_v42  ;;  %v6504_v56 = vld [vmem:[#allocation6_spill] sm:$0xff] }
 0xdcf   :  { %v1830_v30 = vmul.f32 %v1773_v41, %v5655_v9 }
 0xe09   :  { %v1833_v45 = vpop.permute.xlu2 %1832 }
 0xe0a   :  { %v1835_v16 = vmul.f32 %v1833_v45, %v1773_v41  ;;  %v6505_v41 = vld [vmem:[#allocation8_spill] sm:$0xff] }
 0xe2b   :  { %v1844_v8 = vpop.permute.xlu0 %1843 }
 0xe2c   :  { %v1846_v14 = vmul.f32 %v1844_v8, %v1812_v6 }
 0xe2e   :  { %1848 = vrot.lane.b32.xlu1 %v1846_v14, %s4847_s3 }
 0xe36   :  { %1837 = vrot.lane.b32.xlu1 %v1835_v16, %s4847_s3 }
 0xea0   :  { %v1849_v47 = vpop.permute.xlu1 %1848 }
 0xea1   :  { %v5707_v3 = vadd.f32 %v1849_v47, %v1841_v11 }
 0xea3   :  { %4603 = vtanh.f32 %v5707_v3 }
 0xea8   :  { %v1838_v0 = vpop.permute.xlu1 %1837 }
 0xea9   :  { %v4604_v5 = vpop.eup %4603  ;;  %v5711_v35 = vadd.f32 %v1838_v0, %v1830_v30 }
 0xeaa   :  { %1861 = vrot.lane.b32.xlu0 %v4604_v5, %s4847_s3 }
 0xeab   :  { %4605 = vtanh.f32 %v5711_v35 }
 0xeac   :  { %4607 = vpow2.f32 %v4246_v17  ;;  %v6506_v17 = vld [vmem:[#allocation10_spill] sm:$0xff] }
 0xeb1   :  { %v4606_v31 = vpop.eup %4605 }
 0xeb2   :  { %1854 = vrot.lane.b32.xlu2 %v4606_v31, %s4847_s3  ;;  %v4608_v48 = vpop.eup %4607 }
 0xeb3   :  { %v1759_v13 = vadd.f32 1.0, %v4608_v48  ;;  %v6507_v48 = vld [vmem:[#allocation7_spill] sm:$0xff] }
 0xeb5   :  { %4609 = vrcp.f32 %v1759_v13  ;;  %v1786_v43 = vand.u32 2147483648, %v1759_v13  ;;  %vm1780_vm4 = vweird.f32 %v1759_v13  ;;  %v1784_v42 = vand.u32 2147483647, %v1759_v13 }
 0xeb6   :  { %4611 = vpow2.f32 %v4248_v58  ;;  %v6509_v58 = vld [vmem:[#allocation9_spill] sm:$0xff] }
 0xeb7   :  { %v1787_v8 = vor.u32 1.1754944e-38, %v1786_v43  ;;  %vm1785_vm7 = vcmp.eq.f32.partialorder %v1784_v42, 8.507059e+37  ;;  %v6512_v42 = vld [vmem:[#allocation14_spill] sm:$0xff] }
 0xebb   :  { %v4610_v9 = vpop.eup %4609 }
 0xebc   :  { %v4612_v60 = vpop.eup %4611  ;;  %v1776_v22 = vmul.f32 %v4610_v9, %v1759_v13  ;;  %vm1781_vm3 = vweird.f32 %v4610_v9  ;;  %v6508_v13 = vld [vmem:[#allocation11_spill] sm:$0xff] }
 0xebd   :  { %v1798_v37 = vadd.f32 1.0, %v4612_v60  ;;  %vm1782_vm5 = vmor %vm1780_vm4, %vm1781_vm3 }
 0xebe   :  { %v1777_v40 = vsub.f32 1.0, %v1776_v22  ;;  %v6511_v22 = vld [vmem:[#allocation16_spill] sm:$0xff] }
 0xebf   :  { %4613 = vrcp.f32 %v1798_v37  ;;  %v1825_v29 = vand.u32 2147483648, %v1798_v37  ;;  %vm1819_vm9 = vweird.f32 %v1798_v37  ;;  %v1823_v16 = vand.u32 2147483647, %v1798_v37 }
 0xec0   :  { %v1778_v55 = vmul.f32 %v4610_v9, %v1777_v40 }
 0xec1   :  { %v1826_v47 = vor.u32 1.1754944e-38, %v1825_v29  ;;  %vm1824_vm11 = vcmp.eq.f32.partialorder %v1823_v16, 8.507059e+37 }
 0xec2   :  { %v1779_v38 = vadd.f32 %v4610_v9, %v1778_v55 }
 0xec4   :  { %v1783_v25 = vsel %vm1782_vm5, %v4610_v9, %v1779_v38  ;;  %v6510_v9 = vld [vmem:[#allocation17_spill] sm:$0xff] }
 0xec5   :  { %v4614_v52 = vpop.eup %4613  ;;  %v1788_v32 = vsel %vm1785_vm7, %v1787_v8, %v1783_v25  ;;  %v309_v60 = vadd.f32 %v6510_v9, %v5290_v23  ;;  %v392_v25 = vadd.f32 %v6512_v42, %v5338_v24 }
 0xec6   :  { %v1815_v63 = vmul.f32 %v4614_v52, %v1798_v37  ;;  %vm1820_vm8 = vweird.f32 %v4614_v52  ;;  %v338_v37 = vadd.f32 %v6511_v22, %v5288_v21 }
 0xec7   :  { %vm1821_vm10 = vmor %vm1819_vm9, %vm1820_vm8 }
 0xec8   :  { %v1816_v14 = vsub.f32 1.0, %v1815_v63  ;;  %v347_v40 = vpack.c.bf16 %v338_v37, %v309_v60 }
 0xeca   :  { %v1817_v36 = vmul.f32 %v4614_v52, %v1816_v14  ;;  %v1903_v55 = vunpack.c.l.bf16 %v347_v40  ;;  %v1904_v38 = vunpack.c.h.bf16 %v347_v40 }
 0xecc   :  { %v1818_v45 = vadd.f32 %v4614_v52, %v1817_v36 }
 0xece   :  { %v1822_v11 = vsel %vm1821_vm10, %v4614_v52, %v1818_v45 }
 0xecf   :  { %v1827_v30 = vsel %vm1824_vm11, %v1826_v47, %v1822_v11 }
 0xf0c   :  { %v1855_v6 = vpop.permute.xlu2 %1854 }
 0xf0d   :  { %v1857_v33 = vmul.f32 %v1855_v6, %v1788_v32  ;;  %v6513_v32 = vld [vmem:[#allocation15_spill] sm:$0xff] }
 0xf0e   :  { %v421_v6 = vadd.f32 %v6513_v32, %v5336_v18 }
 0xf0f   :  { %v5718_v59 = vpack.c.bf16 %v1857_v33, %v1857_v33 }
 0xf10   :  { %v440_v33 = vpack.c.bf16 %v421_v6, %v392_v25 }
 0xf11   :  { %4249 = vmatmul.msk.bf16.vlgmr.msrb.gmra.mxu2 %vm497_vm2, %v5718_v59  ;;  %4250 = vmatmul.msk.bf16.vlgmr.msrb.gmra.mxu3 %vm497_vm2, %v5718_v59 }
 0xf12   :  { %2415 = vmatpush.bf16.msrb.mxu3 %v6504_v56  ;;  %v1938_v45 = vunpack.c.h.bf16 %v440_v33 }
 0xf16   :  { %2416 = vmatpush.bf16.msrb.mxu3 %v6505_v41 }
 0xf1c   :  { %v1862_v0 = vpop.permute.xlu0 %1861 }
 0xf1d   :  { %v1864_v5 = vmul.f32 %v1862_v0, %v1827_v30  ;;  %v1937_v0 = vunpack.c.l.bf16 %v440_v33 }
 0xf1f   :  { %v1865_v31 = vpack.c.bf16 %v1864_v5, %v1864_v5 }
 0xf21   :  { %4251 = vmatmul.msk.bf16.vlgmr.msra.gmra.mxu0 %vm497_vm2, %v1865_v31  ;;  %4252 = vmatmul.msk.bf16.vlgmr.msra.gmra.mxu1 %vm497_vm2, %v1865_v31 }
 0xf22   :  { %2460 = vmatpush.bf16.msra.mxu0 %v6506_v17  ;;  %2489 = vmatpush.bf16.msra.mxu1 %v6507_v48 }
 0xf26   :  { %2461 = vmatpush.bf16.msra.mxu0 %v6508_v13  ;;  %2490 = vmatpush.bf16.msra.mxu1 %v6509_v58 }
 0xf94   :  { %v1886_v52 = vpop.f32.mrf.mxu2  ;;  %v1899_v43 = vpop.f32.mrf.mxu3 }
 0xf95   :  { %v1905_v63 = vadd.f32 %v1903_v55, %v1886_v52  ;;  %v5738_v8 = vadd.f32 %v1904_v38, %v1899_v43 }
 0xf97   :  { %4615 = vtanh.f32 %v5738_v8  ;;  %v4253_v48 = vmul.f32 -1.442695, %v1905_v63 }
 0xf9c   :  { %v1888_v14 = vpop.f32.mrf.mxu2  ;;  %v1901_v36 = vpop.f32.mrf.mxu3 }
 0xf9d   :  { %v4616_v56 = vpop.eup %4615 }
 0xf9e   :  { %v1920_v29 = vpop.f32.mrf.mxu0  ;;  %v1933_v41 = vpop.f32.mrf.mxu1  ;;  %2021 = vrot.lane.b32.xlu2 %v4616_v56, %s4847_s3 }
 0xf9f   :  { %v5744_v16 = vadd.f32 %v1938_v45, %v1933_v41  ;;  %v1939_v5 = vadd.f32 %v1937_v0, %v1920_v29 }
 0xfa1   :  { %4617 = vtanh.f32 %v5744_v16  ;;  %v4255_v17 = vmul.f32 -1.442695, %v1939_v5 }
 0xfa3   :  { %4619 = vpow2.f32 %v4255_v17 }
 0xfa4   :  { %4621 = vpow2.f32 %v4253_v48 }
 0xfa6   :  { %v1922_v11 = vpop.f32.mrf.mxu0  ;;  %v1935_v47 = vpop.f32.mrf.mxu1  ;;  %1868 = vrot.lane.b32.xlu2 %v1865_v31, %s4847_s3 }
 0xfa7   :  { %v4618_v30 = vpop.eup %4617 }
 0xfa8   :  { %2032 = vrot.lane.b32.xlu0 %v4618_v30, %s4847_s3 }
 0xfa9   :  { %v4620_v13 = vpop.eup %4619 }
 0xfaa   :  { %v1986_v9 = vadd.f32 1.0, %v4620_v13  ;;  %v4622_v60 = vpop.eup %4621 }
 0xfab   :  { %v1947_v31 = vadd.f32 1.0, %v4622_v60 }
 0xfac   :  { %4623 = vrcp.f32 %v1986_v9  ;;  %v1999_v63 = vand.u32 2147483648, %v1986_v9  ;;  %vm1993_vm14 = vweird.f32 %v1986_v9  ;;  %v1997_v32 = vand.u32 2147483647, %v1986_v9 }
 0xfad   :  { %4625 = vrcp.f32 %v1947_v31  ;;  %v1960_v41 = vand.u32 2147483648, %v1947_v31  ;;  %vm1954_vm4 = vweird.f32 %v1947_v31  ;;  %v1958_v11 = vand.u32 2147483647, %v1947_v31 }
 0xfae   :  { %1678 = vrot.lane.b32.xlu2 %v5680_v62, %s4847_s3  ;;  %v2000_v14 = vor.u32 1.1754944e-38, %v1999_v63  ;;  %vm1998_vm1 = vcmp.eq.f32.partialorder %v1997_v32, 8.507059e+37  ;;  %v4427_v32 = vld [vmem:[%s6472_s6 + $0x20] sm:$0xff] }
 0xfaf   :  { %v1961_v30 = vor.u32 1.1754944e-38, %v1960_v41  ;;  %vm1959_vm7 = vcmp.eq.f32.partialorder %v1958_v11, 8.507059e+37  ;;  %v4424_v41 = vld [vmem:[%s6472_s6 + $0x8] sm:$0xff]  ;;  %v4423_v11 = vld [vmem:[%s6472_s6] sm:$0xff] }
 0xfb2   :  { %v4624_v37 = vpop.eup %4623 }
 0xfb3   :  { %v1989_v40 = vmul.f32 %v4624_v37, %v1986_v9  ;;  %v4626_v38 = vpop.eup %4625  ;;  %vm1994_vm13 = vweird.f32 %v4624_v37 }
 0xfb4   :  { %v1950_v52 = vmul.f32 %v4626_v38, %v1947_v31  ;;  %vm1995_vm15 = vmor %vm1993_vm14, %vm1994_vm13  ;;  %vm1955_vm3 = vweird.f32 %v4626_v38 }
 0xfb5   :  { %v1990_v55 = vsub.f32 1.0, %v1989_v40  ;;  %vm1956_vm5 = vmor %vm1954_vm4, %vm1955_vm3 }
 0xfb6   :  { %v1951_v42 = vsub.f32 1.0, %v1950_v52  ;;  %v4429_v52 = vld [vmem:[%s6472_s6 + $0x30] sm:$0xff] }
 0xfb7   :  { %v1991_v43 = vmul.f32 %v4624_v37, %v1990_v55 }
 0xfb8   :  { %v1952_v6 = vmul.f32 %v4626_v38, %v1951_v42  ;;  %v4428_v42 = vld [vmem:[%s6472_s6 + $0x28] sm:$0xff] }
 0xfb9   :  { %v1992_v25 = vadd.f32 %v4624_v37, %v1991_v43 }
 0xfba   :  { %v1953_v45 = vadd.f32 %v4626_v38, %v1952_v6 }
 0xfbb   :  { %v1996_v33 = vsel %vm1995_vm15, %v4624_v37, %v1992_v25 }
 0xfbc   :  { %v2001_v56 = vsel %vm1998_vm1, %v2000_v14, %v1996_v33  ;;  %v1957_v47 = vsel %vm1956_vm5, %v4626_v38, %v1953_v45  ;;  %v4425_v45 = vld [vmem:[%s6472_s6 + $0x10] sm:$0xff] }
 0xfbd   :  { %v1962_v0 = vsel %vm1959_vm7, %v1961_v30, %v1957_v47  ;;  %v2030_v17 = vmul.f32 %v2001_v56, %v5707_v3  ;;  %v4256_v3 = vmul.f32 -1.442695, %v5744_v16 }
 0xfbe   :  { %v2019_v9 = vmul.f32 %v1962_v0, %v5711_v35 }
 0xff8   :  { %v2022_v58 = vpop.permute.xlu2 %2021 }
 0xff9   :  { %v2024_v5 = vmul.f32 %v2022_v58, %v1962_v0 }
0x1000   :  { %v1869_v22 = vpop.permute.xlu2 %1868 }
0x1001   :  { %1871 = vst.msk [vmem:[#allocation5 + $0x4] sm:$0xf] %vm724_vm12, %v1869_v22 }
0x1008   :  { %v1679_v62 = vpop.permute.xlu2 %1678 }
0x1009   :  { %1681 = vst.msk [vmem:[#allocation5 + $0x8] sm:$0xf] %vm724_vm12, %v1679_v62 }
0x101a   :  { %v2033_v36 = vpop.permute.xlu0 %2032 }
0x101b   :  { %v2035_v29 = vmul.f32 %v2033_v36, %v2001_v56  ;;  %v4426_v56 = vld [vmem:[%s6472_s6 + $0x18] sm:$0xff] }
0x101d   :  { %2037 = vrot.lane.b32.xlu1 %v2035_v29, %s4847_s3  ;;  %v4254_v29 = vmul.f32 -1.442695, %v5738_v8 }
0x1025   :  { %2026 = vrot.lane.b32.xlu1 %v2024_v5, %s4847_s3 }
0x102d   :  { %1488 = vrot.lane.b32.xlu1 %v5618_v50, %s4847_s3 }
0x1035   :  { %1297 = vrot.lane.b32.xlu1 %v5564_v12, %s4847_s3 }
0x103d   :  { %913 = vrot.lane.b32.xlu1 %v5458_v28, %s4847_s3 }
0x108f   :  { %v2038_v48 = vpop.permute.xlu1 %2037 }
0x1090   :  { %v2040_v13 = vadd.f32 %v2038_v48, %v2030_v17 }
0x1092   :  { %4627 = vtanh.f32 %v2040_v13 }
0x1097   :  { %v2027_v60 = vpop.permute.xlu1 %2026 }
0x1098   :  { %v4628_v58 = vpop.eup %4627  ;;  %v2029_v22 = vadd.f32 %v2027_v60, %v2019_v9 }
0x1099   :  { %2050 = vrot.lane.b32.xlu0 %v4628_v58, %s4847_s3 }
0x109a   :  { %4629 = vtanh.f32 %v2029_v22 }
0x109b   :  { %4631 = vpow2.f32 %v4256_v3 }
0x109f   :  { %v1489_v50 = vpop.permute.xlu1 %1488 }
0x10a0   :  { %v4630_v31 = vpop.eup %4629  ;;  %1491 = vst.msk [vmem:[#allocation5 + $0xc] sm:$0xf] %vm724_vm12, %v1489_v50 }
0x10a1   :  { %2043 = vrot.lane.b32.xlu2 %v4630_v31, %s4847_s3  ;;  %v4632_v35 = vpop.eup %4631 }
0x10a2   :  { %v1987_v37 = vadd.f32 1.0, %v4632_v35 }
0x10a4   :  { %4633 = vrcp.f32 %v1987_v37  ;;  %v2014_v16 = vand.u32 2147483648, %v1987_v37  ;;  %vm2008_vm9 = vweird.f32 %v1987_v37  ;;  %v2012_v43 = vand.u32 2147483647, %v1987_v37 }
0x10a5   :  { %4635 = vpow2.f32 %v4254_v29 }
0x10a6   :  { %v2015_v63 = vor.u32 1.1754944e-38, %v2014_v16  ;;  %vm2013_vm11 = vcmp.eq.f32.partialorder %v2012_v43, 8.507059e+37 }
0x10a7   :  { %v1298_v28 = vpop.permute.xlu1 %1297  ;;  %v4432_v35 = vld [vmem:[#allocation5 + $0x8] sm:$0xff] }
0x10a8   :  { %1301 = vst.msk [vmem:[#allocation5 + $0x10] sm:$0xf] %vm724_vm12, %v1298_v28 }
0x10a9   :  { %1486 = vst.msk [vmem:[#allocation5 + $0x10] sm:$0xf] %vm717_vm6, %v5604_v27  ;;  %v4430_v27 = vld [vmem:[%s6472_s6 + $0x38] sm:$0xff] }
0x10aa   :  { %v4634_v40 = vpop.eup %4633  ;;  %2141 = vmatpush.bf16.msra.mxu2 %v4430_v27 }
0x10ab   :  { %v2004_v62 = vmul.f32 %v4634_v40, %v1987_v37  ;;  %vm2009_vm8 = vweird.f32 %v4634_v40  ;;  %v4636_v47 = vpop.eup %4635 }
0x10ac   :  { %vm2010_vm10 = vmor %vm2008_vm9, %vm2009_vm8 }
0x10ad   :  { %v2005_v55 = vsub.f32 1.0, %v2004_v62 }
0x10ae   :  { %2142 = vmatpush.bf16.msra.mxu2 %v4429_v52 }
0x10af   :  { %v914_v12 = vpop.permute.xlu1 %913  ;;  %v2006_v38 = vmul.f32 %v4634_v40, %v2005_v55  ;;  %v2170_v55 = vld [vmem:[%s6467_s0] sm:$0xff] }
0x10b0   :  { %917 = vst.msk [vmem:[#allocation5 + $0x18] sm:$0xf] %vm724_vm12, %v914_v12 }
0x10b1   :  { %1866 = vst.msk [vmem:[#allocation5 + $0x18] sm:$0xf] %vm717_vm6, %v5718_v59  ;;  %v2007_v59 = vadd.f32 %v4634_v40, %v2006_v38 }
0x10b2   :  { %2143 = vmatpush.bf16.msra.mxu2 %v4428_v42 }
0x10b3   :  { %v2011_v25 = vsel %vm2010_vm10, %v4634_v40, %v2007_v59  ;;  %v4837_v40 = vld [vmem:[%s6469_s1] sm:$0x7]  ;;  %v2171_v59 = vld [vmem:[%s6467_s0 + $0x8] sm:$0xff] }
0x10b4   :  { %v2016_v6 = vsel %vm2013_vm11, %v2015_v63, %v2011_v25  ;;  %v5820_v62 = vperm.slane %v4837_v40, 2  ;;  %v2172_v25 = vld [vmem:[%s6467_s0 + $0x10] sm:$0xff] }
0x10b6   :  { %2144 = vmatpush.bf16.msra.mxu2 %v4427_v32  ;;  %v2179_v38 = vadd.f32 %v5820_v62, %v2170_v55  ;;  %v2180_v16 = vadd.f32 %v5820_v62, %v2171_v59  ;;  %v2181_v63 = vadd.f32 %v5820_v62, %v2172_v25 }
0x10ba   :  { %2145 = vmatpush.bf16.msra.mxu2 %v4426_v56 }
0x10be   :  { %2146 = vmatpush.bf16.msra.mxu2 %v4425_v45  ;;  %v2174_v45 = vld [vmem:[%s6467_s0 + $0x20] sm:$0xff] }
0x10bf   :  { %v2183_v29 = vadd.f32 %v5820_v62, %v2174_v45 }
0x10c2   :  { %2147 = vmatpush.bf16.msra.mxu2 %v4424_v41 }
0x10c6   :  { %2148 = vmatpush.bf16.msra.mxu2 %v4423_v11 }
0x10ca   :  { %2700 = vmatpush.bf16.msrb.mxu2 %v5186_v54 }
0x10ce   :  { %2701 = vmatpush.bf16.msrb.mxu2 %v5207_v61 }
0x10d2   :  { %2702 = vmatpush.bf16.msrb.mxu2 %v5234_v7 }
0x10d6   :  { %2703 = vmatpush.bf16.msrb.mxu2 %v5253_v15 }
0x10fb   :  { %v2044_v50 = vpop.permute.xlu2 %2043 }
0x110b   :  { %v2051_v33 = vpop.permute.xlu0 %2050 }
0x110c   :  { %v2053_v14 = vmul.f32 %v2051_v33, %v2016_v6  ;;  %v2173_v33 = vld [vmem:[%s6467_s0 + $0x18] sm:$0xff] }
0x110e   :  { %v2054_v36 = vpack.c.bf16 %v2053_v14, %v2053_v14  ;;  %v2182_v14 = vadd.f32 %v5820_v62, %v2173_v33 }
0x1110   :  { %2057 = vrot.lane.b32.xlu0 %v2054_v36, %s4847_s3 }
0x1118   :  { %1105 = vrot.lane.b32.xlu0 %v5509_v34, %s4847_s3  ;;  %v1948_v34 = vadd.f32 1.0, %v4636_v47  ;;  %v2175_v47 = vld [vmem:[%s6467_s0 + $0x28] sm:$0xff] }
0x111a   :  { %4637 = vrcp.f32 %v1948_v34  ;;  %v1975_v48 = vand.u32 2147483648, %v1948_v34  ;;  %vm1969_vm14 = vweird.f32 %v1948_v34  ;;  %v1973_v13 = vand.u32 2147483647, %v1948_v34 }
0x111c   :  { %v1976_v22 = vor.u32 1.1754944e-38, %v1975_v48  ;;  %vm1974_vm1 = vcmp.eq.f32.partialorder %v1973_v13, 8.507059e+37  ;;  %v2177_v48 = vld [vmem:[%s6467_s0 + $0x38] sm:$0xff] }
0x1120   :  { %720 = vrot.lane.b32.xlu0 %v5392_v20, %s4847_s3  ;;  %v4638_v20 = vpop.eup %4637 }
0x1121   :  { %v1965_v8 = vmul.f32 %v4638_v20, %v1948_v34  ;;  %vm1970_vm13 = vweird.f32 %v4638_v20  ;;  %v2184_v34 = vadd.f32 %v5820_v62, %v2175_v47 }
0x1122   :  { %vm1971_vm15 = vmor %vm1969_vm14, %vm1970_vm13 }
0x1123   :  { %v1966_v30 = vsub.f32 1.0, %v1965_v8 }
0x1125   :  { %v1967_v0 = vmul.f32 %v4638_v20, %v1966_v30  ;;  %v2176_v30 = vld [vmem:[%s6467_s0 + $0x30] sm:$0xff] }
0x1127   :  { %v1968_v17 = vadd.f32 %v4638_v20, %v1967_v0  ;;  %v2185_v0 = vadd.f32 %v5820_v62, %v2176_v30 }
0x1129   :  { %v1972_v9 = vsel %vm1971_vm15, %v4638_v20, %v1968_v17 }
0x112a   :  { %v1977_v31 = vsel %vm1974_vm1, %v1976_v22, %v1972_v9 }
0x112b   :  { %v2046_v28 = vmul.f32 %v2044_v50, %v1977_v31 }
0x112d   :  { %v2047_v12 = vpack.c.bf16 %v2046_v28, %v2046_v28 }
0x1182   :  { %v2058_v5 = vpop.permute.xlu0 %2057 }
0x1183   :  { %2060 = vst.msk [vmem:[#allocation5] sm:$0xf] %vm724_vm12, %v2058_v5 }
0x118a   :  { %v1106_v60 = vpop.permute.xlu0 %1105  ;;  %v4431_v58 = vld [vmem:[#allocation5] sm:$0xff] }
0x118b   :  { %1109 = vst.msk [vmem:[#allocation5 + $0x14] sm:$0xf] %vm724_vm12, %v1106_v60  ;;  %2149 = vmatmul.bf16.vlgmr.msra.gmra.mxu2 %v4431_v58  ;;  %v2186_v58 = vadd.f32 %v5820_v62, %v2177_v48 }
0x118c   :  { %1676 = vst.msk [vmem:[#allocation5 + $0x14] sm:$0xf] %vm717_vm6, %v5662_v4  ;;  %2867 = vmatpush.bf16.msra.mxu2 %v5161_v49 }
0x1190   :  { %2868 = vmatpush.bf16.msra.mxu2 %v5184_v53 }
0x1192   :  { %v721_v3 = vpop.permute.xlu0 %720 }
0x1193   :  { %725 = vst.msk [vmem:[#allocation5 + $0x1c] sm:$0xf] %vm724_vm12, %v721_v3  ;;  %v4433_v4 = vld [vmem:[#allocation5 + $0x10] sm:$0xff] }
0x1194   :  { %2055 = vst.msk [vmem:[#allocation5 + $0x1c] sm:$0xf] %vm717_vm6, %v2047_v12  ;;  %2869 = vmatpush.bf16.msra.mxu2 %v5222_v1 }
0x1198   :  { %2870 = vmatpush.bf16.msra.mxu2 %v5237_v10 }
0x119b   :  { %2154 = vmatmul.bf16.gmra.mxu2 %v4432_v35  ;;  %v4434_v37 = vld [vmem:[#allocation5 + $0x18] sm:$0xff] }
0x11ab   :  { %2159 = vmatmul.bf16.gmra.mxu2 %v4433_v4 }
0x11bb   :  { %2164 = vmatmul.bf16.gmra.mxu2 %v4434_v37 }
0x120e   :  { %v2150_v27 = vpop.f32.mrf.mxu2 }
0x120f   :  { %v2187_v52 = vadd.f32 %v2179_v38, %v2150_v27 }
0x1211   :  { %2195 = vst.msk [vmem:[#allocation2] sm:$0xff] %vm83_vm0, %v2187_v52 }
0x1216   :  { %v2152_v43 = vpop.f32.mrf.mxu2 }
0x1217   :  { %v2188_v42 = vadd.f32 %v2180_v16, %v2152_v43 }
0x1218   :  { %v2203_v9 = vld [vmem:[#allocation2] sm:$0xff] }
0x1219   :  { %2196 = vst.msk [vmem:[#allocation2 + $0x8] sm:$0xff] %vm83_vm0, %v2188_v42  ;;  %v2211_v31 = vsel %vm83_vm0, %v2203_v9, 0.0 }
0x121e   :  { %v2155_v32 = vpop.f32.mrf.mxu2 }
0x121f   :  { %v2189_v6 = vadd.f32 %v2181_v63, %v2155_v32 }
0x1220   :  { %v2204_v13 = vld [vmem:[#allocation2 + $0x8] sm:$0xff] }
0x1221   :  { %2197 = vst.msk [vmem:[#allocation2 + $0x10] sm:$0xff] %vm83_vm0, %v2189_v6  ;;  %v2212_v22 = vsel %vm83_vm0, %v2204_v13, 0.0 }
0x1222   :  { %v2213_v35 = vadd.f32 %v2212_v22, %v2211_v31 }
0x1226   :  { %v2157_v36 = vpop.f32.mrf.mxu2 }
0x1227   :  { %v2190_v56 = vadd.f32 %v2182_v14, %v2157_v36 }
0x1228   :  { %v2205_v60 = vld [vmem:[#allocation2 + $0x10] sm:$0xff] }
0x1229   :  { %2198 = vst.msk [vmem:[#allocation2 + $0x18] sm:$0xff] %vm83_vm0, %v2190_v56  ;;  %v2214_v28 = vsel %vm83_vm0, %v2205_v60, 0.0 }
0x122a   :  { %v2215_v55 = vadd.f32 %v2214_v28, %v2213_v35 }
0x122e   :  { %v2160_v41 = vpop.f32.mrf.mxu2 }
0x122f   :  { %v2191_v11 = vadd.f32 %v2183_v29, %v2160_v41 }
0x1230   :  { %v2206_v50 = vld [vmem:[#allocation2 + $0x18] sm:$0xff] }
0x1231   :  { %2199 = vst.msk [vmem:[#allocation2 + $0x20] sm:$0xff] %vm83_vm0, %v2191_v11  ;;  %v2216_v37 = vsel %vm83_vm0, %v2206_v50, 0.0 }
0x1232   :  { %v2217_v52 = vadd.f32 %v2216_v37, %v2215_v55 }
0x1236   :  { %v2162_v20 = vpop.f32.mrf.mxu2 }
0x1237   :  { %v2192_v8 = vadd.f32 %v2184_v34, %v2162_v20 }
0x1238   :  { %v2207_v3 = vld [vmem:[#allocation2 + $0x20] sm:$0xff] }
0x1239   :  { %2200 = vst.msk [vmem:[#allocation2 + $0x28] sm:$0xff] %vm83_vm0, %v2192_v8  ;;  %v2218_v38 = vsel %vm83_vm0, %v2207_v3, 0.0 }
0x123a   :  { %v2219_v16 = vadd.f32 %v2218_v38, %v2217_v52 }
0x123e   :  { %v2165_v5 = vpop.f32.mrf.mxu2 }
0x123f   :  { %v2193_v17 = vadd.f32 %v2185_v0, %v2165_v5 }
0x1240   :  { %v2208_v40 = vld [vmem:[#allocation2 + $0x28] sm:$0xff] }
0x1241   :  { %2201 = vst.msk [vmem:[#allocation2 + $0x30] sm:$0xff] %vm83_vm0, %v2193_v17  ;;  %v2220_v59 = vsel %vm83_vm0, %v2208_v40, 0.0 }
0x1242   :  { %v2221_v42 = vadd.f32 %v2220_v59, %v2219_v16 }
0x1246   :  { %v2167_v12 = vpop.f32.mrf.mxu2 }
0x1247   :  { %v2194_v4 = vadd.f32 %v2186_v58, %v2167_v12 }
0x1248   :  { %v2209_v27 = vld [vmem:[#allocation2 + $0x30] sm:$0xff] }
0x1249   :  { %2202 = vst.msk [vmem:[#allocation2 + $0x38] sm:$0xff] %vm83_vm0, %v2194_v4  ;;  %v2222_v43 = vsel %vm83_vm0, %v2209_v27, 0.0 }
0x124a   :  { %v2223_v63 = vadd.f32 %v2222_v43, %v2221_v42 }
0x1250   :  { %v2210_v25 = vld [vmem:[#allocation2 + $0x38] sm:$0xff] }
0x1251   :  { %v2224_v32 = vsel %vm83_vm0, %v2210_v25, 0.0 }
0x1252   :  { %v2225_v6 = vadd.f32 %v2224_v32, %v2223_v63 }
0x1254   :  { %4305 = vmatmul.msk.f32.vlgmr.msra.gmra.mxu3 %vm83_vm0, %v2225_v6 }
0x1255   :  { %2666 = vmatpush.bf16.msra.mxu3 %v5095_v46 }
0x1259   :  { %2667 = vmatpush.bf16.msra.mxu3 %v5106_v19 }
0x125d   :  { %2668 = vmatpush.bf16.msra.mxu3 %v5115_v26 }
0x1261   :  { %2669 = vmatpush.bf16.msra.mxu3 %v5124_v39 }
0x12d7   :  { %v2246_v33 = vpop.f32.mrf.mxu3 }
0x12d8   :  { %v2249_v14 = vmul.f32 0.015625, %v2246_v33 }
0x12da   :  { %v2250_v36 = vsub.f32 %v2203_v9, %v2249_v14  ;;  %v2251_v56 = vsub.f32 %v2204_v13, %v2249_v14  ;;  %v2252_v45 = vsub.f32 %v2205_v60, %v2249_v14  ;;  %v2253_v29 = vsub.f32 %v2206_v50, %v2249_v14 }
0x12db   :  { %v5875_v41 = vsub.f32 %v2207_v3, %v2249_v14  ;;  %v5877_v20 = vsub.f32 %v2208_v40, %v2249_v14  ;;  %v5881_v17 = vsub.f32 %v2209_v27, %v2249_v14  ;;  %v5886_v60 = vsub.f32 %v2210_v25, %v2249_v14 }
0x12dc   :  { %v2258_v11 = vmul.f32 %v2250_v36, %v2250_v36  ;;  %v2259_v47 = vmul.f32 %v2251_v56, %v2251_v56  ;;  %v2260_v34 = vmul.f32 %v2252_v45, %v2252_v45  ;;  %v2261_v8 = vmul.f32 %v2253_v29, %v2253_v29 }
0x12dd   :  { %v2262_v48 = vmul.f32 %v5875_v41, %v5875_v41  ;;  %v2263_v58 = vmul.f32 %v5877_v20, %v5877_v20  ;;  %v2264_v31 = vmul.f32 %v5881_v17, %v5881_v17  ;;  %v2265_v3 = vmul.f32 %v5886_v60, %v5886_v60 }
0x12de   :  { %v2266_v30 = vsel %vm83_vm0, %v2258_v11, 0.0  ;;  %v2267_v0 = vsel %vm83_vm0, %v2259_v47, 0.0  ;;  %v2269_v13 = vsel %vm83_vm0, %v2260_v34, 0.0  ;;  %v2271_v22 = vsel %vm83_vm0, %v2261_v8, 0.0  ;;  %v6514_v11 = vld [vmem:[#allocation12_spill] sm:$0xff]  ;;  %v6515_v8 = vld [vmem:[#allocation13_spill] sm:$0xff] }
0x12df   :  { %v2268_v5 = vadd.f32 %v2267_v0, %v2266_v30  ;;  %v2273_v28 = vsel %vm83_vm0, %v2262_v48, 0.0  ;;  %v2275_v35 = vsel %vm83_vm0, %v2263_v58, 0.0  ;;  %v2277_v37 = vsel %vm83_vm0, %v2264_v31, 0.0 }
0x12e0   :  { %v2279_v55 = vsel %vm83_vm0, %v2265_v3, 0.0 }
0x12e1   :  { %v2270_v9 = vadd.f32 %v2269_v13, %v2268_v5 }
0x12e3   :  { %v2272_v50 = vadd.f32 %v2271_v22, %v2270_v9 }
0x12e5   :  { %v2274_v12 = vadd.f32 %v2273_v28, %v2272_v50 }
0x12e7   :  { %v2276_v4 = vadd.f32 %v2275_v35, %v2274_v12 }
0x12e9   :  { %v2278_v40 = vadd.f32 %v2277_v37, %v2276_v4 }
0x12eb   :  { %v2280_v38 = vadd.f32 %v2279_v55, %v2278_v40 }
0x12ed   :  { %4306 = vmatmul.msk.f32.vlgmr.msrb.gmra.mxu0 %vm83_vm0, %v2280_v38 }
0x12ee   :  { %2679 = vmatpush.bf16.msrb.mxu0 %v5161_v49 }
0x12f2   :  { %2680 = vmatpush.bf16.msrb.mxu0 %v5184_v53 }
0x12f6   :  { %2681 = vmatpush.bf16.msrb.mxu0 %v5222_v1 }
0x12fa   :  { %2682 = vmatpush.bf16.msrb.mxu0 %v5237_v10 }
0x136a   :  { %v2301_v27 = vpop.f32.mrf.mxu0 }
0x136b   :  { %v2304_v52 = vmul.f32 0.015625, %v2301_v27 }
0x136d   :  { %v2305_v59 = vadd.f32 1e-05, %v2304_v52 }
0x136f   :  { %4639 = vrsqrt.f32 %v2305_v59  ;;  %vm2312_vm4 = vweird.f32 %v2305_v59 }
0x1375   :  { %v4640_v16 = vpop.eup %4639 }
0x1376   :  { %v2307_v43 = vmul.f32 %v4640_v16, %v2305_v59  ;;  %vm2313_vm3 = vweird.f32 %v4640_v16 }
0x1377   :  { %vm2314_vm5 = vmor %vm2312_vm4, %vm2313_vm3 }
0x1378   :  { %v2308_v42 = vmul.f32 %v4640_v16, %v2307_v43 }
0x137a   :  { %v2309_v25 = vmul.f32 0.5, %v2308_v42 }
0x137c   :  { %v2310_v63 = vsub.f32 1.5, %v2309_v25 }
0x137e   :  { %v2311_v32 = vmul.f32 %v4640_v16, %v2310_v63 }
0x1380   :  { %v2315_v6 = vsel %vm2314_vm5, %v4640_v16, %v2311_v32 }
0x1381   :  { %v2316_v33 = vmul.f32 %v2315_v6, %v2250_v36  ;;  %v2317_v14 = vmul.f32 %v2315_v6, %v2251_v56  ;;  %v2318_v13 = vmul.f32 %v2315_v6, %v2252_v45  ;;  %v2319_v9 = vmul.f32 %v2315_v6, %v2253_v29 }
0x1382   :  { %v2320_v35 = vmul.f32 %v2315_v6, %v5875_v41  ;;  %v2321_v4 = vmul.f32 %v2315_v6, %v5877_v20  ;;  %v2322_v16 = vmul.f32 %v2315_v6, %v5881_v17  ;;  %v2323_v43 = vmul.f32 %v2315_v6, %v5886_v60 }
0x1383   :  { %v2324_v47 = vmul.f32 %v2316_v33, %v6514_v11  ;;  %v2325_v34 = vmul.f32 %v2317_v14, %v6514_v11  ;;  %v2326_v31 = vmul.f32 %v2318_v13, %v6514_v11  ;;  %v2327_v36 = vmul.f32 %v2319_v9, %v6514_v11  ;;  %v6516_v13 = vld [vmem:[#allocation21_spill] sm:$0xff] }
0x1384   :  { %v2328_v40 = vmul.f32 %v2320_v35, %v6514_v11  ;;  %v2329_v55 = vmul.f32 %v2321_v4, %v6514_v11  ;;  %v2330_v25 = vmul.f32 %v2322_v16, %v6514_v11  ;;  %v2331_v63 = vmul.f32 %v2323_v43, %v6514_v11 }
0x1385   :  { %v2332_v30 = vadd.f32 %v2324_v47, %v6515_v8  ;;  %v2333_v0 = vadd.f32 %v2325_v34, %v6515_v8  ;;  %v2334_v56 = vadd.f32 %v2326_v31, %v6515_v8  ;;  %v2335_v45 = vadd.f32 %v2327_v36, %v6515_v8 }
0x1386   :  { %v2336_v41 = vadd.f32 %v2328_v40, %v6515_v8  ;;  %v2337_v20 = vadd.f32 %v2329_v55, %v6515_v8  ;;  %v2338_v32 = vadd.f32 %v2330_v25, %v6515_v8  ;;  %v2339_v33 = vadd.f32 %v2331_v63, %v6515_v8  ;;  %v6517_v25 = vld [vmem:[#allocation19_spill] sm:$0xff] }
0x1387   :  { %v2340_v5 = vpack.c.bf16 %v2332_v30, %v2332_v30  ;;  %v2341_v48 = vpack.c.bf16 %v2333_v0, %v2333_v0  ;;  %v2342_v29 = vpack.c.bf16 %v2334_v56, %v2334_v56  ;;  %v2343_v28 = vpack.c.bf16 %v2335_v45, %v2335_v45 }
0x1388   :  { %v2344_v38 = vpack.c.bf16 %v2336_v41, %v2336_v41  ;;  %v2345_v27 = vpack.c.bf16 %v2337_v20, %v2337_v20  ;;  %v2346_v14 = vpack.c.bf16 %v2338_v32, %v2338_v32  ;;  %v2347_v47 = vpack.c.bf16 %v2339_v33, %v2339_v33 }
0x1389   :  { %v2356_v58 = vunpack.c.l.b16 %v2340_v5  ;;  %v2357_v22 = vunpack.c.l.b16 %v2341_v48  ;;  %v2358_v12 = vunpack.c.l.b16 %v2342_v29  ;;  %v2359_v3 = vunpack.c.l.b16 %v2343_v28 }
0x138a   :  { %v2360_v52 = vunpack.c.l.b16 %v2344_v38  ;;  %v2361_v59 = vunpack.c.l.b16 %v2345_v27  ;;  %v2362_v17 = vunpack.c.l.b16 %v2346_v14  ;;  %v2363_v34 = vunpack.c.l.b16 %v2347_v47 }
0x138b   :  { %v2364_v50 = vpack.c.b16 %v2357_v22, %v2356_v58  ;;  %v2365_v37 = vpack.c.b16 %v2359_v3, %v2358_v12 }
0x138c   :  { %v2366_v42 = vpack.c.b16 %v2361_v59, %v2360_v52  ;;  %v2367_v60 = vpack.c.b16 %v2363_v34, %v2362_v17 }
0x138d   :  { %4307 = vmatmul.msk.bf16.vlgmr.msrb.gmra.mxu1 %vm83_vm0, %v2364_v50  ;;  %4311 = vmatmul.msk.bf16.vlgmr.msrb.gmra.mxu3 %vm83_vm0, %v2364_v50 }
0x138e   :  { %4315 = vmatmul.msk.bf16.vlgmr.msra.gmra.mxu0 %vm83_vm0, %v2364_v50  ;;  %2713 = vmatpush.bf16.msrb.mxu3 %v5141_v44 }
0x138f   :  { %2854 = vmatpush.bf16.msra.mxu0 %v5095_v46  ;;  %3230 = vmatpush.bf16.msrb.mxu1 %v5095_v46 }
0x1392   :  { %2714 = vmatpush.bf16.msrb.mxu3 %v5172_v51 }
0x1393   :  { %2855 = vmatpush.bf16.msra.mxu0 %v5106_v19  ;;  %3231 = vmatpush.bf16.msrb.mxu1 %v5106_v19 }
0x1396   :  { %2715 = vmatpush.bf16.msrb.mxu3 %v5195_v57 }
0x1397   :  { %2856 = vmatpush.bf16.msra.mxu0 %v5115_v26  ;;  %3232 = vmatpush.bf16.msrb.mxu1 %v5115_v26 }
0x139a   :  { %2716 = vmatpush.bf16.msrb.mxu3 %v5225_v2 }
0x139b   :  { %2857 = vmatpush.bf16.msra.mxu0 %v5124_v39  ;;  %3233 = vmatpush.bf16.msrb.mxu1 %v5124_v39 }
0x139d   :  { %4308 = vmatmul.msk.bf16.gmra.mxu1 %vm83_vm0, %v2365_v37  ;;  %4312 = vmatmul.msk.bf16.gmra.mxu3 %vm83_vm0, %v2365_v37 }
0x139e   :  { %4316 = vmatmul.msk.bf16.gmra.mxu0 %vm83_vm0, %v2365_v37 }
0x13ad   :  { %4309 = vmatmul.msk.bf16.gmra.mxu1 %vm83_vm0, %v2366_v42  ;;  %4313 = vmatmul.msk.bf16.gmra.mxu3 %vm83_vm0, %v2366_v42 }
0x13ae   :  { %4317 = vmatmul.msk.bf16.gmra.mxu0 %vm83_vm0, %v2366_v42 }
0x13bd   :  { %4310 = vmatmul.msk.bf16.gmra.mxu1 %vm83_vm0, %v2367_v60  ;;  %4314 = vmatmul.msk.bf16.gmra.mxu3 %vm83_vm0, %v2367_v60 }
0x13be   :  { %4318 = vmatmul.msk.bf16.gmra.mxu0 %vm83_vm0, %v2367_v60 }
0x13cd   :  { %4319 = vmatmul.msk.bf16.vlgmr.msra.gmra.mxu1 %vm83_vm0, %v2364_v50 }
0x13ce   :  { %3418 = vmatpush.bf16.msra.mxu1 %v5095_v46 }
0x13d2   :  { %3419 = vmatpush.bf16.msra.mxu1 %v5106_v19 }
0x13d6   :  { %3420 = vmatpush.bf16.msra.mxu1 %v5115_v26 }
0x13da   :  { %3421 = vmatpush.bf16.msra.mxu1 %v5124_v39 }
0x13dd   :  { %4320 = vmatmul.msk.bf16.gmra.mxu1 %vm83_vm0, %v2365_v37 }
0x13ed   :  { %4321 = vmatmul.msk.bf16.gmra.mxu1 %vm83_vm0, %v2366_v42 }
0x13fd   :  { %4322 = vmatmul.msk.bf16.gmra.mxu1 %vm83_vm0, %v2367_v60 }
0x140a   :  { %v2389_v6 = vpop.f32.mrf.mxu1 }
0x140b   :  { %v2390_v8 = vadd.f32 %v2389_v6, %v5290_v23  ;;  %v2463_v41 = vpop.f32.mrf.mxu0 }
0x140c   :  { %v2464_v33 = vadd.f32 %v2463_v41, %v5338_v24 }
0x1410   :  { %v2418_v11 = vpop.f32.mrf.mxu3 }
0x1411   :  { %v2419_v30 = vadd.f32 %v2418_v11, %v5288_v21 }
0x1412   :  { %v5958_v0 = vpop.f32.mrf.mxu1 }
0x1413   :  { %v2438_v5 = vpack.c.bf16 %v2419_v30, %v2390_v8  ;;  %v2465_v43 = vpop.f32.mrf.mxu0 }
0x1414   :  { %v2466_v6 = vadd.f32 %v2465_v43, %v5338_v24 }
0x1415   :  { %v2530_v48 = vunpack.c.h.bf16 %v2438_v5  ;;  %v2529_v42 = vunpack.c.l.bf16 %v2438_v5 }
0x1417   :  { %v5961_v9 = vadd.f32 %v2530_v48, %v6516_v13  ;;  %v2531_v63 = vadd.f32 %v2529_v42, %v6517_v25 }
0x1418   :  { %v5963_v58 = vpop.f32.mrf.mxu3 }
0x1419   :  { %4641 = vtanh.f32 %v5961_v9  ;;  %v4323_v47 = vmul.f32 -1.442695, %v2531_v63 }
0x141a   :  { %v2394_v22 = vpop.f32.mrf.mxu1 }
0x141b   :  { %v2395_v36 = vadd.f32 %v2394_v22, %v5290_v23  ;;  %v2468_v34 = vpop.f32.mrf.mxu0  ;;  %4643 = vpow2.f32 %v4323_v47 }
0x141c   :  { %v2469_v22 = vadd.f32 %v2468_v34, %v5338_v24 }
0x141f   :  { %v4642_v50 = vpop.eup %4641 }
0x1420   :  { %v2423_v31 = vpop.f32.mrf.mxu3  ;;  %2618 = vrot.lane.b32.xlu2 %v4642_v50, %s4847_s3 }
0x1421   :  { %v2424_v56 = vadd.f32 %v2423_v31, %v5288_v21  ;;  %v4644_v30 = vpop.eup %4643 }
0x1422   :  { %v5969_v45 = vpop.f32.mrf.mxu1  ;;  %v2544_v48 = vadd.f32 1.0, %v4644_v30 }
0x1423   :  { %v5971_v29 = vpack.c.bf16 %v2424_v56, %v2395_v36  ;;  %v2470_v5 = vpop.f32.mrf.mxu0 }
0x1424   :  { %4645 = vrcp.f32 %v2544_v48  ;;  %v2557_v47 = vand.u32 2147483648, %v2544_v48  ;;  %vm2551_vm8 = vweird.f32 %v2544_v48 }
0x1426   :  { %v2558_v30 = vor.u32 1.1754944e-38, %v2557_v47 }
0x1428   :  { %v5973_v28 = vpop.f32.mrf.mxu3 }
0x142a   :  { %v2399_v12 = vpop.f32.mrf.mxu1 }
0x142b   :  { %v2400_v35 = vadd.f32 %v2399_v12, %v5290_v23  ;;  %v2473_v36 = vpop.f32.mrf.mxu0  ;;  %v2471_v12 = vadd.f32 %v2470_v5, %v5338_v24 }
0x1430   :  { %v2428_v3 = vpop.f32.mrf.mxu3 }
0x1431   :  { %v2429_v4 = vadd.f32 %v2428_v3, %v5288_v21 }
0x1432   :  { %v5977_v37 = vpop.f32.mrf.mxu1 }
0x1433   :  { %v5979_v40 = vpack.c.bf16 %v2429_v4, %v2400_v35  ;;  %v4646_v35 = vpop.eup %4645  ;;  %v2475_v43 = vpop.f32.mrf.mxu0 }
0x1434   :  { %v2547_v41 = vmul.f32 %v4646_v35, %v2544_v48  ;;  %vm2552_vm7 = vweird.f32 %v4646_v35 }
0x1435   :  { %vm2553_vm9 = vmor %vm2551_vm8, %vm2552_vm7 }
0x1438   :  { %v5981_v55 = vpop.f32.mrf.mxu3 }
0x143a   :  { %v2404_v20 = vpop.f32.mrf.mxu1 }
0x143b   :  { %v2405_v27 = vadd.f32 %v2404_v20, %v5290_v23 }
0x1440   :  { %v2433_v38 = vpop.f32.mrf.mxu3 }
0x1441   :  { %v2434_v52 = vadd.f32 %v2433_v38, %v5288_v21  ;;  %v2474_v38 = vadd.f32 %v2473_v36, %v5338_v24 }
0x1442   :  { %v5985_v59 = vpop.f32.mrf.mxu1 }
0x1443   :  { %v5987_v16 = vpack.c.bf16 %v2434_v52, %v2405_v27  ;;  %v2548_v52 = vsub.f32 1.0, %v2547_v41 }
0x1445   :  { %v2549_v25 = vmul.f32 %v4646_v35, %v2548_v52 }
0x144a   :  { %v2492_v32 = vpop.f32.mrf.mxu1 }
0x144b   :  { %v2493_v14 = vadd.f32 %v2492_v32, %v5336_v18  ;;  %v2476_v32 = vadd.f32 %v2475_v43, %v5338_v24 }
0x144d   :  { %v5992_v17 = vpack.c.bf16 %v2493_v14, %v2464_v33  ;;  %v2550_v14 = vadd.f32 %v4646_v35, %v2549_v25 }
0x1452   :  { %v2494_v60 = vpop.f32.mrf.mxu1 }
0x1453   :  { %v2495_v11 = vadd.f32 %v2494_v60, %v5336_v18  ;;  %v2555_v60 = vand.u32 2147483647, %v2544_v48 }
0x1455   :  { %v5996_v8 = vpack.c.bf16 %v2495_v11, %v2466_v6  ;;  %v2478_v6 = vpop.f32.mrf.mxu0  ;;  %v2554_v11 = vsel %vm2553_vm9, %v4646_v35, %v2550_v14  ;;  %vm2556_vm10 = vcmp.eq.f32.partialorder %v2555_v60, 8.507059e+37 }
0x145a   :  { %v2497_v13 = vpop.f32.mrf.mxu1 }
0x145b   :  { %v2498_v50 = vadd.f32 %v2497_v13, %v5336_v18 }
0x145d   :  { %v6000_v31 = vpack.c.bf16 %v2498_v50, %v2469_v22  ;;  %v2559_v22 = vsel %vm2556_vm10, %v2558_v30, %v2554_v11  ;;  %v2479_v50 = vadd.f32 %v2478_v6, %v5338_v24 }
0x1462   :  { %v2499_v56 = vpop.f32.mrf.mxu1 }
0x1463   :  { %v2500_v3 = vadd.f32 %v2499_v56, %v5336_v18 }
0x1465   :  { %v6004_v4 = vpack.c.bf16 %v2500_v3, %v2471_v12  ;;  %v2480_v3 = vpop.f32.mrf.mxu0 }
0x1466   :  { %v2481_v48 = vadd.f32 %v2480_v3, %v5338_v24 }
0x146a   :  { %v2502_v20 = vpop.f32.mrf.mxu1 }
0x146b   :  { %v2503_v27 = vadd.f32 %v2502_v20, %v5336_v18 }
0x146d   :  { %v6008_v42 = vpack.c.bf16 %v2503_v27, %v2474_v38  ;;  %v6518_v27 = vld [vmem:[#allocation18_spill] sm:$0xff] }
0x1472   :  { %v2504_v63 = vpop.f32.mrf.mxu1 }
0x1473   :  { %v2505_v33 = vadd.f32 %v2504_v63, %v5336_v18  ;;  %v6519_v63 = vld [vmem:[#allocation20_spill] sm:$0xff] }
0x1475   :  { %v6012_v34 = vpack.c.bf16 %v2505_v33, %v2476_v32 }
0x147a   :  { %v2507_v5 = vpop.f32.mrf.mxu1  ;;  %v2619_v13 = vpop.permute.xlu2 %2618 }
0x147b   :  { %v2508_v36 = vadd.f32 %v2507_v5, %v5336_v18  ;;  %v2621_v56 = vmul.f32 %v2619_v13, %v2559_v22 }
0x147d   :  { %v6016_v12 = vpack.c.bf16 %v2508_v36, %v2479_v50  ;;  %2623 = vrot.lane.b32.xlu1 %v2621_v56, %s4847_s3 }
0x1482   :  { %v2509_v41 = vpop.f32.mrf.mxu1 }
0x1483   :  { %v2510_v35 = vadd.f32 %v2509_v41, %v5336_v18  ;;  %v2616_v18 = vmul.f32 0.0, %v2559_v22 }
0x1485   :  { %v2519_v20 = vpack.c.bf16 %v2510_v35, %v2481_v48 }
0x1487   :  { %v2535_v38 = vunpack.c.h.bf16 %v2519_v20  ;;  %v2534_v25 = vunpack.c.l.bf16 %v2519_v20  ;;  %v4324_v20 = vmul.f32 -1.442695, %v5961_v9 }
0x1489   :  { %v6022_v52 = vadd.f32 %v2535_v38, %v6518_v27  ;;  %v2536_v32 = vadd.f32 %v2534_v25, %v6519_v63 }
0x148b   :  { %4647 = vtanh.f32 %v6022_v52  ;;  %v4325_v33 = vmul.f32 -1.442695, %v2536_v32 }
0x148d   :  { %4649 = vpow2.f32 %v4325_v33 }
0x1491   :  { %v4648_v43 = vpop.eup %4647 }
0x1492   :  { %2629 = vrot.lane.b32.xlu0 %v4648_v43, %s4847_s3 }
0x1493   :  { %v4650_v14 = vpop.eup %4649 }
0x1494   :  { %v2583_v47 = vadd.f32 1.0, %v4650_v14 }
0x1496   :  { %4651 = vrcp.f32 %v2583_v47  ;;  %v2596_v36 = vand.u32 2147483648, %v2583_v47  ;;  %vm2590_vm13 = vweird.f32 %v2583_v47  ;;  %v2594_v56 = vand.u32 2147483647, %v2583_v47 }
0x1498   :  { %v2597_v41 = vor.u32 1.1754944e-38, %v2596_v36  ;;  %vm2595_vm15 = vcmp.eq.f32.partialorder %v2594_v56, 8.507059e+37  ;;  %v4326_v56 = vmul.f32 -1.442695, %v6022_v52 }
0x149c   :  { %v4652_v24 = vpop.eup %4651 }
0x149d   :  { %v2586_v11 = vmul.f32 %v4652_v24, %v2583_v47  ;;  %vm2591_vm11 = vweird.f32 %v4652_v24 }
0x149e   :  { %vm2592_vm14 = vmor %vm2590_vm13, %vm2591_vm11 }
0x149f   :  { %v2587_v30 = vsub.f32 1.0, %v2586_v11 }
0x14a1   :  { %v2588_v13 = vmul.f32 %v4652_v24, %v2587_v30 }
0x14a3   :  { %v2589_v50 = vadd.f32 %v4652_v24, %v2588_v13 }
0x14a5   :  { %v2593_v3 = vsel %vm2592_vm14, %v4652_v24, %v2589_v50 }
0x14a6   :  { %v2598_v48 = vsel %vm2595_vm15, %v2597_v41, %v2593_v3 }
0x14a7   :  { %v2627_v32 = vmul.f32 0.0, %v2598_v48 }
0x14ef   :  { %v2624_v60 = vpop.permute.xlu1 %2623 }
0x14f0   :  { %v6027_v6 = vadd.f32 %v2624_v60, %v2616_v18 }
0x14f2   :  { %4653 = vtanh.f32 %v6027_v6 }
0x14f3   :  { %4655 = vpow2.f32 %v4324_v20 }
0x14f8   :  { %v4654_v5 = vpop.eup %4653 }
0x14f9   :  { %2640 = vrot.lane.b32.xlu0 %v4654_v5, %s4847_s3  ;;  %v4656_v38 = vpop.eup %4655 }
0x14fa   :  { %v2545_v27 = vadd.f32 1.0, %v4656_v38 }
0x14fc   :  { %4657 = vrcp.f32 %v2545_v27  ;;  %v2572_v18 = vand.u32 2147483648, %v2545_v27  ;;  %vm2566_vm3 = vweird.f32 %v2545_v27  ;;  %v2570_v60 = vand.u32 2147483647, %v2545_v27 }
0x14fe   :  { %v2573_v11 = vor.u32 1.1754944e-38, %v2572_v18  ;;  %vm2571_vm5 = vcmp.eq.f32.partialorder %v2570_v60, 8.507059e+37  ;;  %v2392_v18 = vadd.f32 %v5958_v0, %v5290_v23 }
0x1502   :  { %v4658_v43 = vpop.eup %4657 }
0x1503   :  { %v2562_v25 = vmul.f32 %v4658_v43, %v2545_v27  ;;  %vm2567_vm1 = vweird.f32 %v4658_v43 }
0x1504   :  { %v2630_v22 = vpop.permute.xlu0 %2629  ;;  %vm2568_vm4 = vmor %vm2566_vm3, %vm2567_vm1 }
0x1505   :  { %v2632_v35 = vmul.f32 %v2630_v22, %v2598_v48  ;;  %v2563_v63 = vsub.f32 1.0, %v2562_v25 }
0x1507   :  { %2634 = vrot.lane.b32.xlu2 %v2632_v35, %s4847_s3  ;;  %v2564_v33 = vmul.f32 %v4658_v43, %v2563_v63 }
0x1509   :  { %v2565_v24 = vadd.f32 %v4658_v43, %v2564_v33 }
0x150b   :  { %v2569_v9 = vsel %vm2568_vm4, %v4658_v43, %v2565_v24  ;;  %v2421_v24 = vadd.f32 %v5963_v58, %v5288_v21 }
0x150c   :  { %v2574_v5 = vsel %vm2571_vm5, %v2573_v11, %v2569_v9  ;;  %v6063_v9 = vpop.f32.mrf.mxu3 }
0x150d   :  { %v2439_v60 = vpack.c.bf16 %v2421_v24, %v2392_v18  ;;  %v2722_v18 = vunpack.c.l.bf16 %v6016_v12 }
0x150f   :  { %v2689_v11 = vunpack.c.h.bf16 %v2439_v60  ;;  %v2688_v0 = vunpack.c.l.bf16 %v2439_v60  ;;  %v2723_v60 = vunpack.c.h.bf16 %v6016_v12 }
0x1561   :  { %v2635_v14 = vpop.permute.xlu2 %2634 }
0x1562   :  { %v6033_v47 = vadd.f32 %v2635_v14, %v2627_v32 }
0x1564   :  { %4659 = vtanh.f32 %v6033_v47 }
0x1565   :  { %4661 = vpow2.f32 %v4326_v56 }
0x156a   :  { %v4660_v30 = vpop.eup %4659 }
0x156b   :  { %2647 = vrot.lane.b32.xlu1 %v4660_v30, %s4847_s3  ;;  %v2641_v13 = vpop.permute.xlu0 %2640  ;;  %v4662_v3 = vpop.eup %4661 }
0x156c   :  { %v2643_v50 = vmul.f32 %v2641_v13, %v2574_v5  ;;  %v2584_v41 = vadd.f32 1.0, %v4662_v3 }
0x156e   :  { %v2644_v36 = vpack.c.bf16 %v2643_v50, %v2643_v50  ;;  %4663 = vrcp.f32 %v2584_v41  ;;  %v2611_v27 = vand.u32 2147483648, %v2584_v41  ;;  %vm2605_vm8 = vweird.f32 %v2584_v41 }
0x156f   :  { %v2609_v43 = vand.u32 2147483647, %v2584_v41 }
0x1570   :  { %2652 = vst.msk [vmem:[#allocation5] sm:$0xf] %vm717_vm6, %v2644_v36  ;;  %4327 = vmatmul.msk.bf16.vlgmr.msra.gmra.mxu3 %vm497_vm2, %v2644_v36  ;;  %4328 = vmatmul.msk.bf16.vlgmr.msrb.gmra.mxu0 %vm497_vm2, %v2644_v36  ;;  %v2612_v63 = vor.u32 1.1754944e-38, %v2611_v27 }
0x1571   :  { %2901 = vmatpush.bf16.msrb.mxu0 %v5141_v44  ;;  %2888 = vmatpush.bf16.msra.mxu3 %v5186_v54  ;;  %vm2610_vm10 = vcmp.eq.f32.partialorder %v2609_v43, 8.507059e+37 }
0x1574   :  { %v4664_v22 = vpop.eup %4663 }
0x1575   :  { %2902 = vmatpush.bf16.msrb.mxu0 %v5172_v51  ;;  %2889 = vmatpush.bf16.msra.mxu3 %v5207_v61  ;;  %v2601_v48 = vmul.f32 %v4664_v22, %v2584_v41  ;;  %vm2606_vm7 = vweird.f32 %v4664_v22 }
0x1576   :  { %vm2607_vm9 = vmor %vm2605_vm8, %vm2606_vm7 }
0x1577   :  { %v2602_v35 = vsub.f32 1.0, %v2601_v48 }
0x1579   :  { %2903 = vmatpush.bf16.msrb.mxu0 %v5195_v57  ;;  %2890 = vmatpush.bf16.msra.mxu3 %v5234_v7  ;;  %v2603_v20 = vmul.f32 %v4664_v22, %v2602_v35 }
0x157b   :  { %v2604_v38 = vadd.f32 %v4664_v22, %v2603_v20 }
0x157d   :  { %2904 = vmatpush.bf16.msrb.mxu0 %v5225_v2  ;;  %2891 = vmatpush.bf16.msra.mxu3 %v5253_v15  ;;  %v2608_v25 = vsel %vm2607_vm9, %v4664_v22, %v2604_v38 }
0x157e   :  { %v2613_v32 = vsel %vm2610_vm10, %v2612_v63, %v2608_v25 }
0x15dd   :  { %v2648_v33 = vpop.permute.xlu1 %2647 }
0x15de   :  { %v2650_v52 = vmul.f32 %v2648_v33, %v2613_v32 }
0x15e0   :  { %v6049_v14 = vpack.c.bf16 %v2650_v52, %v2650_v52 }
0x15e2   :  { %4329 = vmatmul.msk.bf16.vlgmr.msrb.gmra.mxu2 %vm497_vm2, %v6049_v14  ;;  %4330 = vmatmul.msk.bf16.vlgmr.msrb.gmra.mxu3 %vm497_vm2, %v6049_v14 }
0x15e3   :  { %3042 = vmatpush.bf16.msrb.mxu2 %v5095_v46  ;;  %3055 = vmatpush.bf16.msrb.mxu3 %v5161_v49 }
0x15e7   :  { %3043 = vmatpush.bf16.msrb.mxu2 %v5106_v19  ;;  %3056 = vmatpush.bf16.msrb.mxu3 %v5184_v53 }
0x15eb   :  { %3044 = vmatpush.bf16.msrb.mxu2 %v5115_v26  ;;  %3057 = vmatpush.bf16.msrb.mxu3 %v5222_v1 }
0x15ed   :  { %v2684_v30 = vpop.f32.mrf.mxu0 }
0x15ee   :  { %v6067_v5 = vadd.f32 %v2689_v11, %v2684_v30 }
0x15ef   :  { %3045 = vmatpush.bf16.msrb.mxu2 %v5124_v39  ;;  %3058 = vmatpush.bf16.msrb.mxu3 %v5237_v10 }
0x15f0   :  { %4665 = vtanh.f32 %v6067_v5 }
0x15f3   :  { %v2671_v58 = vpop.f32.mrf.mxu3 }
0x15f4   :  { %v2690_v13 = vadd.f32 %v2688_v0, %v2671_v58 }
0x15f5   :  { %v2686_v50 = vpop.f32.mrf.mxu0 }
0x15f6   :  { %v4666_v36 = vpop.eup %4665  ;;  %v4331_v3 = vmul.f32 -1.442695, %v2690_v13 }
0x15f7   :  { %2806 = vrot.lane.b32.xlu2 %v4666_v36, %s4847_s3 }
0x15f8   :  { %4667 = vpow2.f32 %v4331_v3 }
0x15fb   :  { %v2673_v56 = vpop.f32.mrf.mxu3 }
0x15fe   :  { %v4668_v41 = vpop.eup %4667 }
0x15ff   :  { %v2732_v22 = vadd.f32 1.0, %v4668_v41 }
0x1601   :  { %4669 = vrcp.f32 %v2732_v22  ;;  %v2745_v43 = vand.u32 2147483648, %v2732_v22  ;;  %vm2739_vm13 = vweird.f32 %v2732_v22  ;;  %v2743_v25 = vand.u32 2147483647, %v2732_v22 }
0x1603   :  { %v2746_v32 = vor.u32 1.1754944e-38, %v2745_v43  ;;  %vm2744_vm15 = vcmp.eq.f32.partialorder %v2743_v25, 8.507059e+37 }
0x1607   :  { %v4670_v48 = vpop.eup %4669 }
0x1608   :  { %v2735_v35 = vmul.f32 %v4670_v48, %v2732_v22  ;;  %vm2740_vm11 = vweird.f32 %v4670_v48 }
0x1609   :  { %vm2741_vm14 = vmor %vm2739_vm13, %vm2740_vm11 }
0x160a   :  { %v2736_v20 = vsub.f32 1.0, %v2735_v35 }
0x160c   :  { %v2737_v38 = vmul.f32 %v4670_v48, %v2736_v20 }
0x160e   :  { %v2738_v27 = vadd.f32 %v4670_v48, %v2737_v38 }
0x1610   :  { %v2742_v63 = vsel %vm2741_vm14, %v4670_v48, %v2738_v27 }
0x1611   :  { %v2747_v52 = vsel %vm2744_vm15, %v2746_v32, %v2742_v63 }
0x1612   :  { %v2804_v22 = vmul.f32 %v2747_v52, %v6027_v6 }
0x1651   :  { %v2807_v33 = vpop.permute.xlu2 %2806 }
0x1652   :  { %v2809_v24 = vmul.f32 %v2807_v33, %v2747_v52 }
0x1654   :  { %2811 = vrot.lane.b32.xlu1 %v2809_v24, %s4847_s3 }
0x1665   :  { %v2705_v11 = vpop.f32.mrf.mxu2  ;;  %v2718_v30 = vpop.f32.mrf.mxu3 }
0x1666   :  { %v2724_v0 = vadd.f32 %v2722_v18, %v2705_v11  ;;  %v6076_v58 = vadd.f32 %v2723_v60, %v2718_v30  ;;  %v4332_v60 = vmul.f32 -1.442695, %v6067_v5 }
0x1668   :  { %4671 = vtanh.f32 %v6076_v58  ;;  %v4333_v56 = vmul.f32 -1.442695, %v2724_v0 }
0x166a   :  { %4673 = vpow2.f32 %v4333_v56 }
0x166d   :  { %v2707_v13 = vpop.f32.mrf.mxu2  ;;  %v2720_v50 = vpop.f32.mrf.mxu3 }
0x166e   :  { %v4672_v36 = vpop.eup %4671 }
0x166f   :  { %2817 = vrot.lane.b32.xlu0 %v4672_v36, %s4847_s3 }
0x1670   :  { %v4674_v3 = vpop.eup %4673 }
0x1671   :  { %v2771_v41 = vadd.f32 1.0, %v4674_v3 }
0x1673   :  { %4675 = vrcp.f32 %v2771_v41  ;;  %v2784_v63 = vand.u32 2147483648, %v2771_v41  ;;  %vm2778_vm3 = vweird.f32 %v2771_v41  ;;  %v2782_v32 = vand.u32 2147483647, %v2771_v41 }
0x1675   :  { %v2785_v6 = vor.u32 1.1754944e-38, %v2784_v63  ;;  %vm2783_vm5 = vcmp.eq.f32.partialorder %v2782_v32, 8.507059e+37 }
0x1679   :  { %v4676_v35 = vpop.eup %4675 }
0x167a   :  { %v2774_v20 = vmul.f32 %v4676_v35, %v2771_v41  ;;  %vm2779_vm1 = vweird.f32 %v4676_v35 }
0x167b   :  { %vm2780_vm4 = vmor %vm2778_vm3, %vm2779_vm1 }
0x167c   :  { %v2775_v27 = vsub.f32 1.0, %v2774_v20 }
0x167e   :  { %v2776_v43 = vmul.f32 %v4676_v35, %v2775_v27 }
0x1680   :  { %v2777_v25 = vadd.f32 %v4676_v35, %v2776_v43 }
0x1682   :  { %v2781_v33 = vsel %vm2780_vm4, %v4676_v35, %v2777_v25 }
0x1683   :  { %v2786_v52 = vsel %vm2783_vm5, %v2785_v6, %v2781_v33 }
0x1684   :  { %v2815_v41 = vmul.f32 %v2786_v52, %v6033_v47  ;;  %v4334_v47 = vmul.f32 -1.442695, %v6076_v58 }
0x16c6   :  { %v2812_v12 = vpop.permute.xlu1 %2811 }
0x16c7   :  { %v6081_v48 = vadd.f32 %v2812_v12, %v2804_v22 }
0x16c9   :  { %4677 = vtanh.f32 %v6081_v48 }
0x16ca   :  { %4679 = vpow2.f32 %v4332_v60 }
0x16cf   :  { %v4678_v38 = vpop.eup %4677 }
0x16d0   :  { %2828 = vrot.lane.b32.xlu0 %v4678_v38, %s4847_s3  ;;  %v4680_v11 = vpop.eup %4679 }
0x16d1   :  { %v2733_v30 = vadd.f32 1.0, %v4680_v11 }
0x16d3   :  { %4681 = vrcp.f32 %v2733_v30  ;;  %v2760_v3 = vand.u32 2147483648, %v2733_v30  ;;  %vm2754_vm8 = vweird.f32 %v2733_v30  ;;  %v2758_v22 = vand.u32 2147483647, %v2733_v30 }
0x16d5   :  { %v2761_v20 = vor.u32 1.1754944e-38, %v2760_v3  ;;  %vm2759_vm10 = vcmp.eq.f32.partialorder %v2758_v22, 8.507059e+37  ;;  %v2876_v3 = vunpack.c.l.bf16 %v5971_v29 }
0x16d9   :  { %v4682_v0 = vpop.eup %4681 }
0x16da   :  { %v2750_v13 = vmul.f32 %v4682_v0, %v2733_v30  ;;  %vm2755_vm7 = vweird.f32 %v4682_v0 }
0x16db   :  { %vm2756_vm9 = vmor %vm2754_vm8, %vm2755_vm7 }
0x16dc   :  { %v2751_v50 = vsub.f32 1.0, %v2750_v13 }
0x16de   :  { %v2752_v36 = vmul.f32 %v4682_v0, %v2751_v50 }
0x16e0   :  { %v2753_v56 = vadd.f32 %v4682_v0, %v2752_v36 }
0x16e1   :  { %v2818_v24 = vpop.permute.xlu0 %2817 }
0x16e2   :  { %v2820_v18 = vmul.f32 %v2818_v24, %v2786_v52  ;;  %v2757_v5 = vsel %vm2756_vm9, %v4682_v0, %v2753_v56 }
0x16e3   :  { %v2762_v38 = vsel %vm2759_vm10, %v2761_v20, %v2757_v5 }
0x16e4   :  { %2822 = vrot.lane.b32.xlu2 %v2820_v18, %s4847_s3 }
0x173e   :  { %v2823_v12 = vpop.permute.xlu2 %2822 }
0x173f   :  { %v6088_v35 = vadd.f32 %v2823_v12, %v2815_v41  ;;  %v2877_v12 = vunpack.c.h.bf16 %v5971_v29 }
0x1741   :  { %4683 = vtanh.f32 %v6088_v35 }
0x1742   :  { %v2829_v27 = vpop.permute.xlu0 %2828  ;;  %4685 = vpow2.f32 %v4334_v47 }
0x1743   :  { %v2831_v43 = vmul.f32 %v2829_v27, %v2762_v38 }
0x1745   :  { %v2832_v25 = vpack.c.bf16 %v2831_v43, %v2831_v43 }
0x1747   :  { %v4684_v63 = vpop.eup %4683  ;;  %2840 = vst.msk [vmem:[#allocation5 + $0x4] sm:$0xf] %vm717_vm6, %v2832_v25  ;;  %4335 = vmatmul.msk.bf16.vlgmr.msra.gmra.mxu0 %vm497_vm2, %v2832_v25  ;;  %4336 = vmatmul.msk.bf16.vlgmr.msra.gmra.mxu2 %vm497_vm2, %v2832_v25 }
0x1748   :  { %2835 = vrot.lane.b32.xlu1 %v4684_v63, %s4847_s3  ;;  %3089 = vmatpush.bf16.msra.mxu2 %v5141_v44  ;;  %v4686_v32 = vpop.eup %4685 }
0x1749   :  { %3076 = vmatpush.bf16.msra.mxu0 %v5186_v54  ;;  %v2772_v33 = vadd.f32 1.0, %v4686_v32 }
0x174b   :  { %4687 = vrcp.f32 %v2772_v33  ;;  %v2799_v11 = vand.u32 2147483648, %v2772_v33  ;;  %vm2793_vm13 = vweird.f32 %v2772_v33  ;;  %v2797_v30 = vand.u32 2147483647, %v2772_v33 }
0x174c   :  { %3090 = vmatpush.bf16.msra.mxu2 %v5172_v51 }
0x174d   :  { %3077 = vmatpush.bf16.msra.mxu0 %v5207_v61  ;;  %v2800_v13 = vor.u32 1.1754944e-38, %v2799_v11  ;;  %vm2798_vm15 = vcmp.eq.f32.partialorder %v2797_v30, 8.507059e+37 }
0x1750   :  { %3091 = vmatpush.bf16.msra.mxu2 %v5195_v57 }
0x1751   :  { %3078 = vmatpush.bf16.msra.mxu0 %v5234_v7  ;;  %v4688_v6 = vpop.eup %4687 }
0x1752   :  { %v2789_v52 = vmul.f32 %v4688_v6, %v2772_v33  ;;  %vm2794_vm11 = vweird.f32 %v4688_v6 }
0x1753   :  { %vm2795_vm14 = vmor %vm2793_vm13, %vm2794_vm11 }
0x1754   :  { %3092 = vmatpush.bf16.msra.mxu2 %v5225_v2  ;;  %v2790_v24 = vsub.f32 1.0, %v2789_v52 }
0x1755   :  { %3079 = vmatpush.bf16.msra.mxu0 %v5253_v15 }
0x1756   :  { %v2791_v18 = vmul.f32 %v4688_v6, %v2790_v24 }
0x1758   :  { %v2792_v60 = vadd.f32 %v4688_v6, %v2791_v18 }
0x175a   :  { %v2796_v0 = vsel %vm2795_vm14, %v4688_v6, %v2792_v60 }
0x175b   :  { %v2801_v36 = vsel %vm2798_vm15, %v2800_v13, %v2796_v0 }
0x17ba   :  { %v2836_v50 = vpop.permute.xlu1 %2835 }
0x17bb   :  { %v2838_v58 = vmul.f32 %v2836_v50, %v2801_v36  ;;  %v2911_v50 = vunpack.c.h.bf16 %v6012_v34 }
0x17bd   :  { %v6104_v56 = vpack.c.bf16 %v2838_v58, %v2838_v58 }
0x17bf   :  { %4337 = vmatmul.msk.bf16.vlgmr.msra.gmra.mxu3 %vm497_vm2, %v6104_v56  ;;  %4338 = vmatmul.msk.bf16.vlgmr.msrb.gmra.mxu0 %vm497_vm2, %v6104_v56 }
0x17c0   :  { %3264 = vmatpush.bf16.msrb.mxu0 %v5186_v54  ;;  %3243 = vmatpush.bf16.msra.mxu3 %v5161_v49 }
0x17c4   :  { %v2859_v41 = vpop.f32.mrf.mxu0  ;;  %3265 = vmatpush.bf16.msrb.mxu0 %v5207_v61  ;;  %3244 = vmatpush.bf16.msra.mxu3 %v5184_v53 }
0x17c5   :  { %v2878_v22 = vadd.f32 %v2876_v3, %v2859_v41  ;;  %v2910_v3 = vunpack.c.l.bf16 %v6012_v34 }
0x17c7   :  { %v4339_v25 = vmul.f32 -1.442695, %v2878_v22 }
0x17c8   :  { %3266 = vmatpush.bf16.msrb.mxu0 %v5234_v7  ;;  %3245 = vmatpush.bf16.msra.mxu3 %v5222_v1 }
0x17ca   :  { %v2872_v5 = vpop.f32.mrf.mxu2 }
0x17cb   :  { %v6118_v20 = vadd.f32 %v2877_v12, %v2872_v5 }
0x17cc   :  { %v2861_v38 = vpop.f32.mrf.mxu0  ;;  %3267 = vmatpush.bf16.msrb.mxu0 %v5253_v15  ;;  %3246 = vmatpush.bf16.msra.mxu3 %v5237_v10 }
0x17cd   :  { %4689 = vtanh.f32 %v6118_v20 }
0x17ce   :  { %4691 = vpow2.f32 %v4339_v25 }
0x17d2   :  { %v2874_v27 = vpop.f32.mrf.mxu2 }
0x17d3   :  { %v4690_v43 = vpop.eup %4689 }
0x17d4   :  { %2994 = vrot.lane.b32.xlu2 %v4690_v43, %s4847_s3  ;;  %v4692_v63 = vpop.eup %4691 }
0x17d5   :  { %v2920_v47 = vadd.f32 1.0, %v4692_v63 }
0x17d7   :  { %4693 = vrcp.f32 %v2920_v47  ;;  %v2933_v24 = vand.u32 2147483648, %v2920_v47  ;;  %vm2927_vm3 = vweird.f32 %v2920_v47  ;;  %v2931_v18 = vand.u32 2147483647, %v2920_v47 }
0x17d9   :  { %v2934_v11 = vor.u32 1.1754944e-38, %v2933_v24  ;;  %vm2932_vm5 = vcmp.eq.f32.partialorder %v2931_v18, 8.507059e+37 }
0x17dd   :  { %v4694_v29 = vpop.eup %4693 }
0x17de   :  { %v2923_v32 = vmul.f32 %v4694_v29, %v2920_v47  ;;  %vm2928_vm1 = vweird.f32 %v4694_v29 }
0x17df   :  { %vm2929_vm4 = vmor %vm2927_vm3, %vm2928_vm1 }
0x17e0   :  { %v2924_v33 = vsub.f32 1.0, %v2923_v32 }
0x17e2   :  { %v2925_v6 = vmul.f32 %v4694_v29, %v2924_v33 }
0x17e4   :  { %v2926_v52 = vadd.f32 %v4694_v29, %v2925_v6 }
0x17e6   :  { %v2930_v60 = vsel %vm2929_vm4, %v4694_v29, %v2926_v52 }
0x17e7   :  { %v2935_v0 = vsel %vm2932_vm5, %v2934_v11, %v2930_v60 }
0x17e8   :  { %v2992_v47 = vmul.f32 %v2935_v0, %v6081_v48 }
0x182e   :  { %v2995_v30 = vpop.permute.xlu2 %2994 }
0x182f   :  { %v2997_v13 = vmul.f32 %v2995_v30, %v2935_v0 }
0x1831   :  { %2999 = vrot.lane.b32.xlu1 %v2997_v13, %s4847_s3 }
0x183c   :  { %v2906_v36 = vpop.f32.mrf.mxu0 }
0x183d   :  { %v6126_v58 = vadd.f32 %v2911_v50, %v2906_v36  ;;  %v4340_v50 = vmul.f32 -1.442695, %v6118_v20 }
0x183f   :  { %4695 = vtanh.f32 %v6126_v58 }
0x1842   :  { %v2893_v41 = vpop.f32.mrf.mxu3 }
0x1843   :  { %v2912_v22 = vadd.f32 %v2910_v3, %v2893_v41 }
0x1844   :  { %v2908_v12 = vpop.f32.mrf.mxu0 }
0x1845   :  { %v4696_v5 = vpop.eup %4695  ;;  %v4341_v27 = vmul.f32 -1.442695, %v2912_v22 }
0x1846   :  { %3005 = vrot.lane.b32.xlu0 %v4696_v5, %s4847_s3 }
0x1847   :  { %4697 = vpow2.f32 %v4341_v27 }
0x184a   :  { %v2895_v38 = vpop.f32.mrf.mxu3 }
0x184d   :  { %v4698_v43 = vpop.eup %4697 }
0x184e   :  { %v2959_v25 = vadd.f32 1.0, %v4698_v43 }
0x1850   :  { %4699 = vrcp.f32 %v2959_v25  ;;  %v2972_v18 = vand.u32 2147483648, %v2959_v25  ;;  %vm2966_vm8 = vweird.f32 %v2959_v25  ;;  %v2970_v60 = vand.u32 2147483647, %v2959_v25 }
0x1852   :  { %v2973_v30 = vor.u32 1.1754944e-38, %v2972_v18  ;;  %vm2971_vm10 = vcmp.eq.f32.partialorder %v2970_v60, 8.507059e+37 }
0x1856   :  { %v4700_v63 = vpop.eup %4699 }
0x1857   :  { %v2962_v33 = vmul.f32 %v4700_v63, %v2959_v25  ;;  %vm2967_vm7 = vweird.f32 %v4700_v63 }
0x1858   :  { %vm2968_vm9 = vmor %vm2966_vm8, %vm2967_vm7 }
0x1859   :  { %v2963_v34 = vsub.f32 1.0, %v2962_v33 }
0x185b   :  { %v2964_v52 = vmul.f32 %v4700_v63, %v2963_v34 }
0x185d   :  { %v2965_v24 = vadd.f32 %v4700_v63, %v2964_v52 }
0x185f   :  { %v2969_v11 = vsel %vm2968_vm9, %v4700_v63, %v2965_v24  ;;  %v4342_v24 = vmul.f32 -1.442695, %v6126_v58 }
0x1860   :  { %v2974_v0 = vsel %vm2971_vm10, %v2973_v30, %v2969_v11 }
0x1861   :  { %v3003_v5 = vmul.f32 %v2974_v0, %v6088_v35 }
0x18a3   :  { %v3000_v29 = vpop.permute.xlu1 %2999 }
0x18a4   :  { %v6132_v32 = vadd.f32 %v3000_v29, %v2992_v47 }
0x18a6   :  { %4701 = vtanh.f32 %v6132_v32 }
0x18a7   :  { %4703 = vpow2.f32 %v4340_v50 }
0x18ac   :  { %v4702_v6 = vpop.eup %4701 }
0x18ad   :  { %3016 = vrot.lane.b32.xlu0 %v4702_v6, %s4847_s3  ;;  %v4704_v36 = vpop.eup %4703 }
0x18ae   :  { %v2921_v3 = vadd.f32 1.0, %v4704_v36 }
0x18b0   :  { %4705 = vrcp.f32 %v2921_v3  ;;  %v2948_v63 = vand.u32 2147483648, %v2921_v3  ;;  %vm2942_vm13 = vweird.f32 %v2921_v3  ;;  %v2946_v20 = vand.u32 2147483647, %v2921_v3 }
0x18b2   :  { %v2949_v29 = vor.u32 1.1754944e-38, %v2948_v63  ;;  %vm2947_vm15 = vcmp.eq.f32.partialorder %v2946_v20, 8.507059e+37 }
0x18b6   :  { %v4706_v41 = vpop.eup %4705 }
0x18b7   :  { %v2938_v22 = vmul.f32 %v4706_v41, %v2921_v3  ;;  %vm2943_vm11 = vweird.f32 %v4706_v41 }
0x18b8   :  { %v3006_v48 = vpop.permute.xlu0 %3005  ;;  %vm2944_vm14 = vmor %vm2942_vm13, %vm2943_vm11 }
0x18b9   :  { %v3008_v13 = vmul.f32 %v3006_v48, %v2974_v0  ;;  %v2939_v12 = vsub.f32 1.0, %v2938_v22 }
0x18bb   :  { %3010 = vrot.lane.b32.xlu2 %v3008_v13, %s4847_s3  ;;  %v2940_v38 = vmul.f32 %v4706_v41, %v2939_v12 }
0x18bd   :  { %v2941_v25 = vadd.f32 %v4706_v41, %v2940_v38  ;;  %v2426_v38 = vadd.f32 %v5973_v28, %v5288_v21 }
0x18bf   :  { %v2945_v47 = vsel %vm2944_vm14, %v4706_v41, %v2941_v25 }
0x18c0   :  { %v2950_v34 = vsel %vm2947_vm15, %v2949_v29, %v2945_v47 }
0x1915   :  { %v3011_v27 = vpop.permute.xlu2 %3010 }
0x1916   :  { %v6139_v43 = vadd.f32 %v3011_v27, %v3003_v5  ;;  %v2397_v27 = vadd.f32 %v5969_v45, %v5290_v23  ;;  %v3098_v45 = vunpack.c.l.bf16 %v6008_v42 }
0x1918   :  { %4707 = vtanh.f32 %v6139_v43  ;;  %v2441_v25 = vpack.c.bf16 %v2426_v38, %v2397_v27 }
0x1919   :  { %4709 = vpow2.f32 %v4342_v24 }
0x191a   :  { %v3064_v63 = vunpack.c.l.bf16 %v2441_v25  ;;  %v3065_v20 = vunpack.c.h.bf16 %v2441_v25 }
0x191e   :  { %v4708_v33 = vpop.eup %4707 }
0x191f   :  { %v3017_v6 = vpop.permute.xlu0 %3016  ;;  %3023 = vrot.lane.b32.xlu1 %v4708_v33, %s4847_s3  ;;  %v4710_v18 = vpop.eup %4709 }
0x1920   :  { %v3019_v35 = vmul.f32 %v3017_v6, %v2950_v34  ;;  %v2960_v60 = vadd.f32 1.0, %v4710_v18  ;;  %v3099_v18 = vunpack.c.h.bf16 %v6008_v42 }
0x1922   :  { %v3020_v52 = vpack.c.bf16 %v3019_v35, %v3019_v35  ;;  %4711 = vrcp.f32 %v2960_v60  ;;  %v2987_v50 = vand.u32 2147483648, %v2960_v60  ;;  %vm2981_vm3 = vweird.f32 %v2960_v60 }
0x1923   :  { %v2985_v36 = vand.u32 2147483647, %v2960_v60 }
0x1924   :  { %3028 = vst.msk [vmem:[#allocation5 + $0x8] sm:$0xf] %vm717_vm6, %v3020_v52  ;;  %4343 = vmatmul.msk.bf16.vlgmr.msrb.gmra.mxu2 %vm497_vm2, %v3020_v52  ;;  %4344 = vmatmul.msk.bf16.vlgmr.msrb.gmra.mxu3 %vm497_vm2, %v3020_v52  ;;  %v2988_v41 = vor.u32 1.1754944e-38, %v2987_v50 }
0x1925   :  { %3277 = vmatpush.bf16.msrb.mxu2 %v5141_v44  ;;  %3431 = vmatpush.bf16.msrb.mxu3 %v5161_v49  ;;  %vm2986_vm5 = vcmp.eq.f32.partialorder %v2985_v36, 8.507059e+37 }
0x1928   :  { %v4712_v11 = vpop.eup %4711 }
0x1929   :  { %3278 = vmatpush.bf16.msrb.mxu2 %v5172_v51  ;;  %3432 = vmatpush.bf16.msrb.mxu3 %v5184_v53  ;;  %v2977_v30 = vmul.f32 %v4712_v11, %v2960_v60  ;;  %vm2982_vm1 = vweird.f32 %v4712_v11 }
0x192a   :  { %vm2983_vm4 = vmor %vm2981_vm3, %vm2982_vm1 }
0x192b   :  { %v2978_v48 = vsub.f32 1.0, %v2977_v30 }
0x192d   :  { %3279 = vmatpush.bf16.msrb.mxu2 %v5195_v57  ;;  %3433 = vmatpush.bf16.msrb.mxu3 %v5222_v1  ;;  %v2979_v0 = vmul.f32 %v4712_v11, %v2978_v48 }
0x192f   :  { %v2980_v13 = vadd.f32 %v4712_v11, %v2979_v0 }
0x1931   :  { %3280 = vmatpush.bf16.msrb.mxu2 %v5225_v2  ;;  %3434 = vmatpush.bf16.msrb.mxu3 %v5237_v10  ;;  %v2984_v3 = vsel %vm2983_vm4, %v4712_v11, %v2980_v13 }
0x1932   :  { %v2989_v22 = vsel %vm2986_vm5, %v2988_v41, %v2984_v3 }
0x1991   :  { %v3024_v12 = vpop.permute.xlu1 %3023 }
0x1992   :  { %v3026_v58 = vmul.f32 %v3024_v12, %v2989_v22 }
0x1994   :  { %v6155_v5 = vpack.c.bf16 %v3026_v58, %v3026_v58 }
0x1996   :  { %4345 = vmatmul.msk.bf16.vlgmr.msra.gmra.mxu0 %vm497_vm2, %v6155_v5  ;;  %4346 = vmatmul.msk.bf16.vlgmr.msra.gmra.mxu2 %vm497_vm2, %v6155_v5 }
0x1997   :  { %3452 = vmatpush.bf16.msra.mxu0 %v5186_v54  ;;  %3465 = vmatpush.bf16.msra.mxu2 %v5141_v44 }
0x199b   :  { %3453 = vmatpush.bf16.msra.mxu0 %v5207_v61  ;;  %3466 = vmatpush.bf16.msra.mxu2 %v5172_v51 }
0x199f   :  { %3454 = vmatpush.bf16.msra.mxu0 %v5234_v7  ;;  %3467 = vmatpush.bf16.msra.mxu2 %v5195_v57 }
0x19a3   :  { %3455 = vmatpush.bf16.msra.mxu0 %v5253_v15  ;;  %3468 = vmatpush.bf16.msra.mxu2 %v5225_v2 }
0x19a7   :  { %v3047_v47 = vpop.f32.mrf.mxu2  ;;  %v3060_v29 = vpop.f32.mrf.mxu3 }
0x19a8   :  { %v3066_v33 = vadd.f32 %v3064_v63, %v3047_v47  ;;  %v6173_v34 = vadd.f32 %v3065_v20, %v3060_v29 }
0x19aa   :  { %4713 = vtanh.f32 %v6173_v34  ;;  %v4347_v50 = vmul.f32 -1.442695, %v3066_v33 }
0x19af   :  { %v3049_v28 = vpop.f32.mrf.mxu2  ;;  %v3062_v6 = vpop.f32.mrf.mxu3 }
0x19b0   :  { %v4714_v35 = vpop.eup %4713 }
0x19b1   :  { %3182 = vrot.lane.b32.xlu1 %v4714_v35, %s4847_s3 }
0x1a13   :  { %v3081_v52 = vpop.f32.mrf.mxu0 }
0x1a14   :  { %v3100_v24 = vadd.f32 %v3098_v45, %v3081_v52 }
0x1a16   :  { %v4349_v13 = vmul.f32 -1.442695, %v3100_v24 }
0x1a19   :  { %v3094_v60 = vpop.f32.mrf.mxu2 }
0x1a1a   :  { %v3101_v11 = vadd.f32 %v3099_v18, %v3094_v60 }
0x1a1b   :  { %v3083_v30 = vpop.f32.mrf.mxu0 }
0x1a1c   :  { %4715 = vtanh.f32 %v3101_v11 }
0x1a1d   :  { %4717 = vpow2.f32 %v4349_v13 }
0x1a1e   :  { %4719 = vpow2.f32 %v4347_v50 }
0x1a21   :  { %v3096_v48 = vpop.f32.mrf.mxu2 }
0x1a22   :  { %v4716_v0 = vpop.eup %4715 }
0x1a23   :  { %3193 = vrot.lane.b32.xlu2 %v4716_v0, %s4847_s3  ;;  %v4718_v36 = vpop.eup %4717  ;;  %v3183_v0 = vpop.permute.xlu1 %3182 }
0x1a24   :  { %v3147_v3 = vadd.f32 1.0, %v4718_v36  ;;  %v4720_v41 = vpop.eup %4719 }
0x1a25   :  { %v3108_v22 = vadd.f32 1.0, %v4720_v41 }
0x1a26   :  { %4721 = vrcp.f32 %v3147_v3  ;;  %v3160_v47 = vand.u32 2147483648, %v3147_v3  ;;  %vm3154_vm8 = vweird.f32 %v3147_v3  ;;  %v3158_v29 = vand.u32 2147483647, %v3147_v3 }
0x1a27   :  { %4723 = vrcp.f32 %v3108_v22  ;;  %v3121_v18 = vand.u32 2147483648, %v3108_v22  ;;  %vm3115_vm13 = vweird.f32 %v3108_v22  ;;  %v3119_v60 = vand.u32 2147483647, %v3108_v22 }
0x1a28   :  { %v3161_v6 = vor.u32 1.1754944e-38, %v3160_v47  ;;  %vm3159_vm10 = vcmp.eq.f32.partialorder %v3158_v29, 8.507059e+37 }
0x1a29   :  { %v3122_v48 = vor.u32 1.1754944e-38, %v3121_v18  ;;  %vm3120_vm15 = vcmp.eq.f32.partialorder %v3119_v60, 8.507059e+37 }
0x1a2c   :  { %v4722_v12 = vpop.eup %4721 }
0x1a2d   :  { %v3150_v42 = vmul.f32 %v4722_v12, %v3147_v3  ;;  %v4724_v38 = vpop.eup %4723  ;;  %vm3155_vm7 = vweird.f32 %v4722_v12 }
0x1a2e   :  { %v3111_v27 = vmul.f32 %v4724_v38, %v3108_v22  ;;  %vm3156_vm9 = vmor %vm3154_vm8, %vm3155_vm7  ;;  %vm3116_vm11 = vweird.f32 %v4724_v38 }
0x1a2f   :  { %v3151_v58 = vsub.f32 1.0, %v3150_v42  ;;  %vm3117_vm14 = vmor %vm3115_vm13, %vm3116_vm11 }
0x1a30   :  { %v3112_v63 = vsub.f32 1.0, %v3111_v27  ;;  %v4350_v27 = vmul.f32 -1.442695, %v3101_v11 }
0x1a31   :  { %v3152_v25 = vmul.f32 %v4722_v12, %v3151_v58 }
0x1a32   :  { %v3113_v33 = vmul.f32 %v4724_v38, %v3112_v63 }
0x1a33   :  { %v3153_v20 = vadd.f32 %v4722_v12, %v3152_v25 }
0x1a34   :  { %v3114_v52 = vadd.f32 %v4724_v38, %v3113_v33 }
0x1a35   :  { %v3157_v28 = vsel %vm3156_vm9, %v4722_v12, %v3153_v20 }
0x1a36   :  { %v3162_v45 = vsel %vm3159_vm10, %v3161_v6, %v3157_v28  ;;  %v3118_v30 = vsel %vm3117_vm14, %v4724_v38, %v3114_v52 }
0x1a37   :  { %v3123_v13 = vsel %vm3120_vm15, %v3122_v48, %v3118_v30  ;;  %v3191_v36 = vmul.f32 %v3162_v45, %v6139_v43 }
0x1a38   :  { %v3185_v50 = vmul.f32 %v3183_v0, %v3123_v13  ;;  %v3180_v22 = vmul.f32 %v3123_v13, %v6132_v32  ;;  %v4348_v32 = vmul.f32 -1.442695, %v6173_v34 }
0x1a7d   :  { %v3194_v35 = vpop.permute.xlu2 %3193 }
0x1a7e   :  { %v3196_v24 = vmul.f32 %v3194_v35, %v3162_v45 }
0x1a80   :  { %3198 = vrot.lane.b32.xlu0 %v3196_v24, %s4847_s3 }
0x1a88   :  { %3187 = vrot.lane.b32.xlu0 %v3185_v50, %s4847_s3 }
0x1af2   :  { %v3199_v3 = vpop.permute.xlu0 %3198 }
0x1af3   :  { %v6183_v41 = vadd.f32 %v3199_v3, %v3191_v36 }
0x1af5   :  { %4725 = vtanh.f32 %v6183_v41 }
0x1afa   :  { %v3188_v12 = vpop.permute.xlu0 %3187 }
0x1afb   :  { %v4726_v42 = vpop.eup %4725  ;;  %v6187_v58 = vadd.f32 %v3188_v12, %v3180_v22 }
0x1afc   :  { %3211 = vrot.lane.b32.xlu2 %v4726_v42, %s4847_s3 }
0x1afd   :  { %4727 = vtanh.f32 %v6187_v58 }
0x1afe   :  { %4729 = vpow2.f32 %v4350_v27 }
0x1b03   :  { %v4728_v38 = vpop.eup %4727 }
0x1b04   :  { %3204 = vrot.lane.b32.xlu1 %v4728_v38, %s4847_s3  ;;  %v4730_v43 = vpop.eup %4729 }
0x1b05   :  { %v3148_v25 = vadd.f32 1.0, %v4730_v43 }
0x1b07   :  { %4731 = vrcp.f32 %v3148_v25  ;;  %v3175_v28 = vand.u32 2147483648, %v3148_v25  ;;  %vm3169_vm3 = vweird.f32 %v3148_v25  ;;  %v3173_v6 = vand.u32 2147483647, %v3148_v25 }
0x1b08   :  { %4733 = vpow2.f32 %v4348_v32 }
0x1b09   :  { %v3176_v11 = vor.u32 1.1754944e-38, %v3175_v28  ;;  %vm3174_vm5 = vcmp.eq.f32.partialorder %v3173_v6, 8.507059e+37 }
0x1b0d   :  { %v4732_v63 = vpop.eup %4731 }
0x1b0e   :  { %v3165_v20 = vmul.f32 %v4732_v63, %v3148_v25  ;;  %vm3170_vm1 = vweird.f32 %v4732_v63  ;;  %v4734_v35 = vpop.eup %4733  ;;  %v3286_v25 = vunpack.c.l.bf16 %v6004_v4 }
0x1b0f   :  { %vm3171_vm4 = vmor %vm3169_vm3, %vm3170_vm1  ;;  %v3109_v52 = vadd.f32 1.0, %v4734_v35  ;;  %v3252_v35 = vunpack.c.l.bf16 %v5979_v40 }
0x1b10   :  { %v3166_v47 = vsub.f32 1.0, %v3165_v20 }
0x1b11   :  { %4735 = vrcp.f32 %v3109_v52  ;;  %v3136_v36 = vand.u32 2147483648, %v3109_v52  ;;  %vm3130_vm8 = vweird.f32 %v3109_v52  ;;  %v3134_v3 = vand.u32 2147483647, %v3109_v52 }
0x1b12   :  { %v3167_v29 = vmul.f32 %v4732_v63, %v3166_v47  ;;  %v3287_v47 = vunpack.c.h.bf16 %v6004_v4 }
0x1b13   :  { %v3137_v12 = vor.u32 1.1754944e-38, %v3136_v36  ;;  %vm3135_vm10 = vcmp.eq.f32.partialorder %v3134_v3, 8.507059e+37 }
0x1b14   :  { %v3168_v33 = vadd.f32 %v4732_v63, %v3167_v29 }
0x1b16   :  { %v3172_v45 = vsel %vm3171_vm4, %v4732_v63, %v3168_v33 }
0x1b17   :  { %v3177_v24 = vsel %vm3174_vm5, %v3176_v11, %v3172_v45  ;;  %v4736_v34 = vpop.eup %4735 }
0x1b18   :  { %v3126_v48 = vmul.f32 %v4736_v34, %v3109_v52  ;;  %vm3131_vm7 = vweird.f32 %v4736_v34  ;;  %v3253_v52 = vunpack.c.h.bf16 %v5979_v40 }
0x1b19   :  { %vm3132_vm9 = vmor %vm3130_vm8, %vm3131_vm7 }
0x1b1a   :  { %v3127_v0 = vsub.f32 1.0, %v3126_v48 }
0x1b1c   :  { %v3128_v13 = vmul.f32 %v4736_v34, %v3127_v0 }
0x1b1e   :  { %v3129_v50 = vadd.f32 %v4736_v34, %v3128_v13 }
0x1b20   :  { %v3133_v22 = vsel %vm3132_vm9, %v4736_v34, %v3129_v50 }
0x1b21   :  { %v3138_v38 = vsel %vm3135_vm10, %v3137_v12, %v3133_v22 }
0x1b56   :  { %v3212_v18 = vpop.permute.xlu2 %3211 }
0x1b57   :  { %v3214_v60 = vmul.f32 %v3212_v18, %v3177_v24 }
0x1b59   :  { %v6193_v30 = vpack.c.bf16 %v3214_v60, %v3214_v60 }
0x1b5b   :  { %4353 = vmatmul.msk.bf16.vlgmr.msrb.gmra.mxu0 %vm497_vm2, %v6193_v30  ;;  %4354 = vmatmul.msk.bf16.vlgmr.msrb.gmra.mxu2 %vm497_vm2, %v6193_v30 }
0x1b5c   :  { %3640 = vmatpush.bf16.msrb.mxu0 %v5186_v54  ;;  %3653 = vmatpush.bf16.msrb.mxu2 %v5141_v44 }
0x1b60   :  { %3641 = vmatpush.bf16.msrb.mxu0 %v5207_v61  ;;  %3654 = vmatpush.bf16.msrb.mxu2 %v5172_v51 }
0x1b64   :  { %3642 = vmatpush.bf16.msrb.mxu0 %v5234_v7  ;;  %3655 = vmatpush.bf16.msrb.mxu2 %v5195_v57 }
0x1b68   :  { %3643 = vmatpush.bf16.msrb.mxu0 %v5253_v15  ;;  %3656 = vmatpush.bf16.msrb.mxu2 %v5225_v2 }
0x1b76   :  { %v3205_v42 = vpop.permute.xlu1 %3204 }
0x1b77   :  { %v3207_v27 = vmul.f32 %v3205_v42, %v3138_v38 }
0x1b79   :  { %v3208_v43 = vpack.c.bf16 %v3207_v27, %v3207_v27 }
0x1b7b   :  { %3216 = vst.msk [vmem:[#allocation5 + $0xc] sm:$0xf] %vm717_vm6, %v3208_v43  ;;  %4351 = vmatmul.msk.bf16.vlgmr.msrb.gmra.mxu1 %vm497_vm2, %v3208_v43  ;;  %4352 = vmatmul.msk.bf16.vlgmr.msra.gmra.mxu3 %vm497_vm2, %v3208_v43 }
0x1b7c   :  { %3619 = vmatpush.bf16.msra.mxu3 %v5161_v49  ;;  %3606 = vmatpush.bf16.msrb.mxu1 %v5095_v46 }
0x1b80   :  { %3620 = vmatpush.bf16.msra.mxu3 %v5184_v53  ;;  %3607 = vmatpush.bf16.msrb.mxu1 %v5106_v19 }
0x1b84   :  { %3621 = vmatpush.bf16.msra.mxu3 %v5222_v1  ;;  %3608 = vmatpush.bf16.msrb.mxu1 %v5115_v26 }
0x1b88   :  { %3622 = vmatpush.bf16.msra.mxu3 %v5237_v10  ;;  %3609 = vmatpush.bf16.msrb.mxu1 %v5124_v39 }
0x1bd8   :  { %v3269_v63 = vpop.f32.mrf.mxu0 }
0x1bd9   :  { %v3288_v20 = vadd.f32 %v3286_v25, %v3269_v63 }
0x1bdb   :  { %v4357_v48 = vmul.f32 -1.442695, %v3288_v20 }
0x1bde   :  { %v3282_v32 = vpop.f32.mrf.mxu2 }
0x1bdf   :  { %v6220_v29 = vadd.f32 %v3287_v47, %v3282_v32 }
0x1be0   :  { %v3271_v33 = vpop.f32.mrf.mxu0 }
0x1be1   :  { %4737 = vtanh.f32 %v6220_v29 }
0x1be6   :  { %v3284_v28 = vpop.f32.mrf.mxu2 }
0x1be7   :  { %v4738_v6 = vpop.eup %4737 }
0x1be8   :  { %3381 = vrot.lane.b32.xlu2 %v4738_v6, %s4847_s3 }
0x1bf8   :  { %v3235_v45 = vpop.f32.mrf.mxu1 }
0x1bf9   :  { %v3254_v11 = vadd.f32 %v3252_v35, %v3235_v45 }
0x1bfb   :  { %v4355_v20 = vmul.f32 -1.442695, %v3254_v11 }
0x1bfe   :  { %v3248_v24 = vpop.f32.mrf.mxu3 }
0x1bff   :  { %v6226_v18 = vadd.f32 %v3253_v52, %v3248_v24 }
0x1c00   :  { %v3237_v4 = vpop.f32.mrf.mxu1 }
0x1c01   :  { %4739 = vtanh.f32 %v6226_v18 }
0x1c02   :  { %4741 = vpow2.f32 %v4357_v48 }
0x1c06   :  { %v3250_v60 = vpop.f32.mrf.mxu3 }
0x1c07   :  { %v4740_v34 = vpop.eup %4739 }
0x1c08   :  { %3370 = vrot.lane.b32.xlu1 %v4740_v34, %s4847_s3  ;;  %v4742_v0 = vpop.eup %4741 }
0x1c09   :  { %v3335_v13 = vadd.f32 1.0, %v4742_v0 }
0x1c0b   :  { %4743 = vrcp.f32 %v3335_v13  ;;  %v3348_v12 = vand.u32 2147483648, %v3335_v13  ;;  %vm3342_vm13 = vweird.f32 %v3335_v13  ;;  %v3346_v42 = vand.u32 2147483647, %v3335_v13 }
0x1c0c   :  { %4745 = vpow2.f32 %v4355_v20 }
0x1c0d   :  { %v3349_v27 = vor.u32 1.1754944e-38, %v3348_v12  ;;  %vm3347_vm15 = vcmp.eq.f32.partialorder %v3346_v42, 8.507059e+37 }
0x1c11   :  { %v4744_v50 = vpop.eup %4743 }
0x1c12   :  { %v3338_v36 = vmul.f32 %v4744_v50, %v3335_v13  ;;  %vm3343_vm11 = vweird.f32 %v4744_v50  ;;  %v4746_v47 = vpop.eup %4745 }
0x1c13   :  { %vm3344_vm14 = vmor %vm3342_vm13, %vm3343_vm11  ;;  %v3296_v32 = vadd.f32 1.0, %v4746_v47 }
0x1c14   :  { %v3339_v3 = vsub.f32 1.0, %v3338_v36 }
0x1c15   :  { %4747 = vrcp.f32 %v3296_v32  ;;  %v3309_v52 = vand.u32 2147483648, %v3296_v32  ;;  %vm3303_vm3 = vweird.f32 %v3296_v32  ;;  %v3307_v24 = vand.u32 2147483647, %v3296_v32 }
0x1c16   :  { %v3340_v22 = vmul.f32 %v4744_v50, %v3339_v3  ;;  %v4358_v3 = vmul.f32 -1.442695, %v6220_v29 }
0x1c17   :  { %v3310_v60 = vor.u32 1.1754944e-38, %v3309_v52  ;;  %vm3308_vm5 = vcmp.eq.f32.partialorder %v3307_v24, 8.507059e+37 }
0x1c18   :  { %v3341_v40 = vadd.f32 %v4744_v50, %v3340_v22 }
0x1c1a   :  { %v3345_v38 = vsel %vm3344_vm14, %v4744_v50, %v3341_v40 }
0x1c1b   :  { %v3350_v25 = vsel %vm3347_vm15, %v3349_v27, %v3345_v38  ;;  %v4748_v33 = vpop.eup %4747 }
0x1c1c   :  { %v3299_v28 = vmul.f32 %v4748_v33, %v3296_v32  ;;  %vm3304_vm1 = vweird.f32 %v4748_v33  ;;  %v3379_v0 = vmul.f32 %v3350_v25, %v6183_v41 }
0x1c1d   :  { %vm3305_vm4 = vmor %vm3303_vm3, %vm3304_vm1 }
0x1c1e   :  { %v3300_v6 = vsub.f32 1.0, %v3299_v28 }
0x1c20   :  { %v3301_v35 = vmul.f32 %v4748_v33, %v3300_v6 }
0x1c22   :  { %v3302_v45 = vadd.f32 %v4748_v33, %v3301_v35 }
0x1c24   :  { %v3306_v4 = vsel %vm3305_vm4, %v4748_v33, %v3302_v45  ;;  %v4356_v45 = vmul.f32 -1.442695, %v6226_v18 }
0x1c25   :  { %v3311_v34 = vsel %vm3308_vm5, %v3310_v60, %v3306_v4 }
0x1c26   :  { %v3368_v22 = vmul.f32 %v3311_v34, %v6187_v58 }
0x1c42   :  { %v3382_v43 = vpop.permute.xlu2 %3381 }
0x1c43   :  { %v3384_v63 = vmul.f32 %v3382_v43, %v3350_v25 }
0x1c45   :  { %3386 = vrot.lane.b32.xlu0 %v3384_v63, %s4847_s3 }
0x1c7a   :  { %v3371_v48 = vpop.permute.xlu1 %3370 }
0x1c7b   :  { %v3373_v11 = vmul.f32 %v3371_v48, %v3311_v34 }
0x1c7d   :  { %3375 = vrot.lane.b32.xlu0 %v3373_v11, %s4847_s3  ;;  %v3474_v11 = vunpack.c.l.bf16 %v6000_v31 }
0x1cb7   :  { %v3387_v13 = vpop.permute.xlu0 %3386 }
0x1cb8   :  { %v6233_v50 = vadd.f32 %v3387_v13, %v3379_v0 }
0x1cba   :  { %4749 = vtanh.f32 %v6233_v50 }
0x1cbb   :  { %4751 = vpow2.f32 %v4358_v3  ;;  %v2402_v3 = vadd.f32 %v5977_v37, %v5290_v23 }
0x1cc0   :  { %v4750_v36 = vpop.eup %4749 }
0x1cc1   :  { %3399 = vrot.lane.b32.xlu2 %v4750_v36, %s4847_s3  ;;  %v4752_v42 = vpop.eup %4751 }
0x1cc2   :  { %v3336_v38 = vadd.f32 1.0, %v4752_v42 }
0x1cc4   :  { %v3363_v29 = vand.u32 2147483648, %v3336_v38  ;;  %vm3357_vm8 = vweird.f32 %v3336_v38  ;;  %v3361_v58 = vand.u32 2147483647, %v3336_v38 }
0x1cc6   :  { %v3364_v32 = vor.u32 1.1754944e-38, %v3363_v29  ;;  %vm3362_vm10 = vcmp.eq.f32.partialorder %v3361_v58, 8.507059e+37 }
0x1cef   :  { %v3376_v40 = vpop.permute.xlu0 %3375 }
0x1cf0   :  { %v6239_v12 = vadd.f32 %v3376_v40, %v3368_v22 }
0x1cf2   :  { %4753 = vtanh.f32 %v6239_v12 }
0x1cf3   :  { %4755 = vrcp.f32 %v3336_v38 }
0x1cf4   :  { %4757 = vpow2.f32 %v4356_v45 }
0x1cf8   :  { %v4754_v41 = vpop.eup %4753 }
0x1cf9   :  { %3392 = vrot.lane.b32.xlu1 %v4754_v41, %s4847_s3  ;;  %v4756_v27 = vpop.eup %4755 }
0x1cfa   :  { %v3353_v43 = vmul.f32 %v4756_v27, %v3336_v38  ;;  %vm3358_vm7 = vweird.f32 %v4756_v27  ;;  %v4758_v52 = vpop.eup %4757 }
0x1cfb   :  { %vm3359_vm9 = vmor %vm3357_vm8, %vm3358_vm7  ;;  %v3297_v24 = vadd.f32 1.0, %v4758_v52 }
0x1cfc   :  { %v3354_v25 = vsub.f32 1.0, %v3353_v43 }
0x1cfd   :  { %4759 = vrcp.f32 %v3297_v24  ;;  %vm3318_vm13 = vweird.f32 %v3297_v24 }
0x1cfe   :  { %v3355_v63 = vmul.f32 %v4756_v27, %v3354_v25 }
0x1d00   :  { %v3356_v20 = vadd.f32 %v4756_v27, %v3355_v63 }
0x1d02   :  { %v3360_v47 = vsel %vm3359_vm9, %v4756_v27, %v3356_v20 }
0x1d03   :  { %v3365_v33 = vsel %vm3362_vm10, %v3364_v32, %v3360_v47 }
0x1d1b   :  { %v3400_v28 = vpop.permute.xlu2 %3399 }
0x1d1c   :  { %v3402_v6 = vmul.f32 %v3400_v28, %v3365_v33 }
0x1d1e   :  { %v6243_v35 = vpack.c.bf16 %v3402_v6, %v3402_v6 }
0x1d20   :  { %4361 = vmatmul.msk.bf16.vlgmr.msra.gmra.mxu0 %vm497_vm2, %v6243_v35  ;;  %4362 = vmatmul.msk.bf16.vlgmr.msra.gmra.mxu2 %vm497_vm2, %v6243_v35 }
0x1d21   :  { %3828 = vmatpush.bf16.msra.mxu0 %v5186_v54  ;;  %3841 = vmatpush.bf16.msra.mxu2 %v5141_v44  ;;  %v4760_v54 = vpop.eup %4759 }
0x1d22   :  { %v3314_v44 = vmul.f32 %v4760_v54, %v3297_v24  ;;  %vm3319_vm11 = vweird.f32 %v4760_v54 }
0x1d23   :  { %vm3320_vm14 = vmor %vm3318_vm13, %vm3319_vm11 }
0x1d24   :  { %v3315_v4 = vsub.f32 1.0, %v3314_v44 }
0x1d25   :  { %3829 = vmatpush.bf16.msra.mxu0 %v5207_v61  ;;  %3842 = vmatpush.bf16.msra.mxu2 %v5172_v51  ;;  %v3324_v51 = vand.u32 2147483648, %v3297_v24 }
0x1d26   :  { %v3316_v61 = vmul.f32 %v4760_v54, %v3315_v4 }
0x1d28   :  { %v3317_v60 = vadd.f32 %v4760_v54, %v3316_v61 }
0x1d29   :  { %3830 = vmatpush.bf16.msra.mxu0 %v5234_v7  ;;  %3843 = vmatpush.bf16.msra.mxu2 %v5195_v57  ;;  %v3322_v7 = vand.u32 2147483647, %v3297_v24 }
0x1d2a   :  { %v3321_v57 = vsel %vm3320_vm14, %v4760_v54, %v3317_v60 }
0x1d2b   :  { %vm3323_vm15 = vcmp.eq.f32.partialorder %v3322_v7, 8.507059e+37 }
0x1d2d   :  { %3831 = vmatpush.bf16.msra.mxu0 %v5253_v15  ;;  %3844 = vmatpush.bf16.msra.mxu2 %v5225_v2  ;;  %v3325_v15 = vor.u32 1.1754944e-38, %v3324_v51 }
0x1d2f   :  { %v3326_v34 = vsel %vm3323_vm15, %v3325_v15, %v3321_v57 }
0x1d6b   :  { %v3393_v2 = vpop.permute.xlu1 %3392 }
0x1d6c   :  { %v3395_v18 = vmul.f32 %v3393_v2, %v3326_v34 }
0x1d6e   :  { %v6258_v48 = vpack.c.bf16 %v3395_v18, %v3395_v18 }
0x1d70   :  { %4359 = vmatmul.msk.bf16.vlgmr.msra.gmra.mxu1 %vm497_vm2, %v6258_v48  ;;  %4360 = vmatmul.msk.bf16.vlgmr.msrb.gmra.mxu3 %vm497_vm2, %v6258_v48 }
0x1d71   :  { %3807 = vmatpush.bf16.msrb.mxu3 %v5161_v49  ;;  %3794 = vmatpush.bf16.msra.mxu1 %v5095_v46  ;;  %v3475_v49 = vunpack.c.h.bf16 %v6000_v31 }
0x1d75   :  { %3808 = vmatpush.bf16.msrb.mxu3 %v5184_v53  ;;  %3795 = vmatpush.bf16.msra.mxu1 %v5106_v19 }
0x1d79   :  { %3809 = vmatpush.bf16.msrb.mxu3 %v5222_v1  ;;  %3796 = vmatpush.bf16.msra.mxu1 %v5115_v26 }
0x1d7d   :  { %3810 = vmatpush.bf16.msrb.mxu3 %v5237_v10  ;;  %3797 = vmatpush.bf16.msra.mxu1 %v5124_v39  ;;  %v2431_v39 = vadd.f32 %v5981_v55, %v5288_v21 }
0x1d7f   :  { %v2443_v22 = vpack.c.bf16 %v2431_v39, %v2402_v3 }
0x1d81   :  { %v3440_v40 = vunpack.c.l.bf16 %v2443_v22  ;;  %v3441_v27 = vunpack.c.h.bf16 %v2443_v22 }
0x1d9d   :  { %v3457_v0 = vpop.f32.mrf.mxu0 }
0x1d9e   :  { %v3476_v13 = vadd.f32 %v3474_v11, %v3457_v0 }
0x1da0   :  { %v4365_v26 = vmul.f32 -1.442695, %v3476_v13 }
0x1da3   :  { %v3470_v36 = vpop.f32.mrf.mxu2 }
0x1da4   :  { %v6274_v46 = vadd.f32 %v3475_v49, %v3470_v36 }
0x1da5   :  { %v3459_v53 = vpop.f32.mrf.mxu0 }
0x1da6   :  { %4761 = vtanh.f32 %v6274_v46 }
0x1da7   :  { %4763 = vpow2.f32 %v4365_v26 }
0x1dab   :  { %v3472_v19 = vpop.f32.mrf.mxu2 }
0x1dac   :  { %v4762_v1 = vpop.eup %4761 }
0x1dad   :  { %3569 = vrot.lane.b32.xlu2 %v4762_v1, %s4847_s3  ;;  %v4764_v10 = vpop.eup %4763  ;;  %v4366_v1 = vmul.f32 -1.442695, %v6274_v46 }
0x1dae   :  { %v3523_v31 = vadd.f32 1.0, %v4764_v10 }
0x1db0   :  { %4765 = vrcp.f32 %v3523_v31  ;;  %v3536_v32 = vand.u32 2147483648, %v3523_v31  ;;  %vm3530_vm3 = vweird.f32 %v3523_v31  ;;  %v3534_v33 = vand.u32 2147483647, %v3523_v31 }
0x1db2   :  { %v3537_v6 = vor.u32 1.1754944e-38, %v3536_v32  ;;  %vm3535_vm5 = vcmp.eq.f32.partialorder %v3534_v33, 8.507059e+37 }
0x1db6   :  { %v4766_v38 = vpop.eup %4765 }
0x1db7   :  { %v3526_v63 = vmul.f32 %v4766_v38, %v3523_v31  ;;  %vm3531_vm1 = vweird.f32 %v4766_v38 }
0x1db8   :  { %vm3532_vm4 = vmor %vm3530_vm3, %vm3531_vm1 }
0x1db9   :  { %v3527_v29 = vsub.f32 1.0, %v3526_v63 }
0x1dbb   :  { %v3528_v47 = vmul.f32 %v4766_v38, %v3527_v29 }
0x1dbd   :  { %v3529_v37 = vadd.f32 %v4766_v38, %v3528_v47 }
0x1dbf   :  { %v3533_v28 = vsel %vm3532_vm4, %v4766_v38, %v3529_v37 }
0x1dc0   :  { %v3538_v52 = vsel %vm3535_vm5, %v3537_v6, %v3533_v28 }
0x1dc1   :  { %v3567_v49 = vmul.f32 %v3538_v52, %v6233_v50 }
0x1ded   :  { %v3423_v42 = vpop.f32.mrf.mxu1 }
0x1dee   :  { %v3442_v41 = vadd.f32 %v3440_v40, %v3423_v42 }
0x1df0   :  { %v4363_v54 = vmul.f32 -1.442695, %v3442_v41 }
0x1df3   :  { %v3436_v43 = vpop.f32.mrf.mxu3 }
0x1df4   :  { %v6282_v25 = vadd.f32 %v3441_v27, %v3436_v43 }
0x1df5   :  { %v3425_v20 = vpop.f32.mrf.mxu1 }
0x1df6   :  { %4767 = vtanh.f32 %v6282_v25  ;;  %v4364_v47 = vmul.f32 -1.442695, %v6282_v25 }
0x1df7   :  { %4769 = vpow2.f32 %v4363_v54 }
0x1dfb   :  { %v3438_v55 = vpop.f32.mrf.mxu3 }
0x1dfc   :  { %v4768_v58 = vpop.eup %4767 }
0x1dfd   :  { %3558 = vrot.lane.b32.xlu1 %v4768_v58, %s4847_s3  ;;  %v4770_v44 = vpop.eup %4769 }
0x1dfe   :  { %v3484_v4 = vadd.f32 1.0, %v4770_v44 }
0x1e00   :  { %4771 = vrcp.f32 %v3484_v4  ;;  %v3497_v15 = vand.u32 2147483648, %v3484_v4  ;;  %vm3491_vm8 = vweird.f32 %v3484_v4  ;;  %v3495_v2 = vand.u32 2147483647, %v3484_v4 }
0x1e02   :  { %v3498_v18 = vor.u32 1.1754944e-38, %v3497_v15  ;;  %vm3496_vm10 = vcmp.eq.f32.partialorder %v3495_v2, 8.507059e+37  ;;  %v4838_v15 = vld [vmem:[%s6472_s6 + $0x38] sm:$0xff]  ;;  %v3663_v2 = vunpack.c.h.bf16 %v5996_v8 }
0x1e06   :  { %v4772_v61 = vpop.eup %4771 }
0x1e07   :  { %v3570_v45 = vpop.permute.xlu2 %3569  ;;  %v3487_v60 = vmul.f32 %v4772_v61, %v3484_v4  ;;  %vm3492_vm7 = vweird.f32 %v4772_v61 }
0x1e08   :  { %v3572_v24 = vmul.f32 %v3570_v45, %v3538_v52  ;;  %vm3493_vm9 = vmor %vm3491_vm8, %vm3492_vm7 }
0x1e09   :  { %v3488_v51 = vsub.f32 1.0, %v3487_v60  ;;  %v3662_v60 = vunpack.c.l.bf16 %v5996_v8  ;;  %v4841_v8 = vld [vmem:[%s6472_s6 + $0x20] sm:$0xff] }
0x1e0a   :  { %3574 = vrot.lane.b32.xlu0 %v3572_v24, %s4847_s3 }
0x1e0b   :  { %v3489_v7 = vmul.f32 %v4772_v61, %v3488_v51 }
0x1e0d   :  { %v3490_v57 = vadd.f32 %v4772_v61, %v3489_v7 }
0x1e0f   :  { %v3494_v34 = vsel %vm3493_vm9, %v4772_v61, %v3490_v57 }
0x1e10   :  { %v3499_v11 = vsel %vm3496_vm10, %v3498_v18, %v3494_v34 }
0x1e11   :  { %v3556_v20 = vmul.f32 %v3499_v11, %v6239_v12 }
0x1e6f   :  { %v3559_v0 = vpop.permute.xlu1 %3558 }
0x1e70   :  { %v3561_v13 = vmul.f32 %v3559_v0, %v3499_v11  ;;  %v4839_v0 = vld [vmem:[%s6472_s6 + $0x30] sm:$0xff] }
0x1e72   :  { %3563 = vrot.lane.b32.xlu0 %v3561_v13, %s4847_s3  ;;  %v4840_v13 = vld [vmem:[%s6472_s6 + $0x28] sm:$0xff] }
0x1e7c   :  { %v3575_v36 = vpop.permute.xlu0 %3574 }
0x1e7d   :  { %v6289_v53 = vadd.f32 %v3575_v36, %v3567_v49 }
0x1e7f   :  { %4773 = vtanh.f32 %v6289_v53 }
0x1e80   :  { %4775 = vpow2.f32 %v4366_v1  ;;  %v4843_v1 = vld [vmem:[%s6472_s6 + $0x10] sm:$0xff] }
0x1e85   :  { %v4774_v19 = vpop.eup %4773 }
0x1e86   :  { %3587 = vrot.lane.b32.xlu2 %v4774_v19, %s4847_s3  ;;  %v4776_v26 = vpop.eup %4775  ;;  %v4842_v19 = vld [vmem:[%s6472_s6 + $0x18] sm:$0xff] }
0x1e87   :  { %v3524_v10 = vadd.f32 1.0, %v4776_v26  ;;  %v4844_v26 = vld [vmem:[%s6472_s6 + $0x8] sm:$0xff] }
0x1e89   :  { %4777 = vrcp.f32 %v3524_v10  ;;  %v3551_v50 = vand.u32 2147483648, %v3524_v10  ;;  %vm3545_vm13 = vweird.f32 %v3524_v10  ;;  %v3549_v42 = vand.u32 2147483647, %v3524_v10 }
0x1e8b   :  { %v3552_v38 = vor.u32 1.1754944e-38, %v3551_v50  ;;  %vm3550_vm15 = vcmp.eq.f32.partialorder %v3549_v42, 8.507059e+37 }
0x1e8f   :  { %v4778_v39 = vpop.eup %4777 }
0x1e90   :  { %v3541_v3 = vmul.f32 %v4778_v39, %v3524_v10  ;;  %vm3546_vm11 = vweird.f32 %v4778_v39  ;;  %v4845_v10 = vld [vmem:[%s6472_s6] sm:$0xff] }
0x1e91   :  { %vm3547_vm14 = vmor %vm3545_vm13, %vm3546_vm11 }
0x1e92   :  { %v3542_v31 = vsub.f32 1.0, %v3541_v3 }
0x1e94   :  { %v3543_v22 = vmul.f32 %v4778_v39, %v3542_v31 }
0x1e96   :  { %v3544_v40 = vadd.f32 %v4778_v39, %v3543_v22 }
0x1e98   :  { %v3548_v41 = vsel %vm3547_vm14, %v4778_v39, %v3544_v40 }
0x1e99   :  { %v3553_v27 = vsel %vm3550_vm15, %v3552_v38, %v3548_v41 }
0x1ee0   :  { %v3588_v43 = vpop.permute.xlu2 %3587 }
0x1ee1   :  { %v3590_v46 = vmul.f32 %v3588_v43, %v3553_v27 }
0x1ee3   :  { %v6294_v63 = vpack.c.bf16 %v3590_v46, %v3590_v46 }
0x1ee4   :  { %v3564_v29 = vpop.permute.xlu0 %3563 }
0x1ee5   :  { %v6297_v55 = vadd.f32 %v3564_v29, %v3556_v20  ;;  %4369 = vmatmul.msk.bf16.vlgmr.msrb.gmra.mxu0 %vm497_vm2, %v6294_v63  ;;  %4370 = vmatmul.msk.bf16.vlgmr.msrb.gmra.mxu2 %vm497_vm2, %v6294_v63 }
0x1ee7   :  { %4779 = vtanh.f32 %v6297_v55 }
0x1ee8   :  { %4781 = vpow2.f32 %v4364_v47  ;;  %v3628_v47 = vunpack.c.l.bf16 %v5987_v16 }
0x1eed   :  { %v4780_v58 = vpop.eup %4779 }
0x1eee   :  { %3580 = vrot.lane.b32.xlu1 %v4780_v58, %s4847_s3  ;;  %v4782_v37 = vpop.eup %4781 }
0x1eef   :  { %v3485_v32 = vadd.f32 1.0, %v4782_v37 }
0x1ef1   :  { %4783 = vrcp.f32 %v3485_v32  ;;  %v3512_v52 = vand.u32 2147483648, %v3485_v32  ;;  %vm3506_vm3 = vweird.f32 %v3485_v32  ;;  %v3510_v24 = vand.u32 2147483647, %v3485_v32 }
0x1ef3   :  { %v3513_v44 = vor.u32 1.1754944e-38, %v3512_v52  ;;  %vm3511_vm5 = vcmp.eq.f32.partialorder %v3510_v24, 8.507059e+37 }
0x1ef7   :  { %v4784_v12 = vpop.eup %4783 }
0x1ef8   :  { %v3502_v33 = vmul.f32 %v4784_v12, %v3485_v32  ;;  %vm3507_vm1 = vweird.f32 %v4784_v12 }
0x1ef9   :  { %vm3508_vm4 = vmor %vm3506_vm3, %vm3507_vm1 }
0x1efa   :  { %v3503_v28 = vsub.f32 1.0, %v3502_v33 }
0x1efc   :  { %v3504_v6 = vmul.f32 %v4784_v12, %v3503_v28 }
0x1efe   :  { %v3505_v45 = vadd.f32 %v4784_v12, %v3504_v6 }
0x1f00   :  { %v3509_v54 = vsel %vm3508_vm4, %v4784_v12, %v3505_v45  ;;  %v3629_v12 = vunpack.c.h.bf16 %v5987_v16 }
0x1f01   :  { %v3514_v61 = vsel %vm3511_vm5, %v3513_v44, %v3509_v54 }
0x1f60   :  { %v3581_v4 = vpop.permute.xlu1 %3580 }
0x1f61   :  { %v3583_v25 = vmul.f32 %v3581_v4, %v3514_v61 }
0x1f62   :  { %v3645_v51 = vpop.f32.mrf.mxu0 }
0x1f63   :  { %v6307_v7 = vpack.c.bf16 %v3583_v25, %v3583_v25  ;;  %v3664_v57 = vadd.f32 %v3662_v60, %v3645_v51 }
0x1f65   :  { %4367 = vmatmul.msk.bf16.vlgmr.msrb.gmra.mxu1 %vm497_vm2, %v6307_v7  ;;  %4368 = vmatmul.msk.bf16.vlgmr.msra.gmra.mxu3 %vm497_vm2, %v6307_v7  ;;  %v4373_v39 = vmul.f32 -1.442695, %v3664_v57 }
0x1f66   :  { %4006 = vmatpush.bf16.msrb.mxu1 %v4838_v15 }
0x1f68   :  { %v3658_v34 = vpop.f32.mrf.mxu2 }
0x1f69   :  { %v6317_v18 = vadd.f32 %v3663_v2, %v3658_v34 }
0x1f6a   :  { %v3647_v11 = vpop.f32.mrf.mxu0  ;;  %4007 = vmatpush.bf16.msrb.mxu1 %v4839_v0 }
0x1f6b   :  { %4785 = vtanh.f32 %v6317_v18 }
0x1f6c   :  { %4787 = vpow2.f32 %v4373_v39 }
0x1f6e   :  { %4008 = vmatpush.bf16.msrb.mxu1 %v4840_v13 }
0x1f70   :  { %v3660_v49 = vpop.f32.mrf.mxu2 }
0x1f71   :  { %v4786_v36 = vpop.eup %4785 }
0x1f72   :  { %3757 = vrot.lane.b32.xlu2 %v4786_v36, %s4847_s3  ;;  %4009 = vmatpush.bf16.msrb.mxu1 %v4841_v8  ;;  %v4788_v3 = vpop.eup %4787  ;;  %v4374_v8 = vmul.f32 -1.442695, %v6317_v18 }
0x1f73   :  { %v3711_v31 = vadd.f32 1.0, %v4788_v3 }
0x1f75   :  { %4789 = vrcp.f32 %v3711_v31  ;;  %v3724_v38 = vand.u32 2147483648, %v3711_v31  ;;  %vm3718_vm8 = vweird.f32 %v3711_v31  ;;  %v3722_v27 = vand.u32 2147483647, %v3711_v31 }
0x1f76   :  { %4010 = vmatpush.bf16.msrb.mxu1 %v4842_v19 }
0x1f77   :  { %v3725_v46 = vor.u32 1.1754944e-38, %v3724_v38  ;;  %vm3723_vm10 = vcmp.eq.f32.partialorder %v3722_v27, 8.507059e+37 }
0x1f7a   :  { %4011 = vmatpush.bf16.msrb.mxu1 %v4843_v1 }
0x1f7b   :  { %v4790_v22 = vpop.eup %4789 }
0x1f7c   :  { %v3714_v40 = vmul.f32 %v4790_v22, %v3711_v31  ;;  %vm3719_vm7 = vweird.f32 %v4790_v22 }
0x1f7d   :  { %vm3720_vm9 = vmor %vm3718_vm8, %vm3719_vm7 }
0x1f7e   :  { %4012 = vmatpush.bf16.msrb.mxu1 %v4844_v26  ;;  %v3715_v50 = vsub.f32 1.0, %v3714_v40 }
0x1f80   :  { %v3716_v42 = vmul.f32 %v4790_v22, %v3715_v50 }
0x1f82   :  { %4013 = vmatpush.bf16.msrb.mxu1 %v4845_v10  ;;  %v3717_v41 = vadd.f32 %v4790_v22, %v3716_v42 }
0x1f84   :  { %v3721_v43 = vsel %vm3720_vm9, %v4790_v22, %v3717_v41 }
0x1f85   :  { %v3726_v29 = vsel %vm3723_vm10, %v3725_v46, %v3721_v43 }
0x1f86   :  { %v3755_v54 = vmul.f32 %v3726_v29, %v6289_v53 }
0x1fcc   :  { %v3758_v20 = vpop.permute.xlu2 %3757 }
0x1fcd   :  { %v3760_v58 = vmul.f32 %v3758_v20, %v3726_v29 }
0x1fcf   :  { %3762 = vrot.lane.b32.xlu0 %v3760_v58, %s4847_s3  ;;  %v3850_v58 = vunpack.c.l.bf16 %v5992_v17 }
0x1fe2   :  { %v3611_v37 = vpop.f32.mrf.mxu1 }
0x1fe3   :  { %v3630_v32 = vadd.f32 %v3628_v47, %v3611_v37 }
0x1fe5   :  { %v4371_v24 = vmul.f32 -1.442695, %v3630_v32 }
0x1fe8   :  { %v3624_v33 = vpop.f32.mrf.mxu3 }
0x1fe9   :  { %v6345_v28 = vadd.f32 %v3629_v12, %v3624_v33  ;;  %v3851_v12 = vunpack.c.h.bf16 %v5992_v17 }
0x1fea   :  { %v3613_v6 = vpop.f32.mrf.mxu1 }
0x1feb   :  { %4791 = vtanh.f32 %v6345_v28  ;;  %v4372_v37 = vmul.f32 -1.442695, %v6345_v28 }
0x1fec   :  { %4793 = vpow2.f32 %v4371_v24 }
0x1ff0   :  { %v3626_v45 = vpop.f32.mrf.mxu3 }
0x1ff1   :  { %v4792_v52 = vpop.eup %4791 }
0x1ff2   :  { %3746 = vrot.lane.b32.xlu1 %v4792_v52, %s4847_s3  ;;  %v4794_v44 = vpop.eup %4793 }
0x1ff3   :  { %v3672_v25 = vadd.f32 1.0, %v4794_v44 }
0x1ff5   :  { %v3685_v34 = vand.u32 2147483648, %v3672_v25  ;;  %vm3679_vm13 = vweird.f32 %v3672_v25  ;;  %v3683_v53 = vand.u32 2147483647, %v3672_v25 }
0x1ff7   :  { %v3686_v0 = vor.u32 1.1754944e-38, %v3685_v34  ;;  %vm3684_vm15 = vcmp.eq.f32.partialorder %v3683_v53, 8.507059e+37 }
0x2041   :  { %v3763_v4 = vpop.permute.xlu0 %3762 }
0x2042   :  { %v6350_v61 = vadd.f32 %v3763_v4, %v3755_v54 }
0x2044   :  { %4795 = vtanh.f32 %v6350_v61 }
0x2045   :  { %4797 = vrcp.f32 %v3672_v25 }
0x2046   :  { %4799 = vpow2.f32 %v4374_v8 }
0x204a   :  { %v4796_v16 = vpop.eup %4795 }
0x204b   :  { %3775 = vrot.lane.b32.xlu2 %v4796_v16, %s4847_s3  ;;  %v4798_v60 = vpop.eup %4797 }
0x204c   :  { %v3675_v51 = vmul.f32 %v4798_v60, %v3672_v25  ;;  %vm3680_vm11 = vweird.f32 %v4798_v60  ;;  %v4800_v19 = vpop.eup %4799 }
0x204d   :  { %vm3681_vm14 = vmor %vm3679_vm13, %vm3680_vm11  ;;  %v3712_v1 = vadd.f32 1.0, %v4800_v19 }
0x204e   :  { %v3676_v57 = vsub.f32 1.0, %v3675_v51 }
0x204f   :  { %4801 = vrcp.f32 %v3712_v1  ;;  %v3739_v22 = vand.u32 2147483648, %v3712_v1  ;;  %vm3733_vm3 = vweird.f32 %v3712_v1  ;;  %v3737_v40 = vand.u32 2147483647, %v3712_v1 }
0x2050   :  { %v3677_v15 = vmul.f32 %v4798_v60, %v3676_v57 }
0x2051   :  { %v3740_v42 = vor.u32 1.1754944e-38, %v3739_v22  ;;  %vm3738_vm5 = vcmp.eq.f32.partialorder %v3737_v40, 8.507059e+37 }
0x2052   :  { %v3678_v2 = vadd.f32 %v4798_v60, %v3677_v15 }
0x2054   :  { %v3682_v11 = vsel %vm3681_vm14, %v4798_v60, %v3678_v2 }
0x2055   :  { %v3687_v13 = vsel %vm3684_vm15, %v3686_v0, %v3682_v11  ;;  %v4802_v26 = vpop.eup %4801 }
0x2056   :  { %v3729_v10 = vmul.f32 %v4802_v26, %v3712_v1  ;;  %vm3734_vm1 = vweird.f32 %v4802_v26  ;;  %v3744_v43 = vmul.f32 %v3687_v13, %v6297_v55 }
0x2057   :  { %vm3735_vm4 = vmor %vm3733_vm3, %vm3734_vm1 }
0x2058   :  { %v3730_v39 = vsub.f32 1.0, %v3729_v10 }
0x205a   :  { %v3731_v3 = vmul.f32 %v4802_v26, %v3730_v39 }
0x205c   :  { %v3732_v31 = vadd.f32 %v4802_v26, %v3731_v3 }
0x205e   :  { %v3736_v50 = vsel %vm3735_vm4, %v4802_v26, %v3732_v31 }
0x205f   :  { %v3741_v41 = vsel %vm3738_vm5, %v3740_v42, %v3736_v50  ;;  %v2436_v50 = vadd.f32 %v6063_v9, %v5288_v21  ;;  %v2407_v42 = vadd.f32 %v5985_v59, %v5290_v23 }
0x2064   :  { %v3747_v49 = vpop.permute.xlu1 %3746 }
0x2065   :  { %v3749_v36 = vmul.f32 %v3747_v49, %v3687_v13 }
0x2067   :  { %3751 = vrot.lane.b32.xlu0 %v3749_v36, %s4847_s3 }
0x20a5   :  { %v3776_v38 = vpop.permute.xlu2 %3775 }
0x20a6   :  { %v3778_v18 = vmul.f32 %v3776_v38, %v3741_v41  ;;  %v2445_v41 = vpack.c.bf16 %v2436_v50, %v2407_v42 }
0x20a8   :  { %v6356_v27 = vpack.c.bf16 %v3778_v18, %v3778_v18  ;;  %v3816_v38 = vunpack.c.l.bf16 %v2445_v41 }
0x20aa   :  { %4377 = vmatmul.msk.bf16.vlgmr.msra.gmra.mxu0 %vm497_vm2, %v6356_v27  ;;  %4378 = vmatmul.msk.bf16.vlgmr.msra.gmra.mxu2 %vm497_vm2, %v6356_v27 }
0x20d9   :  { %v3752_v46 = vpop.permute.xlu0 %3751 }
0x20da   :  { %v6363_v20 = vadd.f32 %v3752_v46, %v3744_v43  ;;  %v3817_v46 = vunpack.c.h.bf16 %v2445_v41 }
0x20dc   :  { %4803 = vtanh.f32 %v6363_v20 }
0x20dd   :  { %4805 = vpow2.f32 %v4372_v37 }
0x20e2   :  { %v4804_v29 = vpop.eup %4803 }
0x20e3   :  { %3768 = vrot.lane.b32.xlu1 %v4804_v29, %s4847_s3  ;;  %v4806_v45 = vpop.eup %4805 }
0x20e4   :  { %v3673_v52 = vadd.f32 1.0, %v4806_v45 }
0x20e6   :  { %v3700_v17 = vand.u32 2147483648, %v3673_v52  ;;  %vm3694_vm8 = vweird.f32 %v3673_v52  ;;  %v3698_v60 = vand.u32 2147483647, %v3673_v52 }
0x20e8   :  { %v3701_v57 = vor.u32 1.1754944e-38, %v3700_v17  ;;  %vm3699_vm10 = vcmp.eq.f32.partialorder %v3698_v60, 8.507059e+37 }
0x2127   :  { %v3833_v47 = vpop.f32.mrf.mxu0 }
0x2128   :  { %v3852_v32 = vadd.f32 %v3850_v58, %v3833_v47 }
0x212a   :  { %v4381_v11 = vmul.f32 -1.442695, %v3852_v32 }
0x212d   :  { %v3846_v33 = vpop.f32.mrf.mxu2 }
0x212e   :  { %v6370_v6 = vadd.f32 %v3851_v12, %v3846_v33 }
0x212f   :  { %v3835_v55 = vpop.f32.mrf.mxu0 }
0x2130   :  { %4807 = vtanh.f32 %v6370_v6  ;;  %v4382_v45 = vmul.f32 -1.442695, %v6370_v6 }
0x2131   :  { %4809 = vrcp.f32 %v3673_v52 }
0x2132   :  { %4811 = vpow2.f32 %v4381_v11 }
0x2135   :  { %v3848_v24 = vpop.f32.mrf.mxu2 }
0x2136   :  { %v4808_v54 = vpop.eup %4807 }
0x2137   :  { %3945 = vrot.lane.b32.xlu2 %v4808_v54, %s4847_s3  ;;  %v4810_v44 = vpop.eup %4809 }
0x2138   :  { %v3690_v4 = vmul.f32 %v4810_v44, %v3673_v52  ;;  %vm3695_vm7 = vweird.f32 %v4810_v44  ;;  %v4812_v0 = vpop.eup %4811 }
0x2139   :  { %vm3696_vm9 = vmor %vm3694_vm8, %vm3695_vm7  ;;  %v3899_v13 = vadd.f32 1.0, %v4812_v0 }
0x213a   :  { %v3691_v28 = vsub.f32 1.0, %v3690_v4 }
0x213b   :  { %4813 = vrcp.f32 %v3899_v13  ;;  %v3912_v26 = vand.u32 2147483648, %v3899_v13  ;;  %vm3906_vm13 = vweird.f32 %v3899_v13  ;;  %v3910_v10 = vand.u32 2147483647, %v3899_v13 }
0x213c   :  { %v3692_v25 = vmul.f32 %v4810_v44, %v3691_v28 }
0x213d   :  { %v3913_v3 = vor.u32 1.1754944e-38, %v3912_v26  ;;  %vm3911_vm15 = vcmp.eq.f32.partialorder %v3910_v10, 8.507059e+37 }
0x213e   :  { %v3693_v16 = vadd.f32 %v4810_v44, %v3692_v25 }
0x2140   :  { %v3697_v51 = vsel %vm3696_vm9, %v4810_v44, %v3693_v16 }
0x2141   :  { %v3702_v2 = vsel %vm3699_vm10, %v3701_v57, %v3697_v51  ;;  %v4814_v49 = vpop.eup %4813 }
0x2142   :  { %v3902_v36 = vmul.f32 %v4814_v49, %v3899_v13  ;;  %vm3907_vm11 = vweird.f32 %v4814_v49 }
0x2143   :  { %vm3908_vm14 = vmor %vm3906_vm13, %vm3907_vm11 }
0x2144   :  { %v3903_v8 = vsub.f32 1.0, %v3902_v36 }
0x2146   :  { %v3904_v19 = vmul.f32 %v4814_v49, %v3903_v8 }
0x2148   :  { %v3905_v1 = vadd.f32 %v4814_v49, %v3904_v19 }
0x214a   :  { %v3909_v39 = vsel %vm3908_vm14, %v4814_v49, %v3905_v1 }
0x214b   :  { %v3914_v22 = vsel %vm3911_vm15, %v3913_v3, %v3909_v39 }
0x214c   :  { %v3943_v21 = vmul.f32 %v3914_v22, %v6350_v61 }
0x2155   :  { %v3769_v15 = vpop.permute.xlu1 %3768 }
0x2156   :  { %v3771_v34 = vmul.f32 %v3769_v15, %v3702_v2 }
0x2158   :  { %v6374_v53 = vpack.c.bf16 %v3771_v34, %v3771_v34 }
0x215a   :  { %4375 = vmatmul.msk.bf16.vlgmr.msra.gmra.mxu1 %vm497_vm2, %v6374_v53  ;;  %4376 = vmatmul.msk.bf16.vlgmr.msrb.gmra.mxu3 %vm497_vm2, %v6374_v53 }
0x2191   :  { %v3946_v31 = vpop.permute.xlu2 %3945 }
0x2192   :  { %v3948_v40 = vmul.f32 %v3946_v31, %v3914_v22 }
0x2194   :  { %3950 = vrot.lane.b32.xlu0 %v3948_v40, %s4847_s3 }
0x21d7   :  { %v3799_v18 = vpop.f32.mrf.mxu1 }
0x21d8   :  { %v3818_v43 = vadd.f32 %v3816_v38, %v3799_v18 }
0x21da   :  { %v4379_v12 = vmul.f32 -1.442695, %v3818_v43 }
0x21dd   :  { %v3812_v29 = vpop.f32.mrf.mxu3 }
0x21de   :  { %v6385_v58 = vadd.f32 %v3817_v46, %v3812_v29 }
0x21df   :  { %v3801_v47 = vpop.f32.mrf.mxu1 }
0x21e0   :  { %4815 = vtanh.f32 %v6385_v58  ;;  %v4380_v42 = vmul.f32 -1.442695, %v6385_v58 }
0x21e5   :  { %v3814_v37 = vpop.f32.mrf.mxu3 }
0x21e6   :  { %v4816_v32 = vpop.eup %4815 }
0x21e7   :  { %3934 = vrot.lane.b32.xlu1 %v4816_v32, %s4847_s3 }
0x21ef   :  { %3782 = vrot.lane.b32.xlu1 %v6356_v27, %s4847_s3 }
0x21f7   :  { %3594 = vrot.lane.b32.xlu1 %v6294_v63, %s4847_s3 }
0x2206   :  { %v3951_v23 = vpop.permute.xlu0 %3950 }
0x2207   :  { %v3953_v59 = vadd.f32 %v3951_v23, %v3943_v21 }
0x2209   :  { %4817 = vtanh.f32 %v3953_v59  ;;  %v4035_v59 = vld [vmem:[#allocation2] sm:$0xff] }
0x220a   :  { %4819 = vpow2.f32 %v4379_v12  ;;  %v4043_v12 = vadd.f32 %v4035_v59, %v5820_v62 }
0x220f   :  { %v4818_v9 = vpop.eup %4817 }
0x2210   :  { %3963 = vrot.lane.b32.xlu2 %v4818_v9, %s4847_s3  ;;  %v4820_v33 = vpop.eup %4819 }
0x2211   :  { %v3860_v55 = vadd.f32 1.0, %v4820_v33 }
0x2213   :  { %4821 = vrcp.f32 %v3860_v55  ;;  %v3873_v4 = vand.u32 2147483648, %v3860_v55  ;;  %vm3867_vm1 = vweird.f32 %v3860_v55  ;;  %v3871_v25 = vand.u32 2147483647, %v3860_v55 }
0x2214   :  { %4823 = vpow2.f32 %v4382_v45  ;;  %v4036_v45 = vld [vmem:[#allocation2 + $0x8] sm:$0xff] }
0x2215   :  { %v3874_v17 = vor.u32 1.1754944e-38, %v3873_v4  ;;  %vm3872_vm4 = vcmp.eq.f32.partialorder %v3871_v25, 8.507059e+37 }
0x2219   :  { %v4822_v27 = vpop.eup %4821 }
0x221a   :  { %v3863_v52 = vmul.f32 %v4822_v27, %v3860_v55  ;;  %v4824_v24 = vpop.eup %4823  ;;  %vm3868_vm2 = vweird.f32 %v4822_v27 }
0x221b   :  { %v3900_v63 = vadd.f32 1.0, %v4824_v24  ;;  %vm3869_vm3 = vmor %vm3867_vm1, %vm3868_vm2 }
0x221c   :  { %v3864_v54 = vsub.f32 1.0, %v3863_v52  ;;  %v4044_v52 = vadd.f32 %v4036_v45, %v5820_v62 }
0x221d   :  { %4825 = vrcp.f32 %v3900_v63  ;;  %v3927_v0 = vand.u32 2147483648, %v3900_v63  ;;  %vm3921_vm7 = vweird.f32 %v3900_v63  ;;  %v3925_v13 = vand.u32 2147483647, %v3900_v63 }
0x221e   :  { %v3865_v61 = vmul.f32 %v4822_v27, %v3864_v54  ;;  %v4037_v54 = vld [vmem:[#allocation2 + $0x10] sm:$0xff] }
0x221f   :  { %v3928_v36 = vor.u32 1.1754944e-38, %v3927_v0  ;;  %vm3926_vm9 = vcmp.eq.f32.partialorder %v3925_v13, 8.507059e+37  ;;  %v4041_v0 = vld [vmem:[#allocation2 + $0x30] sm:$0xff] }
0x2220   :  { %v3866_v44 = vadd.f32 %v4822_v27, %v3865_v61  ;;  %v4045_v61 = vadd.f32 %v4037_v54, %v5820_v62  ;;  %v4049_v13 = vadd.f32 %v4041_v0, %v5820_v62 }
0x2222   :  { %v3870_v16 = vsel %vm3869_vm3, %v4822_v27, %v3866_v44 }
0x2223   :  { %v4826_v28 = vpop.eup %4825  ;;  %v3875_v6 = vsel %vm3872_vm4, %v3874_v17, %v3870_v16 }
0x2224   :  { %v3917_v60 = vmul.f32 %v4826_v28, %v3900_v63  ;;  %vm3922_vm5 = vweird.f32 %v4826_v28  ;;  %v3932_v39 = vmul.f32 %v3875_v6, %v6363_v20 }
0x2225   :  { %vm3923_vm8 = vmor %vm3921_vm7, %vm3922_vm5 }
0x2226   :  { %v3918_v15 = vsub.f32 1.0, %v3917_v60  ;;  %v4039_v60 = vld [vmem:[#allocation2 + $0x20] sm:$0xff] }
0x2228   :  { %v3919_v2 = vmul.f32 %v4826_v28, %v3918_v15  ;;  %v4040_v15 = vld [vmem:[#allocation2 + $0x28] sm:$0xff] }
0x222a   :  { %v3920_v11 = vadd.f32 %v4826_v28, %v3919_v2  ;;  %v4048_v2 = vadd.f32 %v4040_v15, %v5820_v62 }
0x222c   :  { %v3924_v49 = vsel %vm3923_vm8, %v4826_v28, %v3920_v11  ;;  %v4038_v28 = vld [vmem:[#allocation2 + $0x18] sm:$0xff] }
0x222d   :  { %v3929_v19 = vsel %vm3926_vm9, %v3928_v36, %v3924_v49  ;;  %v4046_v25 = vadd.f32 %v4038_v28, %v5820_v62 }
0x2259   :  { %v3935_v51 = vpop.permute.xlu1 %3934 }
0x225a   :  { %v3937_v57 = vmul.f32 %v3935_v51, %v3875_v6  ;;  %v4047_v6 = vadd.f32 %v4039_v60, %v5820_v62 }
0x225c   :  { %3939 = vrot.lane.b32.xlu0 %v3937_v57, %s4847_s3 }
0x2261   :  { %v3783_v34 = vpop.permute.xlu1 %3782 }
0x2262   :  { %3785 = vst.msk [vmem:[#allocation5 + $0x4] sm:$0xf] %vm724_vm12, %v3783_v34 }
0x2264   :  { %3406 = vrot.lane.b32.xlu0 %v6243_v35, %s4847_s3 }
0x2269   :  { %v3595_v8 = vpop.permute.xlu1 %3594 }
0x226a   :  { %3597 = vst.msk [vmem:[#allocation5 + $0x8] sm:$0xf] %vm724_vm12, %v3595_v8  ;;  %v3964_v1 = vpop.permute.xlu2 %3963  ;;  %v4042_v8 = vld [vmem:[#allocation2 + $0x38] sm:$0xff] }
0x226b   :  { %v3966_v26 = vmul.f32 %v3964_v1, %v3929_v19  ;;  %v4050_v19 = vadd.f32 %v4042_v8, %v5820_v62 }
0x226c   :  { %3218 = vrot.lane.b32.xlu0 %v6193_v30, %s4847_s3 }
0x226d   :  { %v3967_v10 = vpack.c.bf16 %v3966_v26, %v3966_v26 }
0x226f   :  { %3970 = vrot.lane.b32.xlu2 %v3967_v10, %s4847_s3 }
0x2274   :  { %2842 = vrot.lane.b32.xlu0 %v6104_v56, %s4847_s3 }
0x2277   :  { %3030 = vrot.lane.b32.xlu2 %v6155_v5, %s4847_s3 }
0x227f   :  { %2654 = vrot.lane.b32.xlu2 %v6049_v14, %s4847_s3 }
0x22c9   :  { %v3971_v35 = vpop.permute.xlu2 %3970 }
0x22ca   :  { %3973 = vst.msk [vmem:[#allocation5] sm:$0xf] %vm724_vm12, %v3971_v35 }
0x22ce   :  { %v3940_v3 = vpop.permute.xlu0 %3939 }
0x22cf   :  { %v3942_v31 = vadd.f32 %v3940_v3, %v3932_v39 }
0x22d1   :  { %4827 = vtanh.f32 %v3942_v31  ;;  %v3031_v30 = vpop.permute.xlu2 %3030  ;;  %v4435_v22 = vld [vmem:[#allocation5] sm:$0xff] }
0x22d2   :  { %3033 = vst.msk [vmem:[#allocation5 + $0x14] sm:$0xf] %vm724_vm12, %v3031_v30  ;;  %4014 = vmatmul.bf16.vlgmr.msrb.gmra.mxu1 %v4435_v22  ;;  %4829 = vpow2.f32 %v4380_v42 }
0x22d3   :  { %3592 = vst.msk [vmem:[#allocation5 + $0x14] sm:$0xf] %vm717_vm6, %v6307_v7 }
0x22d6   :  { %v3407_v56 = vpop.permute.xlu0 %3406 }
0x22d7   :  { %v4828_v5 = vpop.eup %4827  ;;  %3409 = vst.msk [vmem:[#allocation5 + $0xc] sm:$0xf] %vm724_vm12, %v3407_v56 }
0x22d8   :  { %3956 = vrot.lane.b32.xlu1 %v4828_v5, %s4847_s3  ;;  %v4830_v41 = vpop.eup %4829 }
0x22d9   :  { %v2655_v14 = vpop.permute.xlu2 %2654  ;;  %v3861_v38 = vadd.f32 1.0, %v4830_v41 }
0x22da   :  { %2657 = vst.msk [vmem:[#allocation5 + $0x1c] sm:$0xf] %vm724_vm12, %v2655_v14 }
0x22db   :  { %4831 = vrcp.f32 %v3861_v38  ;;  %v3888_v47 = vand.u32 2147483648, %v3861_v38  ;;  %vm3882_vm11 = vweird.f32 %v3861_v38  ;;  %v3886_v37 = vand.u32 2147483647, %v3861_v38 }
0x22dd   :  { %vm3887_vm13 = vcmp.eq.f32.partialorder %v3886_v37, 8.507059e+37 }
0x22de   :  { %v3219_v20 = vpop.permute.xlu0 %3218  ;;  %v4436_v40 = vld [vmem:[#allocation5 + $0x8] sm:$0xff] }
0x22df   :  { %3221 = vst.msk [vmem:[#allocation5 + $0x10] sm:$0xf] %vm724_vm12, %v3219_v20 }
0x22e0   :  { %3404 = vst.msk [vmem:[#allocation5 + $0x10] sm:$0xf] %vm717_vm6, %v6258_v48 }
0x22e1   :  { %v4832_v18 = vpop.eup %4831 }
0x22e2   :  { %4019 = vmatmul.bf16.gmra.mxu1 %v4436_v40  ;;  %v3878_v43 = vmul.f32 %v4832_v18, %v3861_v38  ;;  %vm3883_vm10 = vweird.f32 %v4832_v18 }
0x22e4   :  { %v3879_v46 = vsub.f32 1.0, %v3878_v43 }
0x22e6   :  { %v2843_v50 = vpop.permute.xlu0 %2842  ;;  %v3880_v48 = vmul.f32 %v4832_v18, %v3879_v46 }
0x22e7   :  { %2845 = vst.msk [vmem:[#allocation5 + $0x18] sm:$0xf] %vm724_vm12, %v2843_v50  ;;  %v4437_v7 = vld [vmem:[#allocation5 + $0x10] sm:$0xff]  ;;  %vm3884_vm12 = vmor %vm3882_vm11, %vm3883_vm10 }
0x22e8   :  { %3780 = vst.msk [vmem:[#allocation5 + $0x18] sm:$0xf] %vm717_vm6, %v6374_v53  ;;  %v3881_v29 = vadd.f32 %v4832_v18, %v3880_v48  ;;  %v3889_v53 = vor.u32 1.1754944e-38, %v3888_v47 }
0x22ea   :  { %v3885_v32 = vsel %vm3884_vm12, %v4832_v18, %v3881_v29 }
0x22eb   :  { %v3890_v23 = vsel %vm3887_vm13, %v3889_v53, %v3885_v32 }
0x22f2   :  { %4024 = vmatmul.bf16.gmra.mxu1 %v4437_v7 }
0x234a   :  { %v3957_v21 = vpop.permute.xlu1 %3956 }
0x234b   :  { %v3959_v58 = vmul.f32 %v3957_v21, %v3890_v23 }
0x234d   :  { %v3960_v9 = vpack.c.bf16 %v3959_v58, %v3959_v58 }
0x234f   :  { %3968 = vst.msk [vmem:[#allocation5 + $0x1c] sm:$0xf] %vm717_vm6, %v3960_v9  ;;  %v4015_v33 = vpop.f32.mrf.mxu1 }
0x2350   :  { %v4051_v55 = vadd.f32 %v4043_v12, %v4015_v33 }
0x2352   :  { %4059 = vst.msk [vmem:[%s6473_s7] sm:$0xff] %vm83_vm0, %v4051_v55 }
0x2356   :  { %v4438_v27 = vld [vmem:[#allocation5 + $0x18] sm:$0xff] }
0x2357   :  { %v4017_v24 = vpop.f32.mrf.mxu1  ;;  %4029 = vmatmul.bf16.gmra.mxu1 %v4438_v27 }
0x2358   :  { %v4052_v63 = vadd.f32 %v4044_v52, %v4017_v24 }
0x235a   :  { %4060 = vst.msk [vmem:[%s6473_s7 + $0x8] sm:$0xff] %vm83_vm0, %v4052_v63 }
0x235f   :  { %v4020_v44 = vpop.f32.mrf.mxu1 }
0x2360   :  { %v4053_v4 = vadd.f32 %v4045_v61, %v4020_v44 }
0x2362   :  { %4061 = vst.msk [vmem:[%s6473_s7 + $0x10] sm:$0xff] %vm83_vm0, %v4053_v4 }
0x2367   :  { %v4022_v16 = vpop.f32.mrf.mxu1 }
0x2368   :  { %v4054_v17 = vadd.f32 %v4046_v25, %v4022_v16 }
0x236a   :  { %4062 = vst.msk [vmem:[%s6473_s7 + $0x18] sm:$0xff] %vm83_vm0, %v4054_v17 }
0x236f   :  { %v4025_v51 = vpop.f32.mrf.mxu1 }
0x2370   :  { %v4055_v57 = vadd.f32 %v4047_v6, %v4025_v51 }
0x2372   :  { %4063 = vst.msk [vmem:[%s6473_s7 + $0x20] sm:$0xff] %vm83_vm0, %v4055_v57 }
0x2377   :  { %v4027_v34 = vpop.f32.mrf.mxu1 }
0x2378   :  { %v4056_v11 = vadd.f32 %v4048_v2, %v4027_v34 }
0x237a   :  { %4064 = vst.msk [vmem:[%s6473_s7 + $0x28] sm:$0xff] %vm83_vm0, %v4056_v11 }
0x23d4   :  { %v4030_v49 = vpop.f32.mrf.mxu1 }
0x23d5   :  { %v4057_v36 = vadd.f32 %v4049_v13, %v4030_v49 }
0x23d7   :  { %4065 = vst.msk [vmem:[%s6473_s7 + $0x30] sm:$0xff] %vm83_vm0, %v4057_v36 }
0x23dc   :  { %v4032_v1 = vpop.f32.mrf.mxu1 }
0x23dd   :  { %v4058_v26 = vadd.f32 %v4050_v19, %v4032_v1 }
0x23df   :  { %4066 = vst.msk [vmem:[%s6473_s7 + $0x38] sm:$0xff] %vm83_vm0, %v4058_v26 }

</bundles_post_ra>
